<compile_context>
chip_gen: v7x
topology: tpu7x:2x2x1
jax: 0.10.0
libtpu: 0.0.40
codegen_flags: <defaults>
</compile_context>

<pallas_src>
import functools

import jax
import jax.numpy as jnp
from jax.experimental import pallas as pl
from jax.experimental.pallas import tpu as pltpu


def _fused_convnet_kernel(*refs, layer_cfgs, neg_slope, H, W, pad_left):
    """One image per grid step; all conv layers fused, activations in vregs.

    refs layout:
      refs[0]             x_ref   (1, Cin, H*W)
      refs[1 : 1+2L]      (w_ref, b_ref) per layer,
                          w: (K*K, Cout, Cin), b: (Cout, 1)
      refs[1+2L]          o_ref   (1, Cout_last, H*W)
      refs[2+2L]          pad_ref (C_max, pad_left + H*W + rim) VMEM scratch
    """
    n_layers = len(layer_cfgs)
    x_ref = refs[0]
    wb_refs = refs[1:1 + 2 * n_layers]
    o_ref = refs[1 + 2 * n_layers]
    pad_ref = refs[2 + 2 * n_layers]

    HW = H * W
    c_all, pad_w = pad_ref.shape

    # Zero only the (lane-aligned) left/right rims once per image; the
    # interior is fully overwritten by each layer's activation write.
    pad_ref[:, 0:pad_left] = jnp.zeros((c_all, pad_left), dtype=pad_ref.dtype)
    pad_ref[:, pad_left + HW:] = jnp.zeros(
        (c_all, pad_w - pad_left - HW), dtype=pad_ref.dtype)

    # Column (width) edge masks, (1, H*W), built once and cached across
    # taps/layers (only taps near the left/right kernel edge need one).
    idx = jax.lax.broadcasted_iota(jnp.int32, (1, HW), 1)
    if W & (W - 1) == 0:
        ww = jnp.bitwise_and(idx, W - 1)
    else:
        ww = idx % W
    mask_cache = {}

    def col_mask(p, kw):
        lo = p - kw           # need w >= lo
        hi = W + p - kw       # need w <  hi
        lo = lo if lo > 0 else None
        hi = hi if hi < W else None
        if lo is None and hi is None:
            return None
        key = (lo, hi)
        if key not in mask_cache:
            m = None
            if lo is not None:
                m = ww >= lo
            if hi is not None:
                c = ww < hi
                m = c if m is None else jnp.logical_and(m, c)
            mask_cache[key] = m
        return mask_cache[key]

    act = x_ref[0]                                    # (Cin, H*W) f32

    for li, (K, cin, cout) in enumerate(layer_cfgs):
        w_ref = wb_refs[2 * li]                       # (K*K, Cout, Cin)
        b_ref = wb_refs[2 * li + 1]                   # (Cout, 1)
        p = K // 2

        # Lane-aligned interior write of this layer's input activation.
        pad_ref[0:cin, pad_left:pad_left + HW] = act

        # Bias folded in as the accumulator's initial value (f32 registers).
        acc = jnp.broadcast_to(b_ref[...], (cout, HW))

        for kh in range(K):
            for kw in range(K):
                d0 = pad_left + (kh - p) * W + (kw - p)
                window = pad_ref[0:cin, d0:d0 + HW]   # (Cin, HW); rim = zeros
                m = col_mask(p, kw)
                if m is not None:
                    window = jnp.where(m, window, 0.0)
                acc = acc + jnp.dot(w_ref[kh * K + kw], window,
                                    preferred_element_type=jnp.float32)

        if li != n_layers - 1:
            acc = jnp.where(acc >= 0, acc, neg_slope * acc)
        act = acc

    o_ref[0] = act.astype(o_ref.dtype)                # lane-dense (Cout, 256)


def params_network_forward(x_nchw, ps, *, neg_slope=0.01):
    """Forward pass matching ParamsNetwork.forward. Input/output: NCHW."""
    x = x_nchw.astype(jnp.float32)
    N, cin0, H, W = x.shape
    HW = H * W
    x_flat = x.reshape(N, cin0, HW)          # NCHW is already (C, H*W) layout

    # Pad layer-1 input channels to a sublane multiple with zero channels
    # (matching weight columns are zero-padded; result unchanged).
    cin0_p = -(-cin0 // 8) * 8
    if cin0_p != cin0:
        x_flat = jnp.concatenate(
            [x_flat, jnp.zeros((N, cin0_p - cin0, HW), x_flat.dtype)], axis=1)

    layer_cfgs = []
    operands = [x_flat]
    in_specs = [pl.BlockSpec((1, cin0_p, HW), lambda n: (n, 0, 0))]
    c_max = cin0_p
    max_halo = 1
    for li, (w, b) in enumerate(ps):          # w: HWIO (K, K, cin, cout)
        K, _, cin, cout = w.shape
        p = K // 2
        # (K*K, Cout, Cin): one aligned weight plane per tap, VMEM-resident
        # across the whole grid (constant index_map).
        w_t = jnp.transpose(w.reshape(K * K, cin, cout), (0, 2, 1))
        cin_eff = cin
        if li == 0 and cin0_p != cin:
            w_t = jnp.concatenate(
                [w_t, jnp.zeros((K * K, cout, cin0_p - cin), w_t.dtype)],
                axis=2)
            cin_eff = cin0_p
        layer_cfgs.append((K, cin_eff, cout))
        c_max = max(c_max, cin_eff)
        max_halo = max(max_halo, p * W + p)
        operands.append(w_t.astype(jnp.float32))
        operands.append(b.reshape(cout, 1).astype(jnp.float32))
        in_specs.append(
            pl.BlockSpec((K * K, cout, cin_eff), lambda n: (0, 0, 0)))
        in_specs.append(pl.BlockSpec((cout, 1), lambda n: (0, 0)))

    cout_last = layer_cfgs[-1][2]

    # Flat zero-rimmed line buffer implementing SAME padding.  64 KiB here.
    pad_left = 128                            # lane-aligned and >= max halo
    assert pad_left >= max_halo
    pad_w = -(-(pad_left + HW + max_halo) // 128) * 128

    kernel = functools.partial(
        _fused_convnet_kernel,
        layer_cfgs=tuple(layer_cfgs), neg_slope=neg_slope,
        H=H, W=W, pad_left=pad_left)

    out_flat = pl.pallas_call(
        kernel,
        out_shape=jax.ShapeDtypeStruct((N, cout_last, HW), jnp.float32),
        grid_spec=pltpu.PrefetchScalarGridSpec(
            num_scalar_prefetch=0,
            grid=(N,),
            in_specs=in_specs,
            out_specs=pl.BlockSpec((1, cout_last, HW), lambda n: (n, 0, 0)),
            scratch_shapes=[pltpu.VMEM((c_max, pad_w), jnp.float32)],
        ),
        compiler_params=pltpu.CompilerParams(
            dimension_semantics=("parallel",)),
    )(*operands)

    return out_flat.reshape(N, cout_last, H, W)   # free reshape, no transpose


def init_params(key, in_channels, out_channels, params=2):
    """Deterministic synthetic parameters (HWIO weights + biases)."""
    c0 = in_channels
    layer_cfg = [
        (5, c0, 4 * c0),
        (5, 4 * c0, 8 * c0),
        (5, 8 * c0, 4 * c0),
        (3, 4 * c0, params * out_channels),
    ]
    ps = []
    for i, (k, cin, cout) in enumerate(layer_cfg):
        kw_key, kb_key = jax.random.split(jax.random.fold_in(key, i))
        fan_in = cin * k * k
        bound = 1.0 / jnp.sqrt(fan_in)
        w = jax.random.uniform(kw_key, (k, k, cin, cout), jnp.float32,
                               -bound, bound)
        b = jax.random.uniform(kb_key, (cout,), jnp.float32, -bound, bound)
        ps.append((w, b))
    return ps


def _reference_forward(x_nchw, ps):
    """Plain-JAX reference (lax conv) for the correctness check."""
    x = jnp.transpose(x_nchw, (0, 2, 3, 1))
    n_layers = len(ps)
    for i, (w, b) in enumerate(ps):
        y = jax.lax.conv_general_dilated(
            x, w, window_strides=(1, 1), padding="SAME",
            dimension_numbers=("NHWC", "HWIO", "NHWC"))
        y = y + b[None, None, None, :]
        if i != n_layers - 1:
            y = jnp.where(y >= 0, y, 0.01 * y)
        x = y
    return jnp.transpose(x, (0, 3, 1, 2))


if __name__ == "__main__":
    # batch=2, in_channels=4, spatial=16x16, out_channels=4, params=2
    N, Cin, H, W = 2, 4, 16, 16
    out_channels, params = 4, 2

    key = jax.random.PRNGKey(0)
    x_key, p_key = jax.random.split(key)
    x = jax.random.normal(x_key, (N, Cin, H, W), jnp.float32)

    ps = init_params(p_key, Cin, out_channels, params)

    fwd = jax.jit(lambda xx: params_network_forward(xx, ps))
    out = fwd(x)
    jax.block_until_ready(out)

    assert out.shape == (N, params * out_channels, H, W), out.shape

    ref = _reference_forward(x, ps)
    max_err = float(jnp.max(jnp.abs(out - ref)))
    assert jnp.allclose(out, ref, rtol=1e-3, atol=1e-3), max_err

    print("KERNEL_OK")
</pallas_src>

<mosaic_0001>
module attributes {stable_mosaic.version = 11 : i64} {
  func.func @_fused_convnet_kernel(%arg0: i32, %arg1: memref<1x8x256xf32, #tpu.memory_space<vmem>>, %arg2: memref<25x16x8xf32, #tpu.memory_space<vmem>>, %arg3: memref<16x1xf32, #tpu.memory_space<vmem>>, %arg4: memref<25x32x16xf32, #tpu.memory_space<vmem>>, %arg5: memref<32x1xf32, #tpu.memory_space<vmem>>, %arg6: memref<25x16x32xf32, #tpu.memory_space<vmem>>, %arg7: memref<16x1xf32, #tpu.memory_space<vmem>>, %arg8: memref<9x8x16xf32, #tpu.memory_space<vmem>>, %arg9: memref<8x1xf32, #tpu.memory_space<vmem>>, %arg10: memref<1x8x256xf32, #tpu.memory_space<vmem>>, %arg11: memref<32x512xf32, #tpu.memory_space<vmem>>) attributes {dimension_semantics = [#tpu.dimension_semantics<parallel>], iteration_bounds = array<i64: 2>, scalar_prefetch = 0 : i64, scratch_operands = 1 : i64, tpu.core_type = #tpu.core_type<tc>, window_params = [{transform_indices = @transform_0, window_bounds = array<i64: 1, 8, 256>}, {pipeline_mode = #tpu.pipeline_mode<synchronous>, transform_indices = @transform_1, window_bounds = array<i64: 25, 16, 8>}, {pipeline_mode = #tpu.pipeline_mode<synchronous>, transform_indices = @transform_2, window_bounds = array<i64: 16, 1>}, {pipeline_mode = #tpu.pipeline_mode<synchronous>, transform_indices = @transform_3, window_bounds = array<i64: 25, 32, 16>}, {pipeline_mode = #tpu.pipeline_mode<synchronous>, transform_indices = @transform_4, window_bounds = array<i64: 32, 1>}, {pipeline_mode = #tpu.pipeline_mode<synchronous>, transform_indices = @transform_5, window_bounds = array<i64: 25, 16, 32>}, {pipeline_mode = #tpu.pipeline_mode<synchronous>, transform_indices = @transform_6, window_bounds = array<i64: 16, 1>}, {pipeline_mode = #tpu.pipeline_mode<synchronous>, transform_indices = @transform_7, window_bounds = array<i64: 9, 8, 16>}, {pipeline_mode = #tpu.pipeline_mode<synchronous>, transform_indices = @transform_8, window_bounds = array<i64: 8, 1>}, {transform_indices = @transform_9, window_bounds = array<i64: 1, 8, 256>}]} {
    %cst = arith.constant 0.000000e+00 : f32
    %0 = vector.broadcast %cst : f32 to vector<32x128xf32>
    %c0 = arith.constant 0 : index
    %c0_0 = arith.constant 0 : index
    %1 = vector.load %arg11[%c0, %c0_0] : memref<32x512xf32, #tpu.memory_space<vmem>>, vector<32x128xf32>
    tpu.vector_store %arg11[%c0, %c0_0], %0 {strides = array<i32>} : memref<32x512xf32, #tpu.memory_space<vmem>>, vector<32x128xf32>,
    %cst_1 = arith.constant 0.000000e+00 : f32
    %2 = vector.broadcast %cst_1 : f32 to vector<32x128xf32>
    %c0_2 = arith.constant 0 : index
    %c384 = arith.constant 384 : index
    %3 = vector.load %arg11[%c0_2, %c384] : memref<32x512xf32, #tpu.memory_space<vmem>>, vector<32x128xf32>
    tpu.vector_store %arg11[%c0_2, %c384], %2 {strides = array<i32>} : memref<32x512xf32, #tpu.memory_space<vmem>>, vector<32x128xf32>,
    %4 = tpu.iota {dimensions = array<i32: 1>} : vector<1x256xi32>
    %c15_i32 = arith.constant 15 : i32
    %5 = vector.broadcast %c15_i32 : i32 to vector<1x256xi32>
    %6 = arith.andi %4, %5 : vector<1x256xi32>
    %c0_3 = arith.constant 0 : index
    %c0_4 = arith.constant 0 : index
    %c0_5 = arith.constant 0 : index
    %7 = vector.load %arg1[%c0_3, %c0_4, %c0_5] : memref<1x8x256xf32, #tpu.memory_space<vmem>>, vector<1x8x256xf32>
    %8 = vector.shape_cast %7 : vector<1x8x256xf32> to vector<8x256xf32>
    %c0_6 = arith.constant 0 : index
    %c128 = arith.constant 128 : index
    %9 = vector.load %arg11[%c0_6, %c128] : memref<32x512xf32, #tpu.memory_space<vmem>>, vector<8x256xf32>
    tpu.vector_store %arg11[%c0_6, %c128], %8 {strides = array<i32>} : memref<32x512xf32, #tpu.memory_space<vmem>>, vector<8x256xf32>,
    %c0_7 = arith.constant 0 : index
    %c0_8 = arith.constant 0 : index
    %10 = vector.load %arg3[%c0_7, %c0_8] : memref<16x1xf32, #tpu.memory_space<vmem>>, vector<16x1xf32>
    %11 = vector.shape_cast %10 : vector<16x1xf32> to vector<16x1xf32>
    %12 = vector.broadcast %11 : vector<16x1xf32> to vector<16x256xf32>
    %c0_9 = arith.constant 0 : index
    %c94 = arith.constant 94 : index
    %13 = vector.load %arg11[%c0_9, %c94] : memref<32x512xf32, #tpu.memory_space<vmem>>, vector<8x256xf32>
    %c2_i32 = arith.constant 2 : i32
    %14 = vector.broadcast %c2_i32 : i32 to vector<1x256xi32>
    %15 = arith.cmpi sge, %6, %14 : vector<1x256xi32>
    %cst_10 = arith.constant 0.000000e+00 : f32
    %16 = vector.shape_cast %15 : vector<1x256xi1> to vector<1x256xi1>
    %17 = vector.broadcast %16 : vector<1x256xi1> to vector<8x256xi1>
    %18 = vector.broadcast %cst_10 : f32 to vector<8x256xf32>
    %19 = arith.select %17, %13, %18 : vector<8x256xi1>, vector<8x256xf32>
    %c0_11 = arith.constant 0 : index
    %c0_12 = arith.constant 0 : index
    %c0_13 = arith.constant 0 : index
    %20 = vector.load %arg2[%c0_11, %c0_12, %c0_13] : memref<25x16x8xf32, #tpu.memory_space<vmem>>, vector<1x16x8xf32>
    %21 = vector.shape_cast %20 : vector<1x16x8xf32> to vector<16x8xf32>
    %cst_14 = arith.constant dense<0.000000e+00> : vector<16x256xf32>
    %22 = tpu.matmul %21, %19, %cst_14 {dimension_numbers = #tpu.dot_dimension_numbers<[1], [0], [0], [1], [0, 0, 1, 1], [], []>} : vector<16x8xf32>, vector<8x256xf32>, vector<16x256xf32> -> vector<16x256xf32>
    %23 = arith.addf %12, %22 : vector<16x256xf32>
    %c0_15 = arith.constant 0 : index
    %c95 = arith.constant 95 : index
    %24 = vector.load %arg11[%c0_15, %c95] : memref<32x512xf32, #tpu.memory_space<vmem>>, vector<8x256xf32>
    %c1_i32 = arith.constant 1 : i32
    %25 = vector.broadcast %c1_i32 : i32 to vector<1x256xi32>
    %26 = arith.cmpi sge, %6, %25 : vector<1x256xi32>
    %cst_16 = arith.constant 0.000000e+00 : f32
    %27 = vector.shape_cast %26 : vector<1x256xi1> to vector<1x256xi1>
    %28 = vector.broadcast %27 : vector<1x256xi1> to vector<8x256xi1>
    %29 = vector.broadcast %cst_16 : f32 to vector<8x256xf32>
    %30 = arith.select %28, %24, %29 : vector<8x256xi1>, vector<8x256xf32>
    %c1 = arith.constant 1 : index
    %c0_17 = arith.constant 0 : index
    %c0_18 = arith.constant 0 : index
    %31 = vector.load %arg2[%c1, %c0_17, %c0_18] : memref<25x16x8xf32, #tpu.memory_space<vmem>>, vector<1x16x8xf32>
    %32 = vector.shape_cast %31 : vector<1x16x8xf32> to vector<16x8xf32>
    %cst_19 = arith.constant dense<0.000000e+00> : vector<16x256xf32>
    %33 = tpu.matmul %32, %30, %cst_19 {dimension_numbers = #tpu.dot_dimension_numbers<[1], [0], [0], [1], [0, 0, 1, 1], [], []>} : vector<16x8xf32>, vector<8x256xf32>, vector<16x256xf32> -> vector<16x256xf32>
    %34 = arith.addf %23, %33 : vector<16x256xf32>
    %c0_20 = arith.constant 0 : index
    %c96 = arith.constant 96 : index
    %35 = vector.load %arg11[%c0_20, %c96] : memref<32x512xf32, #tpu.memory_space<vmem>>, vector<8x256xf32>
    %c2 = arith.constant 2 : index
    %c0_21 = arith.constant 0 : index
    %c0_22 = arith.constant 0 : index
    %36 = vector.load %arg2[%c2, %c0_21, %c0_22] : memref<25x16x8xf32, #tpu.memory_space<vmem>>, vector<1x16x8xf32>
    %37 = vector.shape_cast %36 : vector<1x16x8xf32> to vector<16x8xf32>
    %cst_23 = arith.constant dense<0.000000e+00> : vector<16x256xf32>
    %38 = tpu.matmul %37, %35, %cst_23 {dimension_numbers = #tpu.dot_dimension_numbers<[1], [0], [0], [1], [0, 0, 1, 1], [], []>} : vector<16x8xf32>, vector<8x256xf32>, vector<16x256xf32> -> vector<16x256xf32>
    %39 = arith.addf %34, %38 : vector<16x256xf32>
    %c0_24 = arith.constant 0 : index
    %c97 = arith.constant 97 : index
    %40 = vector.load %arg11[%c0_24, %c97] : memref<32x512xf32, #tpu.memory_space<vmem>>, vector<8x256xf32>
    %c15_i32_25 = arith.constant 15 : i32
    %41 = vector.broadcast %c15_i32_25 : i32 to vector<1x256xi32>
    %42 = arith.cmpi slt, %6, %41 : vector<1x256xi32>
    %cst_26 = arith.constant 0.000000e+00 : f32
    %43 = vector.shape_cast %42 : vector<1x256xi1> to vector<1x256xi1>
    %44 = vector.broadcast %43 : vector<1x256xi1> to vector<8x256xi1>
    %45 = vector.broadcast %cst_26 : f32 to vector<8x256xf32>
    %46 = arith.select %44, %40, %45 : vector<8x256xi1>, vector<8x256xf32>
    %c3 = arith.constant 3 : index
    %c0_27 = arith.constant 0 : index
    %c0_28 = arith.constant 0 : index
    %47 = vector.load %arg2[%c3, %c0_27, %c0_28] : memref<25x16x8xf32, #tpu.memory_space<vmem>>, vector<1x16x8xf32>
    %48 = vector.shape_cast %47 : vector<1x16x8xf32> to vector<16x8xf32>
    %cst_29 = arith.constant dense<0.000000e+00> : vector<16x256xf32>
    %49 = tpu.matmul %48, %46, %cst_29 {dimension_numbers = #tpu.dot_dimension_numbers<[1], [0], [0], [1], [0, 0, 1, 1], [], []>} : vector<16x8xf32>, vector<8x256xf32>, vector<16x256xf32> -> vector<16x256xf32>
    %50 = arith.addf %39, %49 : vector<16x256xf32>
    %c0_30 = arith.constant 0 : index
    %c98 = arith.constant 98 : index
    %51 = vector.load %arg11[%c0_30, %c98] : memref<32x512xf32, #tpu.memory_space<vmem>>, vector<8x256xf32>
    %c14_i32 = arith.constant 14 : i32
    %52 = vector.broadcast %c14_i32 : i32 to vector<1x256xi32>
    %53 = arith.cmpi slt, %6, %52 : vector<1x256xi32>
    %cst_31 = arith.constant 0.000000e+00 : f32
    %54 = vector.shape_cast %53 : vector<1x256xi1> to vector<1x256xi1>
    %55 = vector.broadcast %54 : vector<1x256xi1> to vector<8x256xi1>
    %56 = vector.broadcast %cst_31 : f32 to vector<8x256xf32>
    %57 = arith.select %55, %51, %56 : vector<8x256xi1>, vector<8x256xf32>
    %c4 = arith.constant 4 : index
    %c0_32 = arith.constant 0 : index
    %c0_33 = arith.constant 0 : index
    %58 = vector.load %arg2[%c4, %c0_32, %c0_33] : memref<25x16x8xf32, #tpu.memory_space<vmem>>, vector<1x16x8xf32>
    %59 = vector.shape_cast %58 : vector<1x16x8xf32> to vector<16x8xf32>
    %cst_34 = arith.constant dense<0.000000e+00> : vector<16x256xf32>
    %60 = tpu.matmul %59, %57, %cst_34 {dimension_numbers = #tpu.dot_dimension_numbers<[1], [0], [0], [1], [0, 0, 1, 1], [], []>} : vector<16x8xf32>, vector<8x256xf32>, vector<16x256xf32> -> vector<16x256xf32>
    %61 = arith.addf %50, %60 : vector<16x256xf32>
    %c0_35 = arith.constant 0 : index
    %c110 = arith.constant 110 : index
    %62 = vector.load %arg11[%c0_35, %c110] : memref<32x512xf32, #tpu.memory_space<vmem>>, vector<8x256xf32>
    %cst_36 = arith.constant 0.000000e+00 : f32
    %63 = vector.shape_cast %15 : vector<1x256xi1> to vector<1x256xi1>
    %64 = vector.broadcast %63 : vector<1x256xi1> to vector<8x256xi1>
    %65 = vector.broadcast %cst_36 : f32 to vector<8x256xf32>
    %66 = arith.select %64, %62, %65 : vector<8x256xi1>, vector<8x256xf32>
    %c5 = arith.constant 5 : index
    %c0_37 = arith.constant 0 : index
    %c0_38 = arith.constant 0 : index
    %67 = vector.load %arg2[%c5, %c0_37, %c0_38] : memref<25x16x8xf32, #tpu.memory_space<vmem>>, vector<1x16x8xf32>
    %68 = vector.shape_cast %67 : vector<1x16x8xf32> to vector<16x8xf32>
    %cst_39 = arith.constant dense<0.000000e+00> : vector<16x256xf32>
    %69 = tpu.matmul %68, %66, %cst_39 {dimension_numbers = #tpu.dot_dimension_numbers<[1], [0], [0], [1], [0, 0, 1, 1], [], []>} : vector<16x8xf32>, vector<8x256xf32>, vector<16x256xf32> -> vector<16x256xf32>
    %70 = arith.addf %61, %69 : vector<16x256xf32>
    %c0_40 = arith.constant 0 : index
    %c111 = arith.constant 111 : index
    %71 = vector.load %arg11[%c0_40, %c111] : memref<32x512xf32, #tpu.memory_space<vmem>>, vector<8x256xf32>
    %cst_41 = arith.constant 0.000000e+00 : f32
    %72 = vector.shape_cast %26 : vector<1x256xi1> to vector<1x256xi1>
    %73 = vector.broadcast %72 : vector<1x256xi1> to vector<8x256xi1>
    %74 = vector.broadcast %cst_41 : f32 to vector<8x256xf32>
    %75 = arith.select %73, %71, %74 : vector<8x256xi1>, vector<8x256xf32>
    %c6 = arith.constant 6 : index
    %c0_42 = arith.constant 0 : index
    %c0_43 = arith.constant 0 : index
    %76 = vector.load %arg2[%c6, %c0_42, %c0_43] : memref<25x16x8xf32, #tpu.memory_space<vmem>>, vector<1x16x8xf32>
    %77 = vector.shape_cast %76 : vector<1x16x8xf32> to vector<16x8xf32>
    %cst_44 = arith.constant dense<0.000000e+00> : vector<16x256xf32>
    %78 = tpu.matmul %77, %75, %cst_44 {dimension_numbers = #tpu.dot_dimension_numbers<[1], [0], [0], [1], [0, 0, 1, 1], [], []>} : vector<16x8xf32>, vector<8x256xf32>, vector<16x256xf32> -> vector<16x256xf32>
    %79 = arith.addf %70, %78 : vector<16x256xf32>
    %c0_45 = arith.constant 0 : index
    %c112 = arith.constant 112 : index
    %80 = vector.load %arg11[%c0_45, %c112] : memref<32x512xf32, #tpu.memory_space<vmem>>, vector<8x256xf32>
    %c7 = arith.constant 7 : index
    %c0_46 = arith.constant 0 : index
    %c0_47 = arith.constant 0 : index
    %81 = vector.load %arg2[%c7, %c0_46, %c0_47] : memref<25x16x8xf32, #tpu.memory_space<vmem>>, vector<1x16x8xf32>
    %82 = vector.shape_cast %81 : vector<1x16x8xf32> to vector<16x8xf32>
    %cst_48 = arith.constant dense<0.000000e+00> : vector<16x256xf32>
    %83 = tpu.matmul %82, %80, %cst_48 {dimension_numbers = #tpu.dot_dimension_numbers<[1], [0], [0], [1], [0, 0, 1, 1], [], []>} : vector<16x8xf32>, vector<8x256xf32>, vector<16x256xf32> -> vector<16x256xf32>
    %84 = arith.addf %79, %83 : vector<16x256xf32>
    %c0_49 = arith.constant 0 : index
    %c113 = arith.constant 113 : index
    %85 = vector.load %arg11[%c0_49, %c113] : memref<32x512xf32, #tpu.memory_space<vmem>>, vector<8x256xf32>
    %cst_50 = arith.constant 0.000000e+00 : f32
    %86 = vector.shape_cast %42 : vector<1x256xi1> to vector<1x256xi1>
    %87 = vector.broadcast %86 : vector<1x256xi1> to vector<8x256xi1>
    %88 = vector.broadcast %cst_50 : f32 to vector<8x256xf32>
    %89 = arith.select %87, %85, %88 : vector<8x256xi1>, vector<8x256xf32>
    %c8 = arith.constant 8 : index
    %c0_51 = arith.constant 0 : index
    %c0_52 = arith.constant 0 : index
    %90 = vector.load %arg2[%c8, %c0_51, %c0_52] : memref<25x16x8xf32, #tpu.memory_space<vmem>>, vector<1x16x8xf32>
    %91 = vector.shape_cast %90 : vector<1x16x8xf32> to vector<16x8xf32>
    %cst_53 = arith.constant dense<0.000000e+00> : vector<16x256xf32>
    %92 = tpu.matmul %91, %89, %cst_53 {dimension_numbers = #tpu.dot_dimension_numbers<[1], [0], [0], [1], [0, 0, 1, 1], [], []>} : vector<16x8xf32>, vector<8x256xf32>, vector<16x256xf32> -> vector<16x256xf32>
    %93 = arith.addf %84, %92 : vector<16x256xf32>
    %c0_54 = arith.constant 0 : index
    %c114 = arith.constant 114 : index
    %94 = vector.load %arg11[%c0_54, %c114] : memref<32x512xf32, #tpu.memory_space<vmem>>, vector<8x256xf32>
    %cst_55 = arith.constant 0.000000e+00 : f32
    %95 = vector.shape_cast %53 : vector<1x256xi1> to vector<1x256xi1>
    %96 = vector.broadcast %95 : vector<1x256xi1> to vector<8x256xi1>
    %97 = vector.broadcast %cst_55 : f32 to vector<8x256xf32>
    %98 = arith.select %96, %94, %97 : vector<8x256xi1>, vector<8x256xf32>
    %c9 = arith.constant 9 : index
    %c0_56 = arith.constant 0 : index
    %c0_57 = arith.constant 0 : index
    %99 = vector.load %arg2[%c9, %c0_56, %c0_57] : memref<25x16x8xf32, #tpu.memory_space<vmem>>, vector<1x16x8xf32>
    %100 = vector.shape_cast %99 : vector<1x16x8xf32> to vector<16x8xf32>
    %cst_58 = arith.constant dense<0.000000e+00> : vector<16x256xf32>
    %101 = tpu.matmul %100, %98, %cst_58 {dimension_numbers = #tpu.dot_dimension_numbers<[1], [0], [0], [1], [0, 0, 1, 1], [], []>} : vector<16x8xf32>, vector<8x256xf32>, vector<16x256xf32> -> vector<16x256xf32>
    %102 = arith.addf %93, %101 : vector<16x256xf32>
    %c0_59 = arith.constant 0 : index
    %c126 = arith.constant 126 : index
    %103 = vector.load %arg11[%c0_59, %c126] : memref<32x512xf32, #tpu.memory_space<vmem>>, vector<8x256xf32>
    %cst_60 = arith.constant 0.000000e+00 : f32
    %104 = vector.shape_cast %15 : vector<1x256xi1> to vector<1x256xi1>
    %105 = vector.broadcast %104 : vector<1x256xi1> to vector<8x256xi1>
    %106 = vector.broadcast %cst_60 : f32 to vector<8x256xf32>
    %107 = arith.select %105, %103, %106 : vector<8x256xi1>, vector<8x256xf32>
    %c10 = arith.constant 10 : index
    %c0_61 = arith.constant 0 : index
    %c0_62 = arith.constant 0 : index
    %108 = vector.load %arg2[%c10, %c0_61, %c0_62] : memref<25x16x8xf32, #tpu.memory_space<vmem>>, vector<1x16x8xf32>
    %109 = vector.shape_cast %108 : vector<1x16x8xf32> to vector<16x8xf32>
    %cst_63 = arith.constant dense<0.000000e+00> : vector<16x256xf32>
    %110 = tpu.matmul %109, %107, %cst_63 {dimension_numbers = #tpu.dot_dimension_numbers<[1], [0], [0], [1], [0, 0, 1, 1], [], []>} : vector<16x8xf32>, vector<8x256xf32>, vector<16x256xf32> -> vector<16x256xf32>
    %111 = arith.addf %102, %110 : vector<16x256xf32>
    %c0_64 = arith.constant 0 : index
    %c127 = arith.constant 127 : index
    %112 = vector.load %arg11[%c0_64, %c127] : memref<32x512xf32, #tpu.memory_space<vmem>>, vector<8x256xf32>
    %cst_65 = arith.constant 0.000000e+00 : f32
    %113 = vector.shape_cast %26 : vector<1x256xi1> to vector<1x256xi1>
    %114 = vector.broadcast %113 : vector<1x256xi1> to vector<8x256xi1>
    %115 = vector.broadcast %cst_65 : f32 to vector<8x256xf32>
    %116 = arith.select %114, %112, %115 : vector<8x256xi1>, vector<8x256xf32>
    %c11 = arith.constant 11 : index
    %c0_66 = arith.constant 0 : index
    %c0_67 = arith.constant 0 : index
    %117 = vector.load %arg2[%c11, %c0_66, %c0_67] : memref<25x16x8xf32, #tpu.memory_space<vmem>>, vector<1x16x8xf32>
    %118 = vector.shape_cast %117 : vector<1x16x8xf32> to vector<16x8xf32>
    %cst_68 = arith.constant dense<0.000000e+00> : vector<16x256xf32>
    %119 = tpu.matmul %118, %116, %cst_68 {dimension_numbers = #tpu.dot_dimension_numbers<[1], [0], [0], [1], [0, 0, 1, 1], [], []>} : vector<16x8xf32>, vector<8x256xf32>, vector<16x256xf32> -> vector<16x256xf32>
    %120 = arith.addf %111, %119 : vector<16x256xf32>
    %c0_69 = arith.constant 0 : index
    %c128_70 = arith.constant 128 : index
    %121 = vector.load %arg11[%c0_69, %c128_70] : memref<32x512xf32, #tpu.memory_space<vmem>>, vector<8x256xf32>
    %c12 = arith.constant 12 : index
    %c0_71 = arith.constant 0 : index
    %c0_72 = arith.constant 0 : index
    %122 = vector.load %arg2[%c12, %c0_71, %c0_72] : memref<25x16x8xf32, #tpu.memory_space<vmem>>, vector<1x16x8xf32>
    %123 = vector.shape_cast %122 : vector<1x16x8xf32> to vector<16x8xf32>
    %cst_73 = arith.constant dense<0.000000e+00> : vector<16x256xf32>
    %124 = tpu.matmul %123, %121, %cst_73 {dimension_numbers = #tpu.dot_dimension_numbers<[1], [0], [0], [1], [0, 0, 1, 1], [], []>} : vector<16x8xf32>, vector<8x256xf32>, vector<16x256xf32> -> vector<16x256xf32>
    %125 = arith.addf %120, %124 : vector<16x256xf32>
    %c0_74 = arith.constant 0 : index
    %c129 = arith.constant 129 : index
    %126 = vector.load %arg11[%c0_74, %c129] : memref<32x512xf32, #tpu.memory_space<vmem>>, vector<8x256xf32>
    %cst_75 = arith.constant 0.000000e+00 : f32
    %127 = vector.shape_cast %42 : vector<1x256xi1> to vector<1x256xi1>
    %128 = vector.broadcast %127 : vector<1x256xi1> to vector<8x256xi1>
    %129 = vector.broadcast %cst_75 : f32 to vector<8x256xf32>
    %130 = arith.select %128, %126, %129 : vector<8x256xi1>, vector<8x256xf32>
    %c13 = arith.constant 13 : index
    %c0_76 = arith.constant 0 : index
    %c0_77 = arith.constant 0 : index
    %131 = vector.load %arg2[%c13, %c0_76, %c0_77] : memref<25x16x8xf32, #tpu.memory_space<vmem>>, vector<1x16x8xf32>
    %132 = vector.shape_cast %131 : vector<1x16x8xf32> to vector<16x8xf32>
    %cst_78 = arith.constant dense<0.000000e+00> : vector<16x256xf32>
    %133 = tpu.matmul %132, %130, %cst_78 {dimension_numbers = #tpu.dot_dimension_numbers<[1], [0], [0], [1], [0, 0, 1, 1], [], []>} : vector<16x8xf32>, vector<8x256xf32>, vector<16x256xf32> -> vector<16x256xf32>
    %134 = arith.addf %125, %133 : vector<16x256xf32>
    %c0_79 = arith.constant 0 : index
    %c130 = arith.constant 130 : index
    %135 = vector.load %arg11[%c0_79, %c130] : memref<32x512xf32, #tpu.memory_space<vmem>>, vector<8x256xf32>
    %cst_80 = arith.constant 0.000000e+00 : f32
    %136 = vector.shape_cast %53 : vector<1x256xi1> to vector<1x256xi1>
    %137 = vector.broadcast %136 : vector<1x256xi1> to vector<8x256xi1>
    %138 = vector.broadcast %cst_80 : f32 to vector<8x256xf32>
    %139 = arith.select %137, %135, %138 : vector<8x256xi1>, vector<8x256xf32>
    %c14 = arith.constant 14 : index
    %c0_81 = arith.constant 0 : index
    %c0_82 = arith.constant 0 : index
    %140 = vector.load %arg2[%c14, %c0_81, %c0_82] : memref<25x16x8xf32, #tpu.memory_space<vmem>>, vector<1x16x8xf32>
    %141 = vector.shape_cast %140 : vector<1x16x8xf32> to vector<16x8xf32>
    %cst_83 = arith.constant dense<0.000000e+00> : vector<16x256xf32>
    %142 = tpu.matmul %141, %139, %cst_83 {dimension_numbers = #tpu.dot_dimension_numbers<[1], [0], [0], [1], [0, 0, 1, 1], [], []>} : vector<16x8xf32>, vector<8x256xf32>, vector<16x256xf32> -> vector<16x256xf32>
    %143 = arith.addf %134, %142 : vector<16x256xf32>
    %c0_84 = arith.constant 0 : index
    %c142 = arith.constant 142 : index
    %144 = vector.load %arg11[%c0_84, %c142] : memref<32x512xf32, #tpu.memory_space<vmem>>, vector<8x256xf32>
    %cst_85 = arith.constant 0.000000e+00 : f32
    %145 = vector.shape_cast %15 : vector<1x256xi1> to vector<1x256xi1>
    %146 = vector.broadcast %145 : vector<1x256xi1> to vector<8x256xi1>
    %147 = vector.broadcast %cst_85 : f32 to vector<8x256xf32>
    %148 = arith.select %146, %144, %147 : vector<8x256xi1>, vector<8x256xf32>
    %c15 = arith.constant 15 : index
    %c0_86 = arith.constant 0 : index
    %c0_87 = arith.constant 0 : index
    %149 = vector.load %arg2[%c15, %c0_86, %c0_87] : memref<25x16x8xf32, #tpu.memory_space<vmem>>, vector<1x16x8xf32>
    %150 = vector.shape_cast %149 : vector<1x16x8xf32> to vector<16x8xf32>
    %cst_88 = arith.constant dense<0.000000e+00> : vector<16x256xf32>
    %151 = tpu.matmul %150, %148, %cst_88 {dimension_numbers = #tpu.dot_dimension_numbers<[1], [0], [0], [1], [0, 0, 1, 1], [], []>} : vector<16x8xf32>, vector<8x256xf32>, vector<16x256xf32> -> vector<16x256xf32>
    %152 = arith.addf %143, %151 : vector<16x256xf32>
    %c0_89 = arith.constant 0 : index
    %c143 = arith.constant 143 : index
    %153 = vector.load %arg11[%c0_89, %c143] : memref<32x512xf32, #tpu.memory_space<vmem>>, vector<8x256xf32>
    %cst_90 = arith.constant 0.000000e+00 : f32
    %154 = vector.shape_cast %26 : vector<1x256xi1> to vector<1x256xi1>
    %155 = vector.broadcast %154 : vector<1x256xi1> to vector<8x256xi1>
    %156 = vector.broadcast %cst_90 : f32 to vector<8x256xf32>
    %157 = arith.select %155, %153, %156 : vector<8x256xi1>, vector<8x256xf32>
    %c16 = arith.constant 16 : index
    %c0_91 = arith.constant 0 : index
    %c0_92 = arith.constant 0 : index
    %158 = vector.load %arg2[%c16, %c0_91, %c0_92] : memref<25x16x8xf32, #tpu.memory_space<vmem>>, vector<1x16x8xf32>
    %159 = vector.shape_cast %158 : vector<1x16x8xf32> to vector<16x8xf32>
    %cst_93 = arith.constant dense<0.000000e+00> : vector<16x256xf32>
    %160 = tpu.matmul %159, %157, %cst_93 {dimension_numbers = #tpu.dot_dimension_numbers<[1], [0], [0], [1], [0, 0, 1, 1], [], []>} : vector<16x8xf32>, vector<8x256xf32>, vector<16x256xf32> -> vector<16x256xf32>
    %161 = arith.addf %152, %160 : vector<16x256xf32>
    %c0_94 = arith.constant 0 : index
    %c144 = arith.constant 144 : index
    %162 = vector.load %arg11[%c0_94, %c144] : memref<32x512xf32, #tpu.memory_space<vmem>>, vector<8x256xf32>
    %c17 = arith.constant 17 : index
    %c0_95 = arith.constant 0 : index
    %c0_96 = arith.constant 0 : index
    %163 = vector.load %arg2[%c17, %c0_95, %c0_96] : memref<25x16x8xf32, #tpu.memory_space<vmem>>, vector<1x16x8xf32>
    %164 = vector.shape_cast %163 : vector<1x16x8xf32> to vector<16x8xf32>
    %cst_97 = arith.constant dense<0.000000e+00> : vector<16x256xf32>
    %165 = tpu.matmul %164, %162, %cst_97 {dimension_numbers = #tpu.dot_dimension_numbers<[1], [0], [0], [1], [0, 0, 1, 1], [], []>} : vector<16x8xf32>, vector<8x256xf32>, vector<16x256xf32> -> vector<16x256xf32>
    %166 = arith.addf %161, %165 : vector<16x256xf32>
    %c0_98 = arith.constant 0 : index
    %c145 = arith.constant 145 : index
    %167 = vector.load %arg11[%c0_98, %c145] : memref<32x512xf32, #tpu.memory_space<vmem>>, vector<8x256xf32>
    %cst_99 = arith.constant 0.000000e+00 : f32
    %168 = vector.shape_cast %42 : vector<1x256xi1> to vector<1x256xi1>
    %169 = vector.broadcast %168 : vector<1x256xi1> to vector<8x256xi1>
    %170 = vector.broadcast %cst_99 : f32 to vector<8x256xf32>
    %171 = arith.select %169, %167, %170 : vector<8x256xi1>, vector<8x256xf32>
    %c18 = arith.constant 18 : index
    %c0_100 = arith.constant 0 : index
    %c0_101 = arith.constant 0 : index
    %172 = vector.load %arg2[%c18, %c0_100, %c0_101] : memref<25x16x8xf32, #tpu.memory_space<vmem>>, vector<1x16x8xf32>
    %173 = vector.shape_cast %172 : vector<1x16x8xf32> to vector<16x8xf32>
    %cst_102 = arith.constant dense<0.000000e+00> : vector<16x256xf32>
    %174 = tpu.matmul %173, %171, %cst_102 {dimension_numbers = #tpu.dot_dimension_numbers<[1], [0], [0], [1], [0, 0, 1, 1], [], []>} : vector<16x8xf32>, vector<8x256xf32>, vector<16x256xf32> -> vector<16x256xf32>
    %175 = arith.addf %166, %174 : vector<16x256xf32>
    %c0_103 = arith.constant 0 : index
    %c146 = arith.constant 146 : index
    %176 = vector.load %arg11[%c0_103, %c146] : memref<32x512xf32, #tpu.memory_space<vmem>>, vector<8x256xf32>
    %cst_104 = arith.constant 0.000000e+00 : f32
    %177 = vector.shape_cast %53 : vector<1x256xi1> to vector<1x256xi1>
    %178 = vector.broadcast %177 : vector<1x256xi1> to vector<8x256xi1>
    %179 = vector.broadcast %cst_104 : f32 to vector<8x256xf32>
    %180 = arith.select %178, %176, %179 : vector<8x256xi1>, vector<8x256xf32>
    %c19 = arith.constant 19 : index
    %c0_105 = arith.constant 0 : index
    %c0_106 = arith.constant 0 : index
    %181 = vector.load %arg2[%c19, %c0_105, %c0_106] : memref<25x16x8xf32, #tpu.memory_space<vmem>>, vector<1x16x8xf32>
    %182 = vector.shape_cast %181 : vector<1x16x8xf32> to vector<16x8xf32>
    %cst_107 = arith.constant dense<0.000000e+00> : vector<16x256xf32>
    %183 = tpu.matmul %182, %180, %cst_107 {dimension_numbers = #tpu.dot_dimension_numbers<[1], [0], [0], [1], [0, 0, 1, 1], [], []>} : vector<16x8xf32>, vector<8x256xf32>, vector<16x256xf32> -> vector<16x256xf32>
    %184 = arith.addf %175, %183 : vector<16x256xf32>
    %c0_108 = arith.constant 0 : index
    %c158 = arith.constant 158 : index
    %185 = vector.load %arg11[%c0_108, %c158] : memref<32x512xf32, #tpu.memory_space<vmem>>, vector<8x256xf32>
    %cst_109 = arith.constant 0.000000e+00 : f32
    %186 = vector.shape_cast %15 : vector<1x256xi1> to vector<1x256xi1>
    %187 = vector.broadcast %186 : vector<1x256xi1> to vector<8x256xi1>
    %188 = vector.broadcast %cst_109 : f32 to vector<8x256xf32>
    %189 = arith.select %187, %185, %188 : vector<8x256xi1>, vector<8x256xf32>
    %c20 = arith.constant 20 : index
    %c0_110 = arith.constant 0 : index
    %c0_111 = arith.constant 0 : index
    %190 = vector.load %arg2[%c20, %c0_110, %c0_111] : memref<25x16x8xf32, #tpu.memory_space<vmem>>, vector<1x16x8xf32>
    %191 = vector.shape_cast %190 : vector<1x16x8xf32> to vector<16x8xf32>
    %cst_112 = arith.constant dense<0.000000e+00> : vector<16x256xf32>
    %192 = tpu.matmul %191, %189, %cst_112 {dimension_numbers = #tpu.dot_dimension_numbers<[1], [0], [0], [1], [0, 0, 1, 1], [], []>} : vector<16x8xf32>, vector<8x256xf32>, vector<16x256xf32> -> vector<16x256xf32>
    %193 = arith.addf %184, %192 : vector<16x256xf32>
    %c0_113 = arith.constant 0 : index
    %c159 = arith.constant 159 : index
    %194 = vector.load %arg11[%c0_113, %c159] : memref<32x512xf32, #tpu.memory_space<vmem>>, vector<8x256xf32>
    %cst_114 = arith.constant 0.000000e+00 : f32
    %195 = vector.shape_cast %26 : vector<1x256xi1> to vector<1x256xi1>
    %196 = vector.broadcast %195 : vector<1x256xi1> to vector<8x256xi1>
    %197 = vector.broadcast %cst_114 : f32 to vector<8x256xf32>
    %198 = arith.select %196, %194, %197 : vector<8x256xi1>, vector<8x256xf32>
    %c21 = arith.constant 21 : index
    %c0_115 = arith.constant 0 : index
    %c0_116 = arith.constant 0 : index
    %199 = vector.load %arg2[%c21, %c0_115, %c0_116] : memref<25x16x8xf32, #tpu.memory_space<vmem>>, vector<1x16x8xf32>
    %200 = vector.shape_cast %199 : vector<1x16x8xf32> to vector<16x8xf32>
    %cst_117 = arith.constant dense<0.000000e+00> : vector<16x256xf32>
    %201 = tpu.matmul %200, %198, %cst_117 {dimension_numbers = #tpu.dot_dimension_numbers<[1], [0], [0], [1], [0, 0, 1, 1], [], []>} : vector<16x8xf32>, vector<8x256xf32>, vector<16x256xf32> -> vector<16x256xf32>
    %202 = arith.addf %193, %201 : vector<16x256xf32>
    %c0_118 = arith.constant 0 : index
    %c160 = arith.constant 160 : index
    %203 = vector.load %arg11[%c0_118, %c160] : memref<32x512xf32, #tpu.memory_space<vmem>>, vector<8x256xf32>
    %c22 = arith.constant 22 : index
    %c0_119 = arith.constant 0 : index
    %c0_120 = arith.constant 0 : index
    %204 = vector.load %arg2[%c22, %c0_119, %c0_120] : memref<25x16x8xf32, #tpu.memory_space<vmem>>, vector<1x16x8xf32>
    %205 = vector.shape_cast %204 : vector<1x16x8xf32> to vector<16x8xf32>
    %cst_121 = arith.constant dense<0.000000e+00> : vector<16x256xf32>
    %206 = tpu.matmul %205, %203, %cst_121 {dimension_numbers = #tpu.dot_dimension_numbers<[1], [0], [0], [1], [0, 0, 1, 1], [], []>} : vector<16x8xf32>, vector<8x256xf32>, vector<16x256xf32> -> vector<16x256xf32>
    %207 = arith.addf %202, %206 : vector<16x256xf32>
    %c0_122 = arith.constant 0 : index
    %c161 = arith.constant 161 : index
    %208 = vector.load %arg11[%c0_122, %c161] : memref<32x512xf32, #tpu.memory_space<vmem>>, vector<8x256xf32>
    %cst_123 = arith.constant 0.000000e+00 : f32
    %209 = vector.shape_cast %42 : vector<1x256xi1> to vector<1x256xi1>
    %210 = vector.broadcast %209 : vector<1x256xi1> to vector<8x256xi1>
    %211 = vector.broadcast %cst_123 : f32 to vector<8x256xf32>
    %212 = arith.select %210, %208, %211 : vector<8x256xi1>, vector<8x256xf32>
    %c23 = arith.constant 23 : index
    %c0_124 = arith.constant 0 : index
    %c0_125 = arith.constant 0 : index
    %213 = vector.load %arg2[%c23, %c0_124, %c0_125] : memref<25x16x8xf32, #tpu.memory_space<vmem>>, vector<1x16x8xf32>
    %214 = vector.shape_cast %213 : vector<1x16x8xf32> to vector<16x8xf32>
    %cst_126 = arith.constant dense<0.000000e+00> : vector<16x256xf32>
    %215 = tpu.matmul %214, %212, %cst_126 {dimension_numbers = #tpu.dot_dimension_numbers<[1], [0], [0], [1], [0, 0, 1, 1], [], []>} : vector<16x8xf32>, vector<8x256xf32>, vector<16x256xf32> -> vector<16x256xf32>
    %216 = arith.addf %207, %215 : vector<16x256xf32>
    %c0_127 = arith.constant 0 : index
    %c162 = arith.constant 162 : index
    %217 = vector.load %arg11[%c0_127, %c162] : memref<32x512xf32, #tpu.memory_space<vmem>>, vector<8x256xf32>
    %cst_128 = arith.constant 0.000000e+00 : f32
    %218 = vector.shape_cast %53 : vector<1x256xi1> to vector<1x256xi1>
    %219 = vector.broadcast %218 : vector<1x256xi1> to vector<8x256xi1>
    %220 = vector.broadcast %cst_128 : f32 to vector<8x256xf32>
    %221 = arith.select %219, %217, %220 : vector<8x256xi1>, vector<8x256xf32>
    %c24 = arith.constant 24 : index
    %c0_129 = arith.constant 0 : index
    %c0_130 = arith.constant 0 : index
    %222 = vector.load %arg2[%c24, %c0_129, %c0_130] : memref<25x16x8xf32, #tpu.memory_space<vmem>>, vector<1x16x8xf32>
    %223 = vector.shape_cast %222 : vector<1x16x8xf32> to vector<16x8xf32>
    %cst_131 = arith.constant dense<0.000000e+00> : vector<16x256xf32>
    %224 = tpu.matmul %223, %221, %cst_131 {dimension_numbers = #tpu.dot_dimension_numbers<[1], [0], [0], [1], [0, 0, 1, 1], [], []>} : vector<16x8xf32>, vector<8x256xf32>, vector<16x256xf32> -> vector<16x256xf32>
    %225 = arith.addf %216, %224 : vector<16x256xf32>
    %cst_132 = arith.constant 0.000000e+00 : f32
    %226 = vector.broadcast %cst_132 : f32 to vector<16x256xf32>
    %227 = arith.cmpf oge, %225, %226 : vector<16x256xf32>
    %cst_133 = arith.constant 0.00999999977 : f32
    %228 = vector.broadcast %cst_133 : f32 to vector<16x256xf32>
    %229 = arith.mulf %228, %225 : vector<16x256xf32>
    %230 = arith.select %227, %225, %229 : vector<16x256xi1>, vector<16x256xf32>
    %c0_134 = arith.constant 0 : index
    %c128_135 = arith.constant 128 : index
    %231 = vector.load %arg11[%c0_134, %c128_135] : memref<32x512xf32, #tpu.memory_space<vmem>>, vector<16x256xf32>
    tpu.vector_store %arg11[%c0_134, %c128_135], %230 {strides = array<i32>} : memref<32x512xf32, #tpu.memory_space<vmem>>, vector<16x256xf32>,
    %c0_136 = arith.constant 0 : index
    %c0_137 = arith.constant 0 : index
    %232 = vector.load %arg5[%c0_136, %c0_137] : memref<32x1xf32, #tpu.memory_space<vmem>>, vector<32x1xf32>
    %233 = vector.shape_cast %232 : vector<32x1xf32> to vector<32x1xf32>
    %234 = vector.broadcast %233 : vector<32x1xf32> to vector<32x256xf32>
    %c0_138 = arith.constant 0 : index
    %c94_139 = arith.constant 94 : index
    %235 = vector.load %arg11[%c0_138, %c94_139] : memref<32x512xf32, #tpu.memory_space<vmem>>, vector<16x256xf32>
    %cst_140 = arith.constant 0.000000e+00 : f32
    %236 = vector.shape_cast %15 : vector<1x256xi1> to vector<1x256xi1>
    %237 = vector.broadcast %236 : vector<1x256xi1> to vector<16x256xi1>
    %238 = vector.broadcast %cst_140 : f32 to vector<16x256xf32>
    %239 = arith.select %237, %235, %238 : vector<16x256xi1>, vector<16x256xf32>
    %c0_141 = arith.constant 0 : index
    %c0_142 = arith.constant 0 : index
    %c0_143 = arith.constant 0 : index
    %240 = vector.load %arg4[%c0_141, %c0_142, %c0_143] : memref<25x32x16xf32, #tpu.memory_space<vmem>>, vector<1x32x16xf32>
    %241 = vector.shape_cast %240 : vector<1x32x16xf32> to vector<32x16xf32>
    %cst_144 = arith.constant dense<0.000000e+00> : vector<32x256xf32>
    %242 = tpu.matmul %241, %239, %cst_144 {dimension_numbers = #tpu.dot_dimension_numbers<[1], [0], [0], [1], [0, 0, 1, 1], [], []>} : vector<32x16xf32>, vector<16x256xf32>, vector<32x256xf32> -> vector<32x256xf32>
    %243 = arith.addf %234, %242 : vector<32x256xf32>
    %c0_145 = arith.constant 0 : index
    %c95_146 = arith.constant 95 : index
    %244 = vector.load %arg11[%c0_145, %c95_146] : memref<32x512xf32, #tpu.memory_space<vmem>>, vector<16x256xf32>
    %cst_147 = arith.constant 0.000000e+00 : f32
    %245 = vector.shape_cast %26 : vector<1x256xi1> to vector<1x256xi1>
    %246 = vector.broadcast %245 : vector<1x256xi1> to vector<16x256xi1>
    %247 = vector.broadcast %cst_147 : f32 to vector<16x256xf32>
    %248 = arith.select %246, %244, %247 : vector<16x256xi1>, vector<16x256xf32>
    %c1_148 = arith.constant 1 : index
    %c0_149 = arith.constant 0 : index
    %c0_150 = arith.constant 0 : index
    %249 = vector.load %arg4[%c1_148, %c0_149, %c0_150] : memref<25x32x16xf32, #tpu.memory_space<vmem>>, vector<1x32x16xf32>
    %250 = vector.shape_cast %249 : vector<1x32x16xf32> to vector<32x16xf32>
    %cst_151 = arith.constant dense<0.000000e+00> : vector<32x256xf32>
    %251 = tpu.matmul %250, %248, %cst_151 {dimension_numbers = #tpu.dot_dimension_numbers<[1], [0], [0], [1], [0, 0, 1, 1], [], []>} : vector<32x16xf32>, vector<16x256xf32>, vector<32x256xf32> -> vector<32x256xf32>
    %252 = arith.addf %243, %251 : vector<32x256xf32>
    %c0_152 = arith.constant 0 : index
    %c96_153 = arith.constant 96 : index
    %253 = vector.load %arg11[%c0_152, %c96_153] : memref<32x512xf32, #tpu.memory_space<vmem>>, vector<16x256xf32>
    %c2_154 = arith.constant 2 : index
    %c0_155 = arith.constant 0 : index
    %c0_156 = arith.constant 0 : index
    %254 = vector.load %arg4[%c2_154, %c0_155, %c0_156] : memref<25x32x16xf32, #tpu.memory_space<vmem>>, vector<1x32x16xf32>
    %255 = vector.shape_cast %254 : vector<1x32x16xf32> to vector<32x16xf32>
    %cst_157 = arith.constant dense<0.000000e+00> : vector<32x256xf32>
    %256 = tpu.matmul %255, %253, %cst_157 {dimension_numbers = #tpu.dot_dimension_numbers<[1], [0], [0], [1], [0, 0, 1, 1], [], []>} : vector<32x16xf32>, vector<16x256xf32>, vector<32x256xf32> -> vector<32x256xf32>
    %257 = arith.addf %252, %256 : vector<32x256xf32>
    %c0_158 = arith.constant 0 : index
    %c97_159 = arith.constant 97 : index
    %258 = vector.load %arg11[%c0_158, %c97_159] : memref<32x512xf32, #tpu.memory_space<vmem>>, vector<16x256xf32>
    %cst_160 = arith.constant 0.000000e+00 : f32
    %259 = vector.shape_cast %42 : vector<1x256xi1> to vector<1x256xi1>
    %260 = vector.broadcast %259 : vector<1x256xi1> to vector<16x256xi1>
    %261 = vector.broadcast %cst_160 : f32 to vector<16x256xf32>
    %262 = arith.select %260, %258, %261 : vector<16x256xi1>, vector<16x256xf32>
    %c3_161 = arith.constant 3 : index
    %c0_162 = arith.constant 0 : index
    %c0_163 = arith.constant 0 : index
    %263 = vector.load %arg4[%c3_161, %c0_162, %c0_163] : memref<25x32x16xf32, #tpu.memory_space<vmem>>, vector<1x32x16xf32>
    %264 = vector.shape_cast %263 : vector<1x32x16xf32> to vector<32x16xf32>
    %cst_164 = arith.constant dense<0.000000e+00> : vector<32x256xf32>
    %265 = tpu.matmul %264, %262, %cst_164 {dimension_numbers = #tpu.dot_dimension_numbers<[1], [0], [0], [1], [0, 0, 1, 1], [], []>} : vector<32x16xf32>, vector<16x256xf32>, vector<32x256xf32> -> vector<32x256xf32>
    %266 = arith.addf %257, %265 : vector<32x256xf32>
    %c0_165 = arith.constant 0 : index
    %c98_166 = arith.constant 98 : index
    %267 = vector.load %arg11[%c0_165, %c98_166] : memref<32x512xf32, #tpu.memory_space<vmem>>, vector<16x256xf32>
    %cst_167 = arith.constant 0.000000e+00 : f32
    %268 = vector.shape_cast %53 : vector<1x256xi1> to vector<1x256xi1>
    %269 = vector.broadcast %268 : vector<1x256xi1> to vector<16x256xi1>
    %270 = vector.broadcast %cst_167 : f32 to vector<16x256xf32>
    %271 = arith.select %269, %267, %270 : vector<16x256xi1>, vector<16x256xf32>
    %c4_168 = arith.constant 4 : index
    %c0_169 = arith.constant 0 : index
    %c0_170 = arith.constant 0 : index
    %272 = vector.load %arg4[%c4_168, %c0_169, %c0_170] : memref<25x32x16xf32, #tpu.memory_space<vmem>>, vector<1x32x16xf32>
    %273 = vector.shape_cast %272 : vector<1x32x16xf32> to vector<32x16xf32>
    %cst_171 = arith.constant dense<0.000000e+00> : vector<32x256xf32>
    %274 = tpu.matmul %273, %271, %cst_171 {dimension_numbers = #tpu.dot_dimension_numbers<[1], [0], [0], [1], [0, 0, 1, 1], [], []>} : vector<32x16xf32>, vector<16x256xf32>, vector<32x256xf32> -> vector<32x256xf32>
    %275 = arith.addf %266, %274 : vector<32x256xf32>
    %c0_172 = arith.constant 0 : index
    %c110_173 = arith.constant 110 : index
    %276 = vector.load %arg11[%c0_172, %c110_173] : memref<32x512xf32, #tpu.memory_space<vmem>>, vector<16x256xf32>
    %cst_174 = arith.constant 0.000000e+00 : f32
    %277 = vector.shape_cast %15 : vector<1x256xi1> to vector<1x256xi1>
    %278 = vector.broadcast %277 : vector<1x256xi1> to vector<16x256xi1>
    %279 = vector.broadcast %cst_174 : f32 to vector<16x256xf32>
    %280 = arith.select %278, %276, %279 : vector<16x256xi1>, vector<16x256xf32>
    %c5_175 = arith.constant 5 : index
    %c0_176 = arith.constant 0 : index
    %c0_177 = arith.constant 0 : index
    %281 = vector.load %arg4[%c5_175, %c0_176, %c0_177] : memref<25x32x16xf32, #tpu.memory_space<vmem>>, vector<1x32x16xf32>
    %282 = vector.shape_cast %281 : vector<1x32x16xf32> to vector<32x16xf32>
    %cst_178 = arith.constant dense<0.000000e+00> : vector<32x256xf32>
    %283 = tpu.matmul %282, %280, %cst_178 {dimension_numbers = #tpu.dot_dimension_numbers<[1], [0], [0], [1], [0, 0, 1, 1], [], []>} : vector<32x16xf32>, vector<16x256xf32>, vector<32x256xf32> -> vector<32x256xf32>
    %284 = arith.addf %275, %283 : vector<32x256xf32>
    %c0_179 = arith.constant 0 : index
    %c111_180 = arith.constant 111 : index
    %285 = vector.load %arg11[%c0_179, %c111_180] : memref<32x512xf32, #tpu.memory_space<vmem>>, vector<16x256xf32>
    %cst_181 = arith.constant 0.000000e+00 : f32
    %286 = vector.shape_cast %26 : vector<1x256xi1> to vector<1x256xi1>
    %287 = vector.broadcast %286 : vector<1x256xi1> to vector<16x256xi1>
    %288 = vector.broadcast %cst_181 : f32 to vector<16x256xf32>
    %289 = arith.select %287, %285, %288 : vector<16x256xi1>, vector<16x256xf32>
    %c6_182 = arith.constant 6 : index
    %c0_183 = arith.constant 0 : index
    %c0_184 = arith.constant 0 : index
    %290 = vector.load %arg4[%c6_182, %c0_183, %c0_184] : memref<25x32x16xf32, #tpu.memory_space<vmem>>, vector<1x32x16xf32>
    %291 = vector.shape_cast %290 : vector<1x32x16xf32> to vector<32x16xf32>
    %cst_185 = arith.constant dense<0.000000e+00> : vector<32x256xf32>
    %292 = tpu.matmul %291, %289, %cst_185 {dimension_numbers = #tpu.dot_dimension_numbers<[1], [0], [0], [1], [0, 0, 1, 1], [], []>} : vector<32x16xf32>, vector<16x256xf32>, vector<32x256xf32> -> vector<32x256xf32>
    %293 = arith.addf %284, %292 : vector<32x256xf32>
    %c0_186 = arith.constant 0 : index
    %c112_187 = arith.constant 112 : index
    %294 = vector.load %arg11[%c0_186, %c112_187] : memref<32x512xf32, #tpu.memory_space<vmem>>, vector<16x256xf32>
    %c7_188 = arith.constant 7 : index
    %c0_189 = arith.constant 0 : index
    %c0_190 = arith.constant 0 : index
    %295 = vector.load %arg4[%c7_188, %c0_189, %c0_190] : memref<25x32x16xf32, #tpu.memory_space<vmem>>, vector<1x32x16xf32>
    %296 = vector.shape_cast %295 : vector<1x32x16xf32> to vector<32x16xf32>
    %cst_191 = arith.constant dense<0.000000e+00> : vector<32x256xf32>
    %297 = tpu.matmul %296, %294, %cst_191 {dimension_numbers = #tpu.dot_dimension_numbers<[1], [0], [0], [1], [0, 0, 1, 1], [], []>} : vector<32x16xf32>, vector<16x256xf32>, vector<32x256xf32> -> vector<32x256xf32>
    %298 = arith.addf %293, %297 : vector<32x256xf32>
    %c0_192 = arith.constant 0 : index
    %c113_193 = arith.constant 113 : index
    %299 = vector.load %arg11[%c0_192, %c113_193] : memref<32x512xf32, #tpu.memory_space<vmem>>, vector<16x256xf32>
    %cst_194 = arith.constant 0.000000e+00 : f32
    %300 = vector.shape_cast %42 : vector<1x256xi1> to vector<1x256xi1>
    %301 = vector.broadcast %300 : vector<1x256xi1> to vector<16x256xi1>
    %302 = vector.broadcast %cst_194 : f32 to vector<16x256xf32>
    %303 = arith.select %301, %299, %302 : vector<16x256xi1>, vector<16x256xf32>
    %c8_195 = arith.constant 8 : index
    %c0_196 = arith.constant 0 : index
    %c0_197 = arith.constant 0 : index
    %304 = vector.load %arg4[%c8_195, %c0_196, %c0_197] : memref<25x32x16xf32, #tpu.memory_space<vmem>>, vector<1x32x16xf32>
    %305 = vector.shape_cast %304 : vector<1x32x16xf32> to vector<32x16xf32>
    %cst_198 = arith.constant dense<0.000000e+00> : vector<32x256xf32>
    %306 = tpu.matmul %305, %303, %cst_198 {dimension_numbers = #tpu.dot_dimension_numbers<[1], [0], [0], [1], [0, 0, 1, 1], [], []>} : vector<32x16xf32>, vector<16x256xf32>, vector<32x256xf32> -> vector<32x256xf32>
    %307 = arith.addf %298, %306 : vector<32x256xf32>
    %c0_199 = arith.constant 0 : index
    %c114_200 = arith.constant 114 : index
    %308 = vector.load %arg11[%c0_199, %c114_200] : memref<32x512xf32, #tpu.memory_space<vmem>>, vector<16x256xf32>
    %cst_201 = arith.constant 0.000000e+00 : f32
    %309 = vector.shape_cast %53 : vector<1x256xi1> to vector<1x256xi1>
    %310 = vector.broadcast %309 : vector<1x256xi1> to vector<16x256xi1>
    %311 = vector.broadcast %cst_201 : f32 to vector<16x256xf32>
    %312 = arith.select %310, %308, %311 : vector<16x256xi1>, vector<16x256xf32>
    %c9_202 = arith.constant 9 : index
    %c0_203 = arith.constant 0 : index
    %c0_204 = arith.constant 0 : index
    %313 = vector.load %arg4[%c9_202, %c0_203, %c0_204] : memref<25x32x16xf32, #tpu.memory_space<vmem>>, vector<1x32x16xf32>
    %314 = vector.shape_cast %313 : vector<1x32x16xf32> to vector<32x16xf32>
    %cst_205 = arith.constant dense<0.000000e+00> : vector<32x256xf32>
    %315 = tpu.matmul %314, %312, %cst_205 {dimension_numbers = #tpu.dot_dimension_numbers<[1], [0], [0], [1], [0, 0, 1, 1], [], []>} : vector<32x16xf32>, vector<16x256xf32>, vector<32x256xf32> -> vector<32x256xf32>
    %316 = arith.addf %307, %315 : vector<32x256xf32>
    %c0_206 = arith.constant 0 : index
    %c126_207 = arith.constant 126 : index
    %317 = vector.load %arg11[%c0_206, %c126_207] : memref<32x512xf32, #tpu.memory_space<vmem>>, vector<16x256xf32>
    %cst_208 = arith.constant 0.000000e+00 : f32
    %318 = vector.shape_cast %15 : vector<1x256xi1> to vector<1x256xi1>
    %319 = vector.broadcast %318 : vector<1x256xi1> to vector<16x256xi1>
    %320 = vector.broadcast %cst_208 : f32 to vector<16x256xf32>
    %321 = arith.select %319, %317, %320 : vector<16x256xi1>, vector<16x256xf32>
    %c10_209 = arith.constant 10 : index
    %c0_210 = arith.constant 0 : index
    %c0_211 = arith.constant 0 : index
    %322 = vector.load %arg4[%c10_209, %c0_210, %c0_211] : memref<25x32x16xf32, #tpu.memory_space<vmem>>, vector<1x32x16xf32>
    %323 = vector.shape_cast %322 : vector<1x32x16xf32> to vector<32x16xf32>
    %cst_212 = arith.constant dense<0.000000e+00> : vector<32x256xf32>
    %324 = tpu.matmul %323, %321, %cst_212 {dimension_numbers = #tpu.dot_dimension_numbers<[1], [0], [0], [1], [0, 0, 1, 1], [], []>} : vector<32x16xf32>, vector<16x256xf32>, vector<32x256xf32> -> vector<32x256xf32>
    %325 = arith.addf %316, %324 : vector<32x256xf32>
    %c0_213 = arith.constant 0 : index
    %c127_214 = arith.constant 127 : index
    %326 = vector.load %arg11[%c0_213, %c127_214] : memref<32x512xf32, #tpu.memory_space<vmem>>, vector<16x256xf32>
    %cst_215 = arith.constant 0.000000e+00 : f32
    %327 = vector.shape_cast %26 : vector<1x256xi1> to vector<1x256xi1>
    %328 = vector.broadcast %327 : vector<1x256xi1> to vector<16x256xi1>
    %329 = vector.broadcast %cst_215 : f32 to vector<16x256xf32>
    %330 = arith.select %328, %326, %329 : vector<16x256xi1>, vector<16x256xf32>
    %c11_216 = arith.constant 11 : index
    %c0_217 = arith.constant 0 : index
    %c0_218 = arith.constant 0 : index
    %331 = vector.load %arg4[%c11_216, %c0_217, %c0_218] : memref<25x32x16xf32, #tpu.memory_space<vmem>>, vector<1x32x16xf32>
    %332 = vector.shape_cast %331 : vector<1x32x16xf32> to vector<32x16xf32>
    %cst_219 = arith.constant dense<0.000000e+00> : vector<32x256xf32>
    %333 = tpu.matmul %332, %330, %cst_219 {dimension_numbers = #tpu.dot_dimension_numbers<[1], [0], [0], [1], [0, 0, 1, 1], [], []>} : vector<32x16xf32>, vector<16x256xf32>, vector<32x256xf32> -> vector<32x256xf32>
    %334 = arith.addf %325, %333 : vector<32x256xf32>
    %c0_220 = arith.constant 0 : index
    %c128_221 = arith.constant 128 : index
    %335 = vector.load %arg11[%c0_220, %c128_221] : memref<32x512xf32, #tpu.memory_space<vmem>>, vector<16x256xf32>
    %c12_222 = arith.constant 12 : index
    %c0_223 = arith.constant 0 : index
    %c0_224 = arith.constant 0 : index
    %336 = vector.load %arg4[%c12_222, %c0_223, %c0_224] : memref<25x32x16xf32, #tpu.memory_space<vmem>>, vector<1x32x16xf32>
    %337 = vector.shape_cast %336 : vector<1x32x16xf32> to vector<32x16xf32>
    %cst_225 = arith.constant dense<0.000000e+00> : vector<32x256xf32>
    %338 = tpu.matmul %337, %335, %cst_225 {dimension_numbers = #tpu.dot_dimension_numbers<[1], [0], [0], [1], [0, 0, 1, 1], [], []>} : vector<32x16xf32>, vector<16x256xf32>, vector<32x256xf32> -> vector<32x256xf32>
    %339 = arith.addf %334, %338 : vector<32x256xf32>
    %c0_226 = arith.constant 0 : index
    %c129_227 = arith.constant 129 : index
    %340 = vector.load %arg11[%c0_226, %c129_227] : memref<32x512xf32, #tpu.memory_space<vmem>>, vector<16x256xf32>
    %cst_228 = arith.constant 0.000000e+00 : f32
    %341 = vector.shape_cast %42 : vector<1x256xi1> to vector<1x256xi1>
    %342 = vector.broadcast %341 : vector<1x256xi1> to vector<16x256xi1>
    %343 = vector.broadcast %cst_228 : f32 to vector<16x256xf32>
    %344 = arith.select %342, %340, %343 : vector<16x256xi1>, vector<16x256xf32>
    %c13_229 = arith.constant 13 : index
    %c0_230 = arith.constant 0 : index
    %c0_231 = arith.constant 0 : index
    %345 = vector.load %arg4[%c13_229, %c0_230, %c0_231] : memref<25x32x16xf32, #tpu.memory_space<vmem>>, vector<1x32x16xf32>
    %346 = vector.shape_cast %345 : vector<1x32x16xf32> to vector<32x16xf32>
    %cst_232 = arith.constant dense<0.000000e+00> : vector<32x256xf32>
    %347 = tpu.matmul %346, %344, %cst_232 {dimension_numbers = #tpu.dot_dimension_numbers<[1], [0], [0], [1], [0, 0, 1, 1], [], []>} : vector<32x16xf32>, vector<16x256xf32>, vector<32x256xf32> -> vector<32x256xf32>
    %348 = arith.addf %339, %347 : vector<32x256xf32>
    %c0_233 = arith.constant 0 : index
    %c130_234 = arith.constant 130 : index
    %349 = vector.load %arg11[%c0_233, %c130_234] : memref<32x512xf32, #tpu.memory_space<vmem>>, vector<16x256xf32>
    %cst_235 = arith.constant 0.000000e+00 : f32
    %350 = vector.shape_cast %53 : vector<1x256xi1> to vector<1x256xi1>
    %351 = vector.broadcast %350 : vector<1x256xi1> to vector<16x256xi1>
    %352 = vector.broadcast %cst_235 : f32 to vector<16x256xf32>
    %353 = arith.select %351, %349, %352 : vector<16x256xi1>, vector<16x256xf32>
    %c14_236 = arith.constant 14 : index
    %c0_237 = arith.constant 0 : index
    %c0_238 = arith.constant 0 : index
    %354 = vector.load %arg4[%c14_236, %c0_237, %c0_238] : memref<25x32x16xf32, #tpu.memory_space<vmem>>, vector<1x32x16xf32>
    %355 = vector.shape_cast %354 : vector<1x32x16xf32> to vector<32x16xf32>
    %cst_239 = arith.constant dense<0.000000e+00> : vector<32x256xf32>
    %356 = tpu.matmul %355, %353, %cst_239 {dimension_numbers = #tpu.dot_dimension_numbers<[1], [0], [0], [1], [0, 0, 1, 1], [], []>} : vector<32x16xf32>, vector<16x256xf32>, vector<32x256xf32> -> vector<32x256xf32>
    %357 = arith.addf %348, %356 : vector<32x256xf32>
    %c0_240 = arith.constant 0 : index
    %c142_241 = arith.constant 142 : index
    %358 = vector.load %arg11[%c0_240, %c142_241] : memref<32x512xf32, #tpu.memory_space<vmem>>, vector<16x256xf32>
    %cst_242 = arith.constant 0.000000e+00 : f32
    %359 = vector.shape_cast %15 : vector<1x256xi1> to vector<1x256xi1>
    %360 = vector.broadcast %359 : vector<1x256xi1> to vector<16x256xi1>
    %361 = vector.broadcast %cst_242 : f32 to vector<16x256xf32>
    %362 = arith.select %360, %358, %361 : vector<16x256xi1>, vector<16x256xf32>
    %c15_243 = arith.constant 15 : index
    %c0_244 = arith.constant 0 : index
    %c0_245 = arith.constant 0 : index
    %363 = vector.load %arg4[%c15_243, %c0_244, %c0_245] : memref<25x32x16xf32, #tpu.memory_space<vmem>>, vector<1x32x16xf32>
    %364 = vector.shape_cast %363 : vector<1x32x16xf32> to vector<32x16xf32>
    %cst_246 = arith.constant dense<0.000000e+00> : vector<32x256xf32>
    %365 = tpu.matmul %364, %362, %cst_246 {dimension_numbers = #tpu.dot_dimension_numbers<[1], [0], [0], [1], [0, 0, 1, 1], [], []>} : vector<32x16xf32>, vector<16x256xf32>, vector<32x256xf32> -> vector<32x256xf32>
    %366 = arith.addf %357, %365 : vector<32x256xf32>
    %c0_247 = arith.constant 0 : index
    %c143_248 = arith.constant 143 : index
    %367 = vector.load %arg11[%c0_247, %c143_248] : memref<32x512xf32, #tpu.memory_space<vmem>>, vector<16x256xf32>
    %cst_249 = arith.constant 0.000000e+00 : f32
    %368 = vector.shape_cast %26 : vector<1x256xi1> to vector<1x256xi1>
    %369 = vector.broadcast %368 : vector<1x256xi1> to vector<16x256xi1>
    %370 = vector.broadcast %cst_249 : f32 to vector<16x256xf32>
    %371 = arith.select %369, %367, %370 : vector<16x256xi1>, vector<16x256xf32>
    %c16_250 = arith.constant 16 : index
    %c0_251 = arith.constant 0 : index
    %c0_252 = arith.constant 0 : index
    %372 = vector.load %arg4[%c16_250, %c0_251, %c0_252] : memref<25x32x16xf32, #tpu.memory_space<vmem>>, vector<1x32x16xf32>
    %373 = vector.shape_cast %372 : vector<1x32x16xf32> to vector<32x16xf32>
    %cst_253 = arith.constant dense<0.000000e+00> : vector<32x256xf32>
    %374 = tpu.matmul %373, %371, %cst_253 {dimension_numbers = #tpu.dot_dimension_numbers<[1], [0], [0], [1], [0, 0, 1, 1], [], []>} : vector<32x16xf32>, vector<16x256xf32>, vector<32x256xf32> -> vector<32x256xf32>
    %375 = arith.addf %366, %374 : vector<32x256xf32>
    %c0_254 = arith.constant 0 : index
    %c144_255 = arith.constant 144 : index
    %376 = vector.load %arg11[%c0_254, %c144_255] : memref<32x512xf32, #tpu.memory_space<vmem>>, vector<16x256xf32>
    %c17_256 = arith.constant 17 : index
    %c0_257 = arith.constant 0 : index
    %c0_258 = arith.constant 0 : index
    %377 = vector.load %arg4[%c17_256, %c0_257, %c0_258] : memref<25x32x16xf32, #tpu.memory_space<vmem>>, vector<1x32x16xf32>
    %378 = vector.shape_cast %377 : vector<1x32x16xf32> to vector<32x16xf32>
    %cst_259 = arith.constant dense<0.000000e+00> : vector<32x256xf32>
    %379 = tpu.matmul %378, %376, %cst_259 {dimension_numbers = #tpu.dot_dimension_numbers<[1], [0], [0], [1], [0, 0, 1, 1], [], []>} : vector<32x16xf32>, vector<16x256xf32>, vector<32x256xf32> -> vector<32x256xf32>
    %380 = arith.addf %375, %379 : vector<32x256xf32>
    %c0_260 = arith.constant 0 : index
    %c145_261 = arith.constant 145 : index
    %381 = vector.load %arg11[%c0_260, %c145_261] : memref<32x512xf32, #tpu.memory_space<vmem>>, vector<16x256xf32>
    %cst_262 = arith.constant 0.000000e+00 : f32
    %382 = vector.shape_cast %42 : vector<1x256xi1> to vector<1x256xi1>
    %383 = vector.broadcast %382 : vector<1x256xi1> to vector<16x256xi1>
    %384 = vector.broadcast %cst_262 : f32 to vector<16x256xf32>
    %385 = arith.select %383, %381, %384 : vector<16x256xi1>, vector<16x256xf32>
    %c18_263 = arith.constant 18 : index
    %c0_264 = arith.constant 0 : index
    %c0_265 = arith.constant 0 : index
    %386 = vector.load %arg4[%c18_263, %c0_264, %c0_265] : memref<25x32x16xf32, #tpu.memory_space<vmem>>, vector<1x32x16xf32>
    %387 = vector.shape_cast %386 : vector<1x32x16xf32> to vector<32x16xf32>
    %cst_266 = arith.constant dense<0.000000e+00> : vector<32x256xf32>
    %388 = tpu.matmul %387, %385, %cst_266 {dimension_numbers = #tpu.dot_dimension_numbers<[1], [0], [0], [1], [0, 0, 1, 1], [], []>} : vector<32x16xf32>, vector<16x256xf32>, vector<32x256xf32> -> vector<32x256xf32>
    %389 = arith.addf %380, %388 : vector<32x256xf32>
    %c0_267 = arith.constant 0 : index
    %c146_268 = arith.constant 146 : index
    %390 = vector.load %arg11[%c0_267, %c146_268] : memref<32x512xf32, #tpu.memory_space<vmem>>, vector<16x256xf32>
    %cst_269 = arith.constant 0.000000e+00 : f32
    %391 = vector.shape_cast %53 : vector<1x256xi1> to vector<1x256xi1>
    %392 = vector.broadcast %391 : vector<1x256xi1> to vector<16x256xi1>
    %393 = vector.broadcast %cst_269 : f32 to vector<16x256xf32>
    %394 = arith.select %392, %390, %393 : vector<16x256xi1>, vector<16x256xf32>
    %c19_270 = arith.constant 19 : index
    %c0_271 = arith.constant 0 : index
    %c0_272 = arith.constant 0 : index
    %395 = vector.load %arg4[%c19_270, %c0_271, %c0_272] : memref<25x32x16xf32, #tpu.memory_space<vmem>>, vector<1x32x16xf32>
    %396 = vector.shape_cast %395 : vector<1x32x16xf32> to vector<32x16xf32>
    %cst_273 = arith.constant dense<0.000000e+00> : vector<32x256xf32>
    %397 = tpu.matmul %396, %394, %cst_273 {dimension_numbers = #tpu.dot_dimension_numbers<[1], [0], [0], [1], [0, 0, 1, 1], [], []>} : vector<32x16xf32>, vector<16x256xf32>, vector<32x256xf32> -> vector<32x256xf32>
    %398 = arith.addf %389, %397 : vector<32x256xf32>
    %c0_274 = arith.constant 0 : index
    %c158_275 = arith.constant 158 : index
    %399 = vector.load %arg11[%c0_274, %c158_275] : memref<32x512xf32, #tpu.memory_space<vmem>>, vector<16x256xf32>
    %cst_276 = arith.constant 0.000000e+00 : f32
    %400 = vector.shape_cast %15 : vector<1x256xi1> to vector<1x256xi1>
    %401 = vector.broadcast %400 : vector<1x256xi1> to vector<16x256xi1>
    %402 = vector.broadcast %cst_276 : f32 to vector<16x256xf32>
    %403 = arith.select %401, %399, %402 : vector<16x256xi1>, vector<16x256xf32>
    %c20_277 = arith.constant 20 : index
    %c0_278 = arith.constant 0 : index
    %c0_279 = arith.constant 0 : index
    %404 = vector.load %arg4[%c20_277, %c0_278, %c0_279] : memref<25x32x16xf32, #tpu.memory_space<vmem>>, vector<1x32x16xf32>
    %405 = vector.shape_cast %404 : vector<1x32x16xf32> to vector<32x16xf32>
    %cst_280 = arith.constant dense<0.000000e+00> : vector<32x256xf32>
    %406 = tpu.matmul %405, %403, %cst_280 {dimension_numbers = #tpu.dot_dimension_numbers<[1], [0], [0], [1], [0, 0, 1, 1], [], []>} : vector<32x16xf32>, vector<16x256xf32>, vector<32x256xf32> -> vector<32x256xf32>
    %407 = arith.addf %398, %406 : vector<32x256xf32>
    %c0_281 = arith.constant 0 : index
    %c159_282 = arith.constant 159 : index
    %408 = vector.load %arg11[%c0_281, %c159_282] : memref<32x512xf32, #tpu.memory_space<vmem>>, vector<16x256xf32>
    %cst_283 = arith.constant 0.000000e+00 : f32
    %409 = vector.shape_cast %26 : vector<1x256xi1> to vector<1x256xi1>
    %410 = vector.broadcast %409 : vector<1x256xi1> to vector<16x256xi1>
    %411 = vector.broadcast %cst_283 : f32 to vector<16x256xf32>
    %412 = arith.select %410, %408, %411 : vector<16x256xi1>, vector<16x256xf32>
    %c21_284 = arith.constant 21 : index
    %c0_285 = arith.constant 0 : index
    %c0_286 = arith.constant 0 : index
    %413 = vector.load %arg4[%c21_284, %c0_285, %c0_286] : memref<25x32x16xf32, #tpu.memory_space<vmem>>, vector<1x32x16xf32>
    %414 = vector.shape_cast %413 : vector<1x32x16xf32> to vector<32x16xf32>
    %cst_287 = arith.constant dense<0.000000e+00> : vector<32x256xf32>
    %415 = tpu.matmul %414, %412, %cst_287 {dimension_numbers = #tpu.dot_dimension_numbers<[1], [0], [0], [1], [0, 0, 1, 1], [], []>} : vector<32x16xf32>, vector<16x256xf32>, vector<32x256xf32> -> vector<32x256xf32>
    %416 = arith.addf %407, %415 : vector<32x256xf32>
    %c0_288 = arith.constant 0 : index
    %c160_289 = arith.constant 160 : index
    %417 = vector.load %arg11[%c0_288, %c160_289] : memref<32x512xf32, #tpu.memory_space<vmem>>, vector<16x256xf32>
    %c22_290 = arith.constant 22 : index
    %c0_291 = arith.constant 0 : index
    %c0_292 = arith.constant 0 : index
    %418 = vector.load %arg4[%c22_290, %c0_291, %c0_292] : memref<25x32x16xf32, #tpu.memory_space<vmem>>, vector<1x32x16xf32>
    %419 = vector.shape_cast %418 : vector<1x32x16xf32> to vector<32x16xf32>
    %cst_293 = arith.constant dense<0.000000e+00> : vector<32x256xf32>
    %420 = tpu.matmul %419, %417, %cst_293 {dimension_numbers = #tpu.dot_dimension_numbers<[1], [0], [0], [1], [0, 0, 1, 1], [], []>} : vector<32x16xf32>, vector<16x256xf32>, vector<32x256xf32> -> vector<32x256xf32>
    %421 = arith.addf %416, %420 : vector<32x256xf32>
    %c0_294 = arith.constant 0 : index
    %c161_295 = arith.constant 161 : index
    %422 = vector.load %arg11[%c0_294, %c161_295] : memref<32x512xf32, #tpu.memory_space<vmem>>, vector<16x256xf32>
    %cst_296 = arith.constant 0.000000e+00 : f32
    %423 = vector.shape_cast %42 : vector<1x256xi1> to vector<1x256xi1>
    %424 = vector.broadcast %423 : vector<1x256xi1> to vector<16x256xi1>
    %425 = vector.broadcast %cst_296 : f32 to vector<16x256xf32>
    %426 = arith.select %424, %422, %425 : vector<16x256xi1>, vector<16x256xf32>
    %c23_297 = arith.constant 23 : index
    %c0_298 = arith.constant 0 : index
    %c0_299 = arith.constant 0 : index
    %427 = vector.load %arg4[%c23_297, %c0_298, %c0_299] : memref<25x32x16xf32, #tpu.memory_space<vmem>>, vector<1x32x16xf32>
    %428 = vector.shape_cast %427 : vector<1x32x16xf32> to vector<32x16xf32>
    %cst_300 = arith.constant dense<0.000000e+00> : vector<32x256xf32>
    %429 = tpu.matmul %428, %426, %cst_300 {dimension_numbers = #tpu.dot_dimension_numbers<[1], [0], [0], [1], [0, 0, 1, 1], [], []>} : vector<32x16xf32>, vector<16x256xf32>, vector<32x256xf32> -> vector<32x256xf32>
    %430 = arith.addf %421, %429 : vector<32x256xf32>
    %c0_301 = arith.constant 0 : index
    %c162_302 = arith.constant 162 : index
    %431 = vector.load %arg11[%c0_301, %c162_302] : memref<32x512xf32, #tpu.memory_space<vmem>>, vector<16x256xf32>
    %cst_303 = arith.constant 0.000000e+00 : f32
    %432 = vector.shape_cast %53 : vector<1x256xi1> to vector<1x256xi1>
    %433 = vector.broadcast %432 : vector<1x256xi1> to vector<16x256xi1>
    %434 = vector.broadcast %cst_303 : f32 to vector<16x256xf32>
    %435 = arith.select %433, %431, %434 : vector<16x256xi1>, vector<16x256xf32>
    %c24_304 = arith.constant 24 : index
    %c0_305 = arith.constant 0 : index
    %c0_306 = arith.constant 0 : index
    %436 = vector.load %arg4[%c24_304, %c0_305, %c0_306] : memref<25x32x16xf32, #tpu.memory_space<vmem>>, vector<1x32x16xf32>
    %437 = vector.shape_cast %436 : vector<1x32x16xf32> to vector<32x16xf32>
    %cst_307 = arith.constant dense<0.000000e+00> : vector<32x256xf32>
    %438 = tpu.matmul %437, %435, %cst_307 {dimension_numbers = #tpu.dot_dimension_numbers<[1], [0], [0], [1], [0, 0, 1, 1], [], []>} : vector<32x16xf32>, vector<16x256xf32>, vector<32x256xf32> -> vector<32x256xf32>
    %439 = arith.addf %430, %438 : vector<32x256xf32>
    %cst_308 = arith.constant 0.000000e+00 : f32
    %440 = vector.broadcast %cst_308 : f32 to vector<32x256xf32>
    %441 = arith.cmpf oge, %439, %440 : vector<32x256xf32>
    %cst_309 = arith.constant 0.00999999977 : f32
    %442 = vector.broadcast %cst_309 : f32 to vector<32x256xf32>
    %443 = arith.mulf %442, %439 : vector<32x256xf32>
    %444 = arith.select %441, %439, %443 : vector<32x256xi1>, vector<32x256xf32>
    %c0_310 = arith.constant 0 : index
    %c128_311 = arith.constant 128 : index
    %445 = vector.load %arg11[%c0_310, %c128_311] : memref<32x512xf32, #tpu.memory_space<vmem>>, vector<32x256xf32>
    tpu.vector_store %arg11[%c0_310, %c128_311], %444 {strides = array<i32>} : memref<32x512xf32, #tpu.memory_space<vmem>>, vector<32x256xf32>,
    %c0_312 = arith.constant 0 : index
    %c0_313 = arith.constant 0 : index
    %446 = vector.load %arg7[%c0_312, %c0_313] : memref<16x1xf32, #tpu.memory_space<vmem>>, vector<16x1xf32>
    %447 = vector.shape_cast %446 : vector<16x1xf32> to vector<16x1xf32>
    %448 = vector.broadcast %447 : vector<16x1xf32> to vector<16x256xf32>
    %c0_314 = arith.constant 0 : index
    %c94_315 = arith.constant 94 : index
    %449 = vector.load %arg11[%c0_314, %c94_315] : memref<32x512xf32, #tpu.memory_space<vmem>>, vector<32x256xf32>
    %cst_316 = arith.constant 0.000000e+00 : f32
    %450 = vector.shape_cast %15 : vector<1x256xi1> to vector<1x256xi1>
    %451 = vector.broadcast %450 : vector<1x256xi1> to vector<32x256xi1>
    %452 = vector.broadcast %cst_316 : f32 to vector<32x256xf32>
    %453 = arith.select %451, %449, %452 : vector<32x256xi1>, vector<32x256xf32>
    %c0_317 = arith.constant 0 : index
    %c0_318 = arith.constant 0 : index
    %c0_319 = arith.constant 0 : index
    %454 = vector.load %arg6[%c0_317, %c0_318, %c0_319] : memref<25x16x32xf32, #tpu.memory_space<vmem>>, vector<1x16x32xf32>
    %455 = vector.shape_cast %454 : vector<1x16x32xf32> to vector<16x32xf32>
    %cst_320 = arith.constant dense<0.000000e+00> : vector<16x256xf32>
    %456 = tpu.matmul %455, %453, %cst_320 {dimension_numbers = #tpu.dot_dimension_numbers<[1], [0], [0], [1], [0, 0, 1, 1], [], []>} : vector<16x32xf32>, vector<32x256xf32>, vector<16x256xf32> -> vector<16x256xf32>
    %457 = arith.addf %448, %456 : vector<16x256xf32>
    %c0_321 = arith.constant 0 : index
    %c95_322 = arith.constant 95 : index
    %458 = vector.load %arg11[%c0_321, %c95_322] : memref<32x512xf32, #tpu.memory_space<vmem>>, vector<32x256xf32>
    %cst_323 = arith.constant 0.000000e+00 : f32
    %459 = vector.shape_cast %26 : vector<1x256xi1> to vector<1x256xi1>
    %460 = vector.broadcast %459 : vector<1x256xi1> to vector<32x256xi1>
    %461 = vector.broadcast %cst_323 : f32 to vector<32x256xf32>
    %462 = arith.select %460, %458, %461 : vector<32x256xi1>, vector<32x256xf32>
    %c1_324 = arith.constant 1 : index
    %c0_325 = arith.constant 0 : index
    %c0_326 = arith.constant 0 : index
    %463 = vector.load %arg6[%c1_324, %c0_325, %c0_326] : memref<25x16x32xf32, #tpu.memory_space<vmem>>, vector<1x16x32xf32>
    %464 = vector.shape_cast %463 : vector<1x16x32xf32> to vector<16x32xf32>
    %cst_327 = arith.constant dense<0.000000e+00> : vector<16x256xf32>
    %465 = tpu.matmul %464, %462, %cst_327 {dimension_numbers = #tpu.dot_dimension_numbers<[1], [0], [0], [1], [0, 0, 1, 1], [], []>} : vector<16x32xf32>, vector<32x256xf32>, vector<16x256xf32> -> vector<16x256xf32>
    %466 = arith.addf %457, %465 : vector<16x256xf32>
    %c0_328 = arith.constant 0 : index
    %c96_329 = arith.constant 96 : index
    %467 = vector.load %arg11[%c0_328, %c96_329] : memref<32x512xf32, #tpu.memory_space<vmem>>, vector<32x256xf32>
    %c2_330 = arith.constant 2 : index
    %c0_331 = arith.constant 0 : index
    %c0_332 = arith.constant 0 : index
    %468 = vector.load %arg6[%c2_330, %c0_331, %c0_332] : memref<25x16x32xf32, #tpu.memory_space<vmem>>, vector<1x16x32xf32>
    %469 = vector.shape_cast %468 : vector<1x16x32xf32> to vector<16x32xf32>
    %cst_333 = arith.constant dense<0.000000e+00> : vector<16x256xf32>
    %470 = tpu.matmul %469, %467, %cst_333 {dimension_numbers = #tpu.dot_dimension_numbers<[1], [0], [0], [1], [0, 0, 1, 1], [], []>} : vector<16x32xf32>, vector<32x256xf32>, vector<16x256xf32> -> vector<16x256xf32>
    %471 = arith.addf %466, %470 : vector<16x256xf32>
    %c0_334 = arith.constant 0 : index
    %c97_335 = arith.constant 97 : index
    %472 = vector.load %arg11[%c0_334, %c97_335] : memref<32x512xf32, #tpu.memory_space<vmem>>, vector<32x256xf32>
    %cst_336 = arith.constant 0.000000e+00 : f32
    %473 = vector.shape_cast %42 : vector<1x256xi1> to vector<1x256xi1>
    %474 = vector.broadcast %473 : vector<1x256xi1> to vector<32x256xi1>
    %475 = vector.broadcast %cst_336 : f32 to vector<32x256xf32>
    %476 = arith.select %474, %472, %475 : vector<32x256xi1>, vector<32x256xf32>
    %c3_337 = arith.constant 3 : index
    %c0_338 = arith.constant 0 : index
    %c0_339 = arith.constant 0 : index
    %477 = vector.load %arg6[%c3_337, %c0_338, %c0_339] : memref<25x16x32xf32, #tpu.memory_space<vmem>>, vector<1x16x32xf32>
    %478 = vector.shape_cast %477 : vector<1x16x32xf32> to vector<16x32xf32>
    %cst_340 = arith.constant dense<0.000000e+00> : vector<16x256xf32>
    %479 = tpu.matmul %478, %476, %cst_340 {dimension_numbers = #tpu.dot_dimension_numbers<[1], [0], [0], [1], [0, 0, 1, 1], [], []>} : vector<16x32xf32>, vector<32x256xf32>, vector<16x256xf32> -> vector<16x256xf32>
    %480 = arith.addf %471, %479 : vector<16x256xf32>
    %c0_341 = arith.constant 0 : index
    %c98_342 = arith.constant 98 : index
    %481 = vector.load %arg11[%c0_341, %c98_342] : memref<32x512xf32, #tpu.memory_space<vmem>>, vector<32x256xf32>
    %cst_343 = arith.constant 0.000000e+00 : f32
    %482 = vector.shape_cast %53 : vector<1x256xi1> to vector<1x256xi1>
    %483 = vector.broadcast %482 : vector<1x256xi1> to vector<32x256xi1>
    %484 = vector.broadcast %cst_343 : f32 to vector<32x256xf32>
    %485 = arith.select %483, %481, %484 : vector<32x256xi1>, vector<32x256xf32>
    %c4_344 = arith.constant 4 : index
    %c0_345 = arith.constant 0 : index
    %c0_346 = arith.constant 0 : index
    %486 = vector.load %arg6[%c4_344, %c0_345, %c0_346] : memref<25x16x32xf32, #tpu.memory_space<vmem>>, vector<1x16x32xf32>
    %487 = vector.shape_cast %486 : vector<1x16x32xf32> to vector<16x32xf32>
    %cst_347 = arith.constant dense<0.000000e+00> : vector<16x256xf32>
    %488 = tpu.matmul %487, %485, %cst_347 {dimension_numbers = #tpu.dot_dimension_numbers<[1], [0], [0], [1], [0, 0, 1, 1], [], []>} : vector<16x32xf32>, vector<32x256xf32>, vector<16x256xf32> -> vector<16x256xf32>
    %489 = arith.addf %480, %488 : vector<16x256xf32>
    %c0_348 = arith.constant 0 : index
    %c110_349 = arith.constant 110 : index
    %490 = vector.load %arg11[%c0_348, %c110_349] : memref<32x512xf32, #tpu.memory_space<vmem>>, vector<32x256xf32>
    %cst_350 = arith.constant 0.000000e+00 : f32
    %491 = vector.shape_cast %15 : vector<1x256xi1> to vector<1x256xi1>
    %492 = vector.broadcast %491 : vector<1x256xi1> to vector<32x256xi1>
    %493 = vector.broadcast %cst_350 : f32 to vector<32x256xf32>
    %494 = arith.select %492, %490, %493 : vector<32x256xi1>, vector<32x256xf32>
    %c5_351 = arith.constant 5 : index
    %c0_352 = arith.constant 0 : index
    %c0_353 = arith.constant 0 : index
    %495 = vector.load %arg6[%c5_351, %c0_352, %c0_353] : memref<25x16x32xf32, #tpu.memory_space<vmem>>, vector<1x16x32xf32>
    %496 = vector.shape_cast %495 : vector<1x16x32xf32> to vector<16x32xf32>
    %cst_354 = arith.constant dense<0.000000e+00> : vector<16x256xf32>
    %497 = tpu.matmul %496, %494, %cst_354 {dimension_numbers = #tpu.dot_dimension_numbers<[1], [0], [0], [1], [0, 0, 1, 1], [], []>} : vector<16x32xf32>, vector<32x256xf32>, vector<16x256xf32> -> vector<16x256xf32>
    %498 = arith.addf %489, %497 : vector<16x256xf32>
    %c0_355 = arith.constant 0 : index
    %c111_356 = arith.constant 111 : index
    %499 = vector.load %arg11[%c0_355, %c111_356] : memref<32x512xf32, #tpu.memory_space<vmem>>, vector<32x256xf32>
    %cst_357 = arith.constant 0.000000e+00 : f32
    %500 = vector.shape_cast %26 : vector<1x256xi1> to vector<1x256xi1>
    %501 = vector.broadcast %500 : vector<1x256xi1> to vector<32x256xi1>
    %502 = vector.broadcast %cst_357 : f32 to vector<32x256xf32>
    %503 = arith.select %501, %499, %502 : vector<32x256xi1>, vector<32x256xf32>
    %c6_358 = arith.constant 6 : index
    %c0_359 = arith.constant 0 : index
    %c0_360 = arith.constant 0 : index
    %504 = vector.load %arg6[%c6_358, %c0_359, %c0_360] : memref<25x16x32xf32, #tpu.memory_space<vmem>>, vector<1x16x32xf32>
    %505 = vector.shape_cast %504 : vector<1x16x32xf32> to vector<16x32xf32>
    %cst_361 = arith.constant dense<0.000000e+00> : vector<16x256xf32>
    %506 = tpu.matmul %505, %503, %cst_361 {dimension_numbers = #tpu.dot_dimension_numbers<[1], [0], [0], [1], [0, 0, 1, 1], [], []>} : vector<16x32xf32>, vector<32x256xf32>, vector<16x256xf32> -> vector<16x256xf32>
    %507 = arith.addf %498, %506 : vector<16x256xf32>
    %c0_362 = arith.constant 0 : index
    %c112_363 = arith.constant 112 : index
    %508 = vector.load %arg11[%c0_362, %c112_363] : memref<32x512xf32, #tpu.memory_space<vmem>>, vector<32x256xf32>
    %c7_364 = arith.constant 7 : index
    %c0_365 = arith.constant 0 : index
    %c0_366 = arith.constant 0 : index
    %509 = vector.load %arg6[%c7_364, %c0_365, %c0_366] : memref<25x16x32xf32, #tpu.memory_space<vmem>>, vector<1x16x32xf32>
    %510 = vector.shape_cast %509 : vector<1x16x32xf32> to vector<16x32xf32>
    %cst_367 = arith.constant dense<0.000000e+00> : vector<16x256xf32>
    %511 = tpu.matmul %510, %508, %cst_367 {dimension_numbers = #tpu.dot_dimension_numbers<[1], [0], [0], [1], [0, 0, 1, 1], [], []>} : vector<16x32xf32>, vector<32x256xf32>, vector<16x256xf32> -> vector<16x256xf32>
    %512 = arith.addf %507, %511 : vector<16x256xf32>
    %c0_368 = arith.constant 0 : index
    %c113_369 = arith.constant 113 : index
    %513 = vector.load %arg11[%c0_368, %c113_369] : memref<32x512xf32, #tpu.memory_space<vmem>>, vector<32x256xf32>
    %cst_370 = arith.constant 0.000000e+00 : f32
    %514 = vector.shape_cast %42 : vector<1x256xi1> to vector<1x256xi1>
    %515 = vector.broadcast %514 : vector<1x256xi1> to vector<32x256xi1>
    %516 = vector.broadcast %cst_370 : f32 to vector<32x256xf32>
    %517 = arith.select %515, %513, %516 : vector<32x256xi1>, vector<32x256xf32>
    %c8_371 = arith.constant 8 : index
    %c0_372 = arith.constant 0 : index
    %c0_373 = arith.constant 0 : index
    %518 = vector.load %arg6[%c8_371, %c0_372, %c0_373] : memref<25x16x32xf32, #tpu.memory_space<vmem>>, vector<1x16x32xf32>
    %519 = vector.shape_cast %518 : vector<1x16x32xf32> to vector<16x32xf32>
    %cst_374 = arith.constant dense<0.000000e+00> : vector<16x256xf32>
    %520 = tpu.matmul %519, %517, %cst_374 {dimension_numbers = #tpu.dot_dimension_numbers<[1], [0], [0], [1], [0, 0, 1, 1], [], []>} : vector<16x32xf32>, vector<32x256xf32>, vector<16x256xf32> -> vector<16x256xf32>
    %521 = arith.addf %512, %520 : vector<16x256xf32>
    %c0_375 = arith.constant 0 : index
    %c114_376 = arith.constant 114 : index
    %522 = vector.load %arg11[%c0_375, %c114_376] : memref<32x512xf32, #tpu.memory_space<vmem>>, vector<32x256xf32>
    %cst_377 = arith.constant 0.000000e+00 : f32
    %523 = vector.shape_cast %53 : vector<1x256xi1> to vector<1x256xi1>
    %524 = vector.broadcast %523 : vector<1x256xi1> to vector<32x256xi1>
    %525 = vector.broadcast %cst_377 : f32 to vector<32x256xf32>
    %526 = arith.select %524, %522, %525 : vector<32x256xi1>, vector<32x256xf32>
    %c9_378 = arith.constant 9 : index
    %c0_379 = arith.constant 0 : index
    %c0_380 = arith.constant 0 : index
    %527 = vector.load %arg6[%c9_378, %c0_379, %c0_380] : memref<25x16x32xf32, #tpu.memory_space<vmem>>, vector<1x16x32xf32>
    %528 = vector.shape_cast %527 : vector<1x16x32xf32> to vector<16x32xf32>
    %cst_381 = arith.constant dense<0.000000e+00> : vector<16x256xf32>
    %529 = tpu.matmul %528, %526, %cst_381 {dimension_numbers = #tpu.dot_dimension_numbers<[1], [0], [0], [1], [0, 0, 1, 1], [], []>} : vector<16x32xf32>, vector<32x256xf32>, vector<16x256xf32> -> vector<16x256xf32>
    %530 = arith.addf %521, %529 : vector<16x256xf32>
    %c0_382 = arith.constant 0 : index
    %c126_383 = arith.constant 126 : index
    %531 = vector.load %arg11[%c0_382, %c126_383] : memref<32x512xf32, #tpu.memory_space<vmem>>, vector<32x256xf32>
    %cst_384 = arith.constant 0.000000e+00 : f32
    %532 = vector.shape_cast %15 : vector<1x256xi1> to vector<1x256xi1>
    %533 = vector.broadcast %532 : vector<1x256xi1> to vector<32x256xi1>
    %534 = vector.broadcast %cst_384 : f32 to vector<32x256xf32>
    %535 = arith.select %533, %531, %534 : vector<32x256xi1>, vector<32x256xf32>
    %c10_385 = arith.constant 10 : index
    %c0_386 = arith.constant 0 : index
    %c0_387 = arith.constant 0 : index
    %536 = vector.load %arg6[%c10_385, %c0_386, %c0_387] : memref<25x16x32xf32, #tpu.memory_space<vmem>>, vector<1x16x32xf32>
    %537 = vector.shape_cast %536 : vector<1x16x32xf32> to vector<16x32xf32>
    %cst_388 = arith.constant dense<0.000000e+00> : vector<16x256xf32>
    %538 = tpu.matmul %537, %535, %cst_388 {dimension_numbers = #tpu.dot_dimension_numbers<[1], [0], [0], [1], [0, 0, 1, 1], [], []>} : vector<16x32xf32>, vector<32x256xf32>, vector<16x256xf32> -> vector<16x256xf32>
    %539 = arith.addf %530, %538 : vector<16x256xf32>
    %c0_389 = arith.constant 0 : index
    %c127_390 = arith.constant 127 : index
    %540 = vector.load %arg11[%c0_389, %c127_390] : memref<32x512xf32, #tpu.memory_space<vmem>>, vector<32x256xf32>
    %cst_391 = arith.constant 0.000000e+00 : f32
    %541 = vector.shape_cast %26 : vector<1x256xi1> to vector<1x256xi1>
    %542 = vector.broadcast %541 : vector<1x256xi1> to vector<32x256xi1>
    %543 = vector.broadcast %cst_391 : f32 to vector<32x256xf32>
    %544 = arith.select %542, %540, %543 : vector<32x256xi1>, vector<32x256xf32>
    %c11_392 = arith.constant 11 : index
    %c0_393 = arith.constant 0 : index
    %c0_394 = arith.constant 0 : index
    %545 = vector.load %arg6[%c11_392, %c0_393, %c0_394] : memref<25x16x32xf32, #tpu.memory_space<vmem>>, vector<1x16x32xf32>
    %546 = vector.shape_cast %545 : vector<1x16x32xf32> to vector<16x32xf32>
    %cst_395 = arith.constant dense<0.000000e+00> : vector<16x256xf32>
    %547 = tpu.matmul %546, %544, %cst_395 {dimension_numbers = #tpu.dot_dimension_numbers<[1], [0], [0], [1], [0, 0, 1, 1], [], []>} : vector<16x32xf32>, vector<32x256xf32>, vector<16x256xf32> -> vector<16x256xf32>
    %548 = arith.addf %539, %547 : vector<16x256xf32>
    %c0_396 = arith.constant 0 : index
    %c128_397 = arith.constant 128 : index
    %549 = vector.load %arg11[%c0_396, %c128_397] : memref<32x512xf32, #tpu.memory_space<vmem>>, vector<32x256xf32>
    %c12_398 = arith.constant 12 : index
    %c0_399 = arith.constant 0 : index
    %c0_400 = arith.constant 0 : index
    %550 = vector.load %arg6[%c12_398, %c0_399, %c0_400] : memref<25x16x32xf32, #tpu.memory_space<vmem>>, vector<1x16x32xf32>
    %551 = vector.shape_cast %550 : vector<1x16x32xf32> to vector<16x32xf32>
    %cst_401 = arith.constant dense<0.000000e+00> : vector<16x256xf32>
    %552 = tpu.matmul %551, %549, %cst_401 {dimension_numbers = #tpu.dot_dimension_numbers<[1], [0], [0], [1], [0, 0, 1, 1], [], []>} : vector<16x32xf32>, vector<32x256xf32>, vector<16x256xf32> -> vector<16x256xf32>
    %553 = arith.addf %548, %552 : vector<16x256xf32>
    %c0_402 = arith.constant 0 : index
    %c129_403 = arith.constant 129 : index
    %554 = vector.load %arg11[%c0_402, %c129_403] : memref<32x512xf32, #tpu.memory_space<vmem>>, vector<32x256xf32>
    %cst_404 = arith.constant 0.000000e+00 : f32
    %555 = vector.shape_cast %42 : vector<1x256xi1> to vector<1x256xi1>
    %556 = vector.broadcast %555 : vector<1x256xi1> to vector<32x256xi1>
    %557 = vector.broadcast %cst_404 : f32 to vector<32x256xf32>
    %558 = arith.select %556, %554, %557 : vector<32x256xi1>, vector<32x256xf32>
    %c13_405 = arith.constant 13 : index
    %c0_406 = arith.constant 0 : index
    %c0_407 = arith.constant 0 : index
    %559 = vector.load %arg6[%c13_405, %c0_406, %c0_407] : memref<25x16x32xf32, #tpu.memory_space<vmem>>, vector<1x16x32xf32>
    %560 = vector.shape_cast %559 : vector<1x16x32xf32> to vector<16x32xf32>
    %cst_408 = arith.constant dense<0.000000e+00> : vector<16x256xf32>
    %561 = tpu.matmul %560, %558, %cst_408 {dimension_numbers = #tpu.dot_dimension_numbers<[1], [0], [0], [1], [0, 0, 1, 1], [], []>} : vector<16x32xf32>, vector<32x256xf32>, vector<16x256xf32> -> vector<16x256xf32>
    %562 = arith.addf %553, %561 : vector<16x256xf32>
    %c0_409 = arith.constant 0 : index
    %c130_410 = arith.constant 130 : index
    %563 = vector.load %arg11[%c0_409, %c130_410] : memref<32x512xf32, #tpu.memory_space<vmem>>, vector<32x256xf32>
    %cst_411 = arith.constant 0.000000e+00 : f32
    %564 = vector.shape_cast %53 : vector<1x256xi1> to vector<1x256xi1>
    %565 = vector.broadcast %564 : vector<1x256xi1> to vector<32x256xi1>
    %566 = vector.broadcast %cst_411 : f32 to vector<32x256xf32>
    %567 = arith.select %565, %563, %566 : vector<32x256xi1>, vector<32x256xf32>
    %c14_412 = arith.constant 14 : index
    %c0_413 = arith.constant 0 : index
    %c0_414 = arith.constant 0 : index
    %568 = vector.load %arg6[%c14_412, %c0_413, %c0_414] : memref<25x16x32xf32, #tpu.memory_space<vmem>>, vector<1x16x32xf32>
    %569 = vector.shape_cast %568 : vector<1x16x32xf32> to vector<16x32xf32>
    %cst_415 = arith.constant dense<0.000000e+00> : vector<16x256xf32>
    %570 = tpu.matmul %569, %567, %cst_415 {dimension_numbers = #tpu.dot_dimension_numbers<[1], [0], [0], [1], [0, 0, 1, 1], [], []>} : vector<16x32xf32>, vector<32x256xf32>, vector<16x256xf32> -> vector<16x256xf32>
    %571 = arith.addf %562, %570 : vector<16x256xf32>
    %c0_416 = arith.constant 0 : index
    %c142_417 = arith.constant 142 : index
    %572 = vector.load %arg11[%c0_416, %c142_417] : memref<32x512xf32, #tpu.memory_space<vmem>>, vector<32x256xf32>
    %cst_418 = arith.constant 0.000000e+00 : f32
    %573 = vector.shape_cast %15 : vector<1x256xi1> to vector<1x256xi1>
    %574 = vector.broadcast %573 : vector<1x256xi1> to vector<32x256xi1>
    %575 = vector.broadcast %cst_418 : f32 to vector<32x256xf32>
    %576 = arith.select %574, %572, %575 : vector<32x256xi1>, vector<32x256xf32>
    %c15_419 = arith.constant 15 : index
    %c0_420 = arith.constant 0 : index
    %c0_421 = arith.constant 0 : index
    %577 = vector.load %arg6[%c15_419, %c0_420, %c0_421] : memref<25x16x32xf32, #tpu.memory_space<vmem>>, vector<1x16x32xf32>
    %578 = vector.shape_cast %577 : vector<1x16x32xf32> to vector<16x32xf32>
    %cst_422 = arith.constant dense<0.000000e+00> : vector<16x256xf32>
    %579 = tpu.matmul %578, %576, %cst_422 {dimension_numbers = #tpu.dot_dimension_numbers<[1], [0], [0], [1], [0, 0, 1, 1], [], []>} : vector<16x32xf32>, vector<32x256xf32>, vector<16x256xf32> -> vector<16x256xf32>
    %580 = arith.addf %571, %579 : vector<16x256xf32>
    %c0_423 = arith.constant 0 : index
    %c143_424 = arith.constant 143 : index
    %581 = vector.load %arg11[%c0_423, %c143_424] : memref<32x512xf32, #tpu.memory_space<vmem>>, vector<32x256xf32>
    %cst_425 = arith.constant 0.000000e+00 : f32
    %582 = vector.shape_cast %26 : vector<1x256xi1> to vector<1x256xi1>
    %583 = vector.broadcast %582 : vector<1x256xi1> to vector<32x256xi1>
    %584 = vector.broadcast %cst_425 : f32 to vector<32x256xf32>
    %585 = arith.select %583, %581, %584 : vector<32x256xi1>, vector<32x256xf32>
    %c16_426 = arith.constant 16 : index
    %c0_427 = arith.constant 0 : index
    %c0_428 = arith.constant 0 : index
    %586 = vector.load %arg6[%c16_426, %c0_427, %c0_428] : memref<25x16x32xf32, #tpu.memory_space<vmem>>, vector<1x16x32xf32>
    %587 = vector.shape_cast %586 : vector<1x16x32xf32> to vector<16x32xf32>
    %cst_429 = arith.constant dense<0.000000e+00> : vector<16x256xf32>
    %588 = tpu.matmul %587, %585, %cst_429 {dimension_numbers = #tpu.dot_dimension_numbers<[1], [0], [0], [1], [0, 0, 1, 1], [], []>} : vector<16x32xf32>, vector<32x256xf32>, vector<16x256xf32> -> vector<16x256xf32>
    %589 = arith.addf %580, %588 : vector<16x256xf32>
    %c0_430 = arith.constant 0 : index
    %c144_431 = arith.constant 144 : index
    %590 = vector.load %arg11[%c0_430, %c144_431] : memref<32x512xf32, #tpu.memory_space<vmem>>, vector<32x256xf32>
    %c17_432 = arith.constant 17 : index
    %c0_433 = arith.constant 0 : index
    %c0_434 = arith.constant 0 : index
    %591 = vector.load %arg6[%c17_432, %c0_433, %c0_434] : memref<25x16x32xf32, #tpu.memory_space<vmem>>, vector<1x16x32xf32>
    %592 = vector.shape_cast %591 : vector<1x16x32xf32> to vector<16x32xf32>
    %cst_435 = arith.constant dense<0.000000e+00> : vector<16x256xf32>
    %593 = tpu.matmul %592, %590, %cst_435 {dimension_numbers = #tpu.dot_dimension_numbers<[1], [0], [0], [1], [0, 0, 1, 1], [], []>} : vector<16x32xf32>, vector<32x256xf32>, vector<16x256xf32> -> vector<16x256xf32>
    %594 = arith.addf %589, %593 : vector<16x256xf32>
    %c0_436 = arith.constant 0 : index
    %c145_437 = arith.constant 145 : index
    %595 = vector.load %arg11[%c0_436, %c145_437] : memref<32x512xf32, #tpu.memory_space<vmem>>, vector<32x256xf32>
    %cst_438 = arith.constant 0.000000e+00 : f32
    %596 = vector.shape_cast %42 : vector<1x256xi1> to vector<1x256xi1>
    %597 = vector.broadcast %596 : vector<1x256xi1> to vector<32x256xi1>
    %598 = vector.broadcast %cst_438 : f32 to vector<32x256xf32>
    %599 = arith.select %597, %595, %598 : vector<32x256xi1>, vector<32x256xf32>
    %c18_439 = arith.constant 18 : index
    %c0_440 = arith.constant 0 : index
    %c0_441 = arith.constant 0 : index
    %600 = vector.load %arg6[%c18_439, %c0_440, %c0_441] : memref<25x16x32xf32, #tpu.memory_space<vmem>>, vector<1x16x32xf32>
    %601 = vector.shape_cast %600 : vector<1x16x32xf32> to vector<16x32xf32>
    %cst_442 = arith.constant dense<0.000000e+00> : vector<16x256xf32>
    %602 = tpu.matmul %601, %599, %cst_442 {dimension_numbers = #tpu.dot_dimension_numbers<[1], [0], [0], [1], [0, 0, 1, 1], [], []>} : vector<16x32xf32>, vector<32x256xf32>, vector<16x256xf32> -> vector<16x256xf32>
    %603 = arith.addf %594, %602 : vector<16x256xf32>
    %c0_443 = arith.constant 0 : index
    %c146_444 = arith.constant 146 : index
    %604 = vector.load %arg11[%c0_443, %c146_444] : memref<32x512xf32, #tpu.memory_space<vmem>>, vector<32x256xf32>
    %cst_445 = arith.constant 0.000000e+00 : f32
    %605 = vector.shape_cast %53 : vector<1x256xi1> to vector<1x256xi1>
    %606 = vector.broadcast %605 : vector<1x256xi1> to vector<32x256xi1>
    %607 = vector.broadcast %cst_445 : f32 to vector<32x256xf32>
    %608 = arith.select %606, %604, %607 : vector<32x256xi1>, vector<32x256xf32>
    %c19_446 = arith.constant 19 : index
    %c0_447 = arith.constant 0 : index
    %c0_448 = arith.constant 0 : index
    %609 = vector.load %arg6[%c19_446, %c0_447, %c0_448] : memref<25x16x32xf32, #tpu.memory_space<vmem>>, vector<1x16x32xf32>
    %610 = vector.shape_cast %609 : vector<1x16x32xf32> to vector<16x32xf32>
    %cst_449 = arith.constant dense<0.000000e+00> : vector<16x256xf32>
    %611 = tpu.matmul %610, %608, %cst_449 {dimension_numbers = #tpu.dot_dimension_numbers<[1], [0], [0], [1], [0, 0, 1, 1], [], []>} : vector<16x32xf32>, vector<32x256xf32>, vector<16x256xf32> -> vector<16x256xf32>
    %612 = arith.addf %603, %611 : vector<16x256xf32>
    %c0_450 = arith.constant 0 : index
    %c158_451 = arith.constant 158 : index
    %613 = vector.load %arg11[%c0_450, %c158_451] : memref<32x512xf32, #tpu.memory_space<vmem>>, vector<32x256xf32>
    %cst_452 = arith.constant 0.000000e+00 : f32
    %614 = vector.shape_cast %15 : vector<1x256xi1> to vector<1x256xi1>
    %615 = vector.broadcast %614 : vector<1x256xi1> to vector<32x256xi1>
    %616 = vector.broadcast %cst_452 : f32 to vector<32x256xf32>
    %617 = arith.select %615, %613, %616 : vector<32x256xi1>, vector<32x256xf32>
    %c20_453 = arith.constant 20 : index
    %c0_454 = arith.constant 0 : index
    %c0_455 = arith.constant 0 : index
    %618 = vector.load %arg6[%c20_453, %c0_454, %c0_455] : memref<25x16x32xf32, #tpu.memory_space<vmem>>, vector<1x16x32xf32>
    %619 = vector.shape_cast %618 : vector<1x16x32xf32> to vector<16x32xf32>
    %cst_456 = arith.constant dense<0.000000e+00> : vector<16x256xf32>
    %620 = tpu.matmul %619, %617, %cst_456 {dimension_numbers = #tpu.dot_dimension_numbers<[1], [0], [0], [1], [0, 0, 1, 1], [], []>} : vector<16x32xf32>, vector<32x256xf32>, vector<16x256xf32> -> vector<16x256xf32>
    %621 = arith.addf %612, %620 : vector<16x256xf32>
    %c0_457 = arith.constant 0 : index
    %c159_458 = arith.constant 159 : index
    %622 = vector.load %arg11[%c0_457, %c159_458] : memref<32x512xf32, #tpu.memory_space<vmem>>, vector<32x256xf32>
    %cst_459 = arith.constant 0.000000e+00 : f32
    %623 = vector.shape_cast %26 : vector<1x256xi1> to vector<1x256xi1>
    %624 = vector.broadcast %623 : vector<1x256xi1> to vector<32x256xi1>
    %625 = vector.broadcast %cst_459 : f32 to vector<32x256xf32>
    %626 = arith.select %624, %622, %625 : vector<32x256xi1>, vector<32x256xf32>
    %c21_460 = arith.constant 21 : index
    %c0_461 = arith.constant 0 : index
    %c0_462 = arith.constant 0 : index
    %627 = vector.load %arg6[%c21_460, %c0_461, %c0_462] : memref<25x16x32xf32, #tpu.memory_space<vmem>>, vector<1x16x32xf32>
    %628 = vector.shape_cast %627 : vector<1x16x32xf32> to vector<16x32xf32>
    %cst_463 = arith.constant dense<0.000000e+00> : vector<16x256xf32>
    %629 = tpu.matmul %628, %626, %cst_463 {dimension_numbers = #tpu.dot_dimension_numbers<[1], [0], [0], [1], [0, 0, 1, 1], [], []>} : vector<16x32xf32>, vector<32x256xf32>, vector<16x256xf32> -> vector<16x256xf32>
    %630 = arith.addf %621, %629 : vector<16x256xf32>
    %c0_464 = arith.constant 0 : index
    %c160_465 = arith.constant 160 : index
    %631 = vector.load %arg11[%c0_464, %c160_465] : memref<32x512xf32, #tpu.memory_space<vmem>>, vector<32x256xf32>
    %c22_466 = arith.constant 22 : index
    %c0_467 = arith.constant 0 : index
    %c0_468 = arith.constant 0 : index
    %632 = vector.load %arg6[%c22_466, %c0_467, %c0_468] : memref<25x16x32xf32, #tpu.memory_space<vmem>>, vector<1x16x32xf32>
    %633 = vector.shape_cast %632 : vector<1x16x32xf32> to vector<16x32xf32>
    %cst_469 = arith.constant dense<0.000000e+00> : vector<16x256xf32>
    %634 = tpu.matmul %633, %631, %cst_469 {dimension_numbers = #tpu.dot_dimension_numbers<[1], [0], [0], [1], [0, 0, 1, 1], [], []>} : vector<16x32xf32>, vector<32x256xf32>, vector<16x256xf32> -> vector<16x256xf32>
    %635 = arith.addf %630, %634 : vector<16x256xf32>
    %c0_470 = arith.constant 0 : index
    %c161_471 = arith.constant 161 : index
    %636 = vector.load %arg11[%c0_470, %c161_471] : memref<32x512xf32, #tpu.memory_space<vmem>>, vector<32x256xf32>
    %cst_472 = arith.constant 0.000000e+00 : f32
    %637 = vector.shape_cast %42 : vector<1x256xi1> to vector<1x256xi1>
    %638 = vector.broadcast %637 : vector<1x256xi1> to vector<32x256xi1>
    %639 = vector.broadcast %cst_472 : f32 to vector<32x256xf32>
    %640 = arith.select %638, %636, %639 : vector<32x256xi1>, vector<32x256xf32>
    %c23_473 = arith.constant 23 : index
    %c0_474 = arith.constant 0 : index
    %c0_475 = arith.constant 0 : index
    %641 = vector.load %arg6[%c23_473, %c0_474, %c0_475] : memref<25x16x32xf32, #tpu.memory_space<vmem>>, vector<1x16x32xf32>
    %642 = vector.shape_cast %641 : vector<1x16x32xf32> to vector<16x32xf32>
    %cst_476 = arith.constant dense<0.000000e+00> : vector<16x256xf32>
    %643 = tpu.matmul %642, %640, %cst_476 {dimension_numbers = #tpu.dot_dimension_numbers<[1], [0], [0], [1], [0, 0, 1, 1], [], []>} : vector<16x32xf32>, vector<32x256xf32>, vector<16x256xf32> -> vector<16x256xf32>
    %644 = arith.addf %635, %643 : vector<16x256xf32>
    %c0_477 = arith.constant 0 : index
    %c162_478 = arith.constant 162 : index
    %645 = vector.load %arg11[%c0_477, %c162_478] : memref<32x512xf32, #tpu.memory_space<vmem>>, vector<32x256xf32>
    %cst_479 = arith.constant 0.000000e+00 : f32
    %646 = vector.shape_cast %53 : vector<1x256xi1> to vector<1x256xi1>
    %647 = vector.broadcast %646 : vector<1x256xi1> to vector<32x256xi1>
    %648 = vector.broadcast %cst_479 : f32 to vector<32x256xf32>
    %649 = arith.select %647, %645, %648 : vector<32x256xi1>, vector<32x256xf32>
    %c24_480 = arith.constant 24 : index
    %c0_481 = arith.constant 0 : index
    %c0_482 = arith.constant 0 : index
    %650 = vector.load %arg6[%c24_480, %c0_481, %c0_482] : memref<25x16x32xf32, #tpu.memory_space<vmem>>, vector<1x16x32xf32>
    %651 = vector.shape_cast %650 : vector<1x16x32xf32> to vector<16x32xf32>
    %cst_483 = arith.constant dense<0.000000e+00> : vector<16x256xf32>
    %652 = tpu.matmul %651, %649, %cst_483 {dimension_numbers = #tpu.dot_dimension_numbers<[1], [0], [0], [1], [0, 0, 1, 1], [], []>} : vector<16x32xf32>, vector<32x256xf32>, vector<16x256xf32> -> vector<16x256xf32>
    %653 = arith.addf %644, %652 : vector<16x256xf32>
    %cst_484 = arith.constant 0.000000e+00 : f32
    %654 = vector.broadcast %cst_484 : f32 to vector<16x256xf32>
    %655 = arith.cmpf oge, %653, %654 : vector<16x256xf32>
    %cst_485 = arith.constant 0.00999999977 : f32
    %656 = vector.broadcast %cst_485 : f32 to vector<16x256xf32>
    %657 = arith.mulf %656, %653 : vector<16x256xf32>
    %658 = arith.select %655, %653, %657 : vector<16x256xi1>, vector<16x256xf32>
    %c0_486 = arith.constant 0 : index
    %c128_487 = arith.constant 128 : index
    %659 = vector.load %arg11[%c0_486, %c128_487] : memref<32x512xf32, #tpu.memory_space<vmem>>, vector<16x256xf32>
    tpu.vector_store %arg11[%c0_486, %c128_487], %658 {strides = array<i32>} : memref<32x512xf32, #tpu.memory_space<vmem>>, vector<16x256xf32>,
    %c0_488 = arith.constant 0 : index
    %c0_489 = arith.constant 0 : index
    %660 = vector.load %arg9[%c0_488, %c0_489] : memref<8x1xf32, #tpu.memory_space<vmem>>, vector<8x1xf32>
    %661 = vector.shape_cast %660 : vector<8x1xf32> to vector<8x1xf32>
    %662 = vector.broadcast %661 : vector<8x1xf32> to vector<8x256xf32>
    %c0_490 = arith.constant 0 : index
    %c111_491 = arith.constant 111 : index
    %663 = vector.load %arg11[%c0_490, %c111_491] : memref<32x512xf32, #tpu.memory_space<vmem>>, vector<16x256xf32>
    %cst_492 = arith.constant 0.000000e+00 : f32
    %664 = vector.shape_cast %26 : vector<1x256xi1> to vector<1x256xi1>
    %665 = vector.broadcast %664 : vector<1x256xi1> to vector<16x256xi1>
    %666 = vector.broadcast %cst_492 : f32 to vector<16x256xf32>
    %667 = arith.select %665, %663, %666 : vector<16x256xi1>, vector<16x256xf32>
    %c0_493 = arith.constant 0 : index
    %c0_494 = arith.constant 0 : index
    %c0_495 = arith.constant 0 : index
    %668 = vector.load %arg8[%c0_493, %c0_494, %c0_495] : memref<9x8x16xf32, #tpu.memory_space<vmem>>, vector<1x8x16xf32>
    %669 = vector.shape_cast %668 : vector<1x8x16xf32> to vector<8x16xf32>
    %cst_496 = arith.constant dense<0.000000e+00> : vector<8x256xf32>
    %670 = tpu.matmul %669, %667, %cst_496 {dimension_numbers = #tpu.dot_dimension_numbers<[1], [0], [0], [1], [0, 0, 1, 1], [], []>} : vector<8x16xf32>, vector<16x256xf32>, vector<8x256xf32> -> vector<8x256xf32>
    %671 = arith.addf %662, %670 : vector<8x256xf32>
    %c0_497 = arith.constant 0 : index
    %c112_498 = arith.constant 112 : index
    %672 = vector.load %arg11[%c0_497, %c112_498] : memref<32x512xf32, #tpu.memory_space<vmem>>, vector<16x256xf32>
    %c1_499 = arith.constant 1 : index
    %c0_500 = arith.constant 0 : index
    %c0_501 = arith.constant 0 : index
    %673 = vector.load %arg8[%c1_499, %c0_500, %c0_501] : memref<9x8x16xf32, #tpu.memory_space<vmem>>, vector<1x8x16xf32>
    %674 = vector.shape_cast %673 : vector<1x8x16xf32> to vector<8x16xf32>
    %cst_502 = arith.constant dense<0.000000e+00> : vector<8x256xf32>
    %675 = tpu.matmul %674, %672, %cst_502 {dimension_numbers = #tpu.dot_dimension_numbers<[1], [0], [0], [1], [0, 0, 1, 1], [], []>} : vector<8x16xf32>, vector<16x256xf32>, vector<8x256xf32> -> vector<8x256xf32>
    %676 = arith.addf %671, %675 : vector<8x256xf32>
    %c0_503 = arith.constant 0 : index
    %c113_504 = arith.constant 113 : index
    %677 = vector.load %arg11[%c0_503, %c113_504] : memref<32x512xf32, #tpu.memory_space<vmem>>, vector<16x256xf32>
    %cst_505 = arith.constant 0.000000e+00 : f32
    %678 = vector.shape_cast %42 : vector<1x256xi1> to vector<1x256xi1>
    %679 = vector.broadcast %678 : vector<1x256xi1> to vector<16x256xi1>
    %680 = vector.broadcast %cst_505 : f32 to vector<16x256xf32>
    %681 = arith.select %679, %677, %680 : vector<16x256xi1>, vector<16x256xf32>
    %c2_506 = arith.constant 2 : index
    %c0_507 = arith.constant 0 : index
    %c0_508 = arith.constant 0 : index
    %682 = vector.load %arg8[%c2_506, %c0_507, %c0_508] : memref<9x8x16xf32, #tpu.memory_space<vmem>>, vector<1x8x16xf32>
    %683 = vector.shape_cast %682 : vector<1x8x16xf32> to vector<8x16xf32>
    %cst_509 = arith.constant dense<0.000000e+00> : vector<8x256xf32>
    %684 = tpu.matmul %683, %681, %cst_509 {dimension_numbers = #tpu.dot_dimension_numbers<[1], [0], [0], [1], [0, 0, 1, 1], [], []>} : vector<8x16xf32>, vector<16x256xf32>, vector<8x256xf32> -> vector<8x256xf32>
    %685 = arith.addf %676, %684 : vector<8x256xf32>
    %c0_510 = arith.constant 0 : index
    %c127_511 = arith.constant 127 : index
    %686 = vector.load %arg11[%c0_510, %c127_511] : memref<32x512xf32, #tpu.memory_space<vmem>>, vector<16x256xf32>
    %cst_512 = arith.constant 0.000000e+00 : f32
    %687 = vector.shape_cast %26 : vector<1x256xi1> to vector<1x256xi1>
    %688 = vector.broadcast %687 : vector<1x256xi1> to vector<16x256xi1>
    %689 = vector.broadcast %cst_512 : f32 to vector<16x256xf32>
    %690 = arith.select %688, %686, %689 : vector<16x256xi1>, vector<16x256xf32>
    %c3_513 = arith.constant 3 : index
    %c0_514 = arith.constant 0 : index
    %c0_515 = arith.constant 0 : index
    %691 = vector.load %arg8[%c3_513, %c0_514, %c0_515] : memref<9x8x16xf32, #tpu.memory_space<vmem>>, vector<1x8x16xf32>
    %692 = vector.shape_cast %691 : vector<1x8x16xf32> to vector<8x16xf32>
    %cst_516 = arith.constant dense<0.000000e+00> : vector<8x256xf32>
    %693 = tpu.matmul %692, %690, %cst_516 {dimension_numbers = #tpu.dot_dimension_numbers<[1], [0], [0], [1], [0, 0, 1, 1], [], []>} : vector<8x16xf32>, vector<16x256xf32>, vector<8x256xf32> -> vector<8x256xf32>
    %694 = arith.addf %685, %693 : vector<8x256xf32>
    %c0_517 = arith.constant 0 : index
    %c128_518 = arith.constant 128 : index
    %695 = vector.load %arg11[%c0_517, %c128_518] : memref<32x512xf32, #tpu.memory_space<vmem>>, vector<16x256xf32>
    %c4_519 = arith.constant 4 : index
    %c0_520 = arith.constant 0 : index
    %c0_521 = arith.constant 0 : index
    %696 = vector.load %arg8[%c4_519, %c0_520, %c0_521] : memref<9x8x16xf32, #tpu.memory_space<vmem>>, vector<1x8x16xf32>
    %697 = vector.shape_cast %696 : vector<1x8x16xf32> to vector<8x16xf32>
    %cst_522 = arith.constant dense<0.000000e+00> : vector<8x256xf32>
    %698 = tpu.matmul %697, %695, %cst_522 {dimension_numbers = #tpu.dot_dimension_numbers<[1], [0], [0], [1], [0, 0, 1, 1], [], []>} : vector<8x16xf32>, vector<16x256xf32>, vector<8x256xf32> -> vector<8x256xf32>
    %699 = arith.addf %694, %698 : vector<8x256xf32>
    %c0_523 = arith.constant 0 : index
    %c129_524 = arith.constant 129 : index
    %700 = vector.load %arg11[%c0_523, %c129_524] : memref<32x512xf32, #tpu.memory_space<vmem>>, vector<16x256xf32>
    %cst_525 = arith.constant 0.000000e+00 : f32
    %701 = vector.shape_cast %42 : vector<1x256xi1> to vector<1x256xi1>
    %702 = vector.broadcast %701 : vector<1x256xi1> to vector<16x256xi1>
    %703 = vector.broadcast %cst_525 : f32 to vector<16x256xf32>
    %704 = arith.select %702, %700, %703 : vector<16x256xi1>, vector<16x256xf32>
    %c5_526 = arith.constant 5 : index
    %c0_527 = arith.constant 0 : index
    %c0_528 = arith.constant 0 : index
    %705 = vector.load %arg8[%c5_526, %c0_527, %c0_528] : memref<9x8x16xf32, #tpu.memory_space<vmem>>, vector<1x8x16xf32>
    %706 = vector.shape_cast %705 : vector<1x8x16xf32> to vector<8x16xf32>
    %cst_529 = arith.constant dense<0.000000e+00> : vector<8x256xf32>
    %707 = tpu.matmul %706, %704, %cst_529 {dimension_numbers = #tpu.dot_dimension_numbers<[1], [0], [0], [1], [0, 0, 1, 1], [], []>} : vector<8x16xf32>, vector<16x256xf32>, vector<8x256xf32> -> vector<8x256xf32>
    %708 = arith.addf %699, %707 : vector<8x256xf32>
    %c0_530 = arith.constant 0 : index
    %c143_531 = arith.constant 143 : index
    %709 = vector.load %arg11[%c0_530, %c143_531] : memref<32x512xf32, #tpu.memory_space<vmem>>, vector<16x256xf32>
    %cst_532 = arith.constant 0.000000e+00 : f32
    %710 = vector.shape_cast %26 : vector<1x256xi1> to vector<1x256xi1>
    %711 = vector.broadcast %710 : vector<1x256xi1> to vector<16x256xi1>
    %712 = vector.broadcast %cst_532 : f32 to vector<16x256xf32>
    %713 = arith.select %711, %709, %712 : vector<16x256xi1>, vector<16x256xf32>
    %c6_533 = arith.constant 6 : index
    %c0_534 = arith.constant 0 : index
    %c0_535 = arith.constant 0 : index
    %714 = vector.load %arg8[%c6_533, %c0_534, %c0_535] : memref<9x8x16xf32, #tpu.memory_space<vmem>>, vector<1x8x16xf32>
    %715 = vector.shape_cast %714 : vector<1x8x16xf32> to vector<8x16xf32>
    %cst_536 = arith.constant dense<0.000000e+00> : vector<8x256xf32>
    %716 = tpu.matmul %715, %713, %cst_536 {dimension_numbers = #tpu.dot_dimension_numbers<[1], [0], [0], [1], [0, 0, 1, 1], [], []>} : vector<8x16xf32>, vector<16x256xf32>, vector<8x256xf32> -> vector<8x256xf32>
    %717 = arith.addf %708, %716 : vector<8x256xf32>
    %c0_537 = arith.constant 0 : index
    %c144_538 = arith.constant 144 : index
    %718 = vector.load %arg11[%c0_537, %c144_538] : memref<32x512xf32, #tpu.memory_space<vmem>>, vector<16x256xf32>
    %c7_539 = arith.constant 7 : index
    %c0_540 = arith.constant 0 : index
    %c0_541 = arith.constant 0 : index
    %719 = vector.load %arg8[%c7_539, %c0_540, %c0_541] : memref<9x8x16xf32, #tpu.memory_space<vmem>>, vector<1x8x16xf32>
    %720 = vector.shape_cast %719 : vector<1x8x16xf32> to vector<8x16xf32>
    %cst_542 = arith.constant dense<0.000000e+00> : vector<8x256xf32>
    %721 = tpu.matmul %720, %718, %cst_542 {dimension_numbers = #tpu.dot_dimension_numbers<[1], [0], [0], [1], [0, 0, 1, 1], [], []>} : vector<8x16xf32>, vector<16x256xf32>, vector<8x256xf32> -> vector<8x256xf32>
    %722 = arith.addf %717, %721 : vector<8x256xf32>
    %c0_543 = arith.constant 0 : index
    %c145_544 = arith.constant 145 : index
    %723 = vector.load %arg11[%c0_543, %c145_544] : memref<32x512xf32, #tpu.memory_space<vmem>>, vector<16x256xf32>
    %cst_545 = arith.constant 0.000000e+00 : f32
    %724 = vector.shape_cast %42 : vector<1x256xi1> to vector<1x256xi1>
    %725 = vector.broadcast %724 : vector<1x256xi1> to vector<16x256xi1>
    %726 = vector.broadcast %cst_545 : f32 to vector<16x256xf32>
    %727 = arith.select %725, %723, %726 : vector<16x256xi1>, vector<16x256xf32>
    %c8_546 = arith.constant 8 : index
    %c0_547 = arith.constant 0 : index
    %c0_548 = arith.constant 0 : index
    %728 = vector.load %arg8[%c8_546, %c0_547, %c0_548] : memref<9x8x16xf32, #tpu.memory_space<vmem>>, vector<1x8x16xf32>
    %729 = vector.shape_cast %728 : vector<1x8x16xf32> to vector<8x16xf32>
    %cst_549 = arith.constant dense<0.000000e+00> : vector<8x256xf32>
    %730 = tpu.matmul %729, %727, %cst_549 {dimension_numbers = #tpu.dot_dimension_numbers<[1], [0], [0], [1], [0, 0, 1, 1], [], []>} : vector<8x16xf32>, vector<16x256xf32>, vector<8x256xf32> -> vector<8x256xf32>
    %731 = arith.addf %722, %730 : vector<8x256xf32>
    %c0_550 = arith.constant 0 : index
    %c0_551 = arith.constant 0 : index
    %c0_552 = arith.constant 0 : index
    %732 = vector.load %arg10[%c0_550, %c0_551, %c0_552] : memref<1x8x256xf32, #tpu.memory_space<vmem>>, vector<1x8x256xf32>
    %733 = vector.shape_cast %732 : vector<1x8x256xf32> to vector<8x256xf32>
    %734 = vector.shape_cast %731 : vector<8x256xf32> to vector<1x8x256xf32>
    tpu.vector_store %arg10[%c0_550, %c0_551, %c0_552], %734 {strides = array<i32>} : memref<1x8x256xf32, #tpu.memory_space<vmem>>, vector<1x8x256xf32>,
    return
  }
  func.func @transform_0(%arg0: i32) -> (i32, i32, i32) {
    %c0_i32 = arith.constant 0 : i32
    %c0_i32_0 = arith.constant 0 : i32
    %c0_i32_1 = arith.constant 0 : i32
    return %arg0, %c0_i32, %c0_i32_0 : i32, i32, i32
  }
  func.func @transform_1(%arg0: i32) -> (i32, i32, i32) {
    %c0_i32 = arith.constant 0 : i32
    %c0_i32_0 = arith.constant 0 : i32
    %c0_i32_1 = arith.constant 0 : i32
    %c0_i32_2 = arith.constant 0 : i32
    return %c0_i32, %c0_i32_0, %c0_i32_1 : i32, i32, i32
  }
  func.func @transform_2(%arg0: i32) -> (i32, i32) {
    %c0_i32 = arith.constant 0 : i32
    %c0_i32_0 = arith.constant 0 : i32
    %c0_i32_1 = arith.constant 0 : i32
    return %c0_i32, %c0_i32_0 : i32, i32
  }
  func.func @transform_3(%arg0: i32) -> (i32, i32, i32) {
    %c0_i32 = arith.constant 0 : i32
    %c0_i32_0 = arith.constant 0 : i32
    %c0_i32_1 = arith.constant 0 : i32
    %c0_i32_2 = arith.constant 0 : i32
    return %c0_i32, %c0_i32_0, %c0_i32_1 : i32, i32, i32
  }
  func.func @transform_4(%arg0: i32) -> (i32, i32) {
    %c0_i32 = arith.constant 0 : i32
    %c0_i32_0 = arith.constant 0 : i32
    %c0_i32_1 = arith.constant 0 : i32
    return %c0_i32, %c0_i32_0 : i32, i32
  }
  func.func @transform_5(%arg0: i32) -> (i32, i32, i32) {
    %c0_i32 = arith.constant 0 : i32
    %c0_i32_0 = arith.constant 0 : i32
    %c0_i32_1 = arith.constant 0 : i32
    %c0_i32_2 = arith.constant 0 : i32
    return %c0_i32, %c0_i32_0, %c0_i32_1 : i32, i32, i32
  }
  func.func @transform_6(%arg0: i32) -> (i32, i32) {
    %c0_i32 = arith.constant 0 : i32
    %c0_i32_0 = arith.constant 0 : i32
    %c0_i32_1 = arith.constant 0 : i32
    return %c0_i32, %c0_i32_0 : i32, i32
  }
  func.func @transform_7(%arg0: i32) -> (i32, i32, i32) {
    %c0_i32 = arith.constant 0 : i32
    %c0_i32_0 = arith.constant 0 : i32
    %c0_i32_1 = arith.constant 0 : i32
    %c0_i32_2 = arith.constant 0 : i32
    return %c0_i32, %c0_i32_0, %c0_i32_1 : i32, i32, i32
  }
  func.func @transform_8(%arg0: i32) -> (i32, i32) {
    %c0_i32 = arith.constant 0 : i32
    %c0_i32_0 = arith.constant 0 : i32
    %c0_i32_1 = arith.constant 0 : i32
    return %c0_i32, %c0_i32_0 : i32, i32
  }
  func.func @transform_9(%arg0: i32) -> (i32, i32, i32) {
    %c0_i32 = arith.constant 0 : i32
    %c0_i32_0 = arith.constant 0 : i32
    %c0_i32_1 = arith.constant 0 : i32
    return %arg0, %c0_i32, %c0_i32_0 : i32, i32, i32
  }
}

</mosaic_0001>

<bundles_post_ra>
// kernel: _lambda_.1
= control target key start
LH: loop header
LB: loop body
LE: loop exit
PB: predicated region body
PF: predicated region fallthrough
CT: control target
= control target key end

     0   :  { %s16380_s0 = inlined_call_operand.vmem [shape: f32[2,8,256], index: 0, kind: input, shape index: {}]   ;;  %s16381_s1 = inlined_call_operand.hbm [shape: f32[25,16,8], index: 1, kind: input, shape index: {}]   ;;  %s16382_s2 = inlined_call_operand.vmem [shape: f32[16,1], index: 2, kind: input, shape index: {}]   ;;  %s16383_s3 = inlined_call_operand.hbm [shape: f32[25,32,16], index: 3, kind: input, shape index: {}]   ;;  %s16384_s4 = inlined_call_operand.vmem [shape: f32[32,1], index: 4, kind: input, shape index: {}]   ;;  %s16385_s5 = inlined_call_operand.hbm [shape: f32[25,16,32], index: 5, kind: input, shape index: {}]   ;;  %s16386_s6 = inlined_call_operand.vmem [shape: f32[16,1], index: 6, kind: input, shape index: {}]   ;;  %s16387_s7 = inlined_call_operand.vmem [shape: f32[9,8,16], index: 7, kind: input, shape index: {}]   ;;  %s16388_s8 = inlined_call_operand.vmem [shape: f32[8,1], index: 8, kind: input, shape index: {}]   ;;  %s16389_s9 = inlined_call_operand.vmem [shape: f32[2,8,256], index: 9, kind: output, shape index: {}]  }
   0x1   :  { %16481 = sst [smem:[#allocation27_spill]] %s16380_s0 }
   0x2   :  { %16482 = sst [smem:[#allocation28_spill]] %s16381_s1 }
   0x3   :  { %14 = vsyncpa [#allocation4], 0 }
   0x4   :  { %15 = vsyncpa [#allocation6], 0  ;;  %s13825_s30 = smov 0  }
   0x5 LB: > { %s13831_s10 = sadd.s32 4294967295, %s13742_s30   ;;  %p10951_p0 = scmp.ge.s32.totalorder %s13742_s30, 1  ;;  %s13742_s30 = sphi %s13825_s30, %s21_s30  }
   0x6   : > { %p246_p1 = scmp.lt.s32.totalorder %s13742_s30, 3  ;;  %p16390_p2 = scmp.eq.s32.totalorder %s13831_s10, 0 }
   0x7   : > { %s13744_s12 = smov [#allocation5]   ;;  %s13745_s14 = smov [#allocation3]  }
   0x8   : > { %p13836_p3 = pnand %p10951_p0, %p246_p1  ;;  %s274_s13 = sshll.u32 %s13744_s12, 4  ;;  %s275_s13 = int_to_ptr.vmem [resolvable:$true] %s274_s13 }
   0x9   : > { %s258_s15 = sshll.u32 %s13745_s14, 4  ;;  %s13746_s17 = smov [#allocation7]   ;;  %s13848_s15 = int_to_ptr.vmem [resolvable:$true] %s258_s15 }
   0xa   : > { %s16483_s11 = scalar_select %p13836_p3, 1, 0 }
   0xb   : > { %p12387_p4 = pneg %p13836_p3  ;;  %s290_s18 = sshll.u32 %s13746_s17, 4  ;;  %s13850_s18 = int_to_ptr.vmem [resolvable:$true] %s290_s18 }
   0xc   : > { %s13644_s21 = scalar_lea.hbm %s16383_s3, 12800 }
   0xd   : > { %p13844_p5 = pnand %p16390_p2, %p12387_p4  ;;  %p13645_p6 = scmp.ne.s32.totalorder %s16383_s3, %s13644_s21 }
   0xe   : > { %p13651_p10 = scmp.lt.u32.totalorder %s13644_s21, %s16383_s3 }
   0xf   : > { %p13860_p7 = pneg %p13844_p5 }
  0x11   : > { %p13647_p8 = pnand %p13860_p7, %p13645_p6 }
  0x13   : > { %p13648_p9 = pneg %p13647_p8 }
  0x15   : > { %p13653_p11 = pnand %p13651_p10, %p13648_p9 }
  0x17   : > { %13656 = shalt.err (!%p13653_p11)
}
  0x18   : > { %s13657_s27 = scalar_lea.vmem %s275_s13, 12800  ;;  %p13665_p1 = scmp.lt.s32.totalorder %s275_s13, %s275_s13 }
  0x19   : > { %p13658_p12 = scmp.ne.s32.totalorder %s275_s13, %s13657_s27  ;;  %p13666_p4 = scmp.lt.s32.totalorder %s13657_s27, %s13657_s27 }
  0x1b   : > { %p13660_p13 = pnand %p13658_p12, %p13860_p7  ;;  %p13667_p2 = por %p13666_p4, %p13665_p1 }
  0x1d   : > { %p13661_p0 = pneg %p13660_p13 }
  0x1f   : > { %p13668_p3 = pnand %p13667_p2, %p13661_p0 }
  0x21   : > { %13671 = shalt.err (!%p13668_p3)
}
  0x22   : > { %s13747_s28 = smov 128   ;;  %s13748_s29 = smov 8  }
  0x23   : > { %12393 = dma.hbm_to_vmem [thread:$0]  (!%p13844_p5), %s16383_s3, 12800, %s275_s13, [#allocation6], %s13747_s28, %s13747_s28, %s13748_s29  }
  0x24   : > { %s16486_s1 = sld [smem:[#allocation28_spill]] }
  0x2a   : > { %s13672_s20 = scalar_lea.hbm %s16486_s1, 6400 }
  0x2b   : > { %p13673_p2 = scmp.ne.s32.totalorder %s16486_s1, %s13672_s20  ;;  %p13679_p8 = scmp.lt.u32.totalorder %s13672_s20, %s16486_s1 }
  0x2d   : > { %p13675_p3 = pnand %p13673_p2, %p13860_p7 }
  0x2f   : > { %p13676_p6 = pneg %p13675_p3 }
  0x31   : > { %p13681_p9 = pnand %p13679_p8, %p13676_p6 }
  0x33   : > { %13684 = shalt.err (!%p13681_p9)
}
  0x34   : > { %s13685_s13 = scalar_lea.vmem %s13848_s15, 6400  ;;  %p13693_p13 = scmp.lt.s32.totalorder %s13848_s15, %s13848_s15 }
  0x35   : > { %p13686_p10 = scmp.ne.s32.totalorder %s13848_s15, %s13685_s13  ;;  %p13694_p0 = scmp.lt.s32.totalorder %s13685_s13, %s13685_s13 }
  0x37   : > { %p13688_p11 = pnand %p13686_p10, %p13860_p7  ;;  %p13695_p1 = por %p13694_p0, %p13693_p13 }
  0x39   : > { %p13689_p12 = pneg %p13688_p11 }
  0x3b   : > { %p13696_p4 = pnand %p13695_p1, %p13689_p12 }
  0x3d   : > { %13699 = shalt.err (!%p13696_p4)
}
  0x3e   : > { %12390 = dma.hbm_to_vmem [thread:$0]  (!%p13844_p5), %s16486_s1, 6400, %s13848_s15, [#allocation4], %s13747_s28, %s13747_s28, %s13748_s29  }
  0x3f   : > { %s13700_s17 = scalar_lea.hbm %s16385_s5, 6400 }
  0x40   : > { %p13701_p2 = scmp.ne.s32.totalorder %s16385_s5, %s13700_s17  ;;  %p13707_p8 = scmp.lt.u32.totalorder %s13700_s17, %s16385_s5 }
  0x42   : > { %p13703_p3 = pnand %p13701_p2, %p13860_p7 }
  0x44   : > { %p13704_p6 = pneg %p13703_p3 }
  0x46   : > { %p13709_p9 = pnand %p13707_p8, %p13704_p6 }
  0x48   : > { %13712 = shalt.err (!%p13709_p9)
}
  0x49   : > { %s13713_s15 = scalar_lea.vmem %s13850_s18, 6400  ;;  %p13721_p13 = scmp.lt.s32.totalorder %s13850_s18, %s13850_s18 }
  0x4a   : > { %p13714_p10 = scmp.ne.s32.totalorder %s13850_s18, %s13713_s15  ;;  %p13722_p0 = scmp.lt.s32.totalorder %s13713_s15, %s13713_s15 }
  0x4c   : > { %p13716_p11 = pnand %p13714_p10, %p13860_p7  ;;  %p13723_p1 = por %p13722_p0, %p13721_p13 }
  0x4e   : > { %p13717_p12 = pneg %p13716_p11 }
  0x50   : > { %p13724_p4 = pnand %p13723_p1, %p13717_p12 }
  0x52   : > { %13727 = shalt.err (!%p13724_p4)
}
  0x53   : > { %12396 = dma.hbm_to_vmem [thread:$0]  (!%p13844_p5), %s16385_s5, 6400, %s13850_s18, [#allocation6], %s13747_s28, %s13747_s28, %s13748_s29  }
  0x54   : > { %p16487_p2 = scmp.ne.s32.totalorder %s16483_s11, 0 }
  0x56   : > { %323 = sbr.rel (%p16487_p2) target bundleno = 2358 (0x936), region = 56 }
  0x5d   : > { %p16488_p7 = scmp.eq.s32.totalorder %s13831_s10, 0 }
  0x5f   : > { %13733 = dma.done.wait (%p16488_p7), [#allocation4], 6400   ;;  %p16489_p3 = pmov %p16488_p7 }
  0x61   : > { %13735 = vsyncadd (%p16489_p3), [#allocation4], 4294960896  ;;  %p16490_p6 = pmov %p16489_p3 }
  0x62   : > { %p16491_p8 = pmov %p16489_p3 }
  0x63   : > { %13737 = dma.done.wait (%p16490_p6), [#allocation6], 19200  }
  0x64   : > { %13739 = vsyncadd (%p16491_p8), [#allocation6], 4294948096  ;;  %p367_p9 = scmp.lt.s32.totalorder %s13831_s10, 1  ;;  %v16462_v0 = vmov 0.0   ;;  %s16458_s16 = smov 32   ;;  %v385_v3 = vlaneseq  ;;  %vm16453_vm0 = vcmask 261120  }
  0x65   : > { %633 = vrot.lane.b32.xlu1 %v16462_v0, %s16458_s16  ;;  %714 = vmatprep.mubr.f32.mxu0 %v16462_v0  ;;  %s16492_s0 = sld [smem:[#allocation27_spill]]  ;;  %s16454_s29 = smov 31   ;;  %vm16426_vm1 = vcmask 252928   ;;  %vm433_vm2 = vcmask 64512   ;;  %v631_v14 = vld [vmem:[#allocation3 + $0x20] sm:$0xff]  ;;  %v632_v20 = vld [vmem:[#allocation3 + $0x28] sm:$0xff] }
  0x66   : > { %s16892_s10 = smov (!%p367_p9, %s13831_s10), 1  ;;  %504 = vmatprep.mubr.f32.mxu1 %v16462_v0  ;;  %s16451_s13 = smov 30   ;;  %v386_v5 = vand.u32 127, %v385_v3  ;;  %vm16423_vm5 = vcmask 244736   ;;  %v751_v24 = vld [vmem:[#allocation3 + $0x30] sm:$0xff]  ;;  %v752_v28 = vld [vmem:[#allocation3 + $0x38] sm:$0xff] }
  0x67   : > { %s16392_s11 = sshll.u32 %s16892_s10, 4  ;;  %s16449_s26 = smov 18   ;;  %vm16404_vm8 = vcmask 146432   ;;  %v860_v32 = vld [vmem:[#allocation3 + $0x40] sm:$0xff]  ;;  %vm16403_vm11 = vcmask 138240   ;;  %v861_v36 = vld [vmem:[#allocation3 + $0x48] sm:$0xff] }
  0x68   : > { %s16447_s27 = smov 17   ;;  %s16445_s12 = smov 16   ;;  %v387_v6 = vadd.s32 128, %v386_v5  ;;  %v14081_v12 = vand.u32 15, %v386_v5  ;;  %v963_v40 = vld [vmem:[#allocation3 + $0x50] sm:$0xff]  ;;  %vm1164_vm14 = vcmask 130048  }
  0x69   : > { %s16443_s14 = smov 15   ;;  %s16441_s17 = smov 14   ;;  %v964_v44 = vld [vmem:[#allocation3 + $0x58] sm:$0xff]  ;;  %vm16405_vm15 = vcmask 121856   ;;  %v1066_v48 = vld [vmem:[#allocation3 + $0x60] sm:$0xff]  ;;  %v1067_v53 = vld [vmem:[#allocation3 + $0x68] sm:$0xff] }
  0x6a   : > { %s16439_s19 = smov 2   ;;  %s16437_s20 = smov 1   ;;  %v14079_v9 = vand.u32 15, %v387_v6  ;;  %vm731_vm4 = vcmp.lt.s32.totalorder %v14081_v12, 15  ;;  %vm840_vm7 = vcmp.lt.s32.totalorder %v14081_v12, 14  ;;  %vm409_vm10 = vcmp.ge.s32.totalorder %v14081_v12, 2 }
  0x6b   : > { %s371_s28 = scalar_lea.vmem %s16492_s0, %s16392_s11  ;;  %s16435_s21 = smov 127   ;;  %vm521_vm13 = vcmp.ge.s32.totalorder %v14081_v12, 1  ;;  %v1156_v56 = vld [vmem:[#allocation3 + $0x70] sm:$0xff]  ;;  %v1157_v61 = vld [vmem:[#allocation3 + $0x78] sm:$0xff]  ;;  %v1270_v3 = vld [vmem:[#allocation3 + $0x80] sm:$0xff] }
  0x6c   : > { %v13955_v1 = vld [vmem:[%s371_s28] sm:$0xff]  ;;  %v13961_v2 = vld [vmem:[%s371_s28 + $0x8] sm:$0xff]  ;;  %s16433_s22 = smov 126   ;;  %s16431_s15 = smov 114   ;;  %vm732_vm3 = vcmp.lt.s32.totalorder %v14079_v9, 15  ;;  %vm841_vm6 = vcmp.lt.s32.totalorder %v14079_v9, 14 }
  0x6d   : > { %635 = vrot.lane.b32.xlu0 %v13955_v1, %s16458_s16  ;;  %739 = vrot.lane.b32.xlu1 %v13955_v1, %s16454_s29  ;;  %s16412_s23 = smov 113   ;;  %s16410_s25 = smov 112   ;;  %vm410_vm9 = vcmp.ge.s32.totalorder %v14079_v9, 2  ;;  %vm522_vm12 = vcmp.ge.s32.totalorder %v14079_v9, 1  ;;  %v3326_v9 = vld [vmem:[#allocation5 + $0x50] sm:$0xff] }
  0x6e   : > { %s16393_s18 = smov 111   ;;  %s16408_s24 = smov 110   ;;  %v3484_v12 = vld [vmem:[#allocation5 + $0x70] sm:$0xff] }
  0x6f   : > { %s16395_s28 = smov 98   ;;  %s16399_s11 = smov 97  }
  0x70   : > { %s16616_s0 = smov 33   ;;  %s16618_s1 = smov 127  }
  0x71   : > { %637 = vrot.lane.b32.xlu0 %v13961_v2, %s16458_s16  ;;  %737 = vrot.lane.b32.xlu1 %v16462_v0, %s16454_s29 }
  0x75   : > { %741 = vrot.lane.b32.xlu0 %v13961_v2, %s16454_s29  ;;  %850 = vrot.lane.b32.xlu1 %v13961_v2, %s16451_s13 }
  0x79   : > { %848 = vrot.lane.b32.xlu0 %v13955_v1, %s16451_s13  ;;  %951 = vrot.lane.b32.xlu1 %v13955_v1, %s16449_s26 }
  0x7d   : > { %846 = vrot.lane.b32.xlu0 %v16462_v0, %s16451_s13  ;;  %949 = vrot.lane.b32.xlu1 %v16462_v0, %s16449_s26 }
  0x81   : > { %953 = vrot.lane.b32.xlu0 %v13961_v2, %s16449_s26  ;;  %1056 = vrot.lane.b32.xlu1 %v13961_v2, %s16447_s27 }
  0x85   : > { %1054 = vrot.lane.b32.xlu0 %v13955_v1, %s16447_s27  ;;  %1160 = vrot.lane.b32.xlu1 %v13955_v1, %s16445_s12 }
  0x89   : > { %1052 = vrot.lane.b32.xlu0 %v16462_v0, %s16447_s27  ;;  %1158 = vrot.lane.b32.xlu1 %v16462_v0, %s16445_s12 }
  0x8d   : > { %1162 = vrot.lane.b32.xlu0 %v13961_v2, %s16445_s12  ;;  %1260 = vrot.lane.b32.xlu1 %v13961_v2, %s16443_s14 }
  0x91   : > { %1258 = vrot.lane.b32.xlu0 %v13955_v1, %s16443_s14  ;;  %1361 = vrot.lane.b32.xlu1 %v13955_v1, %s16441_s17 }
  0x95   : > { %1256 = vrot.lane.b32.xlu0 %v16462_v0, %s16443_s14  ;;  %1359 = vrot.lane.b32.xlu1 %v16462_v0, %s16441_s17 }
  0x99   : > { %1363 = vrot.lane.b32.xlu0 %v13961_v2, %s16441_s17  ;;  %1466 = vrot.lane.b32.xlu1 %v13961_v2, %s16439_s19 }
  0x9d   : > { %1464 = vrot.lane.b32.xlu0 %v13955_v1, %s16439_s19  ;;  %1567 = vrot.lane.b32.xlu1 %v13955_v1, %s16437_s20 }
  0xa1   : > { %1462 = vrot.lane.b32.xlu0 %v16462_v0, %s16439_s19  ;;  %1565 = vrot.lane.b32.xlu1 %v16462_v0, %s16437_s20 }
  0xa5   : > { %1569 = vrot.lane.b32.xlu0 %v13961_v2, %s16437_s20  ;;  %1768 = vrot.lane.b32.xlu1 %v16462_v0, %s16435_s21 }
  0xa9   : > { %1766 = vrot.lane.b32.xlu0 %v13961_v2, %s16435_s21  ;;  %1869 = vrot.lane.b32.xlu1 %v13961_v2, %s16433_s22 }
  0xad   : > { %1764 = vrot.lane.b32.xlu0 %v13955_v1, %s16435_s21  ;;  %1867 = vrot.lane.b32.xlu1 %v13955_v1, %s16433_s22 }
  0xb1   : > { %1871 = vrot.lane.b32.xlu0 %v16462_v0, %s16433_s22  ;;  %1974 = vrot.lane.b32.xlu1 %v16462_v0, %s16431_s15 }
  0xb5   : > { %1972 = vrot.lane.b32.xlu0 %v13961_v2, %s16431_s15  ;;  %2075 = vrot.lane.b32.xlu1 %v13961_v2, %s16412_s23 }
  0xb9   : > { %1970 = vrot.lane.b32.xlu0 %v13955_v1, %s16431_s15  ;;  %2073 = vrot.lane.b32.xlu1 %v13955_v1, %s16412_s23 }
  0xbd   : > { %2077 = vrot.lane.b32.xlu0 %v16462_v0, %s16412_s23  ;;  %2183 = vrot.lane.b32.xlu1 %v16462_v0, %s16410_s25  ;;  %s16493_s23 = smov 113  }
  0xc1   : > { %2181 = vrot.lane.b32.xlu0 %v13961_v2, %s16410_s25  ;;  %2279 = vrot.lane.b32.xlu1 %v13961_v2, %s16393_s18 }
  0xc5   : > { %2179 = vrot.lane.b32.xlu0 %v13955_v1, %s16410_s25  ;;  %2277 = vrot.lane.b32.xlu1 %v13955_v1, %s16393_s18  ;;  %s16494_s25 = smov 112  }
  0xc9   : > { %2281 = vrot.lane.b32.xlu0 %v16462_v0, %s16393_s18  ;;  %2384 = vrot.lane.b32.xlu1 %v16462_v0, %s16408_s24  ;;  %s16397_s18 = smov 96  }
  0xcd   : > { %2382 = vrot.lane.b32.xlu0 %v13961_v2, %s16408_s24  ;;  %2485 = vrot.lane.b32.xlu1 %v13961_v2, %s16395_s28 }
  0xd1   : > { %2380 = vrot.lane.b32.xlu0 %v13955_v1, %s16408_s24  ;;  %2483 = vrot.lane.b32.xlu1 %v13955_v1, %s16395_s28  ;;  %s16496_s24 = smov 110  }
  0xd5   : > { %2487 = vrot.lane.b32.xlu0 %v16462_v0, %s16395_s28  ;;  %2590 = vrot.lane.b32.xlu1 %v16462_v0, %s16399_s11  ;;  %s16456_s28 = smov 34  }
  0xd7   : > { %v634_v4 = vpop.permute.xlu1 %633 }
  0xd9   : > { %2588 = vrot.lane.b32.xlu0 %v13961_v2, %s16399_s11  ;;  %2694 = vrot.lane.b32.xlu1 %v13961_v2, %s16397_s18 }
  0xdd   : > { %2586 = vrot.lane.b32.xlu0 %v13955_v1, %s16399_s11  ;;  %2692 = vrot.lane.b32.xlu1 %v13955_v1, %s16397_s18  ;;  %s16460_s11 = smov 33  }
  0xdf   : > { %v636_v7 = vpop.permute.xlu0 %635  ;;  %v740_v8 = vpop.permute.xlu1 %739 }
  0xe0   : > { %v640_v15 = vsel %vm16453_vm0, %v634_v4, %v636_v7 }
  0xe1   : > { %2696 = vrot.lane.b32.xlu0 %v16462_v0, %s16397_s18  ;;  %422 = vrot.lane.b32.xlu1 %v13961_v2, %s16456_s28  ;;  %s16401_s18 = smov 95  }
  0xe3   : > { %v638_v10 = vpop.permute.xlu0 %637  ;;  %v738_v11 = vpop.permute.xlu1 %737 }
  0xe4   : > { %v641_v13 = vsel %vm16453_vm0, %v636_v7, %v638_v10  ;;  %v744_v16 = vsel %vm16426_vm1, %v738_v11, %v740_v8 }
  0xe5   : > { %650 = vmatprep.subr.mxu0 %v641_v13  ;;  %420 = vrot.lane.b32.xlu0 %v13955_v1, %s16456_s28  ;;  %v394_v13 = vld [vmem:[%s16382_s2] sm:$0xff] }
  0xe6   : > { %651 = vmatpush1.msra.mxu0 %v640_v15  ;;  %2792 = vrot.lane.b32.xlu1 %v13961_v2, %s16401_s18  ;;  %v1373_v15 = vld [vmem:[#allocation3 + $0x90] sm:$0xff] }
  0xe7   : > { %10972 = vmatmul.mubr.msk.f32.vlgmr.msra.gmra.mrb[0].mxu0 %vm433_vm2, %v631_v14  ;;  %v742_v17 = vpop.permute.xlu0 %741  ;;  %v851_v18 = vpop.permute.xlu1 %850  ;;  %v395_v14 = vld [vmem:[%s16382_s2 + $0x8] sm:$0xff] }
  0xe8   : > { %v745_v19 = vsel %vm16426_vm1, %v740_v8, %v742_v17  ;;  %720 = vmatprep.mubr.f32.mxu0 %v16462_v0  ;;  %v1271_v8 = vld [vmem:[#allocation3 + $0x88] sm:$0xff]  ;;  %vm16429_vm1 = vcmask 777216  }
  0xe9   : > { %10974 = vmatprep.subr.msk.mxu0 %vm732_vm3, %v745_v19  ;;  %418 = vrot.lane.b32.xlu0 %v16462_v0, %s16456_s28 }
  0xea   : > { %10975 = vmatpush1.msk.msra.mxu0 %vm731_vm4, %v744_v16  ;;  %2790 = vrot.lane.b32.xlu1 %v13955_v1, %s16401_s18  ;;  %v13774_v16 = vmov 0  }
  0xeb   : > { %10973 = vmatmul.mubr.msk.f32.gmra.mrb[2].mxu0 %vm433_vm2, %v632_v20  ;;  %v849_v21 = vpop.permute.xlu0 %848  ;;  %v952_v22 = vpop.permute.xlu1 %951  ;;  %12442 = vset.pattern.permute.xlu0 %v13774_v16 }
  0xec   : > { %v854_v23 = vsel %vm16423_vm5, %v849_v21, %v851_v18  ;;  %823 = vmatprep.mubr.f32.mxu0 %v16462_v0  ;;  %12443 = vset.pattern.permute.xlu1 %v13774_v16 }
  0xed   : > { %10978 = vmatprep.subr.msk.mxu0 %vm841_vm6, %v854_v23  ;;  %2794 = vrot.lane.b32.xlu0 %v16462_v0, %s16401_s18  ;;  %s16406_s18 = smov 94  }
  0xee   : > { %531 = vrot.lane.b32.xlu1 %v13961_v2, %s16460_s11 }
  0xef   : > { %10976 = vmatmul.mubr.msk.f32.vlgmr.msra.gmra.mrb[0].mxu0 %vm433_vm2, %v751_v24  ;;  %v847_v25 = vpop.permute.xlu0 %846  ;;  %v950_v26 = vpop.permute.xlu1 %949  ;;  %v1476_v24 = vld [vmem:[#allocation3 + $0xa0] sm:$0xff] }
  0xf0   : > { %v853_v27 = vsel %vm16423_vm5, %v847_v25, %v849_v21  ;;  %829 = vmatprep.mubr.f32.mxu0 %v16462_v0  ;;  %v956_v33 = vsel %vm16404_vm8, %v950_v26, %v952_v22  ;;  %v1374_v21 = vld [vmem:[#allocation3 + $0x98] sm:$0xff]  ;;  %vm16425_vm5 = vcmask 801792  }
  0xf1   : > { %10979 = vmatpush1.msk.msra.mxu0 %vm840_vm7, %v853_v27  ;;  %529 = vrot.lane.b32.xlu0 %v13955_v1, %s16460_s11 }
  0xf2   : > { %2895 = vrot.lane.b32.xlu1 %v13961_v2, %s16406_s18 }
  0xf3   : > { %10977 = vmatmul.mubr.msk.f32.gmra.mrb[2].mxu0 %vm433_vm2, %v752_v28  ;;  %v954_v29 = vpop.permute.xlu0 %953  ;;  %v1057_v30 = vpop.permute.xlu1 %1056  ;;  %v1477_v28 = vld [vmem:[#allocation3 + $0xa8] sm:$0xff] }
  0xf4   : > { %v957_v31 = vsel %vm16404_vm8, %v952_v22, %v954_v29  ;;  %932 = vmatprep.mubr.f32.mxu0 %v16462_v0  ;;  %vm16414_vm8 = vcmask 15360  }
  0xf5   : > { %10982 = vmatprep.subr.msk.mxu0 %vm410_vm9, %v957_v31  ;;  %527 = vrot.lane.b32.xlu0 %v16462_v0, %s16460_s11  ;;  %v1579_v31 = vld [vmem:[#allocation3 + $0xb0] sm:$0xff] }
  0xf6   : > { %2893 = vrot.lane.b32.xlu1 %v13955_v1, %s16406_s18 }
  0xf7   : > { %10980 = vmatmul.mubr.msk.f32.vlgmr.msra.gmra.mrb[0].mxu0 %vm433_vm2, %v860_v32  ;;  %v1055_v34 = vpop.permute.xlu0 %1054  ;;  %v1161_v35 = vpop.permute.xlu1 %1160 }
  0xf8   : > { %10983 = vmatpush1.msk.msra.mxu0 %vm409_vm10, %v956_v33  ;;  %938 = vmatprep.mubr.f32.mxu0 %v16462_v0  ;;  %v1060_v37 = vsel %vm16403_vm11, %v1055_v34, %v1057_v30 }
  0xf9   : > { %10986 = vmatprep.subr.msk.mxu0 %vm522_vm12, %v1060_v37  ;;  %2897 = vrot.lane.b32.xlu0 %v16462_v0, %s16406_s18  ;;  %v1669_v37 = vld [vmem:[#allocation3 + $0xc0] sm:$0xff]  ;;  %s16495_s18 = smov 111  }
  0xfa   : > { %403 = vperm.xlu1 %12443, %v395_v14  }
  0xfb   : > { %10981 = vmatmul.mubr.msk.f32.gmra.mrb[2].mxu0 %vm433_vm2, %v861_v36  ;;  %v1053_v38 = vpop.permute.xlu0 %1052  ;;  %v1159_v39 = vpop.permute.xlu1 %1158 }
  0xfc   : > { %1035 = vmatprep.mubr.f32.mxu0 %v16462_v0  ;;  %v1059_v41 = vsel %vm16403_vm11, %v1053_v38, %v1055_v34  ;;  %v1165_v49 = vsel %vm1164_vm14, %v1159_v39, %v1161_v35  ;;  %vm16419_vm11 = vcmask 113664  }
  0xfd   : > { %398 = vperm.xlu0 %12442, %v394_v13   ;;  %v2088_v13 = vld [vmem:[#allocation3 + $0x108] sm:$0xff] }
  0xff   : > { %10984 = vmatmul.mubr.msk.f32.vlgmr.msra.gmra.mrb[0].mxu0 %vm433_vm2, %v963_v40  ;;  %v1163_v42 = vpop.permute.xlu0 %1162  ;;  %v1261_v43 = vpop.permute.xlu1 %1260 }
 0x100   : > { %10987 = vmatpush1.msk.msra.mxu0 %vm521_vm13, %v1059_v41  ;;  %1041 = vmatprep.mubr.f32.mxu0 %v16462_v0  ;;  %v1166_v45 = vsel %vm1164_vm14, %v1161_v35, %v1163_v42  ;;  %v1580_v35 = vld [vmem:[#allocation3 + $0xb8] sm:$0xff]  ;;  %v1670_v41 = vld [vmem:[#allocation3 + $0xc8] sm:$0xff] }
 0x101   : > { %1175 = vmatprep.subr.mxu0 %v1166_v45 }
 0x103   : > { %10985 = vmatmul.mubr.msk.f32.gmra.mrb[2].mxu0 %vm433_vm2, %v964_v44  ;;  %v1259_v46 = vpop.permute.xlu0 %1258  ;;  %v1362_v47 = vpop.permute.xlu1 %1361  ;;  %v1778_v44 = vld [vmem:[#allocation3 + $0xd0] sm:$0xff] }
 0x104   : > { %1138 = vmatprep.mubr.f32.mxu0 %v16462_v0  ;;  %v1264_v50 = vsel %vm16405_vm15, %v1259_v46, %v1261_v43 }
 0x107   : > { %10988 = vmatmul.mubr.msk.f32.vlgmr.msra.gmra.mrb[0].mxu0 %vm433_vm2, %v1066_v48  ;;  %v1257_v51 = vpop.permute.xlu0 %1256  ;;  %v1360_v52 = vpop.permute.xlu1 %1359 }
 0x108   : > { %1176 = vmatpush1.msra.mxu0 %v1165_v49  ;;  %1144 = vmatprep.mubr.f32.mxu0 %v16462_v0  ;;  %v1263_v57 = vsel %vm16405_vm15, %v1257_v51, %v1259_v46  ;;  %v1366_v4 = vsel %vm16419_vm11, %v1360_v52, %v1362_v47  ;;  %vm16415_vm15 = vcmask 7168   ;;  %v1779_v49 = vld [vmem:[#allocation3 + $0xd8] sm:$0xff]  ;;  %v1881_v52 = vld [vmem:[#allocation3 + $0xe0] sm:$0xff] }
 0x109   : > { %10992 = vmatprep.subr.msk.mxu0 %vm732_vm3, %v1264_v50 }
 0x10b   : > { %10989 = vmatmul.mubr.msk.f32.gmra.mrb[2].mxu0 %vm433_vm2, %v1067_v53  ;;  %v1364_v54 = vpop.permute.xlu0 %1363  ;;  %v1467_v55 = vpop.permute.xlu1 %1466 }
 0x10c   : > { %1239 = vmatprep.mubr.f32.mxu0 %v16462_v0  ;;  %v1367_v58 = vsel %vm16419_vm11, %v1362_v47, %v1364_v54  ;;  %vm16422_vm11 = vcmask 908288  }
 0x10f   : > { %10990 = vmatmul.mubr.msk.f32.vlgmr.msra.gmra.mrb[0].mxu0 %vm433_vm2, %v1156_v56  ;;  %v1465_v59 = vpop.permute.xlu0 %1464  ;;  %v1568_v60 = vpop.permute.xlu1 %1567 }
 0x110   : > { %10993 = vmatpush1.msk.msra.mxu0 %vm731_vm4, %v1263_v57  ;;  %1245 = vmatprep.mubr.f32.mxu0 %v16462_v0  ;;  %v1470_v5 = vsel %vm16414_vm8, %v1465_v59, %v1467_v55  ;;  %v1882_v57 = vld [vmem:[#allocation3 + $0xe8] sm:$0xff] }
 0x111   : > { %10996 = vmatprep.subr.msk.mxu0 %vm841_vm6, %v1367_v58 }
 0x113   : > { %10991 = vmatmul.mubr.msk.f32.gmra.mrb[2].mxu0 %vm433_vm2, %v1157_v61  ;;  %v1463_v62 = vpop.permute.xlu0 %1462  ;;  %v1566_v63 = vpop.permute.xlu1 %1565 }
 0x114   : > { %1342 = vmatprep.mubr.f32.mxu0 %v16462_v0  ;;  %v1469_v17 = vsel %vm16414_vm8, %v1463_v62, %v1465_v59  ;;  %v1572_v25 = vsel %vm16415_vm15, %v1566_v63, %v1568_v60  ;;  %vm16416_vm8 = vcmask 1039360  }
 0x117   : > { %10994 = vmatmul.mubr.msk.f32.vlgmr.msra.gmra.mrb[0].mxu0 %vm433_vm2, %v1270_v3  ;;  %v1570_v6 = vpop.permute.xlu0 %1569  ;;  %v1769_v7 = vpop.permute.xlu1 %1768 }
 0x118   : > { %10997 = vmatpush1.msk.msra.mxu0 %vm840_vm7, %v1366_v4  ;;  %1348 = vmatprep.mubr.f32.mxu0 %v16462_v0  ;;  %v1573_v18 = vsel %vm16415_vm15, %v1568_v60, %v1570_v6  ;;  %vm16417_vm15 = vcmask 1031168   ;;  %v1984_v60 = vld [vmem:[#allocation3 + $0xf0] sm:$0xff]  ;;  %v1985_v4 = vld [vmem:[#allocation3 + $0xf8] sm:$0xff] }
 0x119   : > { %11000 = vmatprep.subr.msk.mxu0 %vm410_vm9, %v1470_v5 }
 0x11b   : > { %10995 = vmatmul.mubr.msk.f32.gmra.mrb[2].mxu0 %vm433_vm2, %v1271_v8  ;;  %v1767_v10 = vpop.permute.xlu0 %1766  ;;  %v14183_v11 = vpop.permute.xlu1 %1869 }
 0x11c   : > { %1445 = vmatprep.mubr.f32.mxu0 %v16462_v0  ;;  %v1772_v32 = vsel %vm16416_vm8, %v1767_v10, %v1769_v7  ;;  %v2087_v7 = vld [vmem:[#allocation3 + $0x100] sm:$0xff] }
 0x11f   : > { %10998 = vmatmul.mubr.msk.f32.vlgmr.msra.gmra.mrb[0].mxu0 %vm433_vm2, %v1373_v15  ;;  %v1765_v19 = vpop.permute.xlu0 %1764  ;;  %v1868_v20 = vpop.permute.xlu1 %1867 }
 0x120   : > { %11001 = vmatpush1.msk.msra.mxu0 %vm409_vm10, %v1469_v17  ;;  %1451 = vmatprep.mubr.f32.mxu0 %v16462_v0  ;;  %v1771_v38 = vsel %vm16416_vm8, %v1765_v19, %v1767_v10  ;;  %vm16418_vm8 = vcmask 932864   ;;  %v1874_v45 = vsel %vm16417_vm15, %v1868_v20, %v14183_v11  ;;  %v431_v17 = vld [vmem:[#allocation3] sm:$0xff] }
 0x121   : > { %11004 = vmatprep.subr.msk.mxu0 %vm522_vm12, %v1573_v18  ;;  %v2177_v18 = vld [vmem:[#allocation3 + $0x110] sm:$0xff] }
 0x123   : > { %10999 = vmatmul.mubr.msk.f32.gmra.mrb[2].mxu0 %vm433_vm2, %v1374_v21  ;;  %v1872_v22 = vpop.permute.xlu0 %1871  ;;  %v1975_v23 = vpop.permute.xlu1 %1974 }
 0x124   : > { %1548 = vmatprep.mubr.f32.mxu0 %v16462_v0  ;;  %v1875_v39 = vsel %vm16417_vm15, %v14183_v11, %v1872_v22  ;;  %vm16420_vm15 = vcmask 924672  }
 0x127   : > { %11002 = vmatmul.mubr.msk.f32.vlgmr.msra.gmra.mrb[0].mxu0 %vm433_vm2, %v1476_v24  ;;  %v1973_v26 = vpop.permute.xlu0 %1972  ;;  %v14204_v27 = vpop.permute.xlu1 %2075  ;;  %v432_v24 = vld [vmem:[#allocation3 + $0x8] sm:$0xff] }
 0x128   : > { %11005 = vmatpush1.msk.msra.mxu0 %vm521_vm13, %v1572_v25  ;;  %1554 = vmatprep.mubr.f32.mxu0 %v16462_v0  ;;  %v1978_v46 = vsel %vm16418_vm8, %v1973_v26, %v1975_v23  ;;  %v2178_v25 = vld [vmem:[#allocation3 + $0x118] sm:$0xff] }
 0x129   : > { %1677 = vmatprep.subr.mxu0 %v13961_v2 }
 0x12b   : > { %11003 = vmatmul.mubr.msk.f32.gmra.mrb[2].mxu0 %vm433_vm2, %v1477_v28  ;;  %v1971_v29 = vpop.permute.xlu0 %1970  ;;  %v14211_v30 = vpop.permute.xlu1 %2073  ;;  %v2291_v28 = vld [vmem:[#allocation3 + $0x120] sm:$0xff] }
 0x12c   : > { %1651 = vmatprep.mubr.f32.mxu0 %v16462_v0  ;;  %v1977_v53 = vsel %vm16418_vm8, %v1971_v29, %v1973_v26  ;;  %vm16421_vm8 = vcmask 916480   ;;  %v2080_v61 = vsel %vm16420_vm15, %v14211_v30, %v14204_v27 }
 0x12f   : > { %11006 = vmatmul.mubr.msk.f32.vlgmr.msra.gmra.mrb[0].mxu0 %vm433_vm2, %v1579_v31  ;;  %v2078_v33 = vpop.permute.xlu0 %2077  ;;  %v2184_v34 = vpop.permute.xlu1 %2183 }
 0x130   : > { %1657 = vmatprep.mubr.f32.mxu0 %v16462_v0  ;;  %1678 = vmatpush1.msra.mxu0 %v13955_v1  ;;  %v2081_v54 = vsel %vm16420_vm15, %v14204_v27, %v2078_v33  ;;  %vm424_vm15 = vcmask 277504   ;;  %v541_v33 = vld [vmem:[#allocation3 + $0x10] sm:$0xff] }
 0x131   : > { %11010 = vmatprep.subr.msk.mxu0 %vm732_vm3, %v1772_v32 }
 0x133   : > { %11007 = vmatmul.mubr.msk.f32.gmra.mrb[2].mxu0 %vm433_vm2, %v1580_v35  ;;  %v14221_v2 = vpop.permute.xlu0 %2181  ;;  %v14223_v36 = vpop.permute.xlu1 %2279 }
 0x134   : > { %1741 = vmatprep.mubr.f32.mxu0 %v16462_v0  ;;  %v2187_v62 = vsel %vm16421_vm8, %v14221_v2, %v2184_v34  ;;  %v2292_v34 = vld [vmem:[#allocation3 + $0x128] sm:$0xff] }
 0x137   : > { %11008 = vmatmul.mubr.msk.f32.vlgmr.msra.gmra.mrb[0].mxu0 %vm433_vm2, %v1669_v37  ;;  %v2180_v1 = vpop.permute.xlu0 %2179  ;;  %v14230_v40 = vpop.permute.xlu1 %2277 }
 0x138   : > { %11011 = vmatpush1.msk.msra.mxu0 %vm731_vm4, %v1771_v38  ;;  %1747 = vmatprep.mubr.f32.mxu0 %v16462_v0  ;;  %v2186_v8 = vsel %vm16421_vm8, %v2180_v1, %v14221_v2  ;;  %vm16424_vm8 = vcmask 900096   ;;  %v2284_v21 = vsel %vm16422_vm11, %v14230_v40, %v14223_v36  ;;  %v542_v2 = vld [vmem:[#allocation3 + $0x18] sm:$0xff]  ;;  %v2497_v1 = vld [vmem:[#allocation3 + $0x140] sm:$0xff] }
 0x139   : > { %11014 = vmatprep.subr.msk.mxu0 %vm841_vm6, %v1875_v39  ;;  %v2395_v39 = vld [vmem:[#allocation3 + $0x138] sm:$0xff] }
 0x13b   : > { %11009 = vmatmul.mubr.msk.f32.gmra.mrb[2].mxu0 %vm433_vm2, %v1670_v41  ;;  %v2282_v42 = vpop.permute.xlu0 %2281  ;;  %v14238_v43 = vpop.permute.xlu1 %2384 }
 0x13c   : > { %1850 = vmatprep.mubr.f32.mxu0 %v16462_v0  ;;  %v2285_v10 = vsel %vm16422_vm11, %v14223_v36, %v2282_v42  ;;  %vm533_vm11 = vcmask 269312   ;;  %v2394_v36 = vld [vmem:[#allocation3 + $0x130] sm:$0xff]  ;;  %v2498_v42 = vld [vmem:[#allocation3 + $0x148] sm:$0xff] }
 0x13f   : > { %11012 = vmatmul.mubr.msk.f32.vlgmr.msra.gmra.mrb[0].mxu0 %vm433_vm2, %v1778_v44  ;;  %v14245_v47 = vpop.permute.xlu0 %2382  ;;  %v14247_v48 = vpop.permute.xlu1 %2485 }
 0x140   : > { %11015 = vmatpush1.msk.msra.mxu0 %vm840_vm7, %v1874_v45  ;;  %1856 = vmatprep.mubr.f32.mxu0 %v16462_v0  ;;  %v2388_v22 = vsel %vm16424_vm8, %v14245_v47, %v14238_v43  ;;  %v2600_v43 = vld [vmem:[#allocation3 + $0x150] sm:$0xff] }
 0x141   : > { %11018 = vmatprep.subr.msk.mxu0 %vm410_vm9, %v1978_v46  ;;  %v2601_v46 = vld [vmem:[#allocation3 + $0x158] sm:$0xff] }
 0x143   : > { %11013 = vmatmul.mubr.msk.f32.gmra.mrb[2].mxu0 %vm433_vm2, %v1779_v49  ;;  %v14255_v50 = vpop.permute.xlu0 %2380  ;;  %v14257_v51 = vpop.permute.xlu1 %2483 }
 0x144   : > { %1953 = vmatprep.mubr.f32.mxu0 %v16462_v0  ;;  %v2387_v30 = vsel %vm16424_vm8, %v14255_v50, %v14245_v47  ;;  %vm16427_vm8 = vcmask 793600   ;;  %v2490_v37 = vsel %vm16425_vm5, %v14257_v51, %v14247_v48 }
 0x147   : > { %11016 = vmatmul.mubr.msk.f32.vlgmr.msra.gmra.mrb[0].mxu0 %vm433_vm2, %v1881_v52  ;;  %v14264_v55 = vpop.permute.xlu0 %2487  ;;  %v14266_v56 = vpop.permute.xlu1 %2590  ;;  %v2691_v52 = vld [vmem:[#allocation3 + $0x168] sm:$0xff] }
 0x148   : > { %11019 = vmatpush1.msk.msra.mxu0 %vm409_vm10, %v1977_v53  ;;  %1959 = vmatprep.mubr.f32.mxu0 %v16462_v0  ;;  %v2491_v31 = vsel %vm16425_vm5, %v14247_v48, %v14264_v55  ;;  %vm16430_vm5 = vcmask 785408   ;;  %v2690_v48 = vld [vmem:[#allocation3 + $0x160] sm:$0xff] }
 0x149   : > { %11022 = vmatprep.subr.msk.mxu0 %vm522_vm12, %v2081_v54  ;;  %v2804_v54 = vld [vmem:[#allocation3 + $0x170] sm:$0xff] }
 0x14b   : > { %11017 = vmatmul.mubr.msk.f32.gmra.mrb[2].mxu0 %vm433_vm2, %v1882_v57  ;;  %v14274_v58 = vpop.permute.xlu0 %2588  ;;  %v14276_v59 = vpop.permute.xlu1 %2694  ;;  %v2907_v57 = vld [vmem:[#allocation3 + $0x180] sm:$0xff] }
 0x14c   : > { %2056 = vmatprep.mubr.f32.mxu0 %v16462_v0  ;;  %v2594_v38 = vsel %vm16427_vm8, %v14274_v58, %v14266_v56  ;;  %v2805_v56 = vld [vmem:[#allocation3 + $0x178] sm:$0xff] }
 0x14f   : > { %11020 = vmatmul.mubr.msk.f32.vlgmr.msra.gmra.mrb[0].mxu0 %vm433_vm2, %v1984_v60  ;;  %v14285_v63 = vpop.permute.xlu0 %2586  ;;  %v14287_v3 = vpop.permute.xlu1 %2692 }
 0x150   : > { %11023 = vmatpush1.msk.msra.mxu0 %vm521_vm13, %v2080_v61  ;;  %2062 = vmatprep.mubr.f32.mxu0 %v16462_v0  ;;  %v2593_v41 = vsel %vm16427_vm8, %v14285_v63, %v14274_v58  ;;  %v2699_v45 = vsel %vm16430_vm5, %v14287_v3, %v14276_v59  ;;  %vm16428_vm8 = vcmask 769024   ;;  %v2908_v58 = vld [vmem:[#allocation3 + $0x188] sm:$0xff] }
 0x151   : > { %2196 = vmatprep.subr.mxu0 %v2187_v62 }
 0x153   : > { %11021 = vmatmul.mubr.msk.f32.gmra.mrb[2].mxu0 %vm433_vm2, %v1985_v4  ;;  %v14293_v5 = vpop.permute.xlu0 %2696  ;;  %v423_v6 = vpop.permute.xlu1 %422 }
 0x154   : > { %2159 = vmatprep.mubr.f32.mxu0 %v16462_v0  ;;  %v2700_v40 = vsel %vm16430_vm5, %v14276_v59, %v14293_v5 }
 0x157   : > { %11024 = vmatmul.mubr.msk.f32.vlgmr.msra.gmra.mrb[0].mxu0 %vm433_vm2, %v2087_v7  ;;  %v421_v11 = vpop.permute.xlu0 %420 }
 0x158   : > { %2197 = vmatpush1.msra.mxu0 %v2186_v8  ;;  %2165 = vmatprep.mubr.f32.mxu0 %v16462_v0  ;;  %v14302_v14 = vpop.permute.xlu1 %2792  ;;  %v426_v15 = vsel %vm424_vm15, %v421_v11, %v423_v6 }
 0x159   : > { %11028 = vmatprep.subr.msk.mxu0 %vm732_vm3, %v2285_v10  ;;  %10964 = vmatprep.subr.msk.mxu1 %vm410_vm9, %v426_v15 }
 0x15b   : > { %11025 = vmatmul.mubr.msk.f32.gmra.mrb[2].mxu0 %vm433_vm2, %v2088_v13  ;;  %v419_v16 = vpop.permute.xlu0 %418 }
 0x15c   : > { %2260 = vmatprep.mubr.f32.mxu0 %v16462_v0  ;;  %v425_v19 = vsel %vm424_vm15, %v419_v16, %v421_v11  ;;  %v14312_v20 = vpop.permute.xlu1 %2790 }
 0x15d   : > { %10965 = vmatpush1.msk.msra.mxu1 %vm409_vm10, %v425_v19  ;;  %v2797_v50 = vsel %vm16429_vm1, %v14312_v20, %v14302_v14 }
 0x15e   : > { %10966 = vmatmul.mubr.msk.f32.vlgmr.msra.gmra.mrb[0].mxu1 %vm433_vm2, %v431_v17 }
 0x15f   : > { %11026 = vmatmul.mubr.msk.f32.vlgmr.msra.gmra.mrb[0].mxu0 %vm433_vm2, %v2177_v18  ;;  %v2795_v23 = vpop.permute.xlu0 %2794  ;;  %510 = vmatprep.mubr.f32.mxu1 %v16462_v0 }
 0x160   : > { %11029 = vmatpush1.msk.msra.mxu0 %vm731_vm4, %v2284_v21  ;;  %2266 = vmatprep.mubr.f32.mxu0 %v16462_v0  ;;  %v532_v26 = vpop.permute.xlu1 %531  ;;  %v2798_v44 = vsel %vm16429_vm1, %v14302_v14, %v2795_v23 }
 0x161   : > { %11032 = vmatprep.subr.msk.mxu0 %vm841_vm6, %v2388_v22 }
 0x162   : > { %10967 = vmatmul.mubr.msk.f32.gmra.mrb[2].mxu1 %vm433_vm2, %v432_v24 }
 0x163   : > { %11027 = vmatmul.mubr.msk.f32.gmra.mrb[2].mxu0 %vm433_vm2, %v2178_v25  ;;  %v530_v27 = vpop.permute.xlu0 %529  ;;  %613 = vmatprep.mubr.f32.mxu1 %v16462_v0 }
 0x164   : > { %2363 = vmatprep.mubr.f32.mxu0 %v16462_v0  ;;  %v535_v29 = vsel %vm533_vm11, %v530_v27, %v532_v26  ;;  %v2896_v49 = vpop.permute.xlu1 %2895 }
 0x165   : > { %10968 = vmatprep.subr.msk.mxu1 %vm522_vm12, %v535_v29 }
 0x167   : > { %11030 = vmatmul.mubr.msk.f32.vlgmr.msra.gmra.mrb[0].mxu0 %vm433_vm2, %v2291_v28  ;;  %v528_v32 = vpop.permute.xlu0 %527 }
 0x168   : > { %11033 = vmatpush1.msk.msra.mxu0 %vm840_vm7, %v2387_v30  ;;  %2369 = vmatprep.mubr.f32.mxu0 %v16462_v0  ;;  %v534_v35 = vsel %vm533_vm11, %v528_v32, %v530_v27  ;;  %v2894_v53 = vpop.permute.xlu1 %2893 }
 0x169   : > { %11036 = vmatprep.subr.msk.mxu0 %vm410_vm9, %v2491_v31  ;;  %10969 = vmatpush1.msk.msra.mxu1 %vm521_vm13, %v534_v35  ;;  %v2900_v55 = vsel %vm16428_vm8, %v2894_v53, %v2896_v49 }
 0x16a   : > { %10970 = vmatmul.mubr.msk.f32.vlgmr.msra.gmra.mrb[0].mxu1 %vm433_vm2, %v541_v33 }
 0x16b   : > { %11031 = vmatmul.mubr.msk.f32.gmra.mrb[2].mxu0 %vm433_vm2, %v2292_v34  ;;  %619 = vmatprep.mubr.f32.mxu1 %v16462_v0  ;;  %v2898_v47 = vpop.permute.xlu0 %2897 }
 0x16c   : > { %2466 = vmatprep.mubr.f32.mxu0 %v16462_v0  ;;  %v2901_v51 = vsel %vm16428_vm8, %v2896_v49, %v2898_v47 }
 0x16e   : > { %10971 = vmatmul.mubr.msk.f32.gmra.mrb[2].mxu1 %vm433_vm2, %v542_v2 }
 0x16f   : > { %11034 = vmatmul.mubr.msk.f32.vlgmr.msra.gmra.mrb[0].mxu0 %vm433_vm2, %v2394_v36  ;;  %3152 = vmatprep.mubr.f32.mxu1 %v16462_v0 }
 0x170   : > { %11037 = vmatpush1.msk.msra.mxu0 %vm409_vm10, %v2490_v37  ;;  %2472 = vmatprep.mubr.f32.mxu0 %v16462_v0 }
 0x171   : > { %11040 = vmatprep.subr.msk.mxu0 %vm522_vm12, %v2594_v38 }
 0x173   : > { %11035 = vmatmul.mubr.msk.f32.gmra.mrb[2].mxu0 %vm433_vm2, %v2395_v39 }
 0x174   : > { %2569 = vmatprep.mubr.f32.mxu0 %v16462_v0 }
 0x177   : > { %11038 = vmatmul.mubr.msk.f32.vlgmr.msra.gmra.mrb[0].mxu0 %vm433_vm2, %v2497_v1 }
 0x178   : > { %11041 = vmatpush1.msk.msra.mxu0 %vm521_vm13, %v2593_v41  ;;  %2575 = vmatprep.mubr.f32.mxu0 %v16462_v0 }
 0x179   : > { %2709 = vmatprep.subr.mxu0 %v2700_v40  ;;  %v404_v4 = vpop.permute.xlu1 %403 }
 0x17b   : > { %11039 = vmatmul.mubr.msk.f32.gmra.mrb[2].mxu0 %vm433_vm2, %v2498_v42 }
 0x17c   : > { %2672 = vmatprep.mubr.f32.mxu0 %v16462_v0  ;;  %v399_v63 = vpop.permute.xlu0 %398 }
 0x17f   : > { %11042 = vmatmul.mubr.msk.f32.vlgmr.msra.gmra.mrb[0].mxu0 %vm433_vm2, %v2600_v43 }
 0x180   : > { %2710 = vmatpush1.msra.mxu0 %v2699_v45  ;;  %2678 = vmatprep.mubr.f32.mxu0 %v16462_v0 }
 0x181   : > { %11046 = vmatprep.subr.msk.mxu0 %vm732_vm3, %v2798_v44 }
 0x183   : > { %11043 = vmatmul.mubr.msk.f32.gmra.mrb[2].mxu0 %vm433_vm2, %v2601_v46 }
 0x184   : > { %2773 = vmatprep.mubr.f32.mxu0 %v16462_v0 }
 0x187   : > { %11044 = vmatmul.mubr.msk.f32.vlgmr.msra.gmra.mrb[0].mxu0 %vm433_vm2, %v2690_v48 }
 0x188   : > { %11047 = vmatpush1.msk.msra.mxu0 %vm731_vm4, %v2797_v50  ;;  %2779 = vmatprep.mubr.f32.mxu0 %v16462_v0 }
 0x189   : > { %11050 = vmatprep.subr.msk.mxu0 %vm841_vm6, %v2901_v51 }
 0x18b   : > { %11045 = vmatmul.mubr.msk.f32.gmra.mrb[2].mxu0 %vm433_vm2, %v2691_v52 }
 0x18c   : > { %2876 = vmatprep.mubr.f32.mxu0 %v16462_v0 }
 0x18f   : > { %11048 = vmatmul.mubr.msk.f32.vlgmr.msra.gmra.mrb[0].mxu0 %vm433_vm2, %v2804_v54 }
 0x190   : > { %11051 = vmatpush1.msk.msra.mxu0 %vm840_vm7, %v2900_v55  ;;  %2882 = vmatprep.mubr.f32.mxu0 %v16462_v0 }
 0x193   : > { %11049 = vmatmul.mubr.msk.f32.gmra.mrb[2].mxu0 %vm433_vm2, %v2805_v56 }
 0x194   : > { %2979 = vmatprep.mubr.f32.mxu0 %v16462_v0 }
 0x197   : > { %11052 = vmatmul.mubr.msk.f32.vlgmr.msra.gmra.mrb[0].mxu0 %vm433_vm2, %v2907_v57 }
 0x198   : > { %2985 = vmatprep.mubr.f32.mxu0 %v16462_v0 }
 0x19b   : > { %11053 = vmatmul.mubr.msk.f32.gmra.mrb[2].mxu0 %vm433_vm2, %v2908_v58 }
 0x19c   : > { %6657 = vmatprep.mubr.f32.mxu0 %v16462_v0 }
 0x23d   : > { %v615_v59 = vpop.f32.mrb[0].mxu1 }
 0x23e   : > { %v617_v60 = vpop.f32.mrb[1].mxu1  ;;  %v11957_v3 = vadd.f32 %v615_v59, %v399_v63  ;;  %v3072_v59 = vld [vmem:[#allocation5] sm:$0xff] }
 0x23f   : > { %v11959_v6 = vadd.f32 %v617_v60, %v399_v63 }
 0x241   : > { %v621_v61 = vpop.f32.mrb[2].mxu1 }
 0x242   : > { %v623_v62 = vpop.f32.mrb[3].mxu1  ;;  %v11961_v13 = vadd.f32 %v621_v61, %v404_v4 }
 0x243   : > { %v11963_v14 = vadd.f32 %v623_v62, %v404_v4 }
 0x26a   : > { %v2981_v5 = vpop.f32.mrb[0].mxu0 }
 0x26b   : > { %v11958_v7 = vadd.f32 %v11957_v3, %v2981_v5  ;;  %v2983_v8 = vpop.f32.mrb[1].mxu0 }
 0x26c   : > { %v11960_v10 = vadd.f32 %v11959_v6, %v2983_v8 }
 0x26d   : > { %vm2996_vm8 = vcmp.ge.f32.partialorder %v11958_v7, 0.0  ;;  %v3000_v11 = vmul.f32 0.01, %v11958_v7 }
 0x26e   : > { %vm2997_vm1 = vcmp.ge.f32.partialorder %v11960_v10, 0.0  ;;  %v3001_v15 = vmul.f32 0.01, %v11960_v10  ;;  %v2987_v16 = vpop.f32.mrb[2].mxu0 }
 0x26f   : > { %v14418_v17 = vsel %vm2996_vm8, %v11958_v7, %v3000_v11  ;;  %v11962_v18 = vadd.f32 %v11961_v13, %v2987_v16  ;;  %v2989_v19 = vpop.f32.mrb[3].mxu0  ;;  %vm14573_vm8 = vmpackc.low %vm522_vm12, %vm522_vm12 }
 0x270   : > { %v14420_v20 = vsel %vm2997_vm1, %v11960_v10, %v3001_v15  ;;  %v11964_v21 = vadd.f32 %v11963_v14, %v2989_v19  ;;  %vm14551_vm1 = vmpackc.low %vm410_vm9, %vm410_vm9  ;;  %v3073_v10 = vld [vmem:[#allocation5 + $0x8] sm:$0xff] }
 0x271   : > { %vm2998_vm2 = vcmp.ge.f32.partialorder %v11962_v18, 0.0  ;;  %v3002_v22 = vmul.f32 0.01, %v11962_v18  ;;  %v12444_v23 = vpack.i.bf16 %v14420_v20, %v14418_v17  ;;  %v14486_v31 = vpack.i.bf16 %v16462_v0, %v14420_v20  ;;  %vm14592_vm9 = vmpackc.low %vm521_vm13, %vm521_vm13 }
 0x272   : > { %vm2999_vm5 = vcmp.ge.f32.partialorder %v11964_v21, 0.0  ;;  %v3003_v24 = vmul.f32 0.01, %v11964_v21  ;;  %vm14628_vm13 = vmpackc.low %vm732_vm3, %vm732_vm3 }
 0x273   : > { %v14424_v25 = vsel %vm2998_vm2, %v11962_v18, %v3002_v22  ;;  %12445 = vrot.lane.b32.xlu1 %v12444_v23, %s16456_s28  ;;  %v3074_v18 = vld [vmem:[#allocation5 + $0x10] sm:$0xff] }
 0x274   : > { %v14427_v26 = vsel %vm2999_vm5, %v11964_v21, %v3003_v24  ;;  %v14436_v28 = vpack.i.bf16 %v14424_v25, %v14418_v17  ;;  %v11559_v30 = vpack.c.bf16 %v14424_v25, %v14418_v17  ;;  %vm14558_vm5 = vmpackc.low %vm409_vm10, %vm409_vm10  ;;  %vm16510_vm10 = vcmask 252928  }
 0x275   : > { %v12449_v27 = vpack.i.bf16 %v14427_v26, %v14424_v25  ;;  %v11557_v29 = vpack.c.bf16 %v14427_v26, %v14420_v20  ;;  %v14494_v32 = vpack.i.bf16 %v16462_v0, %v14427_v26  ;;  %vm16511_vm12 = vmmov %vm16510_vm10  ;;  %v4582_v26 = vld [vmem:[#allocation5 + $0x160] sm:$0xff] }
 0x276   : > { %vm16514_vm3 = vmmov %vm16510_vm10 }
 0x277   : > { %12450 = vrot.lane.b32.xlu0 %v12449_v27, %s16456_s28  ;;  %12455 = vrot.lane.b32.xlu1 %v16462_v0, %s16456_s28  ;;  %vm16515_vm2 = vmmov %vm16514_vm3 }
 0x27b   : > { %12460 = vrot.lane.b32.xlu0 %v12444_v23, %s16460_s11  ;;  %12465 = vrot.lane.b32.xlu1 %v12449_v27, %s16460_s11 }
 0x27f   : > { %12470 = vrot.lane.b32.xlu0 %v16462_v0, %s16460_s11  ;;  %12475 = vrot.lane.b32.xlu1 %v12444_v23, %s16458_s16 }
 0x283   : > { %12480 = vrot.lane.b32.xlu0 %v12449_v27, %s16458_s16  ;;  %12485 = vrot.lane.b32.xlu1 %v16462_v0, %s16458_s16 }
 0x287   : > { %12490 = vrot.lane.b32.xlu0 %v12444_v23, %s16454_s29  ;;  %12495 = vrot.lane.b32.xlu1 %v12449_v27, %s16454_s29 }
 0x28b   : > { %12500 = vrot.lane.b32.xlu0 %v16462_v0, %s16454_s29  ;;  %12505 = vrot.lane.b32.xlu1 %v12444_v23, %s16451_s13 }
 0x28f   : > { %12510 = vrot.lane.b32.xlu0 %v12449_v27, %s16451_s13  ;;  %12515 = vrot.lane.b32.xlu1 %v16462_v0, %s16451_s13  ;;  %s16580_s13 = smov 30  }
 0x293   : > { %12520 = vrot.lane.b32.xlu0 %v12444_v23, %s16449_s26  ;;  %12525 = vrot.lane.b32.xlu1 %v12449_v27, %s16449_s26 }
 0x297   : > { %12530 = vrot.lane.b32.xlu0 %v16462_v0, %s16449_s26  ;;  %12535 = vrot.lane.b32.xlu1 %v12444_v23, %s16447_s27  ;;  %s16581_s26 = smov 18  }
 0x29b   : > { %12540 = vrot.lane.b32.xlu0 %v12449_v27, %s16447_s27  ;;  %12545 = vrot.lane.b32.xlu1 %v16462_v0, %s16447_s27  ;;  %s16582_s27 = smov 17  }
 0x29f   : > { %12550 = vrot.lane.b32.xlu0 %v12444_v23, %s16445_s12  ;;  %12555 = vrot.lane.b32.xlu1 %v12449_v27, %s16445_s12 }
 0x2a3   : > { %12560 = vrot.lane.b32.xlu0 %v16462_v0, %s16445_s12  ;;  %12565 = vrot.lane.b32.xlu1 %v12444_v23, %s16443_s14  ;;  %s16583_s12 = smov 16  }
 0x2a7   : > { %12570 = vrot.lane.b32.xlu0 %v12449_v27, %s16443_s14  ;;  %12575 = vrot.lane.b32.xlu1 %v16462_v0, %s16443_s14  ;;  %s16587_s14 = smov 15  }
 0x2ab   : > { %12580 = vrot.lane.b32.xlu0 %v12444_v23, %s16441_s17  ;;  %12585 = vrot.lane.b32.xlu1 %v12449_v27, %s16441_s17 }
 0x2af   : > { %12590 = vrot.lane.b32.xlu0 %v16462_v0, %s16441_s17  ;;  %12595 = vrot.lane.b32.xlu1 %v12444_v23, %s16439_s19  ;;  %s16603_s17 = smov 14  }
 0x2b3   : > { %12600 = vrot.lane.b32.xlu0 %v12449_v27, %s16439_s19  ;;  %12605 = vrot.lane.b32.xlu1 %v16462_v0, %s16439_s19  ;;  %s16509_s19 = smov 94  }
 0x2b7   : > { %12610 = vrot.lane.b32.xlu0 %v12444_v23, %s16437_s20  ;;  %12615 = vrot.lane.b32.xlu1 %v12449_v27, %s16437_s20 }
 0x2bb   : > { %12620 = vrot.lane.b32.xlu0 %v16462_v0, %s16437_s20  ;;  %12625 = vrot.lane.b32.xlu1 %v14486_v31, %s16435_s21  ;;  %s16508_s20 = smov 95  }
 0x2bf   : > { %12630 = vrot.lane.b32.xlu0 %v14494_v32, %s16435_s21  ;;  %12635 = vrot.lane.b32.xlu1 %v14436_v28, %s16435_s21  ;;  %s16505_s21 = smov 96  }
 0x2c3   : > { %12640 = vrot.lane.b32.xlu0 %v14486_v31, %s16433_s22  ;;  %12645 = vrot.lane.b32.xlu1 %v14494_v32, %s16433_s22 }
 0x2c7   : > { %12650 = vrot.lane.b32.xlu0 %v14436_v28, %s16433_s22  ;;  %12655 = vrot.lane.b32.xlu1 %v14486_v31, %s16431_s15  ;;  %s16498_s22 = smov 97  }
 0x2cb   : > { %12660 = vrot.lane.b32.xlu0 %v14494_v32, %s16431_s15  ;;  %12665 = vrot.lane.b32.xlu1 %v14436_v28, %s16431_s15  ;;  %s16497_s15 = smov 98  }
 0x2cf   : > { %12670 = vrot.lane.b32.xlu0 %v14486_v31, %s16493_s23  ;;  %12675 = vrot.lane.b32.xlu1 %v14494_v32, %s16493_s23 }
 0x2d3   : > { %12680 = vrot.lane.b32.xlu0 %v14436_v28, %s16493_s23  ;;  %12685 = vrot.lane.b32.xlu1 %v14486_v31, %s16494_s25 }
 0x2d7   : > { %12690 = vrot.lane.b32.xlu0 %v14494_v32, %s16494_s25  ;;  %12695 = vrot.lane.b32.xlu1 %v14436_v28, %s16494_s25 }
 0x2db   : > { %12700 = vrot.lane.b32.xlu0 %v14486_v31, %s16495_s18  ;;  %12705 = vrot.lane.b32.xlu1 %v14494_v32, %s16495_s18 }
 0x2df   : > { %12710 = vrot.lane.b32.xlu0 %v14436_v28, %s16495_s18  ;;  %12715 = vrot.lane.b32.xlu1 %v14486_v31, %s16496_s24 }
 0x2e3   : > { %12720 = vrot.lane.b32.xlu0 %v14494_v32, %s16496_s24  ;;  %12725 = vrot.lane.b32.xlu1 %v14436_v28, %s16496_s24 }
 0x2e5   : > { %v12446_v33 = vpop.permute.xlu1 %12445 }
 0x2e6   : > { %v12448_v34 = vunpack.i.h.bf16 %v12446_v33  ;;  %v12447_v35 = vunpack.i.l.bf16 %v12446_v33 }
 0x2e7   : > { %12730 = vrot.lane.b32.xlu0 %v14486_v31, %s16497_s15  ;;  %12735 = vrot.lane.b32.xlu1 %v14494_v32, %s16497_s15 }
 0x2e8   : > { %v3061_v40 = vsel %vm424_vm15, %v12447_v35, %v12448_v34 }
 0x2e9   : > { %v12456_v2 = vpop.permute.xlu1 %12455  ;;  %v12451_v36 = vpop.permute.xlu0 %12450 }
 0x2ea   : > { %v12458_v37 = vunpack.i.h.bf16 %v12456_v2  ;;  %v12457_v38 = vunpack.i.l.bf16 %v12456_v2  ;;  %v12453_v39 = vunpack.i.h.bf16 %v12451_v36  ;;  %v12452_v1 = vunpack.i.l.bf16 %v12451_v36  ;;  %v3075_v2 = vld [vmem:[#allocation5 + $0x18] sm:$0xff] }
 0x2eb   : > { %12740 = vrot.lane.b32.xlu0 %v14436_v28, %s16497_s15  ;;  %12745 = vrot.lane.b32.xlu1 %v14486_v31, %s16498_s22 }
 0x2ec   : > { %v3060_v41 = vsel %vm424_vm15, %v12457_v38, %v12447_v35  ;;  %v3062_v42 = vsel %vm424_vm15, %v12458_v37, %v12452_v1  ;;  %v3063_v43 = vsel %vm424_vm15, %v12452_v1, %v12453_v39  ;;  %v3012_v38 = vld [vmem:[%s16384_s4] sm:$0xff] }
 0x2ed   : > { %v11492_v45 = vpack.c.bf16 %v3062_v42, %v3060_v41  ;;  %v12466_v46 = vpop.permute.xlu1 %12465  ;;  %v12461_v47 = vpop.permute.xlu0 %12460  ;;  %v11489_v48 = vpack.c.bf16 %v3063_v43, %v3061_v40  ;;  %v3013_v43 = vld [vmem:[%s16384_s4 + $0x8] sm:$0xff] }
 0x2ee   : > { %v12468_v50 = vunpack.i.h.bf16 %v12466_v46  ;;  %v12467_v51 = vunpack.i.l.bf16 %v12466_v46  ;;  %v12463_v52 = vunpack.i.h.bf16 %v12461_v47  ;;  %v12462_v53 = vunpack.i.l.bf16 %v12461_v47  ;;  %v3211_v46 = vld [vmem:[#allocation5 + $0x28] sm:$0xff]  ;;  %v3212_v47 = vld [vmem:[#allocation5 + $0x30] sm:$0xff] }
 0x2ef   : > { %12750 = vrot.lane.b32.xlu0 %v14494_v32, %s16498_s22  ;;  %12755 = vrot.lane.b32.xlu1 %v14436_v28, %s16498_s22 }
 0x2f0   : > { %v3200_v54 = vsel %vm533_vm11, %v12467_v51, %v12468_v50  ;;  %v3198_v55 = vsel %vm533_vm11, %v12462_v53, %v12463_v52  ;;  %11491 = vmatprep.subr.msk.bf16.mxu1 %vm14551_vm1, %v11489_v48 }
 0x2f1   : > { %11494 = vmatpush1.bf16.msk.msra.mxu1 %vm14558_vm5, %v11492_v45  ;;  %v12476_v57 = vpop.permute.xlu1 %12475  ;;  %v12471_v58 = vpop.permute.xlu0 %12470  ;;  %v11495_v60 = vpack.c.bf16 %v3200_v54, %v3198_v55  ;;  %v3014_v45 = vld [vmem:[%s16384_s4 + $0x10] sm:$0xff]  ;;  %v3213_v55 = vld [vmem:[#allocation5 + $0x38] sm:$0xff] }
 0x2f2   : > { %v12473_v61 = vunpack.i.h.bf16 %v12471_v58  ;;  %v12472_v62 = vunpack.i.l.bf16 %v12471_v58  ;;  %v12478_v63 = vunpack.i.h.bf16 %v12476_v57  ;;  %v12477_v3 = vunpack.i.l.bf16 %v12476_v57 }
 0x2f3   : > { %12760 = vrot.lane.b32.xlu0 %v14486_v31, %s16505_s21  ;;  %12765 = vrot.lane.b32.xlu1 %v14494_v32, %s16505_s21 }
 0x2f4   : > { %v3199_v4 = vsel %vm533_vm11, %v12473_v61, %v12467_v51  ;;  %v3197_v5 = vsel %vm533_vm11, %v12472_v62, %v12462_v53  ;;  %11058 = vmatmul.mubr.msk.f32.vlgmr.msra.gmra.mrb[4].mxu1 %vm1164_vm14, %v3072_v59  ;;  %11497 = vmatprep.subr.msk.bf16.mxu1 %vm14573_vm8, %v11495_v60  ;;  %v3341_v15 = vsel %vm16453_vm0, %v12477_v3, %v12478_v63  ;;  %v3324_v62 = vld [vmem:[#allocation5 + $0x40] sm:$0xff] }
 0x2f5   : > { %v11498_v6 = vpack.c.bf16 %v3199_v4, %v3197_v5  ;;  %v12486_v7 = vpop.permute.xlu1 %12485  ;;  %v12481_v8 = vpop.permute.xlu0 %12480  ;;  %3158 = vmatprep.mubr.f32.mxu1 %v16462_v0 }
 0x2f6   : > { %v12483_v13 = vunpack.i.h.bf16 %v12481_v8  ;;  %v12482_v14 = vunpack.i.l.bf16 %v12481_v8  ;;  %v12488_v23 = vunpack.i.h.bf16 %v12486_v7  ;;  %v12487_v24 = vunpack.i.l.bf16 %v12486_v7  ;;  %v3325_v8 = vld [vmem:[#allocation5 + $0x48] sm:$0xff] }
 0x2f7   : > { %12770 = vrot.lane.b32.xlu0 %v14436_v28, %s16505_s21  ;;  %12775 = vrot.lane.b32.xlu1 %v14486_v31, %s16508_s20 }
 0x2f8   : > { %11059 = vmatmul.mubr.msk.f32.gmra.mrb[6].mxu1 %vm1164_vm14, %v3073_v10  ;;  %v3343_v16 = vsel %vm16453_vm0, %v12482_v14, %v12483_v13  ;;  %v3340_v36 = vsel %vm16453_vm0, %v12487_v24, %v12477_v3  ;;  %v3342_v37 = vsel %vm16453_vm0, %v12488_v23, %v12482_v14  ;;  %vm14690_vm0 = vmpackc.low %vm840_vm7, %vm840_vm7 }
 0x2f9   : > { %11500 = vmatpush1.bf16.msk.msra.mxu1 %vm14592_vm9, %v11498_v6  ;;  %3164 = vmatprep.mubr.f32.mxu1 %v16462_v0  ;;  %v11501_v19 = vpack.c.bf16 %v3343_v16, %v3341_v15  ;;  %v12496_v21 = vpop.permute.xlu1 %12495  ;;  %v12491_v22 = vpop.permute.xlu0 %12490  ;;  %v11503_v40 = vpack.c.bf16 %v3342_v37, %v3340_v36 }
 0x2fa   : > { %v12498_v27 = vunpack.i.h.bf16 %v12496_v21  ;;  %v12497_v33 = vunpack.i.l.bf16 %v12496_v21  ;;  %v12493_v34 = vunpack.i.h.bf16 %v12491_v22  ;;  %v12492_v35 = vunpack.i.l.bf16 %v12491_v22  ;;  %v3327_v22 = vld [vmem:[#allocation5 + $0x58] sm:$0xff] }
 0x2fb   : > { %12780 = vrot.lane.b32.xlu0 %v14494_v32, %s16508_s20  ;;  %12785 = vrot.lane.b32.xlu1 %v14436_v28, %s16508_s20 }
 0x2fc   : > { %11060 = vmatmul.mubr.msk.f32.gmra.mrb[8].mxu1 %vm1164_vm14, %v3074_v18  ;;  %11502 = vmatprep.subr.bf16.mxu1 %v11501_v19  ;;  %v3472_v39 = vsel %vm16510_vm10, %v12497_v33, %v12498_v27  ;;  %v3470_v1 = vsel %vm16511_vm12, %v12492_v35, %v12493_v34  ;;  %vm16516_vm10 = vcmask 244736   ;;  %vm14659_vm12 = vmpackc.low %vm731_vm4, %vm731_vm4  ;;  %v3482_v34 = vld [vmem:[#allocation5 + $0x60] sm:$0xff] }
 0x2fd   : > { %3170 = vmatprep.mubr.f32.mxu1 %v16462_v0  ;;  %v12501_v41 = vpop.permute.xlu0 %12500  ;;  %v11505_v42 = vpack.c.bf16 %v3472_v39, %v3470_v1  ;;  %v12506_v50 = vpop.permute.xlu1 %12505 }
 0x2fe   : > { %v12503_v51 = vunpack.i.h.bf16 %v12501_v41  ;;  %v12502_v52 = vunpack.i.l.bf16 %v12501_v41  ;;  %v12508_v57 = vunpack.i.h.bf16 %v12506_v50  ;;  %v12507_v58 = vunpack.i.l.bf16 %v12506_v50  ;;  %v3620_v50 = vld [vmem:[#allocation5 + $0x80] sm:$0xff] }
 0x2ff   : > { %12790 = vrot.lane.b32.xlu0 %v14486_v31, %s16509_s19  ;;  %12795 = vrot.lane.b32.xlu1 %v14494_v32, %s16509_s19  ;;  %v3210_v31 = vld [vmem:[#allocation5 + $0x20] sm:$0xff]  ;;  %v11479_v32 = vld [vmem:[%s16387_s7 + $0x40] sm:$0xff] }
 0x300   : > { %11061 = vmatmul.mubr.msk.f32.gmra.mrb[10].mxu1 %vm1164_vm14, %v3075_v2  ;;  %v3471_v59 = vsel %vm16514_vm3, %v12503_v51, %v12497_v33  ;;  %v3469_v60 = vsel %vm16515_vm2, %v12502_v52, %v12492_v35  ;;  %vm14666_vm3 = vmpackc.low %vm841_vm6, %vm841_vm6 }
 0x301   : > { %3290 = vmatprep.mubr.f32.mxu1 %v16462_v0  ;;  %v12511_v48 = vpop.permute.xlu0 %12510  ;;  %vm16521_vm2 = vmmov %vm16516_vm10  ;;  %v11508_v5 = vpack.c.bf16 %v3471_v59, %v3469_v60  ;;  %v12516_v6 = vpop.permute.xlu1 %12515 }
 0x302   : > { %v12513_v53 = vunpack.i.h.bf16 %v12511_v48  ;;  %v12512_v54 = vunpack.i.l.bf16 %v12511_v48  ;;  %v3608_v4 = vsel %vm16521_vm2, %v12507_v58, %v12508_v57  ;;  %v12518_v14 = vunpack.i.h.bf16 %v12516_v6  ;;  %vm16522_vm4 = vmmov %vm16521_vm2  ;;  %v3622_v57 = vld [vmem:[#allocation5 + $0x90] sm:$0xff] }
 0x303   : > { %12800 = vrot.lane.b32.xlu0 %v14436_v28, %s16509_s19  ;;  %3018 = vperm.xlu1 %12443, %v3012_v38   ;;  %v3015_v28 = vld [vmem:[%s16384_s4 + $0x18] sm:$0xff]  ;;  %v12517_v15 = vunpack.i.l.bf16 %v12516_v6  ;;  %vm16523_vm6 = vmmov %vm16521_vm2 }
 0x304   : > { %11066 = vmatmul.mubr.msk.f32.vlgmr.msra.gmra.mrb[4].mxu1 %vm1164_vm14, %v3210_v31  ;;  %v3610_v61 = vsel %vm16516_vm10, %v12512_v54, %v12513_v53  ;;  %v3609_v24 = vsel %vm16523_vm6, %v12518_v14, %v12512_v54  ;;  %vm16524_vm10 = vcmask 146432   ;;  %v3483_v38 = vld [vmem:[#allocation5 + $0x68] sm:$0xff]  ;;  %vm16530_vm6 = vcmask 138240  }
 0x305   : > { %11504 = vmatpush1.bf16.msra.mxu1 %v11503_v40  ;;  %3296 = vmatprep.mubr.f32.mxu1 %v16462_v0  ;;  %v11511_v7 = vpack.c.bf16 %v3610_v61, %v3608_v4  ;;  %v12526_v10 = vpop.permute.xlu1 %12525  ;;  %v12521_v13 = vpop.permute.xlu0 %12520  ;;  %v3607_v23 = vsel %vm16522_vm4, %v12517_v15, %v12507_v58  ;;  %vm16525_vm2 = vmmov %vm16524_vm10 }
 0x306   : > { %11507 = vmatprep.subr.msk.bf16.mxu1 %vm14628_vm13, %v11505_v42  ;;  %v12528_v16 = vunpack.i.h.bf16 %v12526_v10  ;;  %v12527_v18 = vunpack.i.l.bf16 %v12526_v10  ;;  %v12523_v19 = vunpack.i.h.bf16 %v12521_v13  ;;  %v12522_v21 = vunpack.i.l.bf16 %v12521_v13  ;;  %vm16528_vm7 = vmmov %vm16525_vm2  ;;  %v3758_v10 = vld [vmem:[#allocation5 + $0xa0] sm:$0xff] }
 0x307   : > { %3023 = vperm.xlu0 %12442, %v3013_v43   ;;  %3028 = vperm.xlu1 %12443, %v3014_v45   ;;  %v11514_v2 = vpack.c.bf16 %v3609_v24, %v3607_v23  ;;  %v3485_v43 = vld [vmem:[#allocation5 + $0x78] sm:$0xff]  ;;  %vm16529_vm4 = vmmov %vm16525_vm2 }
 0x308   : > { %11067 = vmatmul.mubr.msk.f32.gmra.mrb[6].mxu1 %vm1164_vm14, %v3211_v46  ;;  %v3748_v27 = vsel %vm16524_vm10, %v12527_v18, %v12528_v16  ;;  %v3746_v33 = vsel %vm16525_vm2, %v12522_v21, %v12523_v19  ;;  %vm16531_vm10 = vmmov %vm16530_vm6  ;;  %v3759_v19 = vld [vmem:[#allocation5 + $0xa8] sm:$0xff] }
 0x309   : > { %3302 = vmatprep.mubr.f32.mxu1 %v16462_v0  ;;  %v12531_v36 = vpop.permute.xlu0 %12530  ;;  %v11517_v37 = vpack.c.bf16 %v3748_v27, %v3746_v33  ;;  %v12536_v1 = vpop.permute.xlu1 %12535  ;;  %vm16532_vm2 = vmmov %vm16530_vm6 }
 0x30a   : > { %v12533_v31 = vunpack.i.h.bf16 %v12531_v36  ;;  %v12532_v40 = vunpack.i.l.bf16 %v12531_v36  ;;  %v12538_v45 = vunpack.i.h.bf16 %v12536_v1  ;;  %v12537_v46 = vunpack.i.l.bf16 %v12536_v1  ;;  %v3896_v1 = vld [vmem:[#allocation5 + $0xc0] sm:$0xff] }
 0x30b   : > { %3033 = vperm.xlu0 %12442, %v3015_v28   ;;  %12805 = vrot.lane.b32.xlu1 %v16462_v0, %s16456_s28 }
 0x30c   : > { %11068 = vmatmul.mubr.msk.f32.gmra.mrb[8].mxu1 %vm1164_vm14, %v3212_v47  ;;  %v3747_v28 = vsel %vm16528_vm7, %v12533_v31, %v12527_v18  ;;  %v3745_v47 = vsel %vm16529_vm4, %v12532_v40, %v12522_v21  ;;  %v3884_v51 = vsel %vm16531_vm10, %v12537_v46, %v12538_v45  ;;  %vm16533_vm7 = vmmov %vm16532_vm2  ;;  %v3760_v21 = vld [vmem:[#allocation5 + $0xb0] sm:$0xff]  ;;  %vm16534_vm4 = vcmask 121856  }
 0x30d   : > { %3308 = vmatprep.mubr.f32.mxu1 %v16462_v0  ;;  %v12541_v39 = vpop.permute.xlu0 %12540  ;;  %v11520_v52 = vpack.c.bf16 %v3747_v28, %v3745_v47  ;;  %v12546_v53 = vpop.permute.xlu1 %12545  ;;  %v3898_v45 = vld [vmem:[#allocation5 + $0xd0] sm:$0xff]  ;;  %vm16536_vm10 = vmmov %vm16534_vm4 }
 0x30e   : > { %v12543_v41 = vunpack.i.h.bf16 %v12541_v39  ;;  %v12542_v42 = vunpack.i.l.bf16 %v12541_v39  ;;  %v12548_v60 = vunpack.i.h.bf16 %v12546_v53  ;;  %v12547_v61 = vunpack.i.l.bf16 %v12546_v53 }
 0x30f   : > { %12810 = vrot.lane.b32.xlu0 %v16462_v0, %s16456_s28  ;;  %12815 = vrot.lane.b32.xlu1 %v16462_v0, %s16460_s11 }
 0x310   : > { %11069 = vmatmul.mubr.msk.f32.gmra.mrb[10].mxu1 %vm1164_vm14, %v3213_v55  ;;  %v3886_v48 = vsel %vm16530_vm6, %v12542_v42, %v12543_v41  ;;  %v3621_v55 = vld [vmem:[#allocation5 + $0x88] sm:$0xff]  ;;  %vm16535_vm6 = vmmov %vm16534_vm4 }
 0x311   : > { %3424 = vmatprep.mubr.f32.mxu1 %v16462_v0  ;;  %v11523_v54 = vpack.c.bf16 %v3886_v48, %v3884_v51  ;;  %v12556_v58 = vpop.permute.xlu1 %12555  ;;  %v12551_v59 = vpop.permute.xlu0 %12550 }
 0x312   : > { %v12557_v4 = vunpack.i.l.bf16 %v12556_v58  ;;  %v12552_v6 = vunpack.i.l.bf16 %v12551_v59 }
 0x313   : > { %12820 = vrot.lane.b32.xlu0 %v16462_v0, %s16460_s11  ;;  %12825 = vrot.lane.b32.xlu1 %v16462_v0, %s16458_s16 }
 0x314   : > { %11070 = vmatmul.mubr.msk.f32.vlgmr.msra.gmra.mrb[4].mxu1 %vm1164_vm14, %v3324_v62  ;;  %v12558_v62 = vunpack.i.h.bf16 %v12556_v58 }
 0x315   : > { %11510 = vmatpush1.bf16.msk.msra.mxu1 %vm14659_vm12, %v11508_v5  ;;  %3430 = vmatprep.mubr.f32.mxu1 %v16462_v0  ;;  %v12553_v5 = vunpack.i.h.bf16 %v12551_v59  ;;  %v12561_v16 = vpop.permute.xlu0 %12560  ;;  %v12566_v23 = vpop.permute.xlu1 %12565 }
 0x316   : > { %11513 = vmatprep.subr.msk.bf16.mxu1 %vm14666_vm3, %v11511_v7  ;;  %v3623_v7 = vld [vmem:[#allocation5 + $0x98] sm:$0xff]  ;;  %v4029_v14 = vsel %vm1164_vm14, %v12557_v4, %v12558_v62  ;;  %v12563_v24 = vunpack.i.h.bf16 %v12561_v16  ;;  %v12562_v27 = vunpack.i.l.bf16 %v12561_v16  ;;  %v12568_v36 = vunpack.i.h.bf16 %v12566_v23 }
 0x317   : > { %v4027_v13 = vsel %vm1164_vm14, %v12552_v6, %v12553_v5  ;;  %v4011_v5 = vld [vmem:[#allocation5 + $0xe8] sm:$0xff]  ;;  %12830 = vrot.lane.b32.xlu0 %v16462_v0, %s16458_s16  ;;  %12835 = vrot.lane.b32.xlu1 %v16462_v0, %s16454_s29 }
 0x318   : > { %11071 = vmatmul.mubr.msk.f32.gmra.mrb[6].mxu1 %vm1164_vm14, %v3325_v8  ;;  %v3883_v8 = vsel %vm16532_vm2, %v12547_v61, %v12537_v46  ;;  %v11529_v18 = vpack.c.bf16 %v4029_v14, %v4027_v13  ;;  %vm16537_vm2 = vmmov %vm16534_vm4 }
 0x319   : > { %3436 = vmatprep.mubr.f32.mxu1 %v16462_v0  ;;  %v12576_v41 = vpop.permute.xlu1 %12575 }
 0x31a   : > { %v12578_v47 = vunpack.i.h.bf16 %v12576_v41  ;;  %v12577_v48 = vunpack.i.l.bf16 %v12576_v41 }
 0x31b   : > { %12840 = vrot.lane.b32.xlu0 %v16462_v0, %s16454_s29  ;;  %12845 = vrot.lane.b32.xlu1 %v16462_v0, %s16580_s13  ;;  %s16604_s29 = smov 2  }
 0x31c   : > { %11072 = vmatmul.mubr.msk.f32.gmra.mrb[8].mxu1 %vm1164_vm14, %v3326_v9  ;;  %v3885_v9 = vsel %vm16533_vm7, %v12548_v60, %v12542_v42  ;;  %vm16538_vm7 = vcmask 113664   ;;  %v4010_v60 = vld [vmem:[#allocation5 + $0xe0] sm:$0xff] }
 0x31d   : > { %3442 = vmatprep.mubr.f32.mxu1 %v16462_v0  ;;  %v11526_v15 = vpack.c.bf16 %v3885_v9, %v3883_v8  ;;  %v12586_v46 = vpop.permute.xlu1 %12585 }
 0x31e   : > { %v12587_v51 = vunpack.i.l.bf16 %v12586_v46 }
 0x31f   : > { %12850 = vrot.lane.b32.xlu0 %v16462_v0, %s16580_s13  ;;  %12855 = vrot.lane.b32.xlu1 %v16462_v0, %s16581_s26 }
 0x320   : > { %11073 = vmatmul.mubr.msk.f32.gmra.mrb[10].mxu1 %vm1164_vm14, %v3327_v22  ;;  %v12571_v22 = vpop.permute.xlu0 %12570 }
 0x321   : > { %3562 = vmatprep.mubr.f32.mxu1 %v16462_v0  ;;  %v12573_v33 = vunpack.i.h.bf16 %v12571_v22  ;;  %v12596_v8 = vpop.permute.xlu1 %12595 }
 0x322   : > { %v12598_v16 = vunpack.i.h.bf16 %v12596_v8 }
 0x323   : > { %12860 = vrot.lane.b32.xlu0 %v16462_v0, %s16581_s26  ;;  %12865 = vrot.lane.b32.xlu1 %v16462_v0, %s16582_s27 }
 0x324   : > { %11078 = vmatmul.mubr.msk.f32.vlgmr.msra.gmra.mrb[4].mxu1 %vm1164_vm14, %v3482_v34  ;;  %v12572_v34 = vunpack.i.l.bf16 %v12571_v22  ;;  %v12581_v28 = vpop.permute.xlu0 %12580 }
 0x325   : > { %11516 = vmatpush1.bf16.msk.msra.mxu1 %vm14690_vm0, %v11514_v2  ;;  %3568 = vmatprep.mubr.f32.mxu1 %v16462_v0  ;;  %v3761_v2 = vld [vmem:[#allocation5 + $0xb8] sm:$0xff]  ;;  %v12582_v53 = vunpack.i.l.bf16 %v12581_v28 }
 0x326   : > { %11519 = vmatprep.subr.msk.bf16.mxu1 %vm14551_vm1, %v11517_v37  ;;  %v12567_v37 = vunpack.i.l.bf16 %v12566_v23  ;;  %v4158_v39 = vsel %vm16534_vm4, %v12572_v34, %v12573_v33  ;;  %vm16539_vm4 = vmmov %vm16538_vm7  ;;  %v4168_v23 = vld [vmem:[#allocation5 + $0x100] sm:$0xff]  ;;  %v12606_v33 = vpop.permute.xlu1 %12605 }
 0x327   : > { %12870 = vrot.lane.b32.xlu0 %v16462_v0, %s16582_s27  ;;  %12875 = vrot.lane.b32.xlu1 %v16462_v0, %s16583_s12 }
 0x328   : > { %11079 = vmatmul.mubr.msk.f32.gmra.mrb[6].mxu1 %vm1164_vm14, %v3483_v38  ;;  %v4028_v38 = vsel %vm1164_vm14, %v12563_v24, %v12557_v4  ;;  %v4156_v31 = vsel %vm16535_vm6, %v12567_v37, %v12568_v36  ;;  %v12591_v62 = vpop.permute.xlu0 %12590  ;;  %vm16540_vm6 = vmmov %vm16539_vm4  ;;  %v4170_v36 = vld [vmem:[#allocation5 + $0x110] sm:$0xff] }
 0x329   : > { %3574 = vmatprep.mubr.f32.mxu1 %v16462_v0  ;;  %v11533_v42 = vpack.c.bf16 %v4158_v39, %v4156_v31  ;;  %v12593_v9 = vunpack.i.h.bf16 %v12591_v62  ;;  %v12607_v39 = vunpack.i.l.bf16 %v12606_v33 }
 0x32b   : > { %12880 = vrot.lane.b32.xlu0 %v16462_v0, %s16583_s12  ;;  %12885 = vrot.lane.b32.xlu1 %v16462_v0, %s16587_s14 }
 0x32c   : > { %11080 = vmatmul.mubr.msk.f32.gmra.mrb[8].mxu1 %vm1164_vm14, %v3484_v12  ;;  %v4026_v12 = vsel %vm1164_vm14, %v12562_v27, %v12552_v6  ;;  %v4012_v6 = vld [vmem:[#allocation5 + $0xf0] sm:$0xff] }
 0x32d   : > { %3580 = vmatprep.mubr.f32.mxu1 %v16462_v0  ;;  %v11531_v40 = vpack.c.bf16 %v4028_v38, %v4026_v12  ;;  %v12608_v12 = vunpack.i.h.bf16 %v12606_v33 }
 0x32f   : > { %12890 = vrot.lane.b32.xlu0 %v16462_v0, %s16587_s14  ;;  %12895 = vrot.lane.b32.xlu1 %v16462_v0, %s16603_s17 }
 0x330   : > { %11081 = vmatmul.mubr.msk.f32.gmra.mrb[10].mxu1 %vm1164_vm14, %v3485_v43  ;;  %v3897_v43 = vld [vmem:[#allocation5 + $0xc8] sm:$0xff] }
 0x331   : > { %3700 = vmatprep.mubr.f32.mxu1 %v16462_v0 }
 0x333   : > { %12900 = vrot.lane.b32.xlu0 %v16462_v0, %s16603_s17  ;;  %12905 = vrot.lane.b32.xlu1 %v16462_v0, %s16604_s29 }
 0x334   : > { %11086 = vmatmul.mubr.msk.f32.vlgmr.msra.gmra.mrb[4].mxu1 %vm1164_vm14, %v3620_v50  ;;  %v12588_v50 = vunpack.i.h.bf16 %v12586_v46 }
 0x335   : > { %11522 = vmatpush1.bf16.msk.msra.mxu1 %vm14558_vm5, %v11520_v52  ;;  %3706 = vmatprep.mubr.f32.mxu1 %v16462_v0  ;;  %v12583_v52 = vunpack.i.h.bf16 %v12581_v28 }
 0x336   : > { %11525 = vmatprep.subr.msk.bf16.mxu1 %vm14573_vm8, %v11523_v54  ;;  %v3899_v54 = vld [vmem:[#allocation5 + $0xd8] sm:$0xff]  ;;  %v4296_v58 = vsel %vm16538_vm7, %v12587_v51, %v12588_v50 }
 0x337   : > { %v4294_v59 = vsel %vm16539_vm4, %v12582_v53, %v12583_v52  ;;  %12910 = vrot.lane.b32.xlu0 %v16462_v0, %s16604_s29 }
 0x338   : > { %11087 = vmatmul.mubr.msk.f32.gmra.mrb[6].mxu1 %vm1164_vm14, %v3621_v55  ;;  %v4155_v55 = vsel %vm16536_vm10, %v12577_v48, %v12567_v37  ;;  %v11539_v4 = vpack.c.bf16 %v4296_v58, %v4294_v59  ;;  %vm16541_vm10 = vmmov %vm16539_vm4  ;;  %v12616_v37 = vpop.permute.xlu1 %12615 }
 0x339   : > { %3712 = vmatprep.mubr.f32.mxu1 %v16462_v0  ;;  %v12617_v31 = vunpack.i.l.bf16 %v12616_v37 }
 0x33c   : > { %11088 = vmatmul.mubr.msk.f32.gmra.mrb[8].mxu1 %vm1164_vm14, %v3622_v57  ;;  %v4157_v57 = vsel %vm16537_vm2, %v12578_v47, %v12572_v34  ;;  %vm16542_vm2 = vcmask 15360   ;;  %v4306_v47 = vld [vmem:[#allocation5 + $0x120] sm:$0xff] }
 0x33d   : > { %3718 = vmatprep.mubr.f32.mxu1 %v16462_v0  ;;  %v11536_v61 = vpack.c.bf16 %v4157_v57, %v4155_v55  ;;  %vm16543_vm7 = vmmov %vm16542_vm2  ;;  %v4309_v57 = vld [vmem:[#allocation5 + $0x138] sm:$0xff] }
 0x33e   : > { %vm16544_vm4 = vmmov %vm16542_vm2 }
 0x340   : > { %11089 = vmatmul.mubr.msk.f32.gmra.mrb[10].mxu1 %vm1164_vm14, %v3623_v7  ;;  %v12601_v7 = vpop.permute.xlu0 %12600 }
 0x341   : > { %3838 = vmatprep.mubr.f32.mxu1 %v16462_v0  ;;  %v12603_v13 = vunpack.i.h.bf16 %v12601_v7  ;;  %v12602_v14 = vunpack.i.l.bf16 %v12601_v7 }
 0x343   : > { %v4434_v22 = vsel %vm16542_vm2, %v12602_v14, %v12603_v13 }
 0x344   : > { %11094 = vmatmul.mubr.msk.f32.vlgmr.msra.gmra.mrb[4].mxu1 %vm1164_vm14, %v3758_v10  ;;  %v12592_v10 = vunpack.i.l.bf16 %v12591_v62  ;;  %v12611_v38 = vpop.permute.xlu0 %12610  ;;  %v4445_v62 = vld [vmem:[#allocation5 + $0x148] sm:$0xff] }
 0x345   : > { %11528 = vmatpush1.bf16.msk.msra.mxu1 %vm14592_vm9, %v11526_v15  ;;  %3844 = vmatprep.mubr.f32.mxu1 %v16462_v0  ;;  %v4013_v15 = vld [vmem:[#allocation5 + $0xf8] sm:$0xff]  ;;  %v12612_v41 = vunpack.i.l.bf16 %v12611_v38 }
 0x346   : > { %11530 = vmatprep.subr.bf16.mxu1 %v11529_v18  ;;  %v12597_v18 = vunpack.i.l.bf16 %v12596_v8 }
 0x348   : > { %11095 = vmatmul.mubr.msk.f32.gmra.mrb[6].mxu1 %vm1164_vm14, %v3759_v19  ;;  %v4295_v19 = vsel %vm16540_vm6, %v12593_v9, %v12587_v51  ;;  %v4432_v24 = vsel %vm16543_vm7, %v12597_v18, %v12598_v16  ;;  %vm16545_vm6 = vmmov %vm16542_vm2  ;;  %v4307_v51 = vld [vmem:[#allocation5 + $0x128] sm:$0xff]  ;;  %v12621_v52 = vpop.permute.xlu0 %12620  ;;  %v4447_v9 = vld [vmem:[#allocation5 + $0x158] sm:$0xff] }
 0x349   : > { %3850 = vmatprep.mubr.f32.mxu1 %v16462_v0  ;;  %v11545_v34 = vpack.c.bf16 %v4434_v22, %v4432_v24  ;;  %v12622_v55 = vunpack.i.l.bf16 %v12621_v52  ;;  %v4583_v16 = vld [vmem:[#allocation5 + $0x168] sm:$0xff] }
 0x34c   : > { %11096 = vmatmul.mubr.msk.f32.gmra.mrb[8].mxu1 %vm1164_vm14, %v3760_v21  ;;  %v4293_v21 = vsel %vm16541_vm10, %v12592_v10, %v12582_v53  ;;  %vm16546_vm10 = vcmask 7168   ;;  %v4308_v53 = vld [vmem:[#allocation5 + $0x130] sm:$0xff] }
 0x34d   : > { %3856 = vmatprep.mubr.f32.mxu1 %v16462_v0  ;;  %v11542_v27 = vpack.c.bf16 %v4295_v19, %v4293_v21  ;;  %vm16547_vm2 = vmmov %vm16546_vm10 }
 0x34e   : > { %vm16548_vm7 = vmmov %vm16547_vm2 }
 0x350   : > { %11097 = vmatmul.mubr.msk.f32.gmra.mrb[10].mxu1 %vm1164_vm14, %v3761_v2  ;;  %v4169_v2 = vld [vmem:[#allocation5 + $0x108] sm:$0xff] }
 0x351   : > { %3976 = vmatprep.mubr.f32.mxu1 %v16462_v0 }
 0x354   : > { %11102 = vmatmul.mubr.msk.f32.vlgmr.msra.gmra.mrb[4].mxu1 %vm1164_vm14, %v3896_v1  ;;  %v12618_v1 = vunpack.i.h.bf16 %v12616_v37  ;;  %v4696_v37 = vld [vmem:[#allocation5 + $0x180] sm:$0xff] }
 0x355   : > { %11532 = vmatpush1.bf16.msra.mxu1 %v11531_v40  ;;  %3982 = vmatprep.mubr.f32.mxu1 %v16462_v0  ;;  %v12613_v40 = vunpack.i.h.bf16 %v12611_v38 }
 0x356   : > { %11535 = vmatprep.subr.msk.bf16.mxu1 %vm14628_vm13, %v11533_v42  ;;  %v4171_v42 = vld [vmem:[#allocation5 + $0x118] sm:$0xff]  ;;  %v4572_v46 = vsel %vm16546_vm10, %v12617_v31, %v12618_v1  ;;  %v4697_v1 = vld [vmem:[#allocation5 + $0x188] sm:$0xff] }
 0x357   : > { %v4570_v28 = vsel %vm16547_vm2, %v12612_v41, %v12613_v40 }
 0x358   : > { %11103 = vmatmul.mubr.msk.f32.gmra.mrb[6].mxu1 %vm1164_vm14, %v3897_v43  ;;  %v4431_v43 = vsel %vm16544_vm4, %v12607_v39, %v12597_v18  ;;  %v11551_v50 = vpack.c.bf16 %v4572_v46, %v4570_v28  ;;  %vm16549_vm4 = vmmov %vm16547_vm2  ;;  %v4584_v18 = vld [vmem:[#allocation5 + $0x170] sm:$0xff]  ;;  %v4699_v28 = vld [vmem:[#allocation5 + $0x198] sm:$0xff] }
 0x359   : > { %3988 = vmatprep.mubr.f32.mxu1 %v16462_v0  ;;  %v4569_v59 = vsel %vm16549_vm4, %v12622_v55, %v12612_v41  ;;  %vm16554_vm4 = vcmask 1031168  }
 0x35c   : > { %11104 = vmatmul.mubr.msk.f32.gmra.mrb[8].mxu1 %vm1164_vm14, %v3898_v45  ;;  %v4433_v45 = vsel %vm16545_vm6, %v12608_v12, %v12602_v14  ;;  %vm16550_vm6 = vcmask 1039360  }
 0x35d   : > { %3994 = vmatprep.mubr.f32.mxu1 %v16462_v0  ;;  %v11548_v48 = vpack.c.bf16 %v4433_v45, %v4431_v43  ;;  %vm16551_vm10 = vmmov %vm16550_vm6 }
 0x35e   : > { %vm16552_vm2 = vmmov %vm16550_vm6 }
 0x360   : > { %11105 = vmatmul.mubr.msk.f32.gmra.mrb[10].mxu1 %vm1164_vm14, %v3899_v54  ;;  %v12623_v54 = vunpack.i.h.bf16 %v12621_v52 }
 0x361   : > { %4110 = vmatprep.mubr.f32.mxu1 %v16462_v0 }
 0x362   : > { %v4571_v58 = vsel %vm16548_vm7, %v12623_v54, %v12617_v31  ;;  %vm16553_vm7 = vmmov %vm16552_vm2  ;;  %v4698_v31 = vld [vmem:[#allocation5 + $0x190] sm:$0xff] }
 0x364   : > { %11106 = vmatmul.mubr.msk.f32.vlgmr.msra.gmra.mrb[4].mxu1 %vm1164_vm14, %v4010_v60  ;;  %v4444_v60 = vld [vmem:[#allocation5 + $0x140] sm:$0xff] }
 0x365   : > { %11538 = vmatpush1.bf16.msk.msra.mxu1 %vm14659_vm12, %v11536_v61  ;;  %4116 = vmatprep.mubr.f32.mxu1 %v16462_v0  ;;  %v11554_v61 = vpack.c.bf16 %v4571_v58, %v4569_v59  ;;  %v4847_v59 = vld [vmem:[#allocation5 + $0x1a8] sm:$0xff] }
 0x366   : > { %11541 = vmatprep.subr.msk.bf16.mxu1 %vm14666_vm3, %v11539_v4  ;;  %v4446_v4 = vld [vmem:[#allocation5 + $0x150] sm:$0xff] }
 0x368   : > { %11107 = vmatmul.mubr.msk.f32.gmra.mrb[6].mxu1 %vm1164_vm14, %v4011_v5  ;;  %v12631_v5 = vpop.permute.xlu0 %12630 }
 0x369   : > { %4122 = vmatprep.mubr.f32.mxu1 %v16462_v0  ;;  %v12633_v7 = vunpack.i.h.bf16 %v12631_v5  ;;  %v12632_v8 = vunpack.i.l.bf16 %v12631_v5 }
 0x36b   : > { %v4836_v20 = vsel %vm16550_vm6, %v12632_v8, %v12633_v7  ;;  %vm16555_vm6 = vmmov %vm16554_vm4 }
 0x36c   : > { %11108 = vmatmul.mubr.msk.f32.gmra.mrb[8].mxu1 %vm1164_vm14, %v4012_v6  ;;  %v12626_v6 = vpop.permute.xlu1 %12625  ;;  %v12641_v21 = vpop.permute.xlu0 %12640 }
 0x36d   : > { %4128 = vmatprep.mubr.f32.mxu1 %v16462_v0  ;;  %v12628_v10 = vunpack.i.h.bf16 %v12626_v6  ;;  %v12627_v13 = vunpack.i.l.bf16 %v12626_v6  ;;  %v12643_v25 = vunpack.i.h.bf16 %v12641_v21 }
 0x370   : > { %11109 = vmatmul.mubr.msk.f32.gmra.mrb[10].mxu1 %vm1164_vm14, %v4013_v15  ;;  %v12636_v14 = vpop.permute.xlu1 %12635  ;;  %v12651_v12 = vpop.permute.xlu0 %12650 }
 0x371   : > { %4248 = vmatprep.mubr.f32.mxu1 %v16462_v0  ;;  %v12638_v22 = vunpack.i.h.bf16 %v12636_v14  ;;  %v12652_v43 = vunpack.i.l.bf16 %v12651_v12 }
 0x374   : > { %11114 = vmatmul.mubr.msk.f32.vlgmr.msra.gmra.mrb[4].mxu1 %vm1164_vm14, %v4168_v23  ;;  %v12646_v19 = vpop.permute.xlu1 %12645  ;;  %v12637_v23 = vunpack.i.l.bf16 %v12636_v14  ;;  %v12661_v40 = vpop.permute.xlu0 %12660  ;;  %v4984_v14 = vld [vmem:[#allocation5 + $0x1c0] sm:$0xff] }
 0x375   : > { %11544 = vmatpush1.bf16.msk.msra.mxu1 %vm14690_vm0, %v11542_v27  ;;  %4254 = vmatprep.mubr.f32.mxu1 %v16462_v0  ;;  %v12648_v24 = vunpack.i.h.bf16 %v12646_v19  ;;  %v12647_v17 = vunpack.i.l.bf16 %v12646_v19  ;;  %v4585_v27 = vld [vmem:[#allocation5 + $0x178] sm:$0xff]  ;;  %v12663_v45 = vunpack.i.h.bf16 %v12661_v40  ;;  %v12662_v46 = vunpack.i.l.bf16 %v12661_v40  ;;  %v4985_v19 = vld [vmem:[#allocation5 + $0x1c8] sm:$0xff] }
 0x376   : > { %11547 = vmatprep.subr.msk.bf16.mxu1 %vm14551_vm1, %v11545_v34  ;;  %v4833_v33 = vsel %vm16552_vm2, %v12637_v23, %v12627_v13  ;;  %v4835_v34 = vsel %vm16553_vm7, %v12638_v22, %v12632_v8  ;;  %vm16557_vm2 = vmmov %vm16554_vm4  ;;  %vm16558_vm7 = vcmask 932864   ;;  %v5123_v40 = vld [vmem:[#allocation5 + $0x1e8] sm:$0xff] }
 0x377   : > { %v11564_v38 = vpack.c.bf16 %v4835_v34, %v4833_v33  ;;  %v5112_v52 = vsel %vm16558_vm7, %v12662_v46, %v12663_v45 }
 0x378   : > { %11115 = vmatmul.mubr.msk.f32.gmra.mrb[6].mxu1 %vm1164_vm14, %v4169_v2  ;;  %v4974_v2 = vsel %vm16554_vm4, %v12647_v17, %v12648_v24  ;;  %v12656_v41 = vpop.permute.xlu1 %12655 }
 0x379   : > { %4260 = vmatprep.mubr.f32.mxu1 %v16462_v0 }
 0x37c   : > { %11116 = vmatmul.mubr.msk.f32.gmra.mrb[8].mxu1 %vm1164_vm14, %v4170_v36 }
 0x37d   : > { %4266 = vmatprep.mubr.f32.mxu1 %v16462_v0 }
 0x380   : > { %11117 = vmatmul.mubr.msk.f32.gmra.mrb[10].mxu1 %vm1164_vm14, %v4171_v42  ;;  %v12653_v42 = vunpack.i.h.bf16 %v12651_v12 }
 0x381   : > { %4386 = vmatprep.mubr.f32.mxu1 %v16462_v0 }
 0x384   : > { %11122 = vmatmul.mubr.msk.f32.vlgmr.msra.gmra.mrb[4].mxu1 %vm1164_vm14, %v4306_v47  ;;  %v12658_v47 = vunpack.i.h.bf16 %v12656_v41 }
 0x385   : > { %11550 = vmatpush1.bf16.msk.msra.mxu1 %vm14558_vm5, %v11548_v48  ;;  %4392 = vmatprep.mubr.f32.mxu1 %v16462_v0  ;;  %v12657_v48 = vunpack.i.l.bf16 %v12656_v41  ;;  %v5124_v41 = vld [vmem:[#allocation5 + $0x1f0] sm:$0xff] }
 0x386   : > { %11553 = vmatprep.subr.msk.bf16.mxu1 %vm14573_vm8, %v11551_v50 }
 0x388   : > { %11123 = vmatmul.mubr.msk.f32.gmra.mrb[6].mxu1 %vm1164_vm14, %v4307_v51 }
 0x389   : > { %4398 = vmatprep.mubr.f32.mxu1 %v16462_v0 }
 0x38c   : > { %11124 = vmatmul.mubr.msk.f32.gmra.mrb[8].mxu1 %vm1164_vm14, %v4308_v53  ;;  %v4846_v53 = vld [vmem:[#allocation5 + $0x1a0] sm:$0xff] }
 0x38d   : > { %4404 = vmatprep.mubr.f32.mxu1 %v16462_v0 }
 0x390   : > { %11125 = vmatmul.mubr.msk.f32.gmra.mrb[10].mxu1 %vm1164_vm14, %v4309_v57  ;;  %v12666_v57 = vpop.permute.xlu1 %12665 }
 0x391   : > { %4524 = vmatprep.mubr.f32.mxu1 %v16462_v0  ;;  %v12667_v5 = vunpack.i.l.bf16 %v12666_v57 }
 0x394   : > { %11130 = vmatmul.mubr.msk.f32.vlgmr.msra.gmra.mrb[4].mxu1 %vm1164_vm14, %v4444_v60  ;;  %v4848_v60 = vld [vmem:[#allocation5 + $0x1b0] sm:$0xff] }
 0x395   : > { %11556 = vmatpush1.bf16.msk.msra.mxu1 %vm14592_vm9, %v11554_v61  ;;  %4530 = vmatprep.mubr.f32.mxu1 %v16462_v0  ;;  %v12676_v61 = vpop.permute.xlu1 %12675 }
 0x396   : > { %11558 = vmatprep.subr.bf16.mxu1 %v11557_v29  ;;  %v4834_v29 = vsel %vm16551_vm10, %v12627_v13, %v12628_v10  ;;  %vm16556_vm10 = vmmov %vm16554_vm4  ;;  %v12678_v6 = vunpack.i.h.bf16 %v12676_v61  ;;  %v12677_v7 = vunpack.i.l.bf16 %v12676_v61  ;;  %v4849_v10 = vld [vmem:[#allocation5 + $0x1b8] sm:$0xff]  ;;  %v5261_v61 = vld [vmem:[#allocation5 + $0x208] sm:$0xff] }
 0x397   : > { %v11561_v15 = vpack.c.bf16 %v4836_v20, %v4834_v29  ;;  %v4973_v50 = vsel %vm16556_vm10, %v12653_v42, %v12647_v17  ;;  %vm16559_vm4 = vmmov %vm16558_vm7 }
 0x398   : > { %11131 = vmatmul.mubr.msk.f32.gmra.mrb[6].mxu1 %vm1164_vm14, %v4445_v62  ;;  %v5110_v54 = vsel %vm16559_vm4, %v12657_v48, %v12658_v47  ;;  %v12671_v62 = vpop.permute.xlu0 %12670  ;;  %vm16561_vm10 = vmmov %vm16559_vm4 }
 0x399   : > { %4536 = vmatprep.mubr.f32.mxu1 %v16462_v0  ;;  %v11573_v58 = vpack.c.bf16 %v5112_v52, %v5110_v54  ;;  %v12673_v8 = vunpack.i.h.bf16 %v12671_v62  ;;  %v12686_v23 = vpop.permute.xlu1 %12685 }
 0x39a   : > { %v12688_v33 = vunpack.i.h.bf16 %v12686_v23  ;;  %v12687_v34 = vunpack.i.l.bf16 %v12686_v23  ;;  %v5376_v23 = vld [vmem:[#allocation5 + $0x230] sm:$0xff] }
 0x39c   : > { %11132 = vmatmul.mubr.msk.f32.gmra.mrb[8].mxu1 %vm1164_vm14, %v4446_v4  ;;  %v12668_v4 = vunpack.i.h.bf16 %v12666_v57  ;;  %v5260_v57 = vld [vmem:[#allocation5 + $0x200] sm:$0xff] }
 0x39d   : > { %4542 = vmatprep.mubr.f32.mxu1 %v16462_v0 }
 0x39e   : > { %v5111_v20 = vsel %vm16561_vm10, %v12668_v4, %v12662_v46  ;;  %vm16566_vm10 = vcmask 916480  }
 0x3a0   : > { %11133 = vmatmul.mubr.msk.f32.gmra.mrb[10].mxu1 %vm1164_vm14, %v4447_v9  ;;  %v12672_v9 = vunpack.i.l.bf16 %v12671_v62  ;;  %v5262_v62 = vld [vmem:[#allocation5 + $0x210] sm:$0xff] }
 0x3a1   : > { %4662 = vmatprep.mubr.f32.mxu1 %v16462_v0 }
 0x3a4   : > { %11138 = vmatmul.mubr.msk.f32.vlgmr.msra.gmra.mrb[4].mxu1 %vm1164_vm14, %v4582_v26 }
 0x3a5   : > { %11560 = vmatpush1.bf16.msra.mxu1 %v11559_v30  ;;  %4668 = vmatprep.mubr.f32.mxu1 %v16462_v0  ;;  %v12642_v30 = vunpack.i.l.bf16 %v12641_v21  ;;  %v4986_v21 = vld [vmem:[#allocation5 + $0x1d0] sm:$0xff] }
 0x3a6   : > { %11563 = vmatprep.subr.msk.bf16.mxu1 %vm14628_vm13, %v11561_v15 }
 0x3a7   : > { %v4972_v36 = vsel %vm16555_vm6, %v12642_v30, %v12643_v25  ;;  %v4971_v51 = vsel %vm16557_vm2, %v12652_v43, %v12642_v30  ;;  %vm16560_vm6 = vmmov %vm16559_vm4  ;;  %vm16562_vm2 = vcmask 924672  }
 0x3a8   : > { %11139 = vmatmul.mubr.msk.f32.gmra.mrb[6].mxu1 %vm1164_vm14, %v4583_v16  ;;  %v11567_v39 = vpack.c.bf16 %v4974_v2, %v4972_v36  ;;  %v11570_v55 = vpack.c.bf16 %v4973_v50, %v4971_v51  ;;  %v5109_v13 = vsel %vm16560_vm6, %v12667_v5, %v12657_v48  ;;  %v5250_v26 = vsel %vm16562_vm2, %v12677_v7, %v12678_v6  ;;  %vm16563_vm7 = vmmov %vm16562_vm2  ;;  %v12681_v16 = vpop.permute.xlu0 %12680  ;;  %v5125_v51 = vld [vmem:[#allocation5 + $0x1f8] sm:$0xff] }
 0x3a9   : > { %4674 = vmatprep.mubr.f32.mxu1 %v16462_v0  ;;  %v5248_v29 = vsel %vm16563_vm7, %v12672_v9, %v12673_v8  ;;  %v11576_v15 = vpack.c.bf16 %v5111_v20, %v5109_v13  ;;  %v12683_v24 = vunpack.i.h.bf16 %v12681_v16  ;;  %v12682_v17 = vunpack.i.l.bf16 %v12681_v16  ;;  %vm16564_vm4 = vmmov %vm16562_vm2 }
 0x3aa   : > { %vm16565_vm6 = vmmov %vm16562_vm2 }
 0x3ab   : > { %v5249_v2 = vsel %vm16564_vm4, %v12683_v24, %v12677_v7  ;;  %v5247_v36 = vsel %vm16565_vm6, %v12682_v17, %v12672_v9  ;;  %vm16567_vm2 = vmmov %vm16566_vm10  ;;  %vm16570_vm6 = vcmask 908288  }
 0x3ac   : > { %11140 = vmatmul.mubr.msk.f32.gmra.mrb[8].mxu1 %vm1164_vm14, %v4584_v18  ;;  %v11579_v18 = vpack.c.bf16 %v5250_v26, %v5248_v29  ;;  %v12691_v22 = vpop.permute.xlu0 %12690  ;;  %v11582_v12 = vpack.c.bf16 %v5249_v2, %v5247_v36  ;;  %vm16568_vm7 = vmmov %vm16567_vm2  ;;  %v5377_v36 = vld [vmem:[#allocation5 + $0x238] sm:$0xff] }
 0x3ad   : > { %4680 = vmatprep.mubr.f32.mxu1 %v16462_v0  ;;  %v12693_v25 = vunpack.i.h.bf16 %v12691_v22  ;;  %v12692_v30 = vunpack.i.l.bf16 %v12691_v22  ;;  %vm16569_vm4 = vmmov %vm16567_vm2  ;;  %v5375_v22 = vld [vmem:[#allocation5 + $0x228] sm:$0xff] }
 0x3b0   : > { %11141 = vmatmul.mubr.msk.f32.gmra.mrb[10].mxu1 %vm1164_vm14, %v4585_v27  ;;  %v4987_v27 = vld [vmem:[#allocation5 + $0x1d8] sm:$0xff]  ;;  %v12701_v43 = vpop.permute.xlu0 %12700 }
 0x3b1   : > { %4776 = vmatprep.mubr.f32.mxu1 %v16462_v0  ;;  %v12703_v48 = vunpack.i.h.bf16 %v12701_v43  ;;  %v12702_v50 = vunpack.i.l.bf16 %v12701_v43  ;;  %v5534_v43 = vld [vmem:[#allocation5 + $0x250] sm:$0xff] }
 0x3b4   : > { %11142 = vmatmul.mubr.msk.f32.vlgmr.msra.gmra.mrb[4].mxu1 %vm1164_vm14, %v4696_v37  ;;  %v5122_v37 = vld [vmem:[#allocation5 + $0x1e0] sm:$0xff] }
 0x3b5   : > { %11566 = vmatpush1.bf16.msk.msra.mxu1 %vm14659_vm12, %v11564_v38  ;;  %4782 = vmatprep.mubr.f32.mxu1 %v16462_v0  ;;  %v5393_v38 = vsel %vm16566_vm10, %v12692_v30, %v12693_v25  ;;  %vm16571_vm10 = vmmov %vm16570_vm6 }
 0x3b6   : > { %11569 = vmatprep.subr.msk.bf16.mxu1 %vm14666_vm3, %v11567_v39  ;;  %v5391_v39 = vsel %vm16567_vm2, %v12687_v34, %v12688_v33  ;;  %vm16572_vm2 = vmmov %vm16570_vm6 }
 0x3b8   : > { %11143 = vmatmul.mubr.msk.f32.gmra.mrb[6].mxu1 %vm1164_vm14, %v4697_v1  ;;  %v12696_v1 = vpop.permute.xlu1 %12695 }
 0x3b9   : > { %4788 = vmatprep.mubr.f32.mxu1 %v16462_v0  ;;  %v12698_v45 = vunpack.i.h.bf16 %v12696_v1  ;;  %v12697_v46 = vunpack.i.l.bf16 %v12696_v1  ;;  %v5532_v1 = vld [vmem:[#allocation5 + $0x240] sm:$0xff] }
 0x3bb   : > { %v5390_v52 = vsel %vm16568_vm7, %v12697_v46, %v12687_v34  ;;  %vm16573_vm7 = vmmov %vm16572_vm2 }
 0x3bc   : > { %11144 = vmatmul.mubr.msk.f32.gmra.mrb[8].mxu1 %vm1164_vm14, %v4698_v31  ;;  %v11585_v31 = vpack.c.bf16 %v5393_v38, %v5391_v39  ;;  %v12706_v42 = vpop.permute.xlu1 %12705 }
 0x3bd   : > { %4794 = vmatprep.mubr.f32.mxu1 %v16462_v0  ;;  %v12707_v47 = vunpack.i.l.bf16 %v12706_v42 }
 0x3c0   : > { %11145 = vmatmul.mubr.msk.f32.gmra.mrb[10].mxu1 %vm1164_vm14, %v4699_v28  ;;  %v12708_v28 = vunpack.i.h.bf16 %v12706_v42  ;;  %v12716_v5 = vpop.permute.xlu1 %12715  ;;  %v5533_v42 = vld [vmem:[#allocation5 + $0x248] sm:$0xff] }
 0x3c1   : > { %4926 = vmatprep.mubr.f32.mxu1 %v16462_v0  ;;  %v12718_v13 = vunpack.i.h.bf16 %v12716_v5  ;;  %v12717_v20 = vunpack.i.l.bf16 %v12716_v5  ;;  %v5672_v5 = vld [vmem:[#allocation5 + $0x270] sm:$0xff] }
 0x3c2   : > { %v5522_v54 = vsel %vm16570_vm6, %v12707_v47, %v12708_v28 }
 0x3c4   : > { %11150 = vmatmul.mubr.msk.f32.vlgmr.msra.gmra.mrb[4].mxu1 %vm1164_vm14, %v4846_v53  ;;  %v5392_v53 = vsel %vm16569_vm4, %v12698_v45, %v12692_v30  ;;  %vm16574_vm4 = vcmask 900096  }
 0x3c5   : > { %11572 = vmatpush1.bf16.msk.msra.mxu1 %vm14690_vm0, %v11570_v55  ;;  %4932 = vmatprep.mubr.f32.mxu1 %v16462_v0  ;;  %v5520_v55 = vsel %vm16571_vm10, %v12702_v50, %v12703_v48  ;;  %vm16575_vm6 = vmmov %vm16574_vm4 }
 0x3c6   : > { %11575 = vmatprep.subr.msk.bf16.mxu1 %vm14551_vm1, %v11573_v58  ;;  %v11587_v58 = vpack.c.bf16 %v5392_v53, %v5390_v52  ;;  %v5658_v16 = vsel %vm16575_vm6, %v12717_v20, %v12718_v13  ;;  %vm16576_vm10 = vmmov %vm16574_vm4 }
 0x3c8   : > { %11151 = vmatmul.mubr.msk.f32.gmra.mrb[6].mxu1 %vm1164_vm14, %v4847_v59  ;;  %v12711_v59 = vpop.permute.xlu0 %12710 }
 0x3c9   : > { %4938 = vmatprep.mubr.f32.mxu1 %v16462_v0  ;;  %v12713_v6 = vunpack.i.h.bf16 %v12711_v59  ;;  %v12712_v7 = vunpack.i.l.bf16 %v12711_v59 }
 0x3cb   : > { %v5521_v26 = vsel %vm16572_vm2, %v12713_v6, %v12707_v47  ;;  %v5519_v29 = vsel %vm16573_vm7, %v12712_v7, %v12702_v50  ;;  %vm16577_vm2 = vmmov %vm16574_vm4  ;;  %vm16578_vm7 = vcmask 801792  }
 0x3cc   : > { %11152 = vmatmul.mubr.msk.f32.gmra.mrb[8].mxu1 %vm1164_vm14, %v4848_v60  ;;  %v11589_v60 = vpack.c.bf16 %v5522_v54, %v5520_v55  ;;  %v12721_v4 = vpop.permute.xlu0 %12720 }
 0x3cd   : > { %4944 = vmatprep.mubr.f32.mxu1 %v16462_v0  ;;  %v12723_v8 = vunpack.i.h.bf16 %v12721_v4  ;;  %v12722_v9 = vunpack.i.l.bf16 %v12721_v4  ;;  %v5671_v4 = vld [vmem:[#allocation5 + $0x268] sm:$0xff] }
 0x3d0   : > { %11153 = vmatmul.mubr.msk.f32.gmra.mrb[10].mxu1 %vm1164_vm14, %v4849_v10  ;;  %v5263_v10 = vld [vmem:[#allocation5 + $0x218] sm:$0xff]  ;;  %v12731_v17 = vpop.permute.xlu0 %12730 }
 0x3d1   : > { %5064 = vmatprep.mubr.f32.mxu1 %v16462_v0  ;;  %v12733_v34 = vunpack.i.h.bf16 %v12731_v17  ;;  %v12732_v2 = vunpack.i.l.bf16 %v12731_v17  ;;  %v5810_v17 = vld [vmem:[#allocation5 + $0x290] sm:$0xff] }
 0x3d4   : > { %11158 = vmatmul.mubr.msk.f32.vlgmr.msra.gmra.mrb[4].mxu1 %vm1164_vm14, %v4984_v14  ;;  %v5660_v14 = vsel %vm16574_vm4, %v12722_v9, %v12723_v8  ;;  %vm16579_vm4 = vmmov %vm16578_vm7 }
 0x3d5   : > { %11578 = vmatpush1.bf16.msk.msra.mxu1 %vm14558_vm5, %v11576_v15  ;;  %5070 = vmatprep.mubr.f32.mxu1 %v16462_v0  ;;  %v5374_v15 = vld [vmem:[#allocation5 + $0x220] sm:$0xff]  ;;  %v5796_v39 = vsel %vm16579_vm4, %v12732_v2, %v12733_v34  ;;  %vm16584_vm6 = vmmov %vm16579_vm4 }
 0x3d6   : > { %11581 = vmatprep.subr.msk.bf16.mxu1 %vm14573_vm8, %v11579_v18  ;;  %v11592_v18 = vpack.c.bf16 %v5521_v26, %v5519_v29  ;;  %v5673_v29 = vld [vmem:[#allocation5 + $0x278] sm:$0xff] }
 0x3d8   : > { %11159 = vmatmul.mubr.msk.f32.gmra.mrb[6].mxu1 %vm1164_vm14, %v4985_v19  ;;  %v12726_v19 = vpop.permute.xlu1 %12725 }
 0x3d9   : > { %5076 = vmatprep.mubr.f32.mxu1 %v16462_v0  ;;  %v12728_v25 = vunpack.i.h.bf16 %v12726_v19  ;;  %v12727_v30 = vunpack.i.l.bf16 %v12726_v19 }
 0x3db   : > { %v5659_v38 = vsel %vm16577_vm2, %v12728_v25, %v12722_v9  ;;  %vm16586_vm2 = vcmask 793600  }
 0x3dc   : > { %11160 = vmatmul.mubr.msk.f32.gmra.mrb[8].mxu1 %vm1164_vm14, %v4986_v21  ;;  %v11595_v21 = vpack.c.bf16 %v5660_v14, %v5658_v16  ;;  %v12736_v24 = vpop.permute.xlu1 %12735  ;;  %v5808_v16 = vld [vmem:[#allocation5 + $0x280] sm:$0xff] }
 0x3dd   : > { %5082 = vmatprep.mubr.f32.mxu1 %v16462_v0  ;;  %v12737_v33 = vunpack.i.l.bf16 %v12736_v24 }
 0x3e0   : > { %11161 = vmatmul.mubr.msk.f32.gmra.mrb[10].mxu1 %vm1164_vm14, %v4987_v27  ;;  %v12738_v27 = vunpack.i.h.bf16 %v12736_v24  ;;  %v12746_v46 = vpop.permute.xlu1 %12745  ;;  %v5809_v24 = vld [vmem:[#allocation5 + $0x288] sm:$0xff] }
 0x3e1   : > { %5202 = vmatprep.mubr.f32.mxu1 %v16462_v0  ;;  %v12748_v52 = vunpack.i.h.bf16 %v12746_v46  ;;  %v12747_v53 = vunpack.i.l.bf16 %v12746_v46  ;;  %v5948_v46 = vld [vmem:[#allocation5 + $0x2b0] sm:$0xff] }
 0x3e4   : > { %11166 = vmatmul.mubr.msk.f32.vlgmr.msra.gmra.mrb[4].mxu1 %vm1164_vm14, %v5122_v37  ;;  %v5657_v37 = vsel %vm16576_vm10, %v12727_v30, %v12717_v20  ;;  %vm16585_vm10 = vmmov %vm16579_vm4 }
 0x3e5   : > { %11584 = vmatpush1.bf16.msk.msra.mxu1 %vm14592_vm9, %v11582_v12  ;;  %5208 = vmatprep.mubr.f32.mxu1 %v16462_v0  ;;  %v5798_v12 = vsel %vm16578_vm7, %v12737_v33, %v12738_v27  ;;  %vm16588_vm7 = vmmov %vm16586_vm2 }
 0x3e6   : > { %11586 = vmatprep.subr.bf16.mxu1 %v11585_v31  ;;  %v11598_v31 = vpack.c.bf16 %v5659_v38, %v5657_v37  ;;  %v5934_v59 = vsel %vm16588_vm7, %v12747_v53, %v12748_v52  ;;  %vm16589_vm4 = vmmov %vm16586_vm2 }
 0x3e8   : > { %11167 = vmatmul.mubr.msk.f32.gmra.mrb[6].mxu1 %vm1164_vm14, %v5123_v40  ;;  %v12741_v40 = vpop.permute.xlu0 %12740 }
 0x3e9   : > { %5214 = vmatprep.mubr.f32.mxu1 %v16462_v0  ;;  %v12743_v28 = vunpack.i.h.bf16 %v12741_v40  ;;  %v12742_v47 = vunpack.i.l.bf16 %v12741_v40 }
 0x3eb   : > { %v5797_v54 = vsel %vm16584_vm6, %v12743_v28, %v12737_v33  ;;  %v5795_v55 = vsel %vm16585_vm10, %v12742_v47, %v12732_v2  ;;  %vm16590_vm6 = vmmov %vm16586_vm2  ;;  %vm16591_vm10 = vcmask 785408  }
 0x3ec   : > { %11168 = vmatmul.mubr.msk.f32.gmra.mrb[8].mxu1 %vm1164_vm14, %v5124_v41  ;;  %v11601_v41 = vpack.c.bf16 %v5798_v12, %v5796_v39  ;;  %v12751_v45 = vpop.permute.xlu0 %12750 }
 0x3ed   : > { %5220 = vmatprep.mubr.f32.mxu1 %v16462_v0  ;;  %v12753_v48 = vunpack.i.h.bf16 %v12751_v45  ;;  %v12752_v50 = vunpack.i.l.bf16 %v12751_v45  ;;  %v5947_v45 = vld [vmem:[#allocation5 + $0x2a8] sm:$0xff] }
 0x3f0   : > { %11169 = vmatmul.mubr.msk.f32.gmra.mrb[10].mxu1 %vm1164_vm14, %v5125_v51  ;;  %v5535_v51 = vld [vmem:[#allocation5 + $0x258] sm:$0xff]  ;;  %v12761_v7 = vpop.permute.xlu0 %12760 }
 0x3f1   : > { %5340 = vmatprep.mubr.f32.mxu1 %v16462_v0  ;;  %v12763_v20 = vunpack.i.h.bf16 %v12761_v7  ;;  %v12762_v26 = vunpack.i.l.bf16 %v12761_v7  ;;  %v6062_v7 = vld [vmem:[#allocation5 + $0x2d0] sm:$0xff] }
 0x3f4   : > { %11174 = vmatmul.mubr.msk.f32.vlgmr.msra.gmra.mrb[4].mxu1 %vm1164_vm14, %v5260_v57  ;;  %v5936_v57 = vsel %vm16586_vm2, %v12752_v50, %v12753_v48  ;;  %vm16592_vm2 = vmmov %vm16591_vm10 }
 0x3f5   : > { %11588 = vmatpush1.bf16.msra.mxu1 %v11587_v58  ;;  %5346 = vmatprep.mubr.f32.mxu1 %v16462_v0  ;;  %v5670_v58 = vld [vmem:[#allocation5 + $0x260] sm:$0xff]  ;;  %vm16593_vm7 = vmmov %vm16592_vm2 }
 0x3f6   : > { %11591 = vmatprep.subr.msk.bf16.mxu1 %vm14628_vm13, %v11589_v60  ;;  %v11604_v60 = vpack.c.bf16 %v5797_v54, %v5795_v55  ;;  %v5949_v55 = vld [vmem:[#allocation5 + $0x2b8] sm:$0xff] }
 0x3f8   : > { %11175 = vmatmul.mubr.msk.f32.gmra.mrb[6].mxu1 %vm1164_vm14, %v5261_v61  ;;  %v12756_v61 = vpop.permute.xlu1 %12755 }
 0x3f9   : > { %5352 = vmatprep.mubr.f32.mxu1 %v16462_v0  ;;  %v12758_v8 = vunpack.i.h.bf16 %v12756_v61  ;;  %v12757_v9 = vunpack.i.l.bf16 %v12756_v61  ;;  %v6060_v61 = vld [vmem:[#allocation5 + $0x2c0] sm:$0xff] }
 0x3fb   : > { %v5933_v14 = vsel %vm16589_vm4, %v12757_v9, %v12747_v53  ;;  %vm16594_vm4 = vmmov %vm16592_vm2 }
 0x3fc   : > { %11176 = vmatmul.mubr.msk.f32.gmra.mrb[8].mxu1 %vm1164_vm14, %v5262_v62  ;;  %v11607_v62 = vpack.c.bf16 %v5936_v57, %v5934_v59  ;;  %v12766_v6 = vpop.permute.xlu1 %12765 }
 0x3fd   : > { %5358 = vmatprep.mubr.f32.mxu1 %v16462_v0  ;;  %v12767_v13 = vunpack.i.l.bf16 %v12766_v6 }
 0x400   : > { %11177 = vmatmul.mubr.msk.f32.gmra.mrb[10].mxu1 %vm1164_vm14, %v5263_v10  ;;  %v12768_v10 = vunpack.i.h.bf16 %v12766_v6  ;;  %v12776_v30 = vpop.permute.xlu1 %12775 }
 0x401   : > { %5474 = vmatprep.mubr.f32.mxu1 %v16462_v0  ;;  %v12778_v37 = vunpack.i.h.bf16 %v12776_v30  ;;  %v12777_v38 = vunpack.i.l.bf16 %v12776_v30 }
 0x402   : > { %v6079_v19 = vsel %vm16592_vm2, %v12767_v13, %v12768_v10  ;;  %v6063_v10 = vld [vmem:[#allocation5 + $0x2d8] sm:$0xff] }
 0x404   : > { %11178 = vmatmul.mubr.msk.f32.vlgmr.msra.gmra.mrb[4].mxu1 %vm1164_vm14, %v5374_v15  ;;  %v5935_v15 = vsel %vm16590_vm6, %v12758_v8, %v12752_v50  ;;  %vm16595_vm6 = vcmask 777216  }
 0x405   : > { %11594 = vmatpush1.bf16.msk.msra.mxu1 %vm14659_vm12, %v11592_v18  ;;  %5480 = vmatprep.mubr.f32.mxu1 %v16462_v0  ;;  %v6077_v18 = vsel %vm16591_vm10, %v12762_v26, %v12763_v20  ;;  %vm16596_vm10 = vmmov %vm16595_vm6 }
 0x406   : > { %11597 = vmatprep.subr.msk.bf16.mxu1 %vm14666_vm3, %v11595_v21  ;;  %v11610_v21 = vpack.c.bf16 %v5935_v15, %v5933_v14  ;;  %v6206_v40 = vsel %vm16596_vm10, %v12777_v38, %v12778_v37  ;;  %vm16597_vm2 = vmmov %vm16595_vm6  ;;  %v6219_v14 = vld [vmem:[#allocation5 + $0x2e8] sm:$0xff]  ;;  %v6220_v15 = vld [vmem:[#allocation5 + $0x2f0] sm:$0xff] }
 0x408   : > { %11179 = vmatmul.mubr.msk.f32.gmra.mrb[6].mxu1 %vm1164_vm14, %v5375_v22  ;;  %v12771_v22 = vpop.permute.xlu0 %12770 }
 0x409   : > { %5486 = vmatprep.mubr.f32.mxu1 %v16462_v0  ;;  %v12773_v27 = vunpack.i.h.bf16 %v12771_v22  ;;  %v12772_v33 = vunpack.i.l.bf16 %v12771_v22  ;;  %v6359_v22 = vld [vmem:[#allocation5 + $0x318] sm:$0xff] }
 0x40b   : > { %v6078_v12 = vsel %vm16593_vm7, %v12773_v27, %v12767_v13  ;;  %v6076_v39 = vsel %vm16594_vm4, %v12772_v33, %v12762_v26  ;;  %vm16598_vm7 = vmmov %vm16597_vm2  ;;  %vm16599_vm4 = vcmask 769024   ;;  %v6218_v26 = vld [vmem:[#allocation5 + $0x2e0] sm:$0xff] }
 0x40c   : > { %11180 = vmatmul.mubr.msk.f32.gmra.mrb[8].mxu1 %vm1164_vm14, %v5376_v23  ;;  %v11613_v23 = vpack.c.bf16 %v6079_v19, %v6077_v18  ;;  %v12781_v25 = vpop.permute.xlu0 %12780  ;;  %vm16601_vm10 = vmmov %vm16599_vm4  ;;  %v6356_v18 = vld [vmem:[#allocation5 + $0x300] sm:$0xff]  ;;  %v6357_v19 = vld [vmem:[#allocation5 + $0x308] sm:$0xff] }
 0x40d   : > { %5492 = vmatprep.mubr.f32.mxu1 %v16462_v0  ;;  %v12783_v34 = vunpack.i.h.bf16 %v12781_v25  ;;  %v12782_v2 = vunpack.i.l.bf16 %v12781_v25 }
 0x410   : > { %11181 = vmatmul.mubr.msk.f32.gmra.mrb[10].mxu1 %vm1164_vm14, %v5377_v36  ;;  %v5811_v36 = vld [vmem:[#allocation5 + $0x298] sm:$0xff]  ;;  %v12791_v47 = vpop.permute.xlu0 %12790 }
 0x411   : > { %5612 = vmatprep.mubr.f32.mxu1 %v16462_v0  ;;  %v12793_v53 = vunpack.i.h.bf16 %v12791_v47  ;;  %v12792_v54 = vunpack.i.l.bf16 %v12791_v47 }
 0x414   : > { %11186 = vmatmul.mubr.msk.f32.vlgmr.msra.gmra.mrb[4].mxu1 %vm1164_vm14, %v5532_v1  ;;  %v6208_v1 = vsel %vm16595_vm6, %v12782_v2, %v12783_v34  ;;  %vm16600_vm6 = vmmov %vm16599_vm4  ;;  %v12801_v6 = vpop.permute.xlu0 %12800 }
 0x415   : > { %11600 = vmatpush1.bf16.msk.msra.mxu1 %vm14690_vm0, %v11598_v31  ;;  %5618 = vmatprep.mubr.f32.mxu1 %v16462_v0  ;;  %v5946_v31 = vld [vmem:[#allocation5 + $0x2a0] sm:$0xff]  ;;  %v12803_v8 = vunpack.i.h.bf16 %v12801_v6  ;;  %v12802_v9 = vunpack.i.l.bf16 %v12801_v6 }
 0x416   : > { %11603 = vmatprep.subr.msk.bf16.mxu1 %vm14551_vm1, %v11601_v41  ;;  %v11615_v41 = vpack.c.bf16 %v6078_v12, %v6076_v39 }
 0x418   : > { %11187 = vmatmul.mubr.msk.f32.gmra.mrb[6].mxu1 %vm1164_vm14, %v5533_v42  ;;  %v12786_v42 = vpop.permute.xlu1 %12785  ;;  %v3024_v33 = vpop.permute.xlu0 %3023 }
 0x419   : > { %5624 = vmatprep.mubr.f32.mxu1 %v16462_v0  ;;  %v12788_v48 = vunpack.i.h.bf16 %v12786_v42  ;;  %v12787_v50 = vunpack.i.l.bf16 %v12786_v42 }
 0x41b   : > { %v6205_v57 = vsel %vm16597_vm2, %v12787_v50, %v12777_v38  ;;  %vm16602_vm2 = vmmov %vm16599_vm4 }
 0x41c   : > { %11188 = vmatmul.mubr.msk.f32.gmra.mrb[8].mxu1 %vm1164_vm14, %v5534_v43  ;;  %v11617_v43 = vpack.c.bf16 %v6208_v1, %v6206_v40  ;;  %v12796_v28 = vpop.permute.xlu1 %12795  ;;  %v6343_v20 = vsel %vm16602_vm2, %v12802_v9, %v12792_v54 }
 0x41d   : > { %5630 = vmatprep.mubr.f32.mxu1 %v16462_v0  ;;  %v12797_v52 = vunpack.i.l.bf16 %v12796_v28 }
 0x41f   : > { %v6345_v13 = vsel %vm16601_vm10, %v12803_v8, %v12797_v52 }
 0x420   : > { %11189 = vmatmul.mubr.msk.f32.gmra.mrb[10].mxu1 %vm1164_vm14, %v5535_v51  ;;  %v12798_v51 = vunpack.i.h.bf16 %v12796_v28 }
 0x421   : > { %5750 = vmatprep.mubr.f32.mxu1 %v16462_v0 }
 0x422   : > { %v6346_v59 = vsel %vm16599_vm4, %v12797_v52, %v12798_v51  ;;  %v3034_v51 = vpop.permute.xlu0 %3033 }
 0x424   : > { %11194 = vmatmul.mubr.msk.f32.vlgmr.msra.gmra.mrb[4].mxu1 %vm1164_vm14, %v5670_v58  ;;  %v6207_v58 = vsel %vm16598_vm7, %v12788_v48, %v12782_v2 }
 0x425   : > { %11606 = vmatpush1.bf16.msk.msra.mxu1 %vm14558_vm5, %v11604_v60  ;;  %5756 = vmatprep.mubr.f32.mxu1 %v16462_v0  ;;  %v6344_v60 = vsel %vm16600_vm6, %v12792_v54, %v12793_v53 }
 0x426   : > { %11609 = vmatprep.subr.msk.bf16.mxu1 %vm14573_vm8, %v11607_v62  ;;  %v11620_v62 = vpack.c.bf16 %v6207_v58, %v6205_v57 }
 0x428   : > { %11195 = vmatmul.mubr.msk.f32.gmra.mrb[6].mxu1 %vm1164_vm14, %v5671_v4  ;;  %v11623_v4 = vpack.c.bf16 %v6346_v59, %v6344_v60 }
 0x429   : > { %5762 = vmatprep.mubr.f32.mxu1 %v16462_v0 }
 0x42c   : > { %11196 = vmatmul.mubr.msk.f32.gmra.mrb[8].mxu1 %vm1164_vm14, %v5672_v5  ;;  %v6061_v5 = vld [vmem:[#allocation5 + $0x2c8] sm:$0xff] }
 0x42d   : > { %5768 = vmatprep.mubr.f32.mxu1 %v16462_v0 }
 0x430   : > { %11197 = vmatmul.mubr.msk.f32.gmra.mrb[10].mxu1 %vm1164_vm14, %v5673_v29  ;;  %v11626_v29 = vpack.c.bf16 %v6345_v13, %v6343_v20 }
 0x431   : > { %5888 = vmatprep.mubr.f32.mxu1 %v16462_v0 }
 0x434   : > { %11202 = vmatmul.mubr.msk.f32.vlgmr.msra.gmra.mrb[4].mxu1 %vm1164_vm14, %v5808_v16  ;;  %v6221_v16 = vld [vmem:[#allocation5 + $0x2f8] sm:$0xff] }
 0x435   : > { %11612 = vmatpush1.bf16.msk.msra.mxu1 %vm14592_vm9, %v11610_v21  ;;  %5894 = vmatprep.mubr.f32.mxu1 %v16462_v0  ;;  %v6358_v21 = vld [vmem:[#allocation5 + $0x310] sm:$0xff] }
 0x436   : > { %11614 = vmatprep.subr.bf16.mxu1 %v11613_v23  ;;  %v3019_v23 = vpop.permute.xlu1 %3018 }
 0x438   : > { %11203 = vmatmul.mubr.msk.f32.gmra.mrb[6].mxu1 %vm1164_vm14, %v5809_v24 }
 0x439   : > { %5900 = vmatprep.mubr.f32.mxu1 %v16462_v0 }
 0x43a   : > { %v3029_v40 = vpop.permute.xlu1 %3028 }
 0x43c   : > { %11204 = vmatmul.mubr.msk.f32.gmra.mrb[8].mxu1 %vm1164_vm14, %v5810_v17 }
 0x43d   : > { %5906 = vmatprep.mubr.f32.mxu1 %v16462_v0 }
 0x440   : > { %11205 = vmatmul.mubr.msk.f32.gmra.mrb[10].mxu1 %vm1164_vm14, %v5811_v36 }
 0x441   : > { %6026 = vmatprep.mubr.f32.mxu1 %v16462_v0 }
 0x444   : > { %11210 = vmatmul.mubr.msk.f32.vlgmr.msra.gmra.mrb[4].mxu1 %vm1164_vm14, %v5946_v31 }
 0x445   : > { %11616 = vmatpush1.bf16.msra.mxu1 %v11615_v41  ;;  %6032 = vmatprep.mubr.f32.mxu1 %v16462_v0 }
 0x446   : > { %11619 = vmatprep.subr.msk.bf16.mxu1 %vm14628_vm13, %v11617_v43 }
 0x448   : > { %11211 = vmatmul.mubr.msk.f32.gmra.mrb[6].mxu1 %vm1164_vm14, %v5947_v45 }
 0x449   : > { %6038 = vmatprep.mubr.f32.mxu1 %v16462_v0 }
 0x44c   : > { %11212 = vmatmul.mubr.msk.f32.gmra.mrb[8].mxu1 %vm1164_vm14, %v5948_v46 }
 0x44d   : > { %6044 = vmatprep.mubr.f32.mxu1 %v16462_v0 }
 0x450   : > { %11213 = vmatmul.mubr.msk.f32.gmra.mrb[10].mxu1 %vm1164_vm14, %v5949_v55 }
 0x451   : > { %6160 = vmatprep.mubr.f32.mxu1 %v16462_v0 }
 0x454   : > { %11214 = vmatmul.mubr.msk.f32.vlgmr.msra.gmra.mrb[4].mxu1 %vm1164_vm14, %v6060_v61 }
 0x455   : > { %11622 = vmatpush1.bf16.msk.msra.mxu1 %vm14659_vm12, %v11620_v62  ;;  %6166 = vmatprep.mubr.f32.mxu1 %v16462_v0 }
 0x456   : > { %11625 = vmatprep.subr.msk.bf16.mxu1 %vm14666_vm3, %v11623_v4 }
 0x458   : > { %11215 = vmatmul.mubr.msk.f32.gmra.mrb[6].mxu1 %vm1164_vm14, %v6061_v5 }
 0x459   : > { %6172 = vmatprep.mubr.f32.mxu1 %v16462_v0 }
 0x45c   : > { %11216 = vmatmul.mubr.msk.f32.gmra.mrb[8].mxu1 %vm1164_vm14, %v6062_v7 }
 0x45d   : > { %6178 = vmatprep.mubr.f32.mxu1 %v16462_v0 }
 0x460   : > { %11217 = vmatmul.mubr.msk.f32.gmra.mrb[10].mxu1 %vm1164_vm14, %v6063_v10 }
 0x461   : > { %6298 = vmatprep.mubr.f32.mxu1 %v16462_v0 }
 0x464   : > { %11222 = vmatmul.mubr.msk.f32.vlgmr.msra.gmra.mrb[4].mxu1 %vm1164_vm14, %v6218_v26  ;;  %v15130_v26 = vpop.permute.xlu1 %12805 }
 0x465   : > { %11628 = vmatpush1.bf16.msk.msra.mxu1 %vm14690_vm0, %v11626_v29  ;;  %6304 = vmatprep.mubr.f32.mxu1 %v16462_v0  ;;  %v15135_v29 = vpop.permute.xlu0 %12810 }
 0x468   : > { %11223 = vmatmul.mubr.msk.f32.gmra.mrb[6].mxu1 %vm1164_vm14, %v6219_v14  ;;  %v15137_v14 = vpop.permute.xlu1 %12815 }
 0x469   : > { %6310 = vmatprep.mubr.f32.mxu1 %v16462_v0 }
 0x46c   : > { %11224 = vmatmul.mubr.msk.f32.gmra.mrb[8].mxu1 %vm1164_vm14, %v6220_v15 }
 0x46d   : > { %6316 = vmatprep.mubr.f32.mxu1 %v16462_v0 }
 0x470   : > { %11225 = vmatmul.mubr.msk.f32.gmra.mrb[10].mxu1 %vm1164_vm14, %v6221_v16  ;;  %v15147_v16 = vpop.permute.xlu0 %12820 }
 0x471   : > { %6436 = vmatprep.mubr.f32.mxu1 %v16462_v0 }
 0x474   : > { %11230 = vmatmul.mubr.msk.f32.vlgmr.msra.gmra.mrb[4].mxu1 %vm1164_vm14, %v6356_v18  ;;  %v15153_v18 = vpop.permute.xlu1 %12825 }
 0x475   : > { %6442 = vmatprep.mubr.f32.mxu1 %v16462_v0 }
 0x478   : > { %11231 = vmatmul.mubr.msk.f32.gmra.mrb[6].mxu1 %vm1164_vm14, %v6357_v19  ;;  %v15159_v19 = vpop.permute.xlu0 %12830 }
 0x479   : > { %6448 = vmatprep.mubr.f32.mxu1 %v16462_v0 }
 0x47c   : > { %11232 = vmatmul.mubr.msk.f32.gmra.mrb[8].mxu1 %vm1164_vm14, %v6358_v21  ;;  %v15161_v21 = vpop.permute.xlu1 %12835 }
 0x47d   : > { %6454 = vmatprep.mubr.f32.mxu1 %v16462_v0 }
 0x480   : > { %11233 = vmatmul.mubr.msk.f32.gmra.mrb[10].mxu1 %vm1164_vm14, %v6359_v22  ;;  %v15167_v22 = vpop.permute.xlu0 %12840 }
 0x547   : > { %v6438_v24 = vpop.f32.mrb[4].mxu1 }
 0x548   : > { %v11965_v17 = vadd.f32 %v6438_v24, %v3019_v23  ;;  %v6440_v25 = vpop.f32.mrb[5].mxu1  ;;  %v15179_v24 = vpop.permute.xlu0 %12850 }
 0x549   : > { %v11966_v30 = vadd.f32 %v6440_v25, %v3019_v23  ;;  %v15173_v23 = vpop.permute.xlu1 %12845 }
 0x54a   : > { %vm6469_vm7 = vcmp.ge.f32.partialorder %v11965_v17, 0.0  ;;  %v6477_v27 = vmul.f32 0.01, %v11965_v17 }
 0x54b   : > { %vm6470_vm4 = vcmp.ge.f32.partialorder %v11966_v30, 0.0  ;;  %v6478_v34 = vmul.f32 0.01, %v11966_v30  ;;  %v6444_v2 = vpop.f32.mrb[6].mxu1 }
 0x54c   : > { %v15059_v36 = vsel %vm6469_vm7, %v11965_v17, %v6477_v27  ;;  %v11967_v37 = vadd.f32 %v6444_v2, %v3024_v33  ;;  %v6446_v38 = vpop.f32.mrb[7].mxu1  ;;  %v15187_v25 = vpop.permute.xlu0 %12860 }
 0x54d   : > { %16605 = vst [vmem:[#allocation10_spill] sm:$0xff] %v15059_v36  ;;  %v15061_v12 = vsel %vm6470_vm4, %v11966_v30, %v6478_v34  ;;  %v11968_v39 = vadd.f32 %v6446_v38, %v3024_v33  ;;  %v15181_v17 = vpop.permute.xlu1 %12855 }
 0x54e   : > { %16606 = vst [vmem:[#allocation11_spill] sm:$0xff] %v15061_v12  ;;  %vm6471_vm6 = vcmp.ge.f32.partialorder %v11967_v37, 0.0  ;;  %v6479_v1 = vmul.f32 0.01, %v11967_v37  ;;  %v12914_v31 = vpack.i.bf16 %v15061_v12, %v15059_v36  ;;  %v15145_v15 = vpack.i.bf16 %v16462_v0, %v15061_v12 }
 0x54f   : > { %vm6472_vm10 = vcmp.ge.f32.partialorder %v11968_v39, 0.0  ;;  %v6480_v41 = vmul.f32 0.01, %v11968_v39  ;;  %v6450_v42 = vpop.f32.mrb[8].mxu1 }
 0x550   : > { %v15065_v43 = vsel %vm6471_vm6, %v11967_v37, %v6479_v1  ;;  %v11969_v45 = vadd.f32 %v6450_v42, %v3029_v40  ;;  %12915 = vrot.lane.b32.xlu1 %v12914_v31, %s16456_s28  ;;  %v6452_v46 = vpop.f32.mrb[9].mxu1  ;;  %v15199_v27 = vpop.permute.xlu0 %12870 }
 0x551   : > { %16607 = vst [vmem:[#allocation12_spill] sm:$0xff] %v15065_v43  ;;  %v15068_v28 = vsel %vm6472_vm10, %v11968_v39, %v6480_v41  ;;  %v11970_v47 = vadd.f32 %v6452_v46, %v3029_v40  ;;  %v15096_v7 = vpack.i.bf16 %v15065_v43, %v15059_v36  ;;  %v15193_v30 = vpop.permute.xlu1 %12865 }
 0x552   : > { %16608 = vst [vmem:[#allocation13_spill] sm:$0xff] %v15068_v28  ;;  %vm6473_vm2 = vcmp.ge.f32.partialorder %v11969_v45, 0.0  ;;  %v6481_v48 = vmul.f32 0.01, %v11969_v45  ;;  %v12974_v50 = vpack.i.bf16 %v15068_v28, %v15065_v43  ;;  %v15223_v38 = vpack.i.bf16 %v16462_v0, %v15068_v28 }
 0x553   : > { %vm6474_vm7 = vcmp.ge.f32.partialorder %v11970_v47, 0.0  ;;  %v6482_v52 = vmul.f32 0.01, %v11970_v47  ;;  %v6456_v53 = vpop.f32.mrb[10].mxu1 }
 0x554   : > { %v15072_v54 = vsel %vm6473_vm2, %v11969_v45, %v6481_v48  ;;  %v11971_v55 = vadd.f32 %v6456_v53, %v3034_v51  ;;  %12920 = vrot.lane.b32.xlu1 %v12914_v31, %s16460_s11  ;;  %12975 = vrot.lane.b32.xlu0 %v12974_v50, %s16456_s28  ;;  %v6458_v57 = vpop.f32.mrb[11].mxu1  ;;  %s16613_s28 = smov 31   ;;  %v15207_v34 = vpop.permute.xlu0 %12880 }
 0x555   : > { %16609 = vst [vmem:[#allocation14_spill] sm:$0xff] %v15072_v54  ;;  %v15076_v58 = vsel %vm6474_vm7, %v11970_v47, %v6482_v52  ;;  %v11972_v59 = vadd.f32 %v6458_v57, %v3034_v51  ;;  %v15201_v33 = vpop.permute.xlu1 %12875  ;;  %v12807_v51 = vunpack.i.l.bf16 %v15130_v26 }
 0x556   : > { %16610 = vst [vmem:[#allocation15_spill] sm:$0xff] %v15076_v58  ;;  %vm6475_vm4 = vcmp.ge.f32.partialorder %v11971_v55, 0.0  ;;  %v6483_v60 = vmul.f32 0.01, %v11971_v55  ;;  %v15086_v5 = vpack.i.bf16 %v15076_v58, %v15072_v54  ;;  %v15233_v1 = vpack.i.bf16 %v16462_v0, %v15076_v58 }
 0x557   : > { %vm6476_vm6 = vcmp.ge.f32.partialorder %v11972_v59, 0.0  ;;  %v6484_v61 = vmul.f32 0.01, %v11972_v59  ;;  %v12813_v58 = vunpack.i.h.bf16 %v15135_v29 }
 0x558   : > { %v15078_v62 = vsel %vm6475_vm4, %v11971_v55, %v6483_v60  ;;  %12925 = vrot.lane.b32.xlu1 %v12914_v31, %s16458_s16  ;;  %12980 = vrot.lane.b32.xlu0 %v12974_v50, %s16460_s11  ;;  %s16615_s11 = smov 34   ;;  %v15219_v37 = vpop.permute.xlu0 %12890 }
 0x559   : > { %16611 = vst [vmem:[#allocation16_spill] sm:$0xff] %v15078_v62  ;;  %v15082_v4 = vsel %vm6476_vm6, %v11972_v59, %v6484_v61  ;;  %v15102_v8 = vpack.i.bf16 %v15078_v62, %v15072_v54  ;;  %v15213_v2 = vpop.permute.xlu1 %12885 }
 0x55a   : > { %16612 = vst [vmem:[#allocation17_spill] sm:$0xff] %v15082_v4  ;;  %v15090_v6 = vpack.i.bf16 %v15082_v4, %v15078_v62  ;;  %v15331_v20 = vpack.i.bf16 %v16462_v0, %v15082_v4  ;;  %v12812_v4 = vunpack.i.l.bf16 %v15135_v29 }
 0x55c   : > { %12930 = vrot.lane.b32.xlu1 %v12914_v31, %s16613_s28  ;;  %12985 = vrot.lane.b32.xlu0 %v12974_v50, %s16458_s16  ;;  %s16614_s16 = smov 1  }
 0x55d   : > { %v15225_v39 = vpop.permute.xlu1 %12895 }
 0x55e   : > { %16621 = vst [vmem:[#allocation18_spill] sm:$0xff] %v15225_v39 }
 0x560   : > { %12935 = vrot.lane.b32.xlu1 %v12914_v31, %s16580_s13  ;;  %12990 = vrot.lane.b32.xlu0 %v12974_v50, %s16613_s28 }
 0x561   : > { %v15241_v40 = vpop.permute.xlu1 %12905 }
 0x562   : > { %16623 = vst [vmem:[#allocation20_spill] sm:$0xff] %v15241_v40 }
 0x564   : > { %12940 = vrot.lane.b32.xlu1 %v12914_v31, %s16581_s26  ;;  %12995 = vrot.lane.b32.xlu0 %v12974_v50, %s16580_s13 }
 0x568   : > { %12945 = vrot.lane.b32.xlu1 %v12914_v31, %s16582_s27  ;;  %13000 = vrot.lane.b32.xlu0 %v12974_v50, %s16581_s26 }
 0x56c   : > { %12950 = vrot.lane.b32.xlu1 %v12914_v31, %s16583_s12  ;;  %13005 = vrot.lane.b32.xlu0 %v12974_v50, %s16582_s27 }
 0x570   : > { %12955 = vrot.lane.b32.xlu1 %v12914_v31, %s16587_s14  ;;  %13010 = vrot.lane.b32.xlu0 %v12974_v50, %s16583_s12 }
 0x574   : > { %12960 = vrot.lane.b32.xlu1 %v12914_v31, %s16603_s17  ;;  %13015 = vrot.lane.b32.xlu0 %v12974_v50, %s16587_s14 }
 0x578   : > { %12965 = vrot.lane.b32.xlu1 %v12914_v31, %s16604_s29  ;;  %13020 = vrot.lane.b32.xlu0 %v12974_v50, %s16603_s17 }
 0x57c   : > { %12970 = vrot.lane.b32.xlu1 %v12914_v31, %s16614_s16  ;;  %13025 = vrot.lane.b32.xlu0 %v12974_v50, %s16604_s29  ;;  %v15235_v31 = vpop.permute.xlu0 %12900 }
 0x57d   : > { %16622 = vst [vmem:[#allocation19_spill] sm:$0xff] %v15235_v31 }
 0x580   : > { %13030 = vrot.lane.b32.xlu0 %v15086_v5, %s16615_s11  ;;  %13090 = vrot.lane.b32.xlu1 %v15090_v6, %s16615_s11  ;;  %s16617_s11 = smov 32   ;;  %v15247_v41 = vpop.permute.xlu0 %12910 }
 0x581   : > { %16624 = vst [vmem:[#allocation21_spill] sm:$0xff] %v15247_v41 }
 0x584   : > { %13035 = vrot.lane.b32.xlu0 %v12974_v50, %s16614_s16  ;;  %13095 = vrot.lane.b32.xlu1 %v16462_v0, %s16614_s16  ;;  %v12808_v50 = vunpack.i.h.bf16 %v15130_v26 }
 0x588   : > { %13040 = vrot.lane.b32.xlu0 %v15086_v5, %s16616_s0  ;;  %13110 = vrot.lane.b32.xlu1 %v15090_v6, %s16616_s0  ;;  %s16619_s0 = smov 126  }
 0x58c   : > { %13045 = vrot.lane.b32.xlu0 %v15086_v5, %s16617_s11  ;;  %13115 = vrot.lane.b32.xlu1 %v15145_v15, %s16618_s1 }
 0x590   : > { %13050 = vrot.lane.b32.xlu0 %v15086_v5, %s16613_s28  ;;  %13125 = vrot.lane.b32.xlu1 %v15090_v6, %s16617_s11 }
 0x594   : > { %13055 = vrot.lane.b32.xlu0 %v15086_v5, %s16580_s13  ;;  %13130 = vrot.lane.b32.xlu1 %v15096_v7, %s16618_s1 }
 0x598   : > { %13060 = vrot.lane.b32.xlu0 %v15086_v5, %s16581_s26  ;;  %13145 = vrot.lane.b32.xlu1 %v15090_v6, %s16613_s28  ;;  %s16620_s28 = smov 114  }
 0x59c   : > { %13065 = vrot.lane.b32.xlu0 %v15086_v5, %s16582_s27  ;;  %13150 = vrot.lane.b32.xlu1 %v15145_v15, %s16619_s0 }
 0x5a0   : > { %13070 = vrot.lane.b32.xlu0 %v15086_v5, %s16583_s12  ;;  %13160 = vrot.lane.b32.xlu1 %v15090_v6, %s16580_s13 }
 0x5a4   : > { %13075 = vrot.lane.b32.xlu0 %v15086_v5, %s16587_s14  ;;  %13165 = vrot.lane.b32.xlu1 %v15096_v7, %s16619_s0 }
 0x5a8   : > { %13080 = vrot.lane.b32.xlu0 %v15086_v5, %s16603_s17  ;;  %13180 = vrot.lane.b32.xlu1 %v15090_v6, %s16581_s26 }
 0x5ac   : > { %13085 = vrot.lane.b32.xlu0 %v15086_v5, %s16604_s29  ;;  %13185 = vrot.lane.b32.xlu1 %v15145_v15, %s16620_s28 }
 0x5b0   : > { %13100 = vrot.lane.b32.xlu0 %v15086_v5, %s16614_s16  ;;  %13195 = vrot.lane.b32.xlu1 %v15090_v6, %s16582_s27 }
 0x5b4   : > { %13105 = vrot.lane.b32.xlu0 %v16462_v0, %s16614_s16  ;;  %13200 = vrot.lane.b32.xlu1 %v15096_v7, %s16620_s28 }
 0x5b8   : > { %13120 = vrot.lane.b32.xlu0 %v15223_v38, %s16618_s1  ;;  %13215 = vrot.lane.b32.xlu1 %v15090_v6, %s16583_s12 }
 0x5bc   : > { %13135 = vrot.lane.b32.xlu0 %v15233_v1, %s16618_s1  ;;  %13220 = vrot.lane.b32.xlu1 %v15145_v15, %s16493_s23 }
 0x5c0   : > { %13140 = vrot.lane.b32.xlu0 %v15102_v8, %s16618_s1  ;;  %13230 = vrot.lane.b32.xlu1 %v15090_v6, %s16587_s14 }
 0x5c2   : > { %v12916_v42 = vpop.permute.xlu1 %12915 }
 0x5c3   : > { %v12918_v45 = vunpack.i.h.bf16 %v12916_v42  ;;  %v12917_v46 = vunpack.i.l.bf16 %v12916_v42 }
 0x5c4   : > { %13155 = vrot.lane.b32.xlu0 %v15223_v38, %s16619_s0  ;;  %13235 = vrot.lane.b32.xlu1 %v15096_v7, %s16493_s23 }
 0x5c5   : > { %v6561_v55 = vsel %vm424_vm15, %v12807_v51, %v12917_v46  ;;  %v6562_v57 = vsel %vm424_vm15, %v12917_v46, %v12918_v45 }
 0x5c6   : > { %v15253_v47 = vpop.permute.xlu1 %12920  ;;  %v12976_v48 = vpop.permute.xlu0 %12975 }
 0x5c7   : > { %v12978_v52 = vunpack.i.h.bf16 %v12976_v48  ;;  %v12977_v53 = vunpack.i.l.bf16 %v12976_v48  ;;  %v12923_v36 = vunpack.i.h.bf16 %v15253_v47  ;;  %v12922_v43 = vunpack.i.l.bf16 %v15253_v47 }
 0x5c8   : > { %13170 = vrot.lane.b32.xlu0 %v15233_v1, %s16619_s0  ;;  %13250 = vrot.lane.b32.xlu1 %v15090_v6, %s16603_s17 }
 0x5c9   : > { %v6563_v59 = vsel %vm424_vm15, %v12808_v50, %v12977_v53  ;;  %v6564_v60 = vsel %vm424_vm15, %v12977_v53, %v12978_v52 }
 0x5ca   : > { %v11632_v61 = vpack.c.bf16 %v6563_v59, %v6561_v55  ;;  %v15265_v5 = vpop.permute.xlu1 %12925  ;;  %v15267_v26 = vpop.permute.xlu0 %12980  ;;  %v11629_v42 = vpack.c.bf16 %v6564_v60, %v6562_v57 }
 0x5cb   : > { %v12983_v54 = vunpack.i.h.bf16 %v15267_v26  ;;  %v12982_v62 = vunpack.i.l.bf16 %v15267_v26 }
 0x5cc   : > { %11631 = vmatprep.subr.msk.bf16.mxu0 %vm14551_vm1, %v11629_v42  ;;  %13175 = vrot.lane.b32.xlu0 %v15102_v8, %s16619_s0 }
 0x5cd   : > { %13255 = vrot.lane.b32.xlu1 %v15145_v15, %s16494_s25  ;;  %11634 = vmatpush1.bf16.msk.msra.mxu0 %vm14558_vm5, %v11632_v61 }
 0x5ce   : > { %v15277_v45 = vpop.permute.xlu1 %12930  ;;  %v15279_v46 = vpop.permute.xlu0 %12985 }
 0x5d0   : > { %13190 = vrot.lane.b32.xlu0 %v15223_v38, %s16620_s28 }
 0x5d1   : > { %13265 = vrot.lane.b32.xlu1 %v15090_v6, %s16604_s29 }
 0x5d2   : > { %v15285_v48 = vpop.permute.xlu1 %12935  ;;  %v15287_v50 = vpop.permute.xlu0 %12990 }
 0x5d4   : > { %13205 = vrot.lane.b32.xlu0 %v15233_v1, %s16620_s28 }
 0x5d5   : > { %13270 = vrot.lane.b32.xlu1 %v15096_v7, %s16494_s25 }
 0x5d6   : > { %v15293_v51 = vpop.permute.xlu1 %12940  ;;  %v15295_v52 = vpop.permute.xlu0 %12995 }
 0x5d8   : > { %13210 = vrot.lane.b32.xlu0 %v15102_v8, %s16620_s28 }
 0x5d9   : > { %13285 = vrot.lane.b32.xlu1 %v15090_v6, %s16614_s16 }
 0x5da   : > { %v15301_v53 = vpop.permute.xlu1 %12945  ;;  %v15303_v55 = vpop.permute.xlu0 %13000 }
 0x5dc   : > { %13225 = vrot.lane.b32.xlu0 %v15223_v38, %s16493_s23 }
 0x5dd   : > { %13290 = vrot.lane.b32.xlu1 %v15145_v15, %s16495_s18 }
 0x5de   : > { %v15309_v57 = vpop.permute.xlu1 %12950  ;;  %v15311_v59 = vpop.permute.xlu0 %13005 }
 0x5e0   : > { %13240 = vrot.lane.b32.xlu0 %v15233_v1, %s16493_s23 }
 0x5e1   : > { %13300 = vrot.lane.b32.xlu1 %v15096_v7, %s16495_s18 }
 0x5e2   : > { %v15317_v6 = vpop.permute.xlu1 %12955  ;;  %v15319_v60 = vpop.permute.xlu0 %13010 }
 0x5e4   : > { %13245 = vrot.lane.b32.xlu0 %v15102_v8, %s16493_s23 }
 0x5e5   : > { %13315 = vrot.lane.b32.xlu1 %v15145_v15, %s16496_s24 }
 0x5e6   : > { %v15325_v61 = vpop.permute.xlu1 %12960  ;;  %v15327_v42 = vpop.permute.xlu0 %13015 }
 0x5e7   : > { %16625 = vst [vmem:[#allocation22_spill] sm:$0xff] %v15325_v61  ;;  %v12818_v61 = vunpack.i.h.bf16 %v15137_v14 }
 0x5e8   : > { %13260 = vrot.lane.b32.xlu0 %v15223_v38, %s16494_s25 }
 0x5e9   : > { %13325 = vrot.lane.b32.xlu1 %v15331_v20, %s16618_s1 }
 0x5ea   : > { %v15337_v13 = vpop.permute.xlu1 %12965  ;;  %v15339_v10 = vpop.permute.xlu0 %13020 }
 0x5eb   : > { %16626 = vst [vmem:[#allocation23_spill] sm:$0xff] %v15337_v13  ;;  %16627 = vst [vmem:[#allocation24_spill] sm:$0xff] %v15339_v10  ;;  %v6701_v13 = vsel %vm533_vm11, %v12982_v62, %v12983_v54  ;;  %v6699_v10 = vsel %vm533_vm11, %v12922_v43, %v12923_v36  ;;  %v12822_v36 = vunpack.i.l.bf16 %v15147_v16 }
 0x5ec   : > { %13275 = vrot.lane.b32.xlu0 %v15233_v1, %s16494_s25 }
 0x5ed   : > { %13330 = vrot.lane.b32.xlu1 %v15096_v7, %s16496_s24 }
 0x5ee   : > { %v15345_v9 = vpop.permute.xlu1 %12970  ;;  %v15347_v0 = vpop.permute.xlu0 %13025 }
 0x5ef   : > { %16628 = vst [vmem:[#allocation25_spill] sm:$0xff] %v15345_v9  ;;  %16629 = vst [vmem:[#allocation26_spill] sm:$0xff] %v15347_v0 }
 0x5f0   : > { %13280 = vrot.lane.b32.xlu0 %v15102_v8, %s16494_s25 }
 0x5f1   : > { %13345 = vrot.lane.b32.xlu1 %v15331_v20, %s16619_s0 }
 0x5f2   : > { %v13031_v12 = vpop.permute.xlu0 %13030  ;;  %v13091_v28 = vpop.permute.xlu1 %13090 }
 0x5f3   : > { %v13033_v9 = vunpack.i.h.bf16 %v13031_v12  ;;  %v13032_v41 = vunpack.i.l.bf16 %v13031_v12  ;;  %v13093_v40 = vunpack.i.h.bf16 %v13091_v28  ;;  %v13092_v26 = vunpack.i.l.bf16 %v13091_v28 }
 0x5f4   : > { %13295 = vrot.lane.b32.xlu0 %v15223_v38, %s16495_s18 }
 0x5f5   : > { %v6565_v29 = vsel %vm424_vm15, %v12812_v4, %v13032_v41  ;;  %v6566_v0 = vsel %vm424_vm15, %v13032_v41, %v13033_v9  ;;  %v6567_v31 = vsel %vm424_vm15, %v12813_v58, %v13092_v26  ;;  %v6568_v39 = vsel %vm424_vm15, %v13092_v26, %v13093_v40  ;;  %13350 = vrot.lane.b32.xlu1 %v15145_v15, %s16497_s15 }
 0x5f6   : > { %v11638_v47 = vpack.c.bf16 %v6567_v31, %v6565_v29  ;;  %v15368_v12 = vpop.permute.xlu0 %13035  ;;  %v15370_v28 = vpop.permute.xlu1 %13095  ;;  %v11635_v54 = vpack.c.bf16 %v6568_v39, %v6566_v0  ;;  %v12817_v4 = vunpack.i.l.bf16 %v15137_v14  ;;  %v11641_v58 = vpack.c.bf16 %v6701_v13, %v6699_v10  ;;  %v6585_v0 = vld [vmem:[#allocation7] sm:$0xff] }
 0x5f7   : > { %v12823_v9 = vunpack.i.h.bf16 %v15147_v16  ;;  %v6700_v31 = vsel %vm533_vm11, %v12818_v61, %v12982_v62  ;;  %v12988_v39 = vunpack.i.h.bf16 %v15279_v46  ;;  %v12987_v40 = vunpack.i.l.bf16 %v15279_v46 }
 0x5f8   : > { %13305 = vrot.lane.b32.xlu0 %v15233_v1, %s16495_s18  ;;  %11637 = vmatprep.subr.msk.bf16.mxu0 %vm14551_vm1, %v11635_v54  ;;  %v6698_v14 = vsel %vm533_vm11, %v12817_v4, %v12922_v43  ;;  %v12928_v29 = vunpack.i.h.bf16 %v15265_v5  ;;  %vm16630_vm15 = vcmask 261120  }
 0x5f9   : > { %13360 = vrot.lane.b32.xlu1 %v15331_v20, %s16620_s28  ;;  %11640 = vmatpush1.bf16.msk.msra.mxu0 %vm14558_vm5, %v11638_v47  ;;  %v12927_v47 = vunpack.i.l.bf16 %v15265_v5  ;;  %v11644_v16 = vpack.c.bf16 %v6700_v31, %v6698_v14  ;;  %v16631_v14 = vmov 0.0   ;;  %vm16632_vm10 = vmmov %vm16630_vm15 }
 0x5fa   : > { %v13041_v10 = vpop.permute.xlu0 %13040  ;;  %v13111_v13 = vpop.permute.xlu1 %13110  ;;  %11643 = vmatprep.subr.msk.bf16.mxu0 %vm14573_vm8, %v11641_v58  ;;  %vm16634_vm2 = vmmov %vm16632_vm10 }
 0x5fb   : > { %v13043_v62 = vunpack.i.h.bf16 %v13041_v10  ;;  %v13042_v41 = vunpack.i.l.bf16 %v13041_v10  ;;  %v13113_v61 = vunpack.i.h.bf16 %v13111_v13  ;;  %v13112_v26 = vunpack.i.l.bf16 %v13111_v13  ;;  %vm16635_vm7 = vmmov %vm16634_vm2 }
 0x5fc   : > { %13310 = vrot.lane.b32.xlu0 %v15102_v8, %s16495_s18  ;;  %11242 = vmatmul.mubr.msk.f32.vlgmr.msra.gmra.mrb[4].mxu0 %vm16630_vm15, %v6585_v0  ;;  %v6842_v10 = vsel %vm16632_vm10, %v12987_v40, %v12988_v39  ;;  %v12827_v13 = vunpack.i.l.bf16 %v15153_v18  ;;  %vm16636_vm4 = vmmov %vm16634_vm2 }
 0x5fd   : > { %v6702_v43 = vsel %vm533_vm11, %v12822_v36, %v13042_v41  ;;  %v6703_v46 = vsel %vm533_vm11, %v13042_v41, %v13043_v62  ;;  %v6704_v54 = vsel %vm533_vm11, %v12823_v9, %v13112_v26  ;;  %v6705_v4 = vsel %vm533_vm11, %v13112_v26, %v13113_v61  ;;  %13365 = vrot.lane.b32.xlu1 %v15096_v7, %s16497_s15  ;;  %v6586_v36 = vld [vmem:[#allocation7 + $0x8] sm:$0xff]  ;;  %vm16633_vm11 = vmmov %vm16632_vm10 }
 0x5fe   : > { %v11650_v58 = vpack.c.bf16 %v6704_v54, %v6702_v43  ;;  %11646 = vmatpush1.bf16.msk.msra.mxu0 %vm14592_vm9, %v11644_v16  ;;  %v13046_v5 = vpop.permute.xlu0 %13045  ;;  %v15404_v31 = vpop.permute.xlu1 %13115  ;;  %6663 = vmatprep.mubr.f32.mxu0 %v16631_v14  ;;  %v11647_v0 = vpack.c.bf16 %v6705_v4, %v6703_v46  ;;  %v12828_v9 = vunpack.i.h.bf16 %v15153_v18  ;;  %v6840_v62 = vsel %vm16633_vm11, %v12927_v47, %v12928_v29  ;;  %v6723_v46 = vld [vmem:[#allocation7 + $0x10] sm:$0xff]  ;;  %vm16637_vm6 = vmmov %vm16634_vm2 }
 0x5ff   : > { %v12833_v41 = vunpack.i.h.bf16 %v15159_v19  ;;  %v11653_v39 = vpack.c.bf16 %v6842_v10, %v6840_v62  ;;  %v6839_v18 = vsel %vm16636_vm4, %v12827_v13, %v12927_v47  ;;  %v12993_v26 = vunpack.i.h.bf16 %v15287_v50  ;;  %vm16638_vm15 = vmmov %vm16634_vm2  ;;  %v6724_v62 = vld [vmem:[#allocation7 + $0x18] sm:$0xff] }
 0x600   : > { %13320 = vrot.lane.b32.xlu0 %v15223_v38, %s16496_s24  ;;  %11649 = vmatprep.subr.msk.bf16.mxu0 %vm14573_vm8, %v11647_v0  ;;  %v6841_v61 = vsel %vm16634_vm2, %v12828_v9, %v12987_v40  ;;  %v13047_v16 = vunpack.i.l.bf16 %v13046_v5  ;;  %v12992_v40 = vunpack.i.l.bf16 %v15287_v50  ;;  %v13048_v54 = vunpack.i.h.bf16 %v13046_v5  ;;  %vm16639_vm10 = vmmov %vm16634_vm2 }
 0x601   : > { %13380 = vrot.lane.b32.xlu1 %v15331_v20, %s16493_s23  ;;  %11243 = vmatmul.mubr.msk.f32.gmra.mrb[6].mxu0 %vm16635_vm7, %v6586_v36  ;;  %v12832_v36 = vunpack.i.l.bf16 %v15159_v19  ;;  %v11655_v47 = vpack.c.bf16 %v6841_v61, %v6839_v18  ;;  %v12933_v10 = vunpack.i.h.bf16 %v15277_v45  ;;  %vm16640_vm11 = vmmov %vm16634_vm2  ;;  %vm16641_vm2 = vcmask 252928  }
 0x602   : > { %11652 = vmatpush1.bf16.msk.msra.mxu0 %vm14592_vm9, %v11650_v58  ;;  %v13051_v43 = vpop.permute.xlu0 %13050  ;;  %v13126_v29 = vpop.permute.xlu1 %13125  ;;  %6795 = vmatprep.mubr.f32.mxu0 %v16631_v14  ;;  %v12932_v58 = vunpack.i.l.bf16 %v15277_v45  ;;  %v6969_v45 = vsel %vm16641_vm2, %v12992_v40, %v12993_v26  ;;  %vm16642_vm7 = vmmov %vm16636_vm4  ;;  %v12843_v26 = vunpack.i.h.bf16 %v15167_v22 }
 0x603   : > { %v13128_v4 = vunpack.i.h.bf16 %v13126_v29  ;;  %v13127_v0 = vunpack.i.l.bf16 %v13126_v29  ;;  %11654 = vmatprep.subr.bf16.mxu0 %v11653_v39  ;;  %v6843_v50 = vsel %vm16639_vm10, %v12832_v36, %v13047_v16  ;;  %v12838_v39 = vunpack.i.h.bf16 %v15161_v21  ;;  %vm16643_vm4 = vmmov %vm16641_vm2 }
 0x604   : > { %13335 = vrot.lane.b32.xlu0 %v15233_v1, %s16496_s24  ;;  %v12837_v29 = vunpack.i.l.bf16 %v15161_v21  ;;  %v13053_v36 = vunpack.i.h.bf16 %v13051_v43  ;;  %v12998_v21 = vunpack.i.h.bf16 %v15295_v52  ;;  %vm16645_vm10 = vmmov %vm16641_vm2 }
 0x605   : > { %v6845_v9 = vsel %vm16637_vm6, %v12833_v41, %v13127_v0  ;;  %13385 = vrot.lane.b32.xlu1 %v15145_v15, %s16498_s22  ;;  %11252 = vmatmul.mubr.msk.f32.vlgmr.msra.gmra.mrb[4].mxu0 %vm16638_vm15, %v6723_v46  ;;  %v6846_v13 = vsel %vm16640_vm11, %v13127_v0, %v13128_v4  ;;  %v6844_v41 = vsel %vm16642_vm7, %v13047_v16, %v13048_v54  ;;  %vm16644_vm15 = vmmov %vm16641_vm2 }
 0x606   : > { %11656 = vmatpush1.bf16.msra.mxu0 %v11655_v47  ;;  %v15436_v5 = vpop.permute.xlu0 %13055  ;;  %v15438_v19 = vpop.permute.xlu1 %13130  ;;  %6801 = vmatprep.mubr.f32.mxu0 %v16631_v14  ;;  %v11659_v61 = vpack.c.bf16 %v6845_v9, %v6843_v50  ;;  %v11657_v18 = vpack.c.bf16 %v6846_v13, %v6844_v41  ;;  %v6967_v46 = vsel %vm16643_vm4, %v12932_v58, %v12933_v10  ;;  %v13052_v47 = vunpack.i.l.bf16 %v13051_v43  ;;  %v6813_v50 = vld [vmem:[#allocation7 + $0x20] sm:$0xff]  ;;  %vm16646_vm11 = vmmov %vm16641_vm2 }
 0x607   : > { %v6968_v16 = vsel %vm16644_vm15, %v12838_v39, %v12992_v40  ;;  %v11661_v0 = vpack.c.bf16 %v6969_v45, %v6967_v46  ;;  %v12997_v43 = vunpack.i.l.bf16 %v15295_v52  ;;  %v12842_v13 = vunpack.i.l.bf16 %v15167_v22  ;;  %vm16647_vm7 = vmmov %vm16641_vm2 }
 0x608   : > { %13340 = vrot.lane.b32.xlu0 %v15102_v8, %s16496_s24  ;;  %11658 = vmatprep.subr.bf16.mxu0 %v11657_v18  ;;  %v12938_v40 = vunpack.i.h.bf16 %v15285_v48  ;;  %v12937_v41 = vunpack.i.l.bf16 %v15285_v48  ;;  %v6971_v52 = vsel %vm16646_vm11, %v13052_v47, %v13053_v36  ;;  %vm16648_vm4 = vmmov %vm16641_vm2  ;;  %vm16649_vm15 = vcmask 244736   ;;  %v6814_v36 = vld [vmem:[#allocation7 + $0x28] sm:$0xff] }
 0x609   : > { %13395 = vrot.lane.b32.xlu1 %v15331_v20, %s16494_s25  ;;  %11253 = vmatmul.mubr.msk.f32.gmra.mrb[6].mxu0 %vm16637_vm6, %v6724_v62  ;;  %v6966_v62 = vsel %vm16645_vm10, %v12837_v29, %v12932_v58  ;;  %v6970_v22 = vsel %vm16648_vm4, %v12842_v13, %v13052_v47  ;;  %v7107_v29 = vsel %vm16649_vm15, %v12997_v43, %v12998_v21  ;;  %v12847_v47 = vunpack.i.l.bf16 %v15173_v23  ;;  %vm16650_vm10 = vmmov %vm16649_vm15 }
 0x60a   : > { %v15454_v54 = vpop.permute.xlu0 %13060  ;;  %v13146_v4 = vpop.permute.xlu1 %13145  ;;  %6925 = vmatprep.mubr.f32.mxu0 %v16631_v14  ;;  %11660 = vmatpush1.bf16.msra.mxu0 %v11659_v61  ;;  %v11664_v45 = vpack.c.bf16 %v6968_v16, %v6966_v62  ;;  %v7105_v16 = vsel %vm16650_vm10, %v12937_v41, %v12938_v40  ;;  %v12853_v21 = vunpack.i.h.bf16 %v15179_v24  ;;  %vm16651_vm11 = vmmov %vm16650_vm10  ;;  %v13002_v62 = vunpack.i.l.bf16 %v15303_v55 }
 0x60b   : > { %v13148_v10 = vunpack.i.h.bf16 %v13146_v4  ;;  %v13147_v9 = vunpack.i.l.bf16 %v13146_v4  ;;  %11663 = vmatprep.subr.msk.bf16.mxu0 %vm14628_vm13, %v11661_v0  ;;  %v13058_v4 = vunpack.i.h.bf16 %v15436_v5  ;;  %v13057_v0 = vunpack.i.l.bf16 %v15436_v5 }
 0x60c   : > { %13355 = vrot.lane.b32.xlu0 %v15223_v38, %s16497_s15  ;;  %v11673_v13 = vpack.c.bf16 %v7107_v29, %v7105_v16  ;;  %v12858_v16 = vunpack.i.h.bf16 %v15181_v17 }
 0x60d   : > { %v6972_v61 = vsel %vm16641_vm2, %v12843_v26, %v13147_v9  ;;  %v6973_v39 = vsel %vm16647_vm7, %v13147_v9, %v13148_v10  ;;  %13400 = vrot.lane.b32.xlu1 %v15096_v7, %s16498_s22  ;;  %11254 = vmatmul.mubr.msk.f32.vlgmr.msra.gmra.mrb[4].mxu0 %vm16637_vm6, %v6813_v50  ;;  %v12848_v26 = vunpack.i.h.bf16 %v15173_v23  ;;  %vm16652_vm2 = vmmov %vm16637_vm6  ;;  %v13003_v23 = vunpack.i.h.bf16 %v15303_v55 }
 0x60e   : > { %v15474_v48 = vpop.permute.xlu0 %13065  ;;  %v15476_v58 = vpop.permute.xlu1 %13150  ;;  %v11667_v18 = vpack.c.bf16 %v6973_v39, %v6971_v52  ;;  %v11670_v46 = vpack.c.bf16 %v6972_v61, %v6970_v22  ;;  %11666 = vmatpush1.bf16.msk.msra.mxu0 %vm14659_vm12, %v11664_v45  ;;  %6931 = vmatprep.mubr.f32.mxu0 %v16631_v14  ;;  %v6991_v45 = vld [vmem:[#allocation7 + $0x30] sm:$0xff]  ;;  %vm16653_vm7 = vmmov %vm16650_vm10  ;;  %v12943_v61 = vunpack.i.h.bf16 %v15293_v51  ;;  %v12942_v39 = vunpack.i.l.bf16 %v15293_v51 }
 0x60f   : > { %v7106_v10 = vsel %vm16651_vm11, %v12848_v26, %v12997_v43  ;;  %v12852_v43 = vunpack.i.l.bf16 %v15179_v24  ;;  %v7104_v52 = vsel %vm16653_vm7, %v12847_v47, %v12937_v41  ;;  %vm16654_vm4 = vmmov %vm16653_vm7  ;;  %v6992_v47 = vld [vmem:[#allocation7 + $0x38] sm:$0xff] }
 0x610   : > { %13370 = vrot.lane.b32.xlu0 %v15233_v1, %s16497_s15  ;;  %11669 = vmatprep.subr.msk.bf16.mxu0 %vm14628_vm13, %v11667_v18  ;;  %v11676_v55 = vpack.c.bf16 %v7106_v10, %v7104_v52  ;;  %v7109_v22 = vsel %vm16654_vm4, %v13057_v0, %v13058_v4  ;;  %vm16655_vm6 = vmmov %vm16654_vm4  ;;  %v12857_v4 = vunpack.i.l.bf16 %v15181_v17  ;;  %v13062_v10 = vunpack.i.l.bf16 %v15454_v54  ;;  %v7129_v52 = vld [vmem:[#allocation7 + $0x40] sm:$0xff] }
 0x611   : > { %13415 = vrot.lane.b32.xlu1 %v15331_v20, %s16495_s18  ;;  %11255 = vmatmul.mubr.msk.f32.gmra.mrb[6].mxu0 %vm16652_vm2, %v6814_v36  ;;  %vm16656_vm15 = vmmov %vm16654_vm4  ;;  %v13008_v17 = vunpack.i.h.bf16 %v15311_v59 }
 0x612   : > { %v15496_v9 = vpop.permute.xlu0 %13070  ;;  %v13161_v50 = vpop.permute.xlu1 %13160  ;;  %11672 = vmatpush1.bf16.msk.msra.mxu0 %vm14659_vm12, %v11670_v46  ;;  %7063 = vmatprep.mubr.f32.mxu0 %v16631_v14  ;;  %vm16657_vm10 = vmmov %vm16654_vm4 }
 0x613   : > { %v13163_v5 = vunpack.i.h.bf16 %v13161_v50  ;;  %v13162_v40 = vunpack.i.l.bf16 %v13161_v50  ;;  %11675 = vmatprep.subr.msk.bf16.mxu0 %vm14666_vm3, %v11673_v13  ;;  %v7108_v24 = vsel %vm16657_vm10, %v12852_v43, %v13057_v0  ;;  %vm16658_vm11 = vmmov %vm16652_vm2  ;;  %vm16659_vm2 = vcmask 146432  }
 0x614   : > { %13375 = vrot.lane.b32.xlu0 %v15102_v8, %s16497_s15  ;;  %v7245_v36 = vsel %vm16659_vm2, %v13002_v62, %v13003_v23  ;;  %vm16660_vm7 = vmmov %vm16659_vm2  ;;  %v12863_v50 = vunpack.i.h.bf16 %v15187_v25 }
 0x615   : > { %v7110_v18 = vsel %vm16655_vm6, %v12853_v21, %v13162_v40  ;;  %v7111_v29 = vsel %vm16656_vm15, %v13162_v40, %v13163_v5  ;;  %13420 = vrot.lane.b32.xlu1 %v15145_v15, %s16505_s21  ;;  %11264 = vmatmul.mubr.msk.f32.vlgmr.msra.gmra.mrb[4].mxu0 %vm16658_vm11, %v6991_v45  ;;  %v7243_v0 = vsel %vm16660_vm7, %v12942_v39, %v12943_v61  ;;  %v13063_v21 = vunpack.i.h.bf16 %v15454_v54  ;;  %vm16661_vm4 = vmmov %vm16659_vm2 }
 0x616   : > { %v15518_v51 = vpop.permute.xlu0 %13075  ;;  %v15520_v41 = vpop.permute.xlu1 %13165  ;;  %v11679_v46 = vpack.c.bf16 %v7111_v29, %v7109_v22  ;;  %v11682_v26 = vpack.c.bf16 %v7110_v18, %v7108_v24  ;;  %11678 = vmatpush1.bf16.msk.msra.mxu0 %vm14690_vm0, %v11676_v55  ;;  %7069 = vmatprep.mubr.f32.mxu0 %v16631_v14  ;;  %v7244_v13 = vsel %vm16661_vm4, %v12858_v16, %v13002_v62  ;;  %vm16662_vm6 = vmmov %vm16658_vm11  ;;  %v13007_v45 = vunpack.i.l.bf16 %v15311_v59 }
 0x617   : > { %v11685_v40 = vpack.c.bf16 %v7245_v36, %v7243_v0  ;;  %v12862_v62 = vunpack.i.l.bf16 %v15187_v25  ;;  %vm16663_vm15 = vmmov %vm16659_vm2  ;;  %v12948_v55 = vunpack.i.h.bf16 %v15301_v53  ;;  %v12947_v22 = vunpack.i.l.bf16 %v15301_v53 }
 0x618   : > { %13390 = vrot.lane.b32.xlu0 %v15223_v38, %s16498_s22  ;;  %11681 = vmatprep.subr.msk.bf16.mxu0 %vm14666_vm3, %v11679_v46  ;;  %v7242_v61 = vsel %vm16663_vm15, %v12857_v4, %v12942_v39  ;;  %vm16664_vm10 = vmmov %vm16659_vm2  ;;  %v12868_v16 = vunpack.i.h.bf16 %v15193_v30  ;;  %v12867_v4 = vunpack.i.l.bf16 %v15193_v30  ;;  %v12873_v0 = vunpack.i.h.bf16 %v15199_v27 }
 0x619   : > { %13430 = vrot.lane.b32.xlu1 %v15331_v20, %s16496_s24  ;;  %11265 = vmatmul.mubr.msk.f32.gmra.mrb[6].mxu0 %vm16662_vm6, %v6992_v47  ;;  %v11688_v59 = vpack.c.bf16 %v7244_v13, %v7242_v61  ;;  %v7247_v18 = vsel %vm16664_vm10, %v13062_v10, %v13063_v21  ;;  %vm16665_vm11 = vmmov %vm16659_vm2  ;;  %v7130_v47 = vld [vmem:[#allocation7 + $0x48] sm:$0xff]  ;;  %v12953_v61 = vunpack.i.h.bf16 %v15309_v57 }
 0x61a   : > { %v15540_v23 = vpop.permute.xlu0 %13080  ;;  %v13181_v5 = vpop.permute.xlu1 %13180  ;;  %11684 = vmatpush1.bf16.msk.msra.mxu0 %vm14690_vm0, %v11682_v26  ;;  %7201 = vmatprep.mubr.f32.mxu0 %v16631_v14  ;;  %vm16666_vm7 = vmmov %vm16659_vm2 }
 0x61b   : > { %v13183_v54 = vunpack.i.h.bf16 %v13181_v5  ;;  %v13182_v43 = vunpack.i.l.bf16 %v13181_v5  ;;  %11687 = vmatprep.subr.msk.bf16.mxu0 %vm14551_vm1, %v11685_v40  ;;  %v7246_v25 = vsel %vm16666_vm7, %v12862_v62, %v13062_v10  ;;  %vm16667_vm4 = vmmov %vm16662_vm6  ;;  %vm16668_vm6 = vcmask 138240  }
 0x61c   : > { %13405 = vrot.lane.b32.xlu0 %v15233_v1, %s16498_s22  ;;  %v7383_v36 = vsel %vm16668_vm6, %v13007_v45, %v13008_v17  ;;  %vm16669_vm15 = vmmov %vm16668_vm6  ;;  %v13068_v10 = vunpack.i.h.bf16 %v15474_v48  ;;  %v13013_v17 = vunpack.i.h.bf16 %v15319_v60 }
 0x61d   : > { %v7248_v29 = vsel %vm16665_vm11, %v12863_v50, %v13182_v43  ;;  %v7249_v24 = vsel %vm16659_vm2, %v13182_v43, %v13183_v54  ;;  %13435 = vrot.lane.b32.xlu1 %v15096_v7, %s16505_s21  ;;  %11274 = vmatmul.mubr.msk.f32.vlgmr.msra.gmra.mrb[4].mxu0 %vm16667_vm4, %v7129_v52  ;;  %v7381_v21 = vsel %vm16669_vm15, %v12947_v22, %v12948_v55  ;;  %v13067_v50 = vunpack.i.l.bf16 %v15474_v48  ;;  %vm16670_vm10 = vmmov %vm16668_vm6  ;;  %v7267_v52 = vld [vmem:[#allocation7 + $0x50] sm:$0xff] }
 0x61e   : > { %v15562_v53 = vpop.permute.xlu0 %13085  ;;  %v15564_v39 = vpop.permute.xlu1 %13185  ;;  %v11691_v46 = vpack.c.bf16 %v7249_v24, %v7247_v18  ;;  %v11694_v26 = vpack.c.bf16 %v7248_v29, %v7246_v25  ;;  %11690 = vmatpush1.bf16.msk.msra.mxu0 %vm14558_vm5, %v11688_v59  ;;  %7207 = vmatprep.mubr.f32.mxu0 %v16631_v14  ;;  %v7382_v13 = vsel %vm16670_vm10, %v12868_v16, %v13007_v45  ;;  %vm16671_vm11 = vmmov %vm16667_vm4  ;;  %v13012_v54 = vunpack.i.l.bf16 %v15319_v60 }
 0x61f   : > { %v11697_v40 = vpack.c.bf16 %v7383_v36, %v7381_v21  ;;  %v12872_v45 = vunpack.i.l.bf16 %v15199_v27  ;;  %vm16672_vm2 = vmmov %vm16668_vm6  ;;  %v12952_v55 = vunpack.i.l.bf16 %v15309_v57  ;;  %v13072_v16 = vunpack.i.l.bf16 %v15496_v9 }
 0x620   : > { %13410 = vrot.lane.b32.xlu0 %v15102_v8, %s16498_s22  ;;  %11693 = vmatprep.subr.msk.bf16.mxu0 %vm14551_vm1, %v11691_v46  ;;  %v7380_v62 = vsel %vm16672_vm2, %v12867_v4, %v12947_v22  ;;  %vm16673_vm7 = vmmov %vm16672_vm2  ;;  %v7268_v46 = vld [vmem:[#allocation7 + $0x58] sm:$0xff]  ;;  %v7524_v36 = vsel %vm1164_vm14, %v13012_v54, %v13013_v17  ;;  %v12883_v21 = vunpack.i.h.bf16 %v15207_v34 }
 0x621   : > { %13450 = vrot.lane.b32.xlu1 %v15331_v20, %s16497_s15  ;;  %11275 = vmatmul.mubr.msk.f32.gmra.mrb[6].mxu0 %vm16671_vm11, %v7130_v47  ;;  %v11700_v60 = vpack.c.bf16 %v7382_v13, %v7380_v62  ;;  %v7385_v59 = vsel %vm16673_vm7, %v13067_v50, %v13068_v10  ;;  %vm16674_vm4 = vmmov %vm16672_vm2  ;;  %v13073_v47 = vunpack.i.h.bf16 %v15496_v9  ;;  %v7522_v4 = vsel %vm1164_vm14, %v12952_v55, %v12953_v61 }
 0x622   : > { %v15584_v30 = vpop.permute.xlu0 %13100  ;;  %v13196_v5 = vpop.permute.xlu1 %13195  ;;  %11696 = vmatpush1.bf16.msk.msra.mxu0 %vm14558_vm5, %v11694_v26  ;;  %7339 = vmatprep.mubr.f32.mxu0 %v16631_v14  ;;  %vm16675_vm6 = vmmov %vm16672_vm2  ;;  %v12878_v26 = vunpack.i.h.bf16 %v15201_v33  ;;  %v13017_v9 = vunpack.i.l.bf16 %v15327_v42  ;;  %vm16680_vm7 = vcmask 121856  }
 0x623   : > { %v13198_v43 = vunpack.i.h.bf16 %v13196_v5  ;;  %v13197_v48 = vunpack.i.l.bf16 %v13196_v5  ;;  %11699 = vmatprep.subr.msk.bf16.mxu0 %vm14573_vm8, %v11697_v40  ;;  %vm16676_vm15 = vmmov %vm16672_vm2  ;;  %v11709_v5 = vpack.c.bf16 %v7524_v36, %v7522_v4  ;;  %v13018_v40 = vunpack.i.h.bf16 %v15327_v42 }
 0x624   : > { %13425 = vrot.lane.b32.xlu0 %v15223_v38, %s16505_s21  ;;  %v7384_v27 = vsel %vm16676_vm15, %v12872_v45, %v13067_v50  ;;  %vm16677_vm10 = vmmov %vm16671_vm11  ;;  %v7523_v10 = vsel %vm1164_vm14, %v12878_v26, %v13012_v54  ;;  %v12882_v54 = vunpack.i.l.bf16 %v15207_v34  ;;  %v12957_v45 = vunpack.i.l.bf16 %v15317_v6 }
 0x625   : > { %v7386_v18 = vsel %vm16674_vm4, %v12873_v0, %v13197_v48  ;;  %v7387_v29 = vsel %vm16675_vm6, %v13197_v48, %v13198_v43  ;;  %13455 = vrot.lane.b32.xlu1 %v15145_v15, %s16508_s20  ;;  %11284 = vmatmul.mubr.msk.f32.vlgmr.msra.gmra.mrb[4].mxu0 %vm16677_vm10, %v7267_v52  ;;  %v12877_v0 = vunpack.i.l.bf16 %v15201_v33  ;;  %vm16678_vm11 = vmmov %vm16677_vm10  ;;  %v7405_v33 = vld [vmem:[#allocation7 + $0x60] sm:$0xff]  ;;  %v12958_v52 = vunpack.i.h.bf16 %v15317_v6 }
 0x626   : > { %v15606_v57 = vpop.permute.xlu0 %13105  ;;  %v15608_v22 = vpop.permute.xlu1 %13200  ;;  %v11703_v24 = vpack.c.bf16 %v7387_v29, %v7385_v59  ;;  %v11706_v25 = vpack.c.bf16 %v7386_v18, %v7384_v27  ;;  %11702 = vmatpush1.bf16.msk.msra.mxu0 %vm14592_vm9, %v11700_v60  ;;  %7345 = vmatprep.mubr.f32.mxu0 %v16631_v14  ;;  %v7526_v61 = vsel %vm1164_vm14, %v13072_v16, %v13073_v47  ;;  %vm16679_vm2 = vmmov %vm16677_vm10  ;;  %v7406_v27 = vld [vmem:[#allocation7 + $0x68] sm:$0xff]  ;;  %v13078_v26 = vunpack.i.h.bf16 %v15518_v51 }
 0x627   : > { %v7521_v48 = vsel %vm1164_vm14, %v12877_v0, %v12952_v55  ;;  %v7525_v55 = vsel %vm1164_vm14, %v12882_v54, %v13072_v16  ;;  %v7651_v18 = vsel %vm16680_vm7, %v13017_v9, %v13018_v40  ;;  %vm16681_vm4 = vmmov %vm16680_vm7  ;;  %v13077_v47 = vunpack.i.l.bf16 %v15518_v51  ;;  %v7495_v51 = vld [vmem:[#allocation7 + $0x70] sm:$0xff] }
 0x628   : > { %13440 = vrot.lane.b32.xlu0 %v15233_v1, %s16505_s21  ;;  %11705 = vmatprep.subr.msk.bf16.mxu0 %vm14573_vm8, %v11703_v24  ;;  %v11711_v62 = vpack.c.bf16 %v7523_v10, %v7521_v48  ;;  %v12888_v24 = vunpack.i.h.bf16 %v15213_v2  ;;  %v7649_v36 = vsel %vm16681_vm4, %v12957_v45, %v12958_v52  ;;  %vm16682_vm6 = vmmov %vm16681_vm4 }
 0x629   : > { %13465 = vrot.lane.b32.xlu1 %v15331_v20, %s16498_s22  ;;  %11285 = vmatmul.mubr.msk.f32.gmra.mrb[6].mxu0 %vm16678_vm11, %v7268_v46  ;;  %v12893_v46 = vunpack.i.h.bf16 %v15219_v37  ;;  %vm16683_vm15 = vmmov %vm16679_vm2  ;;  %v11717_v0 = vpack.c.bf16 %v7651_v18, %v7649_v36  ;;  %v7496_v18 = vld [vmem:[#allocation7 + $0x78] sm:$0xff]  ;;  %s16890_s22 = sshll.u32 %s16892_s10, 4 }
 0x62a   : > { %v15628_v50 = vpop.permute.xlu0 %13120  ;;  %v13216_v13 = vpop.permute.xlu1 %13215  ;;  %11708 = vmatpush1.bf16.msk.msra.mxu0 %vm14592_vm9, %v11706_v25  ;;  %7477 = vmatprep.mubr.f32.mxu0 %v16631_v14  ;;  %v12887_v25 = vunpack.i.l.bf16 %v15213_v2  ;;  %v7650_v16 = vsel %vm16682_vm6, %v12888_v24, %v13017_v9  ;;  %vm16685_vm10 = vmmov %vm16681_vm4  ;;  %v16695_v36 = vld [vmem:[#allocation19_spill] sm:$0xff] }
 0x62b   : > { %v13218_v17 = vunpack.i.h.bf16 %v13216_v13  ;;  %v13217_v43 = vunpack.i.l.bf16 %v13216_v13  ;;  %11710 = vmatprep.subr.bf16.mxu0 %v11709_v5  ;;  %vm16687_vm11 = vmmov %vm16681_vm4 }
 0x62c   : > { %13445 = vrot.lane.b32.xlu0 %v15102_v8, %s16505_s21  ;;  %v7648_v9 = vsel %vm16685_vm10, %v12887_v25, %v12957_v45  ;;  %v7653_v52 = vsel %vm16687_vm11, %v13077_v47, %v13078_v26  ;;  %vm16691_vm6 = vmmov %vm16683_vm15  ;;  %v13083_v25 = vunpack.i.h.bf16 %v15540_v23  ;;  %v12903_v26 = vunpack.i.h.bf16 %v16695_v36 }
 0x62d   : > { %v7527_v42 = vsel %vm1164_vm14, %v12883_v21, %v13217_v43  ;;  %13470 = vrot.lane.b32.xlu1 %v15096_v7, %s16508_s20  ;;  %v7528_v34 = vsel %vm1164_vm14, %v13217_v43, %v13218_v17  ;;  %11294 = vmatmul.mubr.msk.f32.vlgmr.msra.gmra.mrb[4].mxu0 %vm16679_vm2, %v7405_v33  ;;  %v16684_v21 = vld [vmem:[#allocation24_spill] sm:$0xff]  ;;  %v12892_v17 = vunpack.i.l.bf16 %v15219_v37  ;;  %v16686_v43 = vld [vmem:[#allocation22_spill] sm:$0xff]  ;;  %v11720_v48 = vpack.c.bf16 %v7650_v16, %v7648_v9  ;;  %vm16688_vm2 = vmmov %vm16681_vm4 }
 0x62e   : > { %v15648_v60 = vpop.permute.xlu0 %13135  ;;  %v15650_v6 = vpop.permute.xlu1 %13220  ;;  %v11713_v59 = vpack.c.bf16 %v7528_v34, %v7526_v61  ;;  %v11715_v29 = vpack.c.bf16 %v7527_v42, %v7525_v55  ;;  %11712 = vmatpush1.bf16.msra.mxu0 %v11711_v62  ;;  %7483 = vmatprep.mubr.f32.mxu0 %v16631_v14  ;;  %v13023_v10 = vunpack.i.h.bf16 %v16684_v21  ;;  %v13022_v13 = vunpack.i.l.bf16 %v16684_v21  ;;  %vm16689_vm7 = vmmov %vm16688_vm2  ;;  %v16698_v21 = vld [vmem:[#allocation26_spill] sm:$0xff]  ;;  %v16700_v9 = vld [vmem:[#allocation23_spill] sm:$0xff] }
 0x62f   : > { %v12963_v33 = vunpack.i.h.bf16 %v16686_v43  ;;  %v12962_v54 = vunpack.i.l.bf16 %v16686_v43  ;;  %vm16690_vm4 = vmmov %vm16688_vm2  ;;  %v12968_v43 = vunpack.i.h.bf16 %v16700_v9 }
 0x630   : > { %13460 = vrot.lane.b32.xlu0 %v15223_v38, %s16508_s20  ;;  %11714 = vmatprep.subr.bf16.mxu0 %v11713_v59  ;;  %v7652_v37 = vsel %vm16690_vm4, %v12892_v17, %v13077_v47 }
 0x631   : > { %13485 = vrot.lane.b32.xlu1 %v15331_v20, %s16505_s21  ;;  %11295 = vmatmul.mubr.msk.f32.gmra.mrb[6].mxu0 %vm16683_vm15, %v7406_v27  ;;  %vm16692_vm15 = vcmask 113664  }
 0x632   : > { %v15666_v2 = vpop.permute.xlu0 %13140  ;;  %v13231_v4 = vpop.permute.xlu1 %13230  ;;  %11716 = vmatpush1.bf16.msra.mxu0 %v11715_v29  ;;  %7607 = vmatprep.mubr.f32.mxu0 %v16631_v14  ;;  %v7789_v55 = vsel %vm16692_vm15, %v13022_v13, %v13023_v10  ;;  %v16693_v29 = vld [vmem:[#allocation18_spill] sm:$0xff]  ;;  %vm16694_vm10 = vmmov %vm16692_vm15  ;;  %v13028_v10 = vunpack.i.h.bf16 %v16698_v21 }
 0x633   : > { %v13233_v5 = vunpack.i.h.bf16 %v13231_v4  ;;  %v13232_v40 = vunpack.i.l.bf16 %v13231_v4  ;;  %11719 = vmatprep.subr.msk.bf16.mxu0 %vm14628_vm13, %v11717_v0  ;;  %v12897_v27 = vunpack.i.l.bf16 %v16693_v29  ;;  %v7787_v24 = vsel %vm16694_vm10, %v12962_v54, %v12963_v33  ;;  %vm16696_vm11 = vmmov %vm16694_vm10 }
 0x634   : > { %13475 = vrot.lane.b32.xlu0 %v15233_v1, %s16508_s20  ;;  %v11729_v0 = vpack.c.bf16 %v7789_v55, %v7787_v24  ;;  %v12967_v33 = vunpack.i.l.bf16 %v16700_v9  ;;  %v13098_v9 = vunpack.i.h.bf16 %v15370_v28 }
 0x635   : > { %v7654_v42 = vsel %vm16688_vm2, %v12893_v46, %v13232_v40  ;;  %v7655_v62 = vsel %vm16689_vm7, %v13232_v40, %v13233_v5  ;;  %13490 = vrot.lane.b32.xlu1 %v15145_v15, %s16509_s19  ;;  %11296 = vmatmul.mubr.msk.f32.vlgmr.msra.gmra.mrb[4].mxu0 %vm16691_vm6, %v7495_v51  ;;  %v12898_v15 = vunpack.i.h.bf16 %v16693_v29  ;;  %v13082_v46 = vunpack.i.l.bf16 %v15540_v23  ;;  %vm16697_vm2 = vmmov %vm16691_vm6  ;;  %v7673_v51 = vld [vmem:[#allocation7 + $0x80] sm:$0xff] }
 0x636   : > { %v11723_v45 = vpack.c.bf16 %v7655_v62, %v7653_v52  ;;  %v15686_v61 = vpop.permute.xlu0 %13155  ;;  %v15688_v34 = vpop.permute.xlu1 %13235  ;;  %v11726_v59 = vpack.c.bf16 %v7654_v42, %v7652_v37  ;;  %11722 = vmatpush1.bf16.msk.msra.mxu0 %vm14659_vm12, %v11720_v48  ;;  %7613 = vmatprep.mubr.f32.mxu0 %v16631_v14  ;;  %v13027_v5 = vunpack.i.l.bf16 %v16698_v21  ;;  %vm16699_vm7 = vmmov %vm16694_vm10  ;;  %v16707_v29 = vld [vmem:[#allocation20_spill] sm:$0xff]  ;;  %v13037_v21 = vunpack.i.l.bf16 %v15368_v12 }
 0x637   : > { %v7788_v47 = vsel %vm16696_vm11, %v12898_v15, %v13022_v13  ;;  %v12902_v13 = vunpack.i.l.bf16 %v16695_v36  ;;  %v7786_v17 = vsel %vm16699_vm7, %v12897_v27, %v12962_v54  ;;  %vm16701_vm4 = vmmov %vm16699_vm7  ;;  %v12907_v15 = vunpack.i.l.bf16 %v16707_v29 }
 0x638   : > { %13480 = vrot.lane.b32.xlu0 %v15102_v8, %s16508_s20  ;;  %11725 = vmatprep.subr.msk.bf16.mxu0 %vm14628_vm13, %v11723_v45  ;;  %v11732_v48 = vpack.c.bf16 %v7788_v47, %v7786_v17  ;;  %v7791_v52 = vsel %vm16701_vm4, %v13082_v46, %v13083_v25  ;;  %vm16702_vm6 = vmmov %vm16701_vm4  ;;  %v13088_v25 = vunpack.i.h.bf16 %v15562_v53  ;;  %v16711_v47 = vld [vmem:[#allocation21_spill] sm:$0xff] }
 0x639   : > { %13500 = vrot.lane.b32.xlu1 %v15331_v20, %s16508_s20  ;;  %11297 = vmatmul.mubr.msk.f32.gmra.mrb[6].mxu0 %vm16697_vm2, %v7496_v18  ;;  %vm16703_vm15 = vmmov %vm16701_vm4  ;;  %v7674_v18 = vld [vmem:[#allocation7 + $0x88] sm:$0xff] }
 0x63a   : > { %v15708_v16 = vpop.permute.xlu0 %13170  ;;  %v13251_v4 = vpop.permute.xlu1 %13250  ;;  %11728 = vmatpush1.bf16.msk.msra.mxu0 %vm14659_vm12, %v11726_v59  ;;  %7745 = vmatprep.mubr.f32.mxu0 %v16631_v14  ;;  %vm16704_vm10 = vmmov %vm16701_vm4 }
 0x63b   : > { %v13253_v23 = vunpack.i.h.bf16 %v13251_v4  ;;  %v13252_v40 = vunpack.i.l.bf16 %v13251_v4  ;;  %11731 = vmatprep.subr.msk.bf16.mxu0 %vm14666_vm3, %v11729_v0  ;;  %v7790_v54 = vsel %vm16704_vm10, %v12902_v13, %v13082_v46  ;;  %vm16705_vm11 = vmmov %vm16697_vm2  ;;  %vm16706_vm2 = vcmask 15360  }
 0x63c   : > { %13495 = vrot.lane.b32.xlu0 %v15223_v38, %s16509_s19  ;;  %v7927_v55 = vsel %vm16706_vm2, %v13027_v5, %v13028_v10  ;;  %vm16708_vm7 = vmmov %vm16706_vm2  ;;  %v13087_v46 = vunpack.i.l.bf16 %v15562_v53  ;;  %v12913_v4 = vunpack.i.h.bf16 %v16711_v47  ;;  %v12912_v0 = vunpack.i.l.bf16 %v16711_v47  ;;  %v7811_v10 = vld [vmem:[#allocation7 + $0x90] sm:$0xff] }
 0x63d   : > { %v7792_v42 = vsel %vm16702_vm6, %v12903_v26, %v13252_v40  ;;  %v7793_v62 = vsel %vm16703_vm15, %v13252_v40, %v13253_v23  ;;  %13505 = vrot.lane.b32.xlu1 %v15096_v7, %s16509_s19  ;;  %11306 = vmatmul.mubr.msk.f32.vlgmr.msra.gmra.mrb[4].mxu0 %vm16705_vm11, %v7673_v51  ;;  %v12908_v7 = vunpack.i.h.bf16 %v16707_v29  ;;  %v7925_v27 = vsel %vm16708_vm7, %v12967_v33, %v12968_v43  ;;  %vm16709_vm4 = vmmov %vm16706_vm2  ;;  %v6501_v26 = vld [vmem:[%s16386_s6] sm:$0xff]  ;;  %v16713_v23 = vld [vmem:[#allocation25_spill] sm:$0xff] }
 0x63e   : > { %v11735_v37 = vpack.c.bf16 %v7793_v62, %v7791_v52  ;;  %v15730_v45 = vpop.permute.xlu0 %13175  ;;  %v11738_v38 = vpack.c.bf16 %v7792_v42, %v7790_v54  ;;  %11734 = vmatpush1.bf16.msk.msra.mxu0 %vm14690_vm0, %v11732_v48  ;;  %7751 = vmatprep.mubr.f32.mxu0 %v16631_v14  ;;  %vm16710_vm6 = vmmov %vm16705_vm11  ;;  %v12973_v40 = vunpack.i.h.bf16 %v16713_v23  ;;  %v13097_v43 = vunpack.i.l.bf16 %v15370_v28 }
 0x63f   : > { %v15735_v59 = vpop.permute.xlu1 %13255  ;;  %v7926_v24 = vsel %vm16709_vm4, %v12908_v7, %v13027_v5  ;;  %vm16712_vm15 = vmmov %vm16706_vm2  ;;  %v13108_v47 = vunpack.i.h.bf16 %v15606_v57 }
 0x640   : > { %13510 = vrot.lane.b32.xlu0 %v15233_v1, %s16509_s19  ;;  %11737 = vmatprep.subr.msk.bf16.mxu0 %vm14666_vm3, %v11735_v37  ;;  %v11741_v1 = vpack.c.bf16 %v7927_v55, %v7925_v27  ;;  %v7924_v5 = vsel %vm16712_vm15, %v12907_v15, %v12967_v33  ;;  %v6502_v33 = vld [vmem:[%s16386_s6 + $0x8] sm:$0xff]  ;;  %vm16714_vm10 = vmmov %vm16706_vm2  ;;  %v13103_v15 = vunpack.i.h.bf16 %v15584_v30  ;;  %v13102_v27 = vunpack.i.l.bf16 %v15584_v30 }
 0x641   : > { %13515 = vrot.lane.b32.xlu1 %v15331_v20, %s16509_s19  ;;  %11307 = vmatmul.mubr.msk.f32.gmra.mrb[6].mxu0 %vm16710_vm6, %v7674_v18  ;;  %v13038_v20 = vunpack.i.h.bf16 %v15368_v12  ;;  %v12972_v12 = vunpack.i.l.bf16 %v16713_v23  ;;  %v11744_v17 = vpack.c.bf16 %v7926_v24, %v7924_v5  ;;  %v7928_v48 = vsel %vm16714_vm10, %v12912_v0, %v13087_v46  ;;  %vm16715_vm11 = vmmov %vm16706_vm2 }
 0x642   : > { %v15751_v36 = vpop.permute.xlu0 %13190  ;;  %11740 = vmatpush1.bf16.msk.msra.mxu0 %vm14690_vm0, %v11738_v38  ;;  %7883 = vmatprep.mubr.f32.mxu0 %v16631_v14  ;;  %v7929_v52 = vsel %vm16715_vm11, %v13087_v46, %v13088_v25  ;;  %vm16716_vm7 = vmmov %vm16706_vm2  ;;  %v7812_v38 = vld [vmem:[#allocation7 + $0x98] sm:$0xff]  ;;  %v13107_v24 = vunpack.i.l.bf16 %v15606_v57 }
 0x643   : > { %v13266_v53 = vpop.permute.xlu1 %13265  ;;  %11743 = vmatprep.subr.msk.bf16.mxu0 %vm14551_vm1, %v11741_v1  ;;  %vm16717_vm4 = vmmov %vm16710_vm6  ;;  %vm16718_vm6 = vcmask 7168  }
 0x644   : > { %v13268_v51 = vunpack.i.h.bf16 %v13266_v53  ;;  %v13267_v13 = vunpack.i.l.bf16 %v13266_v53  ;;  %13520 = vrot.lane.b32.xlu0 %v15102_v8, %s16509_s19  ;;  %v8065_v54 = vsel %vm16718_vm6, %v13037_v21, %v13038_v20  ;;  %vm16719_vm15 = vmmov %vm16718_vm6 }
 0x645   : > { %6505 = vperm.xlu1 %12443, %v6501_v26   ;;  %11316 = vmatmul.mubr.msk.f32.vlgmr.msra.gmra.mrb[4].mxu0 %vm16717_vm4, %v7811_v10  ;;  %v8063_v18 = vsel %vm16719_vm15, %v12972_v12, %v12973_v40  ;;  %vm16720_vm10 = vmmov %vm16718_vm6  ;;  %v7949_v26 = vld [vmem:[#allocation7 + $0xa0] sm:$0xff] }
 0x646   : > { %v7930_v42 = vsel %vm16706_vm2, %v12913_v4, %v13267_v13  ;;  %v7931_v8 = vsel %vm16716_vm7, %v13267_v13, %v13268_v51  ;;  %v15780_v62 = vpop.permute.xlu0 %13205  ;;  %11746 = vmatpush1.bf16.msk.msra.mxu0 %vm14558_vm5, %v11744_v17  ;;  %7889 = vmatprep.mubr.f32.mxu0 %v16631_v14  ;;  %v8064_v29 = vsel %vm16720_vm10, %v13098_v9, %v13037_v21  ;;  %vm16721_vm11 = vmmov %vm16718_vm6  ;;  %v7950_v51 = vld [vmem:[#allocation7 + $0xa8] sm:$0xff]  ;;  %v13122_v17 = vunpack.i.l.bf16 %v15628_v50 }
 0x647   : > { %v11747_v28 = vpack.c.bf16 %v7931_v8, %v7929_v52  ;;  %v11750_v37 = vpack.c.bf16 %v7930_v42, %v7928_v48  ;;  %v15785_v55 = vpop.permute.xlu1 %13270  ;;  %v8062_v7 = vsel %vm16721_vm11, %v13097_v43, %v12972_v12  ;;  %vm16722_vm2 = vmmov %vm16717_vm4  ;;  %v11753_v46 = vpack.c.bf16 %v8065_v54, %v8063_v18  ;;  %v8087_v43 = vld [vmem:[#allocation7 + $0xb0] sm:$0xff]  ;;  %v16730_v48 = vld [vmem:[#allocation11_spill] sm:$0xff] }
 0x648   : > { %6510 = vperm.xlu0 %12442, %v6502_v33   ;;  %v11756_v30 = vpack.c.bf16 %v8064_v29, %v8062_v7  ;;  %vm16723_vm7 = vmmov %vm16718_vm6  ;;  %v13123_v12 = vunpack.i.h.bf16 %v15628_v50  ;;  %v16729_v33 = vld [vmem:[#allocation13_spill] sm:$0xff]  ;;  %v13118_v42 = vunpack.i.h.bf16 %v15404_v31  ;;  %v13117_v8 = vunpack.i.l.bf16 %v15404_v31  ;;  %v8088_v7 = vld [vmem:[#allocation7 + $0xb8] sm:$0xff] }
 0x649   : > { %11749 = vmatprep.subr.msk.bf16.mxu0 %vm14551_vm1, %v11747_v28  ;;  %11317 = vmatmul.mubr.msk.f32.gmra.mrb[6].mxu0 %vm16722_vm2, %v7812_v38  ;;  %v8067_v20 = vsel %vm16723_vm7, %v13102_v27, %v13103_v15  ;;  %vm16724_vm4 = vmmov %vm16718_vm6  ;;  %v16731_v52 = vpack.c.bf16 %v16729_v33, %v16730_v48  ;;  %v13133_v50 = vunpack.i.h.bf16 %v15438_v19  ;;  %vm16732_vm7 = vcmask 1039360   ;;  %v16734_v38 = vld [vmem:[#allocation10_spill] sm:$0xff]  ;;  %v16736_v31 = vld [vmem:[#allocation17_spill] sm:$0xff] }
 0x64a   : > { %v15797_v25 = vpop.permute.xlu0 %13210  ;;  %11752 = vmatpush1.bf16.msk.msra.mxu0 %vm14558_vm5, %v11750_v37  ;;  %8021 = vmatprep.mubr.f32.mxu0 %v16631_v14  ;;  %v8066_v21 = vsel %vm16724_vm4, %v13107_v24, %v13102_v27  ;;  %vm16725_vm6 = vmmov %vm16724_vm4  ;;  %v8317_v28 = vsel %vm16732_vm7, %v13122_v17, %v13123_v12  ;;  %v16733_v37 = vld [vmem:[#allocation12_spill] sm:$0xff]  ;;  %v13132_v15 = vunpack.i.l.bf16 %v15438_v19  ;;  %v16737_v27 = vld [vmem:[#allocation15_spill] sm:$0xff]  ;;  %v13158_v19 = vunpack.i.h.bf16 %v15686_v61 }
 0x64b   : > { %v13286_v1 = vpop.permute.xlu1 %13285  ;;  %11755 = vmatprep.subr.msk.bf16.mxu0 %vm14573_vm8, %v11753_v46  ;;  %vm16726_vm15 = vmmov %vm16724_vm4  ;;  %v16735_v18 = vpack.c.bf16 %v16733_v37, %v16734_v38  ;;  %v16738_v24 = vpack.c.bf16 %v16736_v31, %v16737_v27 }
 0x64c   : > { %v13288_v4 = vunpack.i.h.bf16 %v13286_v1  ;;  %v13287_v0 = vunpack.i.l.bf16 %v13286_v1  ;;  %vm16727_vm10 = vmmov %vm16722_vm2 }
 0x64d   : > { %11326 = vmatmul.mubr.msk.f32.vlgmr.msra.gmra.mrb[4].mxu0 %vm16727_vm10, %v7949_v26  ;;  %vm16728_vm11 = vmmov %vm16722_vm2 }
 0x64e   : > { %v8068_v53 = vsel %vm16725_vm6, %v13108_v47, %v13287_v0  ;;  %v8069_v10 = vsel %vm16726_vm15, %v13287_v0, %v13288_v4  ;;  %v15810_v5 = vpop.permute.xlu0 %13225  ;;  %11758 = vmatpush1.bf16.msk.msra.mxu0 %vm14592_vm9, %v11756_v30  ;;  %8027 = vmatprep.mubr.f32.mxu0 %v16631_v14  ;;  %vm16739_vm4 = vmmov %vm16732_vm7  ;;  %v13138_v47 = vunpack.i.h.bf16 %v15648_v60  ;;  %v13137_v4 = vunpack.i.l.bf16 %v15648_v60 }
 0x64f   : > { %v11759_v23 = vpack.c.bf16 %v8069_v10, %v8067_v20  ;;  %v11762_v57 = vpack.c.bf16 %v8068_v53, %v8066_v21  ;;  %v15814_v40 = vpop.permute.xlu1 %13290  ;;  %v8315_v46 = vsel %vm16739_vm4, %v13117_v8, %v13118_v42  ;;  %vm16740_vm6 = vmmov %vm16739_vm4  ;;  %v13142_v0 = vunpack.i.l.bf16 %v15666_v2  ;;  %v16742_v21 = vld [vmem:[#allocation16_spill] sm:$0xff]  ;;  %v16743_v53 = vld [vmem:[#allocation14_spill] sm:$0xff] }
 0x650   : > { %v8316_v1 = vsel %vm16740_vm6, %v13133_v50, %v13122_v17  ;;  %v11773_v26 = vpack.c.bf16 %v8317_v28, %v8315_v46  ;;  %vm16741_vm15 = vmmov %vm16722_vm2  ;;  %v13157_v20 = vunpack.i.l.bf16 %v15686_v61  ;;  %v16744_v10 = vpack.c.bf16 %v16742_v21, %v16743_v53 }
 0x651   : > { %11761 = vmatprep.subr.msk.bf16.mxu0 %vm14573_vm8, %v11759_v23  ;;  %11327 = vmatmul.mubr.msk.f32.gmra.mrb[6].mxu0 %vm16728_vm11, %v7950_v51  ;;  %vm16745_vm10 = vmmov %vm16739_vm4  ;;  %v13143_v51 = vunpack.i.h.bf16 %v15666_v2  ;;  %v13152_v61 = vunpack.i.l.bf16 %v15476_v58  ;;  %v13168_v50 = vunpack.i.h.bf16 %v15520_v41  ;;  %v13172_v46 = vunpack.i.l.bf16 %v15708_v16 }
 0x652   : > { %v15820_v13 = vpop.permute.xlu0 %13240  ;;  %11764 = vmatpush1.bf16.msk.msra.mxu0 %vm14592_vm9, %v11762_v57  ;;  %8159 = vmatprep.mubr.f32.mxu0 %v16631_v14  ;;  %v8177_v57 = vld [vmem:[#allocation7 + $0xc0] sm:$0xff]  ;;  %v8314_v60 = vsel %vm16745_vm10, %v13132_v15, %v13117_v8  ;;  %vm16746_vm11 = vmmov %vm16739_vm4  ;;  %v13188_v53 = vunpack.i.h.bf16 %v15564_v39 }
 0x653   : > { %v15826_v9 = vpop.permute.xlu1 %13300  ;;  %11766 = vmatprep.subr.bf16.mxu0 %v16731_v52  ;;  %v11776_v33 = vpack.c.bf16 %v8316_v1, %v8314_v60  ;;  %v8319_v48 = vsel %vm16746_vm11, %v13137_v4, %v13138_v47  ;;  %vm16750_vm6 = vmmov %vm16741_vm15  ;;  %v13177_v1 = vunpack.i.l.bf16 %v15730_v45  ;;  %v13192_v47 = vunpack.i.l.bf16 %v15751_v36 }
 0x655   : > { %11336 = vmatmul.mubr.msk.f32.vlgmr.msra.gmra.mrb[4].mxu0 %vm16722_vm2, %v8087_v43  ;;  %v13153_v43 = vunpack.i.h.bf16 %v15476_v58  ;;  %vm16747_vm2 = vmmov %vm16739_vm4 }
 0x656   : > { %v15835_v54 = vpop.permute.xlu0 %13245  ;;  %11768 = vmatpush1.bf16.msra.mxu0 %v16735_v18  ;;  %8165 = vmatprep.mubr.f32.mxu0 %v16631_v14  ;;  %v8318_v52 = vsel %vm16747_vm2, %v13142_v0, %v13137_v4  ;;  %vm16748_vm7 = vmmov %vm16747_vm2  ;;  %v8178_v18 = vld [vmem:[#allocation7 + $0xc8] sm:$0xff]  ;;  %v8339_v0 = vld [vmem:[#allocation7 + $0xd0] sm:$0xff] }
 0x657   : > { %v15842_v29 = vpop.permute.xlu1 %13315  ;;  %11770 = vmatprep.subr.bf16.mxu0 %v16738_v24  ;;  %vm16749_vm4 = vmmov %vm16747_vm2  ;;  %v13173_v24 = vunpack.i.h.bf16 %v15708_v16  ;;  %v13178_v16 = vunpack.i.h.bf16 %v15730_v45 }
 0x658   : > { %vm16754_vm2 = vmmov %vm16750_vm6 }
 0x659   : > { %11337 = vmatmul.mubr.msk.f32.gmra.mrb[6].mxu0 %vm16741_vm15, %v8088_v7  ;;  %vm16751_vm15 = vcmask 1031168   ;;  %v13167_v7 = vunpack.i.l.bf16 %v15520_v41  ;;  %v13193_v41 = vunpack.i.h.bf16 %v15751_v36  ;;  %v13187_v36 = vunpack.i.l.bf16 %v15564_v39 }
 0x65a   : > { %v15855_v30 = vpop.permute.xlu0 %13260  ;;  %11772 = vmatpush1.bf16.msra.mxu0 %v16744_v10  ;;  %8249 = vmatprep.mubr.f32.mxu0 %v16631_v14  ;;  %v8455_v28 = vsel %vm16751_vm15, %v13157_v20, %v13158_v19  ;;  %vm16752_vm10 = vmmov %vm16751_vm15 }
 0x65b   : > { %v13326_v23 = vpop.permute.xlu1 %13325  ;;  %11775 = vmatprep.subr.msk.bf16.mxu0 %vm14628_vm13, %v11773_v26  ;;  %v8453_v15 = vsel %vm16752_vm10, %v13152_v61, %v13153_v43  ;;  %vm16753_vm11 = vmmov %vm16752_vm10 }
 0x65c   : > { %v13328_v12 = vunpack.i.h.bf16 %v13326_v23  ;;  %v13327_v17 = vunpack.i.l.bf16 %v13326_v23  ;;  %v8454_v31 = vsel %vm16753_vm11, %v13168_v50, %v13157_v20  ;;  %v11785_v27 = vpack.c.bf16 %v8455_v28, %v8453_v15  ;;  %vm16760_vm11 = vmmov %vm16754_vm2  ;;  %v8477_v15 = vld [vmem:[#allocation7 + $0xe0] sm:$0xff] }
 0x65d   : > { %11338 = vmatmul.mubr.msk.f32.vlgmr.msra.gmra.mrb[4].mxu0 %vm16750_vm6, %v8177_v57  ;;  %v13208_v50 = vunpack.i.h.bf16 %v15780_v62  ;;  %v13207_v28 = vunpack.i.l.bf16 %v15780_v62  ;;  %v13213_v62 = vunpack.i.h.bf16 %v15797_v25 }
 0x65e   : > { %v8320_v42 = vsel %vm16748_vm7, %v13143_v51, %v13327_v17  ;;  %v8321_v8 = vsel %vm16749_vm4, %v13327_v17, %v13328_v12  ;;  %v15874_v2 = vpop.permute.xlu0 %13275  ;;  %11778 = vmatpush1.bf16.msk.msra.mxu0 %vm14659_vm12, %v11776_v33  ;;  %8255 = vmatprep.mubr.f32.mxu0 %v16631_v14  ;;  %vm16755_vm7 = vmmov %vm16752_vm10  ;;  %v13203_v12 = vunpack.i.h.bf16 %v15608_v22  ;;  %v8340_v33 = vld [vmem:[#allocation7 + $0xd8] sm:$0xff] }
 0x65f   : > { %v11779_v37 = vpack.c.bf16 %v8321_v8, %v8319_v48  ;;  %v11782_v38 = vpack.c.bf16 %v8320_v42, %v8318_v52  ;;  %v15880_v58 = vpop.permute.xlu1 %13330  ;;  %v8452_v19 = vsel %vm16755_vm7, %v13167_v7, %v13152_v61  ;;  %vm16756_vm4 = vmmov %vm16755_vm7  ;;  %v13202_v48 = vunpack.i.l.bf16 %v15608_v22 }
 0x660   : > { %v11788_v10 = vpack.c.bf16 %v8454_v31, %v8452_v19  ;;  %v8457_v23 = vsel %vm16756_vm4, %v13172_v46, %v13173_v24  ;;  %vm16757_vm6 = vmmov %vm16756_vm4  ;;  %v13228_v22 = vunpack.i.h.bf16 %v15810_v5  ;;  %v13238_v19 = vunpack.i.h.bf16 %v15688_v34 }
 0x661   : > { %11781 = vmatprep.subr.msk.bf16.mxu0 %vm14628_vm13, %v11779_v37  ;;  %11339 = vmatmul.mubr.msk.f32.gmra.mrb[6].mxu0 %vm16754_vm2, %v8178_v18  ;;  %v8456_v57 = vsel %vm16757_vm6, %v13177_v1, %v13172_v46  ;;  %vm16758_vm15 = vmmov %vm16756_vm4  ;;  %vm16761_vm2 = vcmask 932864   ;;  %v13212_v37 = vunpack.i.l.bf16 %v15797_v25  ;;  %v13227_v18 = vunpack.i.l.bf16 %v15810_v5 }
 0x662   : > { %v15892_v26 = vpop.permute.xlu0 %13280  ;;  %11784 = vmatpush1.bf16.msk.msra.mxu0 %vm14659_vm12, %v11782_v38  ;;  %8411 = vmatprep.mubr.f32.mxu0 %v16631_v14  ;;  %vm16759_vm10 = vmmov %vm16756_vm4  ;;  %v8593_v17 = vsel %vm16761_vm2, %v13192_v47, %v13193_v41  ;;  %v13223_v46 = vunpack.i.h.bf16 %v15650_v6  ;;  %v13222_v5 = vunpack.i.l.bf16 %v15650_v6 }
 0x663   : > { %v13346_v4 = vpop.permute.xlu1 %13345  ;;  %11787 = vmatprep.subr.msk.bf16.mxu0 %vm14666_vm3, %v11785_v27  ;;  %vm16762_vm7 = vmmov %vm16761_vm2 }
 0x664   : > { %v13348_v20 = vunpack.i.h.bf16 %v13346_v4  ;;  %v13347_v21 = vunpack.i.l.bf16 %v13346_v4  ;;  %v8591_v52 = vsel %vm16762_vm7, %v13187_v36, %v13188_v53  ;;  %vm16763_vm4 = vmmov %vm16761_vm2  ;;  %v8478_v53 = vld [vmem:[#allocation7 + $0xe8] sm:$0xff] }
 0x665   : > { %11348 = vmatmul.mubr.msk.f32.vlgmr.msra.gmra.mrb[4].mxu0 %vm16760_vm11, %v8339_v0  ;;  %v8592_v42 = vsel %vm16763_vm4, %v13203_v12, %v13192_v47  ;;  %v11797_v8 = vpack.c.bf16 %v8593_v17, %v8591_v52  ;;  %vm16764_vm6 = vmmov %vm16760_vm11  ;;  %v13247_v12 = vunpack.i.l.bf16 %v15835_v54 }
 0x666   : > { %v8458_v60 = vsel %vm16758_vm15, %v13178_v16, %v13347_v21  ;;  %v8459_v51 = vsel %vm16759_vm10, %v13347_v21, %v13348_v20  ;;  %v15910_v45 = vpop.permute.xlu0 %13295  ;;  %11790 = vmatpush1.bf16.msk.msra.mxu0 %vm14690_vm0, %v11788_v10  ;;  %8417 = vmatprep.mubr.f32.mxu0 %v16631_v14  ;;  %vm16765_vm15 = vmmov %vm16761_vm2 }
 0x667   : > { %v11791_v43 = vpack.c.bf16 %v8459_v51, %v8457_v23  ;;  %v11794_v61 = vpack.c.bf16 %v8458_v60, %v8456_v57  ;;  %v15916_v39 = vpop.permute.xlu1 %13350  ;;  %v8590_v31 = vsel %vm16765_vm15, %v13202_v48, %v13187_v36  ;;  %vm16766_vm10 = vmmov %vm16761_vm2  ;;  %v13237_v36 = vunpack.i.l.bf16 %v15688_v34 }
 0x668   : > { %v11800_v1 = vpack.c.bf16 %v8592_v42, %v8590_v31  ;;  %v8595_v41 = vsel %vm16766_vm10, %v13207_v28, %v13208_v50  ;;  %vm16767_vm11 = vmmov %vm16761_vm2  ;;  %v13243_v60 = vunpack.i.h.bf16 %v15820_v13  ;;  %v13242_v51 = vunpack.i.l.bf16 %v15820_v13 }
 0x669   : > { %11793 = vmatprep.subr.msk.bf16.mxu0 %vm14666_vm3, %v11791_v43  ;;  %11349 = vmatmul.mubr.msk.f32.gmra.mrb[6].mxu0 %vm16764_vm6, %v8340_v33  ;;  %v8594_v47 = vsel %vm16767_vm11, %v13212_v37, %v13207_v28  ;;  %vm16768_vm7 = vmmov %vm16761_vm2  ;;  %v13263_v34 = vunpack.i.h.bf16 %v15855_v30  ;;  %v13262_v43 = vunpack.i.l.bf16 %v15855_v30  ;;  %v8615_v33 = vld [vmem:[#allocation7 + $0xf0] sm:$0xff]  ;;  %v13248_v13 = vunpack.i.h.bf16 %v15835_v54 }
 0x66a   : > { %v15928_v38 = vpop.permute.xlu0 %13305  ;;  %11796 = vmatpush1.bf16.msk.msra.mxu0 %vm14690_vm0, %v11794_v61  ;;  %8549 = vmatprep.mubr.f32.mxu0 %v16631_v14  ;;  %vm16769_vm4 = vmmov %vm16764_vm6  ;;  %vm16770_vm6 = vcmask 924672   ;;  %v13257_v30 = vunpack.i.l.bf16 %v15735_v59 }
 0x66b   : > { %v13361_v7 = vpop.permute.xlu1 %13360  ;;  %11799 = vmatprep.subr.msk.bf16.mxu0 %vm14551_vm1, %v11797_v8  ;;  %v8731_v16 = vsel %vm16770_vm6, %v13227_v18, %v13228_v22  ;;  %vm16771_vm15 = vmmov %vm16770_vm6  ;;  %v13258_v8 = vunpack.i.h.bf16 %v15735_v59 }
 0x66c   : > { %v13363_v27 = vunpack.i.h.bf16 %v13361_v7  ;;  %v13362_v24 = vunpack.i.l.bf16 %v13361_v7  ;;  %v8729_v10 = vsel %vm16771_vm15, %v13222_v5, %v13223_v46  ;;  %vm16772_vm10 = vmmov %vm16770_vm6  ;;  %v13273_v7 = vunpack.i.h.bf16 %v15785_v55 }
 0x66d   : > { %11358 = vmatmul.mubr.msk.f32.vlgmr.msra.gmra.mrb[4].mxu0 %vm16769_vm4, %v8477_v15  ;;  %v8730_v23 = vsel %vm16772_vm10, %v13238_v19, %v13227_v18  ;;  %v11809_v57 = vpack.c.bf16 %v8731_v16, %v8729_v10  ;;  %vm16773_vm11 = vmmov %vm16769_vm4  ;;  %v13297_v19 = vunpack.i.l.bf16 %v15910_v45  ;;  %v13293_v10 = vunpack.i.h.bf16 %v15814_v40 }
 0x66e   : > { %v8596_v4 = vsel %vm16761_vm2, %v13213_v62, %v13362_v24  ;;  %v8597_v0 = vsel %vm16768_vm7, %v13362_v24, %v13363_v27  ;;  %v15946_v25 = vpop.permute.xlu0 %13310  ;;  %11802 = vmatpush1.bf16.msk.msra.mxu0 %vm14558_vm5, %v11800_v1  ;;  %8555 = vmatprep.mubr.f32.mxu0 %v16631_v14  ;;  %vm16774_vm2 = vmmov %vm16770_vm6  ;;  %v8616_v62 = vld [vmem:[#allocation7 + $0xf8] sm:$0xff]  ;;  %v13272_v24 = vunpack.i.l.bf16 %v15785_v55  ;;  %v13278_v1 = vunpack.i.h.bf16 %v15874_v2 }
 0x66f   : > { %v11803_v20 = vpack.c.bf16 %v8597_v0, %v8595_v41  ;;  %v11806_v21 = vpack.c.bf16 %v8596_v4, %v8594_v47  ;;  %v15952_v6 = vpop.permute.xlu1 %13365  ;;  %v8728_v48 = vsel %vm16774_vm2, %v13237_v36, %v13222_v5  ;;  %vm16775_vm7 = vmmov %vm16774_vm2  ;;  %v13277_v41 = vunpack.i.l.bf16 %v15874_v2 }
 0x670   : > { %v11812_v50 = vpack.c.bf16 %v8730_v23, %v8728_v48  ;;  %v8733_v28 = vsel %vm16775_vm7, %v13242_v51, %v13243_v60  ;;  %vm16776_vm4 = vmmov %vm16774_vm2  ;;  %v13282_v47 = vunpack.i.l.bf16 %v15892_v26  ;;  %v13298_v55 = vunpack.i.h.bf16 %v15910_v45  ;;  %v8754_v48 = vld [vmem:[#allocation7 + $0x108] sm:$0xff] }
 0x671   : > { %11805 = vmatprep.subr.msk.bf16.mxu0 %vm14551_vm1, %v11803_v20  ;;  %11359 = vmatmul.mubr.msk.f32.gmra.mrb[6].mxu0 %vm16773_vm11, %v8478_v53  ;;  %v8732_v37 = vsel %vm16776_vm4, %v13247_v12, %v13242_v51  ;;  %vm16777_vm6 = vmmov %vm16774_vm2  ;;  %v8753_v20 = vld [vmem:[#allocation7 + $0x100] sm:$0xff]  ;;  %v13292_v23 = vunpack.i.l.bf16 %v15814_v40 }
 0x672   : > { %v15964_v17 = vpop.permute.xlu0 %13320  ;;  %11808 = vmatpush1.bf16.msk.msra.mxu0 %vm14558_vm5, %v11806_v21  ;;  %8687 = vmatprep.mubr.f32.mxu0 %v16631_v14  ;;  %vm16778_vm15 = vmmov %vm16774_vm2  ;;  %v13283_v21 = vunpack.i.h.bf16 %v15892_v26 }
 0x673   : > { %v13381_v61 = vpop.permute.xlu1 %13380  ;;  %11811 = vmatprep.subr.msk.bf16.mxu0 %vm14573_vm8, %v11809_v57  ;;  %vm16779_vm10 = vmmov %vm16773_vm11  ;;  %vm16780_vm11 = vcmask 916480  }
 0x674   : > { %v13383_v52 = vunpack.i.h.bf16 %v13381_v61  ;;  %v13382_v42 = vunpack.i.l.bf16 %v13381_v61  ;;  %v8872_v27 = vsel %vm16780_vm11, %v13262_v43, %v13263_v34  ;;  %vm16781_vm2 = vmmov %vm16780_vm11  ;;  %v13303_v34 = vunpack.i.h.bf16 %v15826_v9 }
 0x675   : > { %11368 = vmatmul.mubr.msk.f32.vlgmr.msra.gmra.mrb[4].mxu0 %vm16779_vm10, %v8615_v33  ;;  %v8871_v46 = vsel %vm16781_vm2, %v13273_v7, %v13262_v43  ;;  %vm16782_vm7 = vmmov %vm16781_vm2  ;;  %v8874_v12 = vsel %vm16781_vm2, %v13277_v41, %v13278_v1  ;;  %v8843_v7 = vld [vmem:[#allocation7 + $0x110] sm:$0xff] }
 0x676   : > { %v8734_v22 = vsel %vm16777_vm6, %v13248_v13, %v13382_v42  ;;  %v8735_v18 = vsel %vm16778_vm15, %v13382_v42, %v13383_v52  ;;  %v15982_v54 = vpop.permute.xlu0 %13335  ;;  %11814 = vmatpush1.bf16.msk.msra.mxu0 %vm14592_vm9, %v11812_v50  ;;  %8693 = vmatprep.mubr.f32.mxu0 %v16631_v14  ;;  %v8870_v5 = vsel %vm16782_vm7, %v13257_v30, %v13258_v8  ;;  %vm16783_vm4 = vmmov %vm16779_vm10  ;;  %v13302_v13 = vunpack.i.l.bf16 %v15826_v9 }
 0x677   : > { %v11815_v15 = vpack.c.bf16 %v8735_v18, %v8733_v28  ;;  %v11818_v31 = vpack.c.bf16 %v8734_v22, %v8732_v37  ;;  %v15987_v59 = vpop.permute.xlu1 %13385  ;;  %v11821_v0 = vpack.c.bf16 %v8872_v27, %v8870_v5  ;;  %vm16784_vm6 = vmmov %vm16781_vm2  ;;  %v13307_v50 = vunpack.i.l.bf16 %v15928_v38 }
 0x678   : > { %v8869_v2 = vsel %vm16784_vm6, %v13272_v24, %v13257_v30  ;;  %vm16785_vm15 = vmmov %vm16781_vm2  ;;  %v13308_v30 = vunpack.i.h.bf16 %v15928_v38  ;;  %v13312_v28 = vunpack.i.l.bf16 %v15946_v25  ;;  %v13323_v22 = vunpack.i.h.bf16 %v15964_v17 }
 0x679   : > { %11817 = vmatprep.subr.msk.bf16.mxu0 %vm14573_vm8, %v11815_v15  ;;  %11369 = vmatmul.mubr.msk.f32.gmra.mrb[6].mxu0 %vm16783_vm4, %v8616_v62  ;;  %v11823_v57 = vpack.c.bf16 %v8871_v46, %v8869_v2  ;;  %v8873_v45 = vsel %vm16785_vm15, %v13282_v47, %v13277_v41  ;;  %vm16786_vm10 = vmmov %vm16781_vm2  ;;  %v13322_v9 = vunpack.i.l.bf16 %v15964_v17  ;;  %v13318_v27 = vunpack.i.h.bf16 %v15842_v29 }
 0x67a   : > { %v16000_v4 = vpop.permute.xlu0 %13340  ;;  %11820 = vmatpush1.bf16.msk.msra.mxu0 %vm14592_vm9, %v11818_v31  ;;  %8825 = vmatprep.mubr.f32.mxu0 %v16631_v14  ;;  %vm16787_vm11 = vmmov %vm16783_vm4  ;;  %vm16789_vm4 = vcmask 908288   ;;  %v13313_v31 = vunpack.i.h.bf16 %v15946_v25  ;;  %v13317_v24 = vunpack.i.l.bf16 %v15842_v29  ;;  %v13333_v47 = vunpack.i.h.bf16 %v15880_v58 }
 0x67b   : > { %v13396_v16 = vpop.permute.xlu1 %13395  ;;  %11822 = vmatprep.subr.bf16.mxu0 %v11821_v0  ;;  %vm16788_vm7 = vmmov %vm16781_vm2  ;;  %v8999_v43 = vsel %vm16789_vm4, %v13297_v19, %v13298_v55 }
 0x67c   : > { %v13398_v53 = vunpack.i.h.bf16 %v13396_v16  ;;  %v13397_v36 = vunpack.i.l.bf16 %v13396_v16  ;;  %vm16790_vm6 = vmmov %vm16789_vm4  ;;  %v8844_v16 = vld [vmem:[#allocation7 + $0x118] sm:$0xff] }
 0x67d   : > { %11378 = vmatmul.mubr.msk.f32.vlgmr.msra.gmra.mrb[4].mxu0 %vm16787_vm11, %v8753_v20  ;;  %v8997_v52 = vsel %vm16790_vm6, %v13292_v23, %v13293_v10  ;;  %vm16791_vm15 = vmmov %vm16789_vm4  ;;  %v13332_v20 = vunpack.i.l.bf16 %v15880_v58  ;;  %v13337_v10 = vunpack.i.l.bf16 %v15982_v54 }
 0x67e   : > { %v8875_v60 = vsel %vm16786_vm10, %v13283_v21, %v13397_v36  ;;  %v16014_v51 = vpop.permute.xlu0 %13355  ;;  %v8876_v26 = vsel %vm16788_vm7, %v13397_v36, %v13398_v53  ;;  %11824 = vmatpush1.bf16.msra.mxu0 %v11823_v57  ;;  %8831 = vmatprep.mubr.f32.mxu0 %v16631_v14  ;;  %v8998_v42 = vsel %vm16791_vm15, %v13303_v34, %v13297_v19  ;;  %vm16792_vm10 = vmmov %vm16787_vm11  ;;  %v13338_v36 = vunpack.i.h.bf16 %v15982_v54 }
 0x67f   : > { %v11827_v61 = vpack.c.bf16 %v8875_v60, %v8873_v45  ;;  %v16020_v40 = vpop.permute.xlu1 %13400  ;;  %v11825_v33 = vpack.c.bf16 %v8876_v26, %v8874_v12  ;;  %v11829_v8 = vpack.c.bf16 %v8999_v43, %v8997_v52  ;;  %vm16793_vm11 = vmmov %vm16789_vm4  ;;  %v13358_v58 = vunpack.i.h.bf16 %v16014_v51  ;;  %v9021_v12 = vld [vmem:[#allocation7 + $0x120] sm:$0xff] }
 0x680   : > { %v8996_v15 = vsel %vm16793_vm11, %v13302_v13, %v13292_v23  ;;  %vm16794_vm2 = vmmov %vm16789_vm4  ;;  %v13342_v23 = vunpack.i.l.bf16 %v16000_v4  ;;  %v13357_v45 = vunpack.i.l.bf16 %v16014_v51  ;;  %v13343_v54 = vunpack.i.h.bf16 %v16000_v4 }
 0x681   : > { %11826 = vmatprep.subr.bf16.mxu0 %v11825_v33  ;;  %11379 = vmatmul.mubr.msk.f32.gmra.mrb[6].mxu0 %vm16792_vm10, %v8754_v48  ;;  %v11832_v46 = vpack.c.bf16 %v8998_v42, %v8996_v15  ;;  %v9001_v17 = vsel %vm16794_vm2, %v13307_v50, %v13308_v30  ;;  %vm16795_vm7 = vmmov %vm16794_vm2  ;;  %v13352_v51 = vunpack.i.l.bf16 %v15916_v39 }
 0x682   : > { %v16030_v37 = vpop.permute.xlu0 %13370  ;;  %11828 = vmatpush1.bf16.msra.mxu0 %v11827_v61  ;;  %8955 = vmatprep.mubr.f32.mxu0 %v16631_v14  ;;  %v9000_v5 = vsel %vm16795_vm7, %v13312_v28, %v13307_v50  ;;  %vm16796_vm4 = vmmov %vm16794_vm2  ;;  %v13353_v61 = vunpack.i.h.bf16 %v15916_v39 }
 0x683   : > { %v13416_v18 = vpop.permute.xlu1 %13415  ;;  %11831 = vmatprep.subr.msk.bf16.mxu0 %vm14628_vm13, %v11829_v8  ;;  %vm16797_vm6 = vmmov %vm16794_vm2  ;;  %v13368_v8 = vunpack.i.h.bf16 %v15952_v6 }
 0x684   : > { %v13418_v38 = vunpack.i.h.bf16 %v13416_v18  ;;  %v13417_v62 = vunpack.i.l.bf16 %v13416_v18  ;;  %vm16798_vm15 = vmmov %vm16792_vm10  ;;  %vm16799_vm10 = vcmask 900096  }
 0x685   : > { %11380 = vmatmul.mubr.msk.f32.vlgmr.msra.gmra.mrb[4].mxu0 %vm16798_vm15, %v8843_v7  ;;  %v9137_v0 = vsel %vm16799_vm10, %v13322_v9, %v13323_v22  ;;  %vm16800_vm11 = vmmov %vm16799_vm10  ;;  %v9022_v22 = vld [vmem:[#allocation7 + $0x128] sm:$0xff] }
 0x686   : > { %v9002_v1 = vsel %vm16796_vm4, %v13313_v31, %v13417_v62  ;;  %v9003_v41 = vsel %vm16797_vm6, %v13417_v62, %v13418_v38  ;;  %v16046_v25 = vpop.permute.xlu0 %13375  ;;  %11834 = vmatpush1.bf16.msk.msra.mxu0 %vm14659_vm12, %v11832_v46  ;;  %8961 = vmatprep.mubr.f32.mxu0 %v16631_v14  ;;  %v9135_v2 = vsel %vm16800_vm11, %v13317_v24, %v13318_v27  ;;  %vm16801_vm2 = vmmov %vm16799_vm10  ;;  %v13373_v31 = vunpack.i.h.bf16 %v16030_v37 }
 0x687   : > { %v11835_v55 = vpack.c.bf16 %v9003_v41, %v9001_v17  ;;  %v11838_v19 = vpack.c.bf16 %v9002_v1, %v9000_v5  ;;  %v16052_v29 = vpop.permute.xlu1 %13420  ;;  %v9136_v21 = vsel %vm16801_vm2, %v13333_v47, %v13322_v9  ;;  %v11841_v53 = vpack.c.bf16 %v9137_v0, %v9135_v2  ;;  %vm16802_vm7 = vmmov %vm16798_vm15  ;;  %v9159_v17 = vld [vmem:[#allocation7 + $0x130] sm:$0xff] }
 0x688   : > { %vm16803_vm4 = vmmov %vm16801_vm2  ;;  %v13367_v9 = vunpack.i.l.bf16 %v15952_v6  ;;  %v13372_v38 = vunpack.i.l.bf16 %v16030_v37  ;;  %v13377_v62 = vunpack.i.l.bf16 %v16046_v25  ;;  %v13378_v37 = vunpack.i.h.bf16 %v16046_v25 }
 0x689   : > { %11837 = vmatprep.subr.msk.bf16.mxu0 %vm14628_vm13, %v11835_v55  ;;  %11381 = vmatmul.mubr.msk.f32.gmra.mrb[6].mxu0 %vm16802_vm7, %v8844_v16  ;;  %v9134_v26 = vsel %vm16803_vm4, %v13332_v20, %v13317_v24  ;;  %vm16804_vm6 = vmmov %vm16801_vm2  ;;  %v13388_v47 = vunpack.i.h.bf16 %v15987_v59  ;;  %v13387_v0 = vunpack.i.l.bf16 %v15987_v59 }
 0x68a   : > { %v16064_v57 = vpop.permute.xlu0 %13390  ;;  %11840 = vmatpush1.bf16.msk.msra.mxu0 %vm14659_vm12, %v11838_v19  ;;  %9093 = vmatprep.mubr.f32.mxu0 %v16631_v14  ;;  %v11844_v33 = vpack.c.bf16 %v9136_v21, %v9134_v26  ;;  %v9139_v48 = vsel %vm16804_vm6, %v13337_v10, %v13338_v36  ;;  %vm16805_vm15 = vmmov %vm16801_vm2  ;;  %v13403_v21 = vunpack.i.h.bf16 %v16020_v40 }
 0x68b   : > { %v13431_v60 = vpop.permute.xlu1 %13430  ;;  %11843 = vmatprep.subr.msk.bf16.mxu0 %vm14666_vm3, %v11841_v53  ;;  %v9138_v13 = vsel %vm16805_vm15, %v13342_v23, %v13337_v10  ;;  %vm16806_vm10 = vmmov %vm16801_vm2  ;;  %v13393_v24 = vunpack.i.h.bf16 %v16064_v57  ;;  %v13392_v6 = vunpack.i.l.bf16 %v16064_v57  ;;  %v9160_v23 = vld [vmem:[#allocation7 + $0x138] sm:$0xff]  ;;  %v13402_v57 = vunpack.i.l.bf16 %v16020_v40 }
 0x68c   : > { %v13433_v34 = vunpack.i.h.bf16 %v13431_v60  ;;  %v13432_v43 = vunpack.i.l.bf16 %v13431_v60  ;;  %vm16807_vm11 = vmmov %vm16801_vm2 }
 0x68d   : > { %vm16808_vm2 = vmmov %vm16802_vm7  ;;  %vm16809_vm7 = vcmask 801792  }
 0x68e   : > { %v9140_v52 = vsel %vm16806_vm10, %v13343_v54, %v13432_v43  ;;  %v9141_v42 = vsel %vm16807_vm11, %v13432_v43, %v13433_v34  ;;  %11390 = vmatmul.mubr.msk.f32.vlgmr.msra.gmra.mrb[4].mxu0 %vm16808_vm2, %v9021_v12  ;;  %v16082_v4 = vpop.permute.xlu0 %13405  ;;  %v9275_v30 = vsel %vm16809_vm7, %v13357_v45, %v13358_v58  ;;  %vm16810_vm4 = vmmov %vm16809_vm7 }
 0x68f   : > { %v11847_v50 = vpack.c.bf16 %v9141_v42, %v9139_v48  ;;  %v11850_v28 = vpack.c.bf16 %v9140_v52, %v9138_v13  ;;  %11846 = vmatpush1.bf16.msk.msra.mxu0 %vm14690_vm0, %v11844_v33  ;;  %v16088_v39 = vpop.permute.xlu1 %13435  ;;  %9099 = vmatprep.mubr.f32.mxu0 %v16631_v14  ;;  %v9273_v18 = vsel %vm16810_vm4, %v13352_v51, %v13353_v61  ;;  %vm16811_vm6 = vmmov %vm16810_vm4  ;;  %v13408_v12 = vunpack.i.h.bf16 %v16082_v4 }
 0x690   : > { %v9274_v7 = vsel %vm16811_vm6, %v13368_v8, %v13357_v45  ;;  %v11853_v15 = vpack.c.bf16 %v9275_v30, %v9273_v18  ;;  %vm16812_vm15 = vmmov %vm16808_vm2  ;;  %v13407_v26 = vunpack.i.l.bf16 %v16082_v4  ;;  %v13423_v52 = vunpack.i.h.bf16 %v16052_v29 }
 0x691   : > { %11849 = vmatprep.subr.msk.bf16.mxu0 %vm14666_vm3, %v11847_v50  ;;  %vm16813_vm10 = vmmov %vm16810_vm4  ;;  %v13422_v42 = vunpack.i.l.bf16 %v16052_v29 }
 0x692   : > { %11391 = vmatmul.mubr.msk.f32.gmra.mrb[6].mxu0 %vm16812_vm15, %v9022_v22  ;;  %v13411_v27 = vpop.permute.xlu0 %13410  ;;  %v9272_v5 = vsel %vm16813_vm10, %v13367_v9, %v13352_v51  ;;  %vm16814_vm11 = vmmov %vm16810_vm4  ;;  %v9297_v51 = vld [vmem:[#allocation7 + $0x140] sm:$0xff]  ;;  %v13438_v22 = vunpack.i.h.bf16 %v16088_v39 }
 0x693   : > { %11852 = vmatpush1.bf16.msk.msra.mxu0 %vm14690_vm0, %v11850_v28  ;;  %v13451_v46 = vpop.permute.xlu1 %13450  ;;  %9231 = vmatprep.mubr.f32.mxu0 %v16631_v14  ;;  %v11856_v55 = vpack.c.bf16 %v9274_v7, %v9272_v5  ;;  %v9277_v19 = vsel %vm16814_vm11, %v13372_v38, %v13373_v31  ;;  %vm16815_vm2 = vmmov %vm16810_vm4  ;;  %v13412_v54 = vunpack.i.l.bf16 %v13411_v27  ;;  %v13413_v33 = vunpack.i.h.bf16 %v13411_v27  ;;  %v9298_v7 = vld [vmem:[#allocation7 + $0x148] sm:$0xff] }
 0x694   : > { %v13453_v1 = vunpack.i.h.bf16 %v13451_v46  ;;  %v13452_v41 = vunpack.i.l.bf16 %v13451_v46  ;;  %11855 = vmatprep.subr.msk.bf16.mxu0 %vm14551_vm1, %v11853_v15  ;;  %v9276_v16 = vsel %vm16815_vm2, %v13377_v62, %v13372_v38  ;;  %vm16816_vm7 = vmmov %vm16815_vm2  ;;  %v13437_v31 = vunpack.i.l.bf16 %v16088_v39 }
 0x695   : > { %vm16817_vm4 = vmmov %vm16815_vm2 }
 0x696   : > { %v9278_v20 = vsel %vm16816_vm7, %v13378_v37, %v13452_v41  ;;  %v9279_v2 = vsel %vm16817_vm4, %v13452_v41, %v13453_v1  ;;  %vm16818_vm6 = vmmov %vm16812_vm15  ;;  %v13426_v25 = vpop.permute.xlu0 %13425  ;;  %vm16819_vm15 = vcmask 793600   ;;  %v9435_v1 = vld [vmem:[#allocation7 + $0x150] sm:$0xff] }
 0x697   : > { %11400 = vmatmul.mubr.msk.f32.vlgmr.msra.gmra.mrb[4].mxu0 %vm16818_vm6, %v9159_v17  ;;  %v9413_v53 = vsel %vm16819_vm15, %v13392_v6, %v13393_v24  ;;  %v11859_v36 = vpack.c.bf16 %v9279_v2, %v9277_v19  ;;  %v11862_v10 = vpack.c.bf16 %v9278_v20, %v9276_v16  ;;  %v16120_v59 = vpop.permute.xlu1 %13455  ;;  %vm16820_vm10 = vmmov %vm16819_vm15  ;;  %v13428_v43 = vunpack.i.h.bf16 %v13426_v25 }
 0x698   : > { %11858 = vmatpush1.bf16.msk.msra.mxu0 %vm14558_vm5, %v11856_v55  ;;  %9237 = vmatprep.mubr.f32.mxu0 %v16631_v14  ;;  %v9411_v58 = vsel %vm16820_vm10, %v13387_v0, %v13388_v47  ;;  %vm16821_vm11 = vmmov %vm16820_vm10  ;;  %v13427_v61 = vunpack.i.l.bf16 %v13426_v25  ;;  %v13458_v16 = vunpack.i.h.bf16 %v16120_v59  ;;  %v13457_v20 = vunpack.i.l.bf16 %v16120_v59  ;;  %v9436_v59 = vld [vmem:[#allocation7 + $0x158] sm:$0xff] }
 0x699   : > { %v9412_v45 = vsel %vm16821_vm11, %v13403_v21, %v13392_v6  ;;  %11861 = vmatprep.subr.msk.bf16.mxu0 %vm14551_vm1, %v11859_v36  ;;  %v11865_v60 = vpack.c.bf16 %v9413_v53, %v9411_v58  ;;  %vm16822_vm2 = vmmov %vm16818_vm6 }
 0x69a   : > { %v13441_v34 = vpop.permute.xlu0 %13440  ;;  %vm16823_vm7 = vmmov %vm16820_vm10  ;;  %vm16829_vm10 = vcmask 785408  }
 0x69b   : > { %11401 = vmatmul.mubr.msk.f32.gmra.mrb[6].mxu0 %vm16822_vm2, %v9160_v23  ;;  %v13466_v40 = vpop.permute.xlu1 %13465  ;;  %v9410_v44 = vsel %vm16823_vm7, %v13402_v57, %v13387_v0  ;;  %vm16824_vm1 = vmmov %vm16823_vm7  ;;  %v9554_v15 = vsel %vm16829_vm10, %v13427_v61, %v13428_v43  ;;  %v13443_v27 = vunpack.i.h.bf16 %v13441_v34  ;;  %v13442_v24 = vunpack.i.l.bf16 %v13441_v34 }
 0x69c   : > { %11864 = vmatpush1.bf16.msk.msra.mxu0 %vm14558_vm5, %v11862_v10  ;;  %9369 = vmatprep.mubr.f32.mxu0 %v16631_v14  ;;  %v13468_v48 = vunpack.i.h.bf16 %v13466_v40  ;;  %v13467_v13 = vunpack.i.l.bf16 %v13466_v40  ;;  %v11868_v4 = vpack.c.bf16 %v9412_v45, %v9410_v44  ;;  %v9415_v49 = vsel %vm16824_vm1, %v13407_v26, %v13408_v12  ;;  %vm16825_vm5 = vmmov %vm16824_vm1 }
 0x69d   : > { %11867 = vmatprep.subr.msk.bf16.mxu0 %vm14573_vm8, %v11865_v60  ;;  %v9414_v8 = vsel %vm16825_vm5, %v13412_v54, %v13407_v26  ;;  %vm16826_vm4 = vmmov %vm16824_vm1 }
 0x69e   : > { %v9416_v30 = vsel %vm16826_vm4, %v13413_v33, %v13467_v13  ;;  %vm16827_vm6 = vmmov %vm16824_vm1  ;;  %v13446_v28 = vpop.permute.xlu0 %13445  ;;  %v9525_v33 = vld [vmem:[#allocation7 + $0x160] sm:$0xff] }
 0x69f   : > { %v9417_v50 = vsel %vm16827_vm6, %v13467_v13, %v13468_v48  ;;  %vm16828_vm15 = vmmov %vm16822_vm2  ;;  %v11874_v18 = vpack.c.bf16 %v9416_v30, %v9414_v8  ;;  %v13471_v29 = vpop.permute.xlu1 %13470  ;;  %v13447_v6 = vunpack.i.l.bf16 %v13446_v28  ;;  %v13448_v47 = vunpack.i.h.bf16 %v13446_v28 }
 0x6a0   : > { %11410 = vmatmul.mubr.msk.f32.vlgmr.msra.gmra.mrb[4].mxu0 %vm16828_vm15, %v9297_v51  ;;  %v11871_v9 = vpack.c.bf16 %v9417_v50, %v9415_v49  ;;  %vm16830_vm11 = vmmov %vm16829_vm10  ;;  %v13473_v45 = vunpack.i.h.bf16 %v13471_v29  ;;  %v13472_v60 = vunpack.i.l.bf16 %v13471_v29 }
 0x6a1   : > { %11870 = vmatpush1.bf16.msk.msra.mxu0 %vm14592_vm9, %v11868_v4  ;;  %9375 = vmatprep.mubr.f32.mxu0 %v16631_v14  ;;  %v9553_v38 = vsel %vm16830_vm11, %v13438_v22, %v13427_v61  ;;  %vm16831_vm2 = vmmov %vm16829_vm10  ;;  %vm16839_vm11 = vcmask 777216  }
 0x6a2   : > { %11873 = vmatprep.subr.msk.bf16.mxu0 %vm14573_vm8, %v11871_v9  ;;  %v9552_v62 = vsel %vm16831_vm2, %v13422_v42, %v13423_v52  ;;  %vm16832_vm7 = vmmov %vm16828_vm15  ;;  %v13461_v46 = vpop.permute.xlu0 %13460 }
 0x6a3   : > { %v11877_v17 = vpack.c.bf16 %v9554_v15, %v9552_v62  ;;  %v13463_v5 = vunpack.i.h.bf16 %v13461_v46  ;;  %v13462_v37 = vunpack.i.l.bf16 %v13461_v46  ;;  %v13486_v39 = vpop.permute.xlu1 %13485  ;;  %vm16833_vm1 = vmmov %vm16831_vm2 }
 0x6a4   : > { %11411 = vmatmul.mubr.msk.f32.gmra.mrb[6].mxu0 %vm16832_vm7, %v9298_v7  ;;  %v9551_v41 = vsel %vm16833_vm1, %v13437_v31, %v13422_v42  ;;  %v13488_v0 = vunpack.i.h.bf16 %v13486_v39  ;;  %v13487_v55 = vunpack.i.l.bf16 %v13486_v39  ;;  %vm16834_vm5 = vmmov %vm16833_vm1  ;;  %v9526_v31 = vld [vmem:[#allocation7 + $0x168] sm:$0xff] }
 0x6a5   : > { %11876 = vmatpush1.bf16.msk.msra.mxu0 %vm14592_vm9, %v11874_v18  ;;  %9507 = vmatprep.mubr.f32.mxu0 %v16631_v14  ;;  %v11879_v19 = vpack.c.bf16 %v9553_v38, %v9551_v41  ;;  %v9555_v2 = vsel %vm16834_vm5, %v13447_v6, %v13442_v24  ;;  %vm16835_vm4 = vmmov %vm16833_vm1  ;;  %v9681_v10 = vsel %vm16839_vm11, %v13462_v37, %v13463_v5 }
 0x6a6   : > { %11878 = vmatprep.subr.bf16.mxu0 %v11877_v17  ;;  %v9557_v25 = vsel %vm16835_vm4, %v13448_v47, %v13487_v55  ;;  %vm16836_vm6 = vmmov %vm16832_vm7  ;;  %v13476_v21 = vpop.permute.xlu0 %13475  ;;  %v9703_v47 = vld [vmem:[#allocation7 + $0x170] sm:$0xff] }
 0x6a7   : > { %vm16837_vm15 = vmmov %vm16833_vm1  ;;  %v11883_v23 = vpack.c.bf16 %v9557_v25, %v9555_v2  ;;  %v13491_v57 = vpop.permute.xlu1 %13490  ;;  %v13478_v34 = vunpack.i.h.bf16 %v13476_v21  ;;  %v13477_v43 = vunpack.i.l.bf16 %v13476_v21 }
 0x6a8   : > { %11420 = vmatmul.mubr.msk.f32.vlgmr.msra.gmra.mrb[4].mxu0 %vm16836_vm6, %v9435_v1  ;;  %v9556_v53 = vsel %vm16837_vm15, %v13442_v24, %v13443_v27  ;;  %vm16838_vm10 = vmmov %vm16833_vm1  ;;  %v13493_v4 = vunpack.i.h.bf16 %v13491_v57  ;;  %v13492_v49 = vunpack.i.l.bf16 %v13491_v57  ;;  %v9841_v57 = vld [vmem:[#allocation7 + $0x180] sm:$0xff] }
 0x6a9   : > { %v9558_v36 = vsel %vm16838_vm10, %v13487_v55, %v13488_v0  ;;  %11880 = vmatpush1.bf16.msra.mxu0 %v11879_v19  ;;  %9513 = vmatprep.mubr.f32.mxu0 %v16631_v14  ;;  %vm16840_vm2 = vmmov %vm16839_vm11 }
 0x6aa   : > { %v11881_v58 = vpack.c.bf16 %v9558_v36, %v9556_v53  ;;  %v9679_v12 = vsel %vm16840_vm2, %v13457_v20, %v13458_v16  ;;  %vm16841_vm7 = vmmov %vm16840_vm2  ;;  %v13481_v61 = vpop.permute.xlu0 %13480  ;;  %v9704_v53 = vld [vmem:[#allocation7 + $0x178] sm:$0xff] }
 0x6ab   : > { %v9680_v26 = vsel %vm16841_vm7, %v13473_v45, %v13462_v37  ;;  %v11885_v54 = vpack.c.bf16 %v9681_v10, %v9679_v12  ;;  %vm16842_vm1 = vmmov %vm16836_vm6  ;;  %v13483_v40 = vunpack.i.h.bf16 %v13481_v61  ;;  %v13482_v51 = vunpack.i.l.bf16 %v13481_v61  ;;  %v13501_v44 = vpop.permute.xlu1 %13500 }
 0x6ac   : > { %11882 = vmatprep.subr.bf16.mxu0 %v11881_v58  ;;  %11421 = vmatmul.mubr.msk.f32.gmra.mrb[6].mxu0 %vm16842_vm1, %v9436_v59  ;;  %vm16843_vm5 = vmmov %vm16840_vm2  ;;  %v13503_v13 = vunpack.i.h.bf16 %v13501_v44  ;;  %v13502_v52 = vunpack.i.l.bf16 %v13501_v44  ;;  %v9842_v58 = vld [vmem:[#allocation7 + $0x188] sm:$0xff] }
 0x6ad   : > { %11884 = vmatpush1.bf16.msra.mxu0 %v11883_v23  ;;  %9637 = vmatprep.mubr.f32.mxu0 %v16631_v14  ;;  %v9678_v48 = vsel %vm16843_vm5, %v13472_v60, %v13457_v20  ;;  %vm16844_vm4 = vmmov %vm16840_vm2 }
 0x6ae   : > { %11887 = vmatprep.subr.msk.bf16.mxu0 %vm14628_vm13, %v11885_v54  ;;  %v11888_v42 = vpack.c.bf16 %v9680_v26, %v9678_v48  ;;  %v9682_v8 = vsel %vm16844_vm4, %v13482_v51, %v13477_v43  ;;  %vm16845_vm6 = vmmov %vm16840_vm2  ;;  %v13496_v22 = vpop.permute.xlu0 %13495 }
 0x6af   : > { %v9683_v30 = vsel %vm16845_vm6, %v13477_v43, %v13478_v34  ;;  %vm16846_vm15 = vmmov %vm16840_vm2  ;;  %v13498_v29 = vunpack.i.h.bf16 %v13496_v22  ;;  %v13497_v7 = vunpack.i.l.bf16 %v13496_v22  ;;  %v13506_v15 = vpop.permute.xlu1 %13505  ;;  %v9946_v22 = vld [vmem:[%s16388_s8] sm:$0xff] }
 0x6b0   : > { %v9684_v50 = vsel %vm16846_vm15, %v13483_v40, %v13502_v52  ;;  %vm16847_vm10 = vmmov %vm16840_vm2  ;;  %v13508_v38 = vunpack.i.h.bf16 %v13506_v15  ;;  %v13507_v62 = vunpack.i.l.bf16 %v13506_v15  ;;  %vm16849_vm2 = vcmask 769024  }
 0x6b1   : > { %v9685_v28 = vsel %vm16847_vm10, %v13502_v52, %v13503_v13  ;;  %vm16848_vm11 = vmmov %vm16842_vm1  ;;  %v11894_v18 = vpack.c.bf16 %v9684_v50, %v9682_v8  ;;  %v9817_v27 = vsel %vm16849_vm2, %v13492_v49, %v13493_v4 }
 0x6b2   : > { %11422 = vmatmul.mubr.msk.f32.vlgmr.msra.gmra.mrb[4].mxu0 %vm16848_vm11, %v9525_v33  ;;  %v11891_v9 = vpack.c.bf16 %v9685_v28, %v9683_v30  ;;  %vm16850_vm7 = vmmov %vm16849_vm2  ;;  %v13511_v5 = vpop.permute.xlu0 %13510 }
 0x6b3   : > { %11890 = vmatpush1.bf16.msk.msra.mxu0 %vm14659_vm12, %v11888_v42  ;;  %9643 = vmatprep.mubr.f32.mxu0 %v16631_v14  ;;  %v9819_v24 = vsel %vm16850_vm7, %v13497_v7, %v13498_v29  ;;  %vm16851_vm1 = vmmov %vm16849_vm2  ;;  %v13513_v39 = vunpack.i.h.bf16 %v13511_v5  ;;  %v13512_v1 = vunpack.i.l.bf16 %v13511_v5  ;;  %v13516_v41 = vpop.permute.xlu1 %13515 }
 0x6b4   : > { %11893 = vmatprep.subr.msk.bf16.mxu0 %vm14628_vm13, %v11891_v9  ;;  %v11897_v6 = vpack.c.bf16 %v9819_v24, %v9817_v27  ;;  %v9818_v46 = vsel %vm16851_vm1, %v13508_v38, %v13497_v7  ;;  %vm16852_vm5 = vmmov %vm16851_vm1  ;;  %v13518_v0 = vunpack.i.h.bf16 %v13516_v41  ;;  %v13517_v55 = vunpack.i.l.bf16 %v13516_v41 }
 0x6b5   : > { %v9816_v17 = vsel %vm16852_vm5, %v13507_v62, %v13492_v49  ;;  %vm16853_vm4 = vmmov %vm16848_vm11 }
 0x6b6   : > { %11423 = vmatmul.mubr.msk.f32.gmra.mrb[6].mxu0 %vm16853_vm4, %v9526_v31  ;;  %v11900_v37 = vpack.c.bf16 %v9818_v46, %v9816_v17  ;;  %vm16854_vm6 = vmmov %vm16851_vm1  ;;  %v13521_v20 = vpop.permute.xlu0 %13520 }
 0x6b7   : > { %11896 = vmatpush1.bf16.msk.msra.mxu0 %vm14659_vm12, %v11894_v18  ;;  %9775 = vmatprep.mubr.f32.mxu0 %v16631_v14  ;;  %v9821_v19 = vsel %vm16854_vm6, %v13512_v1, %v13513_v39  ;;  %vm16855_vm15 = vmmov %vm16851_vm1  ;;  %v13523_v25 = vunpack.i.h.bf16 %v13521_v20  ;;  %v13522_v21 = vunpack.i.l.bf16 %v13521_v20 }
 0x6b8   : > { %11899 = vmatprep.subr.msk.bf16.mxu0 %vm14666_vm3, %v11897_v6  ;;  %v9823_v16 = vsel %vm16855_vm15, %v13517_v55, %v13518_v0  ;;  %vm16856_vm10 = vmmov %vm16853_vm4  ;;  %vm16862_vm15 = vcmask 138240  }
 0x6b9   : > { %v11903_v2 = vpack.c.bf16 %v9823_v16, %v9821_v19  ;;  %vm16857_vm11 = vmmov %vm16851_vm1  ;;  %v9988_v19 = vld [vmem:[%s16387_s7] sm:$0xff] }
 0x6ba   : > { %11432 = vmatmul.mubr.msk.f32.vlgmr.msra.gmra.mrb[4].mxu0 %vm16856_vm10, %v9703_v47  ;;  %v9820_v36 = vsel %vm16857_vm11, %v13522_v21, %v13512_v1  ;;  %vm16858_vm2 = vmmov %vm16851_vm1 }
 0x6bb   : > { %11902 = vmatpush1.bf16.msk.msra.mxu0 %vm14690_vm0, %v11900_v37  ;;  %9781 = vmatprep.mubr.f32.mxu0 %v16631_v14  ;;  %v9822_v10 = vsel %vm16858_vm2, %v13523_v25, %v13517_v55  ;;  %vm16859_vm7 = vmmov %vm16853_vm4 }
 0x6bc   : > { %11905 = vmatprep.subr.msk.bf16.mxu0 %vm14666_vm3, %v11903_v2  ;;  %v11906_v23 = vpack.c.bf16 %v9822_v10, %v9820_v36  ;;  %vm16860_vm1 = vmmov %vm16853_vm4 }
 0x6bd   : > { %vm16861_vm5 = vmmov %vm16860_vm1 }
 0x6be   : > { %11433 = vmatmul.mubr.msk.f32.gmra.mrb[6].mxu0 %vm16859_vm7, %v9704_v53  ;;  %vm16863_vm10 = vmmov %vm16862_vm15  ;;  %vm16866_vm7 = vcmask 121856  }
 0x6bf   : > { %9913 = vmatprep.mubr.f32.mxu0 %v16631_v14  ;;  %11908 = vmatpush1.bf16.msk.msra.mxu0 %vm14690_vm0, %v11906_v23  ;;  %vm16864_vm11 = vmmov %vm16863_vm10 }
 0x6c0   : > { %vm16865_vm2 = vmmov %vm16863_vm10 }
 0x6c2   : > { %11442 = vmatmul.mubr.msk.f32.vlgmr.msra.gmra.mrb[4].mxu0 %vm16860_vm1, %v9841_v57  ;;  %vm16867_vm1 = vmmov %vm16866_vm7 }
 0x6c3   : > { %9919 = vmatprep.mubr.f32.mxu0 %v16631_v14 }
 0x6c4   : > { %v6506_v3 = vpop.permute.xlu1 %6505 }
 0x6c6   : > { %11443 = vmatmul.mubr.msk.f32.gmra.mrb[6].mxu0 %vm16861_vm5, %v9842_v58  ;;  %vm16868_vm5 = vmmov %vm16867_vm1 }
 0x6c7   : > { %10056 = vmatprep.mubr.f32.mxu0 %v16631_v14  ;;  %v6511_v54 = vpop.permute.xlu0 %6510 }
 0x795   : > { %v9915_v59 = vpop.f32.mrb[4].mxu0 }
 0x796   : > { %v11973_v45 = vadd.f32 %v9915_v59, %v6506_v3  ;;  %v9917_v60 = vpop.f32.mrb[5].mxu0 }
 0x797   : > { %v11974_v12 = vadd.f32 %v9917_v60, %v6506_v3 }
 0x798   : > { %vm9930_vm3 = vcmp.ge.f32.partialorder %v11973_v45, 0.0  ;;  %v9934_v26 = vmul.f32 0.01, %v11973_v45 }
 0x799   : > { %vm9931_vm4 = vcmp.ge.f32.partialorder %v11974_v12, 0.0  ;;  %v9935_v35 = vmul.f32 0.01, %v11974_v12  ;;  %v9921_v34 = vpop.f32.mrb[6].mxu0 }
 0x79a   : > { %v16213_v43 = vsel %vm9930_vm3, %v11973_v45, %v9934_v26  ;;  %v11975_v61 = vadd.f32 %v9921_v34, %v6511_v54  ;;  %v9923_v40 = vpop.f32.mrb[7].mxu0  ;;  %vm16869_vm3 = vmmov %vm16867_vm1 }
 0x79b   : > { %v16215_v51 = vsel %vm9931_vm4, %v11974_v12, %v9935_v35  ;;  %v11976_v44 = vadd.f32 %v9923_v40, %v6511_v54  ;;  %vm16870_vm4 = vcmask 7168  }
 0x79c   : > { %vm9932_vm0 = vcmp.ge.f32.partialorder %v11975_v61, 0.0  ;;  %v9936_v33 = vmul.f32 0.01, %v11975_v61  ;;  %v13524_v48 = vpack.i.bf16 %v16215_v51, %v16213_v43  ;;  %v13584_v50 = vpack.i.bf16 %v16631_v14, %v16215_v51 }
 0x79d   : > { %vm9933_vm6 = vcmp.ge.f32.partialorder %v11976_v44, 0.0  ;;  %v9937_v13 = vmul.f32 0.01, %v11976_v44 }
 0x79e   : > { %v16219_v52 = vsel %vm9932_vm0, %v11975_v61, %v9936_v33  ;;  %13525 = vrot.lane.b32.xlu1 %v13524_v48, %s16582_s27  ;;  %vm16871_vm0 = vmmov %vm16870_vm4 }
 0x79f   : > { %v16222_v42 = vsel %vm9933_vm6, %v11976_v44, %v9937_v13  ;;  %v13594_v4 = vpack.i.bf16 %v16219_v52, %v16213_v43  ;;  %v11933_v30 = vpack.c.bf16 %v16219_v52, %v16213_v43  ;;  %v11449_v44 = vld [vmem:[%s16387_s7 + $0x8] sm:$0xff]  ;;  %vm16872_vm6 = vmmov %vm16871_vm0 }
 0x7a0   : > { %v13529_v49 = vpack.i.bf16 %v16222_v42, %v16219_v52  ;;  %v11931_v8 = vpack.c.bf16 %v16222_v42, %v16215_v51  ;;  %v13589_v28 = vpack.i.bf16 %v16631_v14, %v16222_v42 }
 0x7a2   : > { %13535 = vrot.lane.b32.xlu1 %v16631_v14, %s16582_s27  ;;  %13530 = vrot.lane.b32.xlu0 %v13529_v49, %s16582_s27 }
 0x7a6   : > { %13545 = vrot.lane.b32.xlu1 %v13529_v49, %s16583_s12  ;;  %13540 = vrot.lane.b32.xlu0 %v13524_v48, %s16583_s12 }
 0x7aa   : > { %13555 = vrot.lane.b32.xlu1 %v13524_v48, %s16587_s14  ;;  %13550 = vrot.lane.b32.xlu0 %v16631_v14, %s16583_s12 }
 0x7ae   : > { %13565 = vrot.lane.b32.xlu1 %v16631_v14, %s16587_s14  ;;  %13560 = vrot.lane.b32.xlu0 %v13529_v49, %s16587_s14 }
 0x7b2   : > { %13575 = vrot.lane.b32.xlu1 %v13529_v49, %s16614_s16  ;;  %13570 = vrot.lane.b32.xlu0 %v13524_v48, %s16614_s16 }
 0x7b6   : > { %13585 = vrot.lane.b32.xlu1 %v13584_v50, %s16618_s1  ;;  %13580 = vrot.lane.b32.xlu0 %v16631_v14, %s16614_s16 }
 0x7ba   : > { %13595 = vrot.lane.b32.xlu1 %v13594_v4, %s16618_s1  ;;  %13590 = vrot.lane.b32.xlu0 %v13589_v28, %s16618_s1  ;;  %s376_s1 = scalar_lea.vmem %s16389_s9, %s16890_s22 }
 0x7be   : > { %13605 = vrot.lane.b32.xlu1 %v13589_v28, %s16493_s23  ;;  %13600 = vrot.lane.b32.xlu0 %v13584_v50, %s16493_s23 }
 0x7c2   : > { %13615 = vrot.lane.b32.xlu1 %v13584_v50, %s16494_s25  ;;  %13610 = vrot.lane.b32.xlu0 %v13594_v4, %s16493_s23 }
 0x7c6   : > { %13625 = vrot.lane.b32.xlu1 %v13594_v4, %s16494_s25  ;;  %13620 = vrot.lane.b32.xlu0 %v13589_v28, %s16494_s25 }
 0x7ca   : > { %13635 = vrot.lane.b32.xlu1 %v13589_v28, %s16495_s18  ;;  %13630 = vrot.lane.b32.xlu0 %v13584_v50, %s16495_s18 }
 0x7ce   : > { %9949 = vperm.xlu1 %12443, %v9946_v22   ;;  %13640 = vrot.lane.b32.xlu0 %v13594_v4, %s16495_s18 }
 0x810   : > { %v13526_v9 = vpop.permute.xlu1 %13525 }
 0x811   : > { %v13528_v18 = vunpack.i.h.bf16 %v13526_v9  ;;  %v13527_v29 = vunpack.i.l.bf16 %v13526_v9 }
 0x813   : > { %v9977_v24 = vsel %vm16862_vm15, %v13527_v29, %v13528_v18  ;;  %vm16873_vm15 = vmmov %vm16871_vm0 }
 0x814   : > { %v13536_v7 = vpop.permute.xlu1 %13535  ;;  %v13531_v15 = vpop.permute.xlu0 %13530 }
 0x815   : > { %v13538_v31 = vunpack.i.h.bf16 %v13536_v7  ;;  %v13537_v38 = vunpack.i.l.bf16 %v13536_v7  ;;  %v13533_v62 = vunpack.i.h.bf16 %v13531_v15  ;;  %v13532_v27 = vunpack.i.l.bf16 %v13531_v15 }
 0x817   : > { %v9976_v6 = vsel %vm16863_vm10, %v13537_v38, %v13527_v29  ;;  %v9978_v46 = vsel %vm16864_vm11, %v13538_v31, %v13532_v27  ;;  %v9979_v17 = vsel %vm16865_vm2, %v13532_v27, %v13533_v62  ;;  %vm16874_vm10 = vcmask 1039360  }
 0x818   : > { %v11909_v5 = vpack.c.bf16 %v9979_v17, %v9977_v24  ;;  %v11912_v37 = vpack.c.bf16 %v9978_v46, %v9976_v6  ;;  %v13546_v39 = vpop.permute.xlu1 %13545  ;;  %v13541_v1 = vpop.permute.xlu0 %13540  ;;  %v11451_v24 = vld [vmem:[%s16387_s7 + $0x10] sm:$0xff]  ;;  %vm16875_vm11 = vmmov %vm16874_vm10 }
 0x819   : > { %v13548_v41 = vunpack.i.h.bf16 %v13546_v39  ;;  %v13547_v47 = vunpack.i.l.bf16 %v13546_v39  ;;  %v13543_v0 = vunpack.i.h.bf16 %v13541_v1  ;;  %v13542_v55 = vunpack.i.l.bf16 %v13541_v1  ;;  %vm16876_vm2 = vmmov %vm16874_vm10 }
 0x81a   : > { %11911 = vmatprep.subr.msk.bf16.mxu0 %vm14573_vm8, %v11909_v5 }
 0x81b   : > { %11914 = vmatpush1.bf16.msk.msra.mxu0 %vm14592_vm9, %v11912_v37  ;;  %v10080_v16 = vsel %vm1164_vm14, %v13542_v55, %v13543_v0  ;;  %v10082_v20 = vsel %vm1164_vm14, %v13547_v47, %v13548_v41 }
 0x81c   : > { %v13556_v2 = vpop.permute.xlu1 %13555  ;;  %v13551_v25 = vpop.permute.xlu0 %13550  ;;  %v11915_v21 = vpack.c.bf16 %v10082_v20, %v10080_v16 }
 0x81d   : > { %v13553_v53 = vunpack.i.h.bf16 %v13551_v25  ;;  %v13552_v36 = vunpack.i.l.bf16 %v13551_v25  ;;  %v13558_v10 = vunpack.i.h.bf16 %v13556_v2  ;;  %v13557_v23 = vunpack.i.l.bf16 %v13556_v2 }
 0x81e   : > { %11448 = vmatmul.mubr.msk.f32.vlgmr.msra.gmra.mrb[8].mxu0 %vm1164_vm14, %v9988_v19  ;;  %11916 = vmatprep.subr.bf16.mxu0 %v11915_v21 }
 0x81f   : > { %v10081_v57 = vsel %vm1164_vm14, %v13553_v53, %v13547_v47  ;;  %v10079_v58 = vsel %vm1164_vm14, %v13552_v36, %v13542_v55  ;;  %10154 = vmatprep.mubr.f32.mxu0 %v16631_v14  ;;  %v10176_v35 = vsel %vm16866_vm7, %v13557_v23, %v13558_v10  ;;  %v11457_v55 = vld [vmem:[%s16387_s7 + $0x18] sm:$0xff]  ;;  %vm16877_vm7 = vmmov %vm16876_vm2 }
 0x820   : > { %v11917_v3 = vpack.c.bf16 %v10081_v57, %v10079_v58  ;;  %v13566_v59 = vpop.permute.xlu1 %13565  ;;  %v13561_v45 = vpop.permute.xlu0 %13560  ;;  %v11463_v58 = vld [vmem:[%s16387_s7 + $0x20] sm:$0xff] }
 0x821   : > { %v13568_v60 = vunpack.i.h.bf16 %v13566_v59  ;;  %v13567_v12 = vunpack.i.l.bf16 %v13566_v59  ;;  %v13563_v26 = vunpack.i.h.bf16 %v13561_v45  ;;  %v13562_v54 = vunpack.i.l.bf16 %v13561_v45 }
 0x822   : > { %11918 = vmatpush1.bf16.msra.mxu0 %v11917_v3 }
 0x823   : > { %v10175_v34 = vsel %vm16867_vm1, %v13567_v12, %v13557_v23  ;;  %v10177_v61 = vsel %vm16868_vm5, %v13568_v60, %v13562_v54  ;;  %v10178_v40 = vsel %vm16869_vm3, %v13562_v54, %v13563_v26  ;;  %vm16878_vm1 = vcmask 924672  }
 0x824   : > { %v11919_v33 = vpack.c.bf16 %v10178_v40, %v10176_v35  ;;  %v11922_v48 = vpack.c.bf16 %v10177_v61, %v10175_v34  ;;  %v13576_v13 = vpop.permute.xlu1 %13575  ;;  %v13571_v4 = vpop.permute.xlu0 %13570  ;;  %vm16879_vm5 = vmmov %vm16878_vm1  ;;  %v11465_v61 = vld [vmem:[%s16387_s7 + $0x28] sm:$0xff] }
 0x825   : > { %v13578_v49 = vunpack.i.h.bf16 %v13576_v13  ;;  %v13577_v50 = vunpack.i.l.bf16 %v13576_v13  ;;  %v13573_v28 = vunpack.i.h.bf16 %v13571_v4  ;;  %v13572_v22 = vunpack.i.l.bf16 %v13571_v4  ;;  %vm16880_vm3 = vmmov %vm16878_vm1 }
 0x826   : > { %11450 = vmatmul.mubr.msk.f32.vlgmr.msra.gmra.mrb[8].mxu0 %vm1164_vm14, %v11449_v44  ;;  %11921 = vmatprep.subr.msk.bf16.mxu0 %vm14628_vm13, %v11919_v33 }
 0x827   : > { %v10280_v9 = vsel %vm16870_vm4, %v13577_v50, %v13578_v49  ;;  %v10278_v18 = vsel %vm16871_vm0, %v13572_v22, %v13573_v28  ;;  %11924 = vmatpush1.bf16.msk.msra.mxu0 %vm14659_vm12, %v11922_v48  ;;  %10256 = vmatprep.mubr.f32.mxu0 %v16631_v14  ;;  %vm16881_vm4 = vmmov %vm16878_vm1  ;;  %vm16882_vm0 = vcmask 916480  }
 0x828   : > { %v11925_v29 = vpack.c.bf16 %v10280_v9, %v10278_v18  ;;  %v13586_v7 = vpop.permute.xlu1 %13585  ;;  %v13581_v15 = vpop.permute.xlu0 %13580 }
 0x829   : > { %v13583_v31 = vunpack.i.h.bf16 %v13581_v15  ;;  %v13582_v38 = vunpack.i.l.bf16 %v13581_v15  ;;  %v13588_v1 = vunpack.i.h.bf16 %v13586_v7  ;;  %v13587_v41 = vunpack.i.l.bf16 %v13586_v7 }
 0x82a   : > { %11927 = vmatprep.subr.msk.bf16.mxu0 %vm14573_vm8, %v11925_v29 }
 0x82b   : > { %v10279_v62 = vsel %vm16872_vm6, %v13583_v31, %v13577_v50  ;;  %v10277_v27 = vsel %vm16873_vm15, %v13582_v38, %v13572_v22  ;;  %v10470_v19 = vsel %vm16875_vm11, %v13587_v41, %v13588_v1  ;;  %vm16883_vm6 = vmmov %vm16882_vm0  ;;  %v11471_v38 = vld [vmem:[%s16387_s7 + $0x30] sm:$0xff] }
 0x82c   : > { %v11928_v6 = vpack.c.bf16 %v10279_v62, %v10277_v27  ;;  %v13596_v46 = vpop.permute.xlu1 %13595  ;;  %v13591_v17 = vpop.permute.xlu0 %13590  ;;  %vm16885_vm15 = vmmov %vm16882_vm0 }
 0x82d   : > { %v13593_v5 = vunpack.i.h.bf16 %v13591_v17  ;;  %v13592_v37 = vunpack.i.l.bf16 %v13591_v17  ;;  %v13598_v16 = vunpack.i.h.bf16 %v13596_v46  ;;  %v13597_v20 = vunpack.i.l.bf16 %v13596_v46  ;;  %v11477_v17 = vld [vmem:[%s16387_s7 + $0x38] sm:$0xff] }
 0x82e   : > { %11456 = vmatmul.mubr.msk.f32.vlgmr.msra.gmra.mrb[8].mxu0 %vm1164_vm14, %v11451_v24 }
 0x82f   : > { %11930 = vmatpush1.bf16.msk.msra.mxu0 %vm14592_vm9, %v11928_v6  ;;  %10358 = vmatprep.mubr.f32.mxu0 %v16631_v14  ;;  %v10472_v0 = vsel %vm16874_vm10, %v13592_v37, %v13593_v5  ;;  %v10469_v36 = vsel %vm16876_vm2, %v13597_v20, %v13587_v41  ;;  %v10471_v10 = vsel %vm16877_vm7, %v13598_v16, %v13592_v37  ;;  %vm16886_vm10 = vcmask 908288  }
 0x830   : > { %11932 = vmatprep.subr.bf16.mxu0 %v11931_v8  ;;  %v13601_v39 = vpop.permute.xlu0 %13600  ;;  %v13606_v47 = vpop.permute.xlu1 %13605  ;;  %v11935_v2 = vpack.c.bf16 %v10472_v0, %v10470_v19  ;;  %v11938_v52 = vpack.c.bf16 %v10471_v10, %v10469_v36  ;;  %vm16887_vm11 = vmmov %vm16886_vm10 }
 0x831   : > { %v13608_v51 = vunpack.i.h.bf16 %v13606_v47  ;;  %v13607_v42 = vunpack.i.l.bf16 %v13606_v47  ;;  %v13603_v8 = vunpack.i.h.bf16 %v13601_v39  ;;  %v13602_v21 = vunpack.i.l.bf16 %v13601_v39 }
 0x833   : > { %v10574_v23 = vsel %vm16878_vm1, %v13607_v42, %v13608_v51  ;;  %v10572_v57 = vsel %vm16879_vm5, %v13602_v21, %v13603_v8 }
 0x834   : > { %v13611_v25 = vpop.permute.xlu0 %13610  ;;  %v13616_v53 = vpop.permute.xlu1 %13615 }
 0x835   : > { %v13613_v3 = vunpack.i.h.bf16 %v13611_v25  ;;  %v13612_v59 = vunpack.i.l.bf16 %v13611_v25  ;;  %v13618_v26 = vunpack.i.h.bf16 %v13616_v53  ;;  %v13617_v54 = vunpack.i.l.bf16 %v13616_v53 }
 0x836   : > { %11462 = vmatmul.mubr.msk.f32.vlgmr.msra.gmra.mrb[8].mxu0 %vm1164_vm14, %v11457_v55 }
 0x837   : > { %11934 = vmatpush1.bf16.msra.mxu0 %v11933_v30  ;;  %10436 = vmatprep.mubr.f32.mxu0 %v16631_v14  ;;  %v11941_v30 = vpack.c.bf16 %v10574_v23, %v10572_v57  ;;  %v10573_v35 = vsel %vm16880_vm3, %v13613_v3, %v13607_v42  ;;  %v10571_v34 = vsel %vm16881_vm4, %v13612_v59, %v13602_v21 }
 0x838   : > { %11937 = vmatprep.subr.msk.bf16.mxu0 %vm14628_vm13, %v11935_v2  ;;  %v13621_v43 = vpop.permute.xlu0 %13620  ;;  %v13626_v45 = vpop.permute.xlu1 %13625  ;;  %v11944_v48 = vpack.c.bf16 %v10573_v35, %v10571_v34  ;;  %v10676_v13 = vsel %vm16883_vm6, %v13617_v54, %v13618_v26 }
 0x839   : > { %v13623_v60 = vunpack.i.h.bf16 %v13621_v43  ;;  %v13622_v12 = vunpack.i.l.bf16 %v13621_v43  ;;  %v13628_v4 = vunpack.i.h.bf16 %v13626_v45  ;;  %v13627_v56 = vunpack.i.l.bf16 %v13626_v45 }
 0x83b   : > { %v10678_v40 = vsel %vm16882_vm0, %v13622_v12, %v13623_v60  ;;  %v10677_v29 = vsel %vm16885_vm15, %v13628_v4, %v13622_v12 }
 0x83c   : > { %v13636_v44 = vpop.permute.xlu1 %13635  ;;  %v13631_v33 = vpop.permute.xlu0 %13630  ;;  %v11947_v49 = vpack.c.bf16 %v10678_v40, %v10676_v13 }
 0x83d   : > { %v13638_v50 = vunpack.i.h.bf16 %v13636_v44  ;;  %v13637_v28 = vunpack.i.l.bf16 %v13636_v44  ;;  %v13633_v22 = vunpack.i.h.bf16 %v13631_v33  ;;  %v13632_v9 = vunpack.i.l.bf16 %v13631_v33 }
 0x83e   : > { %11464 = vmatmul.mubr.msk.f32.vlgmr.msra.gmra.mrb[8].mxu0 %vm1164_vm14, %v11463_v58 }
 0x83f   : > { %11940 = vmatpush1.bf16.msk.msra.mxu0 %vm14659_vm12, %v11938_v52  ;;  %10550 = vmatprep.mubr.f32.mxu0 %v16631_v14  ;;  %v10774_v7 = vsel %vm16886_vm10, %v13637_v28, %v13638_v50  ;;  %v10772_v15 = vsel %vm16887_vm11, %v13632_v9, %v13633_v22 }
 0x840   : > { %11943 = vmatprep.subr.msk.bf16.mxu0 %vm14573_vm8, %v11941_v30  ;;  %vm16884_vm8 = vmmov %vm16882_vm0  ;;  %v13641_v31 = vpop.permute.xlu0 %13640  ;;  %v11951_v27 = vpack.c.bf16 %v10774_v7, %v10772_v15 }
 0x841   : > { %v10675_v18 = vsel %vm16884_vm8, %v13627_v56, %v13617_v54  ;;  %v13643_v11 = vunpack.i.h.bf16 %v13641_v31  ;;  %v13642_v24 = vunpack.i.l.bf16 %v13641_v31 }
 0x842   : > { %v11949_v62 = vpack.c.bf16 %v10677_v29, %v10675_v18 }
 0x846   : > { %11470 = vmatmul.mubr.msk.f32.vlgmr.msra.gmra.mrb[8].mxu0 %vm1164_vm14, %v11465_v61 }
 0x847   : > { %11946 = vmatpush1.bf16.msk.msra.mxu0 %vm14592_vm9, %v11944_v48  ;;  %10652 = vmatprep.mubr.f32.mxu0 %v16631_v14  ;;  %vm16888_vm9 = vmmov %vm16886_vm10 }
 0x848   : > { %11948 = vmatprep.subr.bf16.mxu0 %v11947_v49  ;;  %v10773_v6 = vsel %vm16888_vm9, %v13643_v11, %v13637_v28  ;;  %vm16889_vm2 = vmmov %vm16888_vm9 }
 0x849   : > { %v10771_v46 = vsel %vm16889_vm2, %v13642_v24, %v13632_v9 }
 0x84a   : > { %v11954_v5 = vpack.c.bf16 %v10773_v6, %v10771_v46 }
 0x84d   : > { %v9950_v37 = vpop.permute.xlu1 %9949 }
 0x84e   : > { %11476 = vmatmul.mubr.msk.f32.vlgmr.msra.gmra.mrb[8].mxu0 %vm1164_vm14, %v11471_v38 }
 0x84f   : > { %11950 = vmatpush1.bf16.msra.mxu0 %v11949_v62  ;;  %10750 = vmatprep.mubr.f32.mxu0 %v16631_v14 }
 0x850   : > { %11953 = vmatprep.subr.msk.bf16.mxu0 %vm14628_vm13, %v11951_v27 }
 0x856   : > { %11478 = vmatmul.mubr.msk.f32.vlgmr.msra.gmra.mrb[8].mxu0 %vm1164_vm14, %v11477_v17 }
 0x857   : > { %11956 = vmatpush1.bf16.msk.msra.mxu0 %vm14659_vm12, %v11954_v5  ;;  %10852 = vmatprep.mubr.f32.mxu0 %v16631_v14 }
 0x85e   : > { %11484 = vmatmul.mubr.msk.f32.vlgmr.msra.gmra.mrb[8].mxu0 %vm1164_vm14, %v11479_v32 }
 0x931   : > { %v10854_v39 = vpop.f32.mrb[8].mxu0 }
 0x932   : > { %v11977_v1 = vadd.f32 %v10854_v39, %v9950_v37  ;;  %v10856_v41 = vpop.f32.mrb[9].mxu0 }
 0x933   : > { %v11978_v47 = vadd.f32 %v10856_v41, %v9950_v37 }
 0x934   : > { %10861 = vst [vmem:[%s376_s1] sm:$0xff] %v11977_v1 }
 0x935   : > { %10862 = vst [vmem:[%s376_s1 + $0x8] sm:$0xff] %v11978_v47 }
 0x936 PF: > { %s21_s30 = sadd.s32 1, %s13742_s30  }
 0x937   : > { %p18_p5 = scmp.ge.s32.totalorder %s21_s30, 4  }
 0x939   :  { %20 = sbr.rel (!%p18_p5) target bundleno = 5 (0x5), region = 179 }
 0x940   :  { %10884 = vsyncpa [#allocation4], 1 }
 0x941   :  { %10886 = vsyncpa [#allocation4 + $0x1], 1 }
 0x942   :  { %10887 = vsyncpa [#allocation6], 1 }

</bundles_post_ra>
